<compile_context>
chip_gen: v6e
topology: v6e:2x2x1
jax: 0.10.0
libtpu: 0.0.40
codegen_flags: <defaults>
</compile_context>

<pallas_src>
import functools

import jax
import jax.numpy as jnp
from jax.experimental import pallas as pl
from jax.experimental.pallas import tpu as pltpu


def _round_up(x, m):
    return (x + m - 1) // m * m


# ---------------------------------------------------------------------------
# Pallas kernel: single-shot matmul with fused bias / residual / ReLU epilogue
# ---------------------------------------------------------------------------

def _matmul_fused_kernel(a_ref, b_ref, bias_ref, *rest, relu, add_residual):
    """o = relu(a @ b + bias [+ residual]); a/b/res bf16, epilogue in f32."""
    if add_residual:
        res_ref, o_ref = rest
    else:
        (o_ref,) = rest
    out = jnp.dot(a_ref[...], b_ref[...], preferred_element_type=jnp.float32)
    out = out + bias_ref[...]
    if add_residual:
        out = out + res_ref[...].astype(jnp.float32)
    if relu:
        out = jnp.maximum(out, 0.0)
    o_ref[...] = out.astype(o_ref.dtype)   # bf16 store for conv layers


def pallas_matmul_fused(a_p, w_p, bias_p, residual_p=None, relu=False,
                        out_dtype=jnp.bfloat16):
    """a_p: (Mp, Kp) bf16 patches, w_p: (Kp, Np) bf16 (BN pre-folded),
    bias_p: (1, Np) f32, residual_p: optional (Mp, Np) bf16."""
    Mp, Kp = a_p.shape
    Kp2, Np = w_p.shape
    assert Kp == Kp2
    add_residual = residual_p is not None

    in_specs = [
        pl.BlockSpec((Mp, Kp), lambda j: (0, 0)),
        pl.BlockSpec((Kp, Np), lambda j: (0, 0)),
        pl.BlockSpec((1, Np), lambda j: (0, 0)),
    ]
    inputs = [a_p, w_p, bias_p]
    if add_residual:
        in_specs.append(pl.BlockSpec((Mp, Np), lambda j: (0, 0)))
        inputs.append(residual_p)

    nbytes = lambda t: int(t.size) * t.dtype.itemsize
    bytes_accessed = (sum(nbytes(t) for t in inputs)
                      + Mp * Np * jnp.dtype(out_dtype).itemsize)

    kernel = functools.partial(_matmul_fused_kernel, relu=relu,
                               add_residual=add_residual)
    return pl.pallas_call(
        kernel,
        out_shape=jax.ShapeDtypeStruct((Mp, Np), out_dtype),
        grid_spec=pltpu.PrefetchScalarGridSpec(
            num_scalar_prefetch=0,
            grid=(1,),                       # single TC step; no fake N split
            in_specs=in_specs,
            out_specs=pl.BlockSpec((Mp, Np), lambda j: (0, 0)),
        ),
        compiler_params=pltpu.CompilerParams(
            dimension_semantics=("arbitrary",),
            # Peak VMEM per call is ~5 MiB (largest folded weight block is
            # 2.25 MiB bf16, double-buffered); safe on v5e/v6e/v7x defaults.
            vmem_limit_bytes=32 * 1024 * 1024,
        ),
        cost_estimate=pl.CostEstimate(
            flops=2 * Mp * Kp * Np,
            transcendentals=0,
            bytes_accessed=int(bytes_accessed)),
    )(*inputs)


# ---------------------------------------------------------------------------
# Conv-as-matmul glue (im2col in plain JAX; the hot matmul is the Pallas call)
# ---------------------------------------------------------------------------

def _im2col_bf16(x, kh, kw, stride, pad, Kp):
    """NHWC bf16 -> (Mp, Kp) bf16 patches (channel fastest within each tap)."""
    B, H, W, C = x.shape
    x = x.astype(jnp.bfloat16)
    xp = jnp.pad(x, ((0, 0), (pad, pad), (pad, pad), (0, 0)))
    Ho = (H + 2 * pad - kh) // stride + 1
    Wo = (W + 2 * pad - kw) // stride + 1
    cols = []
    for i in range(kh):
        for j in range(kw):
            cols.append(xp[:, i::stride, j::stride, :][:, :Ho, :Wo, :])
    patches = jnp.concatenate(cols, axis=-1).reshape(B * Ho * Wo, kh * kw * C)
    M, K = patches.shape
    Mp = _round_up(M, 16)                    # bf16 sublane packing
    a_p = jnp.pad(patches, ((0, Mp - M), (0, Kp - K)))
    return a_p, M, Ho, Wo


def _flat_padded(x_nhwc, Np):
    """NHWC -> zero-padded (Mp, Np) bf16 flat form (for residual reuse)."""
    B, H, W, C = x_nhwc.shape
    M = B * H * W
    Mp = _round_up(M, 16)
    return jnp.pad(x_nhwc.reshape(M, C).astype(jnp.bfloat16),
                   ((0, Mp - M), (0, Np - C)))


def conv_bn_act(x, layer, stride, pad, relu=False, residual_flat=None):
    """Conv2d(bias=False) + folded BN (+ residual) (+ ReLU), all fused.

    x: NHWC bf16.  Returns (NHWC bf16, padded (Mp, Np) bf16 flat output).
    The flat output is reused directly as the next residual operand.
    """
    B, H, W, C = x.shape
    kh, kw, N = layer["kh"], layer["kw"], layer["N"]

    if (kh == 3 and kw == 3 and pad == 1 and H == 1 and W == 1
            and "w_center" in layer):
        # 3x3/pad=1 conv on a 1x1 spatial input: only the center tap sees real
        # data; use the precomputed center-tap weight slice (K: 9C -> C).
        w_p = layer["w_center"]
        Kp = w_p.shape[0]
        M, Ho, Wo = B, 1, 1
        Mp = _round_up(M, 16)
        a_p = jnp.pad(x.reshape(B, C).astype(jnp.bfloat16),
                      ((0, Mp - M), (0, Kp - C)))
    else:
        w_p = layer["w"]
        Kp = w_p.shape[0]
        a_p, M, Ho, Wo = _im2col_bf16(x, kh, kw, stride, pad, Kp)
        Mp = a_p.shape[0]

    Np = w_p.shape[1]
    if residual_flat is not None:
        assert residual_flat.shape == (Mp, Np), (residual_flat.shape, (Mp, Np))

    out_flat = pallas_matmul_fused(a_p, w_p, layer["bias"], residual_flat,
                                   relu, out_dtype=jnp.bfloat16)
    out_nhwc = out_flat[:M, :N].reshape(B, Ho, Wo, N)
    return out_nhwc, out_flat


def maxpool_3x3_s2(x):
    """nn.MaxPool2d(3, stride=2, padding=1) on NHWC bf16.  Plain JAX: the
    pooled tensor is ~32 KB, so a Pallas launch costs more than the 9-way max."""
    B, H, W, C = x.shape
    xp = jnp.pad(x, ((0, 0), (1, 1), (1, 1), (0, 0)), constant_values=-jnp.inf)
    Ho = (H + 2 - 3) // 2 + 1
    Wo = (W + 2 - 3) // 2 + 1
    out = None
    for i in range(3):
        for j in range(3):
            s = xp[:, i::2, j::2, :][:, :Ho, :Wo, :]
            out = s if out is None else jnp.maximum(out, s)
    return out


# ---------------------------------------------------------------------------
# ResNet-18 parameters (BN folded + padded + bf16 at init) & forward
# ---------------------------------------------------------------------------

_BN_EPS = 1e-5


def _prep_conv(w, bn_gamma, bn_beta, bn_mean, bn_var):
    """Fold BN into the conv weight, reshape to (K, N), pad to TPU tiles, bf16.
    For 3x3 convs, also precompute the center-tap slice (rows [4C:5C])."""
    kh, kw, cin, cout = w.shape
    scale = bn_gamma / jnp.sqrt(bn_var + _BN_EPS)
    bias = bn_beta - bn_mean * scale
    K, N = kh * kw * cin, cout
    w2 = w.reshape(K, N) * scale[None, :]
    Kp, Np = _round_up(K, 128), _round_up(N, 128)
    layer = {
        "w": jnp.pad(w2, ((0, Kp - K), (0, Np - N))).astype(jnp.bfloat16),
        "bias": jnp.pad(bias[None, :], ((0, 0), (0, Np - N))),
        "kh": kh, "kw": kw, "N": N,
    }
    if kh == 3 and kw == 3:
        wc = w2[4 * cin:5 * cin, :]                 # tap (1, 1), channel-fast
        Kc = _round_up(cin, 128)
        layer["w_center"] = jnp.pad(
            wc, ((0, Kc - cin), (0, Np - N))).astype(jnp.bfloat16)
    return layer


def init_resnet_arcface_params(key, embedding_size):
    keys = iter(jax.random.split(key, 64))

    def conv_w(k, kh, kw, cin, cout):
        fan_out = kh * kw * cout
        std = (2.0 / fan_out) ** 0.5            # kaiming_normal_(mode='fan_out')
        return jax.random.normal(k, (kh, kw, cin, cout), jnp.float32) * std

    def bn_default(c):
        # torch defaults: weight=1, bias=0, running_mean=0, running_var=1
        return (jnp.ones((c,), jnp.float32), jnp.zeros((c,), jnp.float32),
                jnp.zeros((c,), jnp.float32), jnp.ones((c,), jnp.float32))

    params = {"conv1": _prep_conv(conv_w(next(keys), 7, 7, 3, 64),
                                  *bn_default(64))}

    blocks = []
    in_c = 64
    for li, c in enumerate([64, 128, 256, 512]):
        for bi in range(2):
            stride = 2 if (li > 0 and bi == 0) else 1
            blk = {
                "stride": stride,
                "conv1": _prep_conv(conv_w(next(keys), 3, 3, in_c, c),
                                    *bn_default(c)),
                "conv2": _prep_conv(conv_w(next(keys), 3, 3, c, c),
                                    *bn_default(c)),
            }
            if stride != 1 or in_c != c:
                blk["down"] = _prep_conv(conv_w(next(keys), 1, 1, in_c, c),
                                         *bn_default(c))
            blocks.append(blk)
            in_c = c
    params["blocks"] = blocks

    kf1, kf2 = jax.random.split(next(keys))
    bound = 1.0 / (512.0 ** 0.5)
    fc_w = jax.random.uniform(kf1, (512, embedding_size), jnp.float32,
                              -bound, bound)
    fc_b = jax.random.uniform(kf2, (embedding_size,), jnp.float32,
                              -bound, bound)
    Kp, Np = _round_up(512, 128), _round_up(embedding_size, 128)
    params["fc"] = {
        "w": jnp.pad(fc_w, ((0, Kp - 512),
                            (0, Np - embedding_size))).astype(jnp.bfloat16),
        "bias": jnp.pad(fc_b[None, :], ((0, 0), (0, Np - embedding_size))),
        "N": embedding_size,
    }
    return params


def _basic_block(x_nhwc, x_flat, blk):
    stride = blk["stride"]
    out_nhwc, _ = conv_bn_act(x_nhwc, blk["conv1"], stride, 1, relu=True)
    if "down" in blk:
        _, id_flat = conv_bn_act(x_nhwc, blk["down"], stride, 0, relu=False)
    else:
        id_flat = x_flat            # padded bf16 flat output of previous layer
    # second conv: BN + residual add + ReLU fused into the matmul epilogue
    return conv_bn_act(out_nhwc, blk["conv2"], 1, 1, relu=True,
                       residual_flat=id_flat)


def resnet_arcface_forward(params, x_nchw):
    x = jnp.transpose(x_nchw, (0, 2, 3, 1)).astype(jnp.bfloat16)  # NCHW->NHWC
    x, _ = conv_bn_act(x, params["conv1"], stride=2, pad=3, relu=True)
    x = maxpool_3x3_s2(x)
    x_flat = _flat_padded(x, params["blocks"][0]["conv2"]["w"].shape[1])
    for blk in params["blocks"]:
        x, x_flat = _basic_block(x, x_flat, blk)

    x = jnp.mean(x.astype(jnp.float32), axis=(1, 2))   # AdaptiveAvgPool2d(1)

    fc = params["fc"]
    Kp, Np = fc["w"].shape
    M = x.shape[0]
    Mp = _round_up(M, 16)
    a_p = jnp.pad(x.astype(jnp.bfloat16), ((0, Mp - M), (0, Kp - 512)))
    emb = pallas_matmul_fused(a_p, fc["w"], fc["bias"], None, relu=False,
                              out_dtype=jnp.float32)
    return emb[:M, :fc["N"]]                            # (B, embedding_size)


if __name__ == "__main__":
    key = jax.random.PRNGKey(0)
    pkey, xkey = jax.random.split(key)

    embedding_size = 32
    num_classes = 10  # ArcFace head exists in __init__ but is unused in forward

    params = init_resnet_arcface_params(pkey, embedding_size)
    x = jax.random.normal(xkey, (2, 3, 32, 32), jnp.float32)  # NCHW like PyTorch

    # Close over params so integer metadata (kh/kw/N/stride) stays static.
    fwd = jax.jit(functools.partial(resnet_arcface_forward, params))
    out = fwd(x)
    out = jax.block_until_ready(out)
    assert out.shape == (2, embedding_size), out.shape
    assert bool(jnp.all(jnp.isfinite(out)))
    print("KERNEL_OK")
</pallas_src>

<mosaic_0001>
module attributes {stable_mosaic.version = 11 : i64} {
  func.func @_matmul_fused_kernel(%arg0: i32, %arg1: memref<512x256xbf16, #tpu.memory_space<vmem>>, %arg2: memref<256x128xbf16, #tpu.memory_space<vmem>>, %arg3: memref<1x128xf32, #tpu.memory_space<vmem>>, %arg4: memref<512x128xbf16, #tpu.memory_space<vmem>>) attributes {dimension_semantics = [#tpu.dimension_semantics<arbitrary>], iteration_bounds = array<i64: 1>, scalar_prefetch = 0 : i64, scratch_operands = 0 : i64, tpu.core_type = #tpu.core_type<tc>, window_params = [{pipeline_mode = #tpu.pipeline_mode<synchronous>, transform_indices = @transform_0, window_bounds = array<i64: 512, 256>}, {pipeline_mode = #tpu.pipeline_mode<synchronous>, transform_indices = @transform_1, window_bounds = array<i64: 256, 128>}, {pipeline_mode = #tpu.pipeline_mode<synchronous>, transform_indices = @transform_2, window_bounds = array<i64: 1, 128>}, {pipeline_mode = #tpu.pipeline_mode<synchronous>, transform_indices = @transform_3, window_bounds = array<i64: 512, 128>}]} {
    %c0 = arith.constant 0 : index
    %c0_0 = arith.constant 0 : index
    %0 = vector.load %arg1[%c0, %c0_0] : memref<512x256xbf16, #tpu.memory_space<vmem>>, vector<512x256xbf16>
    %c0_1 = arith.constant 0 : index
    %c0_2 = arith.constant 0 : index
    %1 = vector.load %arg2[%c0_1, %c0_2] : memref<256x128xbf16, #tpu.memory_space<vmem>>, vector<256x128xbf16>
    %cst = arith.constant dense<0.000000e+00> : vector<512x128xf32>
    %2 = tpu.matmul %0, %1, %cst {dimension_numbers = #tpu.dot_dimension_numbers<[1], [0], [0], [1], [0, 0, 1, 1], [], []>} : vector<512x256xbf16>, vector<256x128xbf16>, vector<512x128xf32> -> vector<512x128xf32>
    %c0_3 = arith.constant 0 : index
    %c0_4 = arith.constant 0 : index
    %3 = vector.load %arg3[%c0_3, %c0_4] : memref<1x128xf32, #tpu.memory_space<vmem>>, vector<1x128xf32>
    %4 = vector.broadcast %3 : vector<1x128xf32> to vector<512x128xf32>
    %5 = arith.addf %2, %4 : vector<512x128xf32>
    %cst_5 = arith.constant 0.000000e+00 : f32
    %6 = vector.broadcast %cst_5 : f32 to vector<512x128xf32>
    %7 = arith.maximumf %5, %6 : vector<512x128xf32>
    %8 = arith.truncf %7 : vector<512x128xf32> to vector<512x128xbf16>
    %c0_6 = arith.constant 0 : index
    %c0_7 = arith.constant 0 : index
    %9 = vector.load %arg4[%c0_6, %c0_7] : memref<512x128xbf16, #tpu.memory_space<vmem>>, vector<512x128xbf16>
    tpu.vector_store %arg4[%c0_6, %c0_7], %8 {strides = array<i32>} : memref<512x128xbf16, #tpu.memory_space<vmem>>, vector<512x128xbf16>,
    return
  }
  func.func @transform_0(%arg0: i32) -> (i32, i32) {
    %c0_i32 = arith.constant 0 : i32
    %c0_i32_0 = arith.constant 0 : i32
    %c0_i32_1 = arith.constant 0 : i32
    return %c0_i32, %c0_i32_0 : i32, i32
  }
  func.func @transform_1(%arg0: i32) -> (i32, i32) {
    %c0_i32 = arith.constant 0 : i32
    %c0_i32_0 = arith.constant 0 : i32
    %c0_i32_1 = arith.constant 0 : i32
    return %c0_i32, %c0_i32_0 : i32, i32
  }
  func.func @transform_2(%arg0: i32) -> (i32, i32) {
    %c0_i32 = arith.constant 0 : i32
    %c0_i32_0 = arith.constant 0 : i32
    %c0_i32_1 = arith.constant 0 : i32
    return %c0_i32, %c0_i32_0 : i32, i32
  }
  func.func @transform_3(%arg0: i32) -> (i32, i32) {
    %c0_i32 = arith.constant 0 : i32
    %c0_i32_0 = arith.constant 0 : i32
    %c0_i32_1 = arith.constant 0 : i32
    return %c0_i32, %c0_i32_0 : i32, i32
  }
}

module attributes {stable_mosaic.version = 11 : i64} {
  func.func @_matmul_fused_kernel(%arg0: i32, %arg1: memref<128x640xbf16, #tpu.memory_space<vmem>>, %arg2: memref<640x128xbf16, #tpu.memory_space<vmem>>, %arg3: memref<1x128xf32, #tpu.memory_space<vmem>>, %arg4: memref<128x128xbf16, #tpu.memory_space<vmem>>) attributes {dimension_semantics = [#tpu.dimension_semantics<arbitrary>], iteration_bounds = array<i64: 1>, scalar_prefetch = 0 : i64, scratch_operands = 0 : i64, tpu.core_type = #tpu.core_type<tc>, window_params = [{pipeline_mode = #tpu.pipeline_mode<synchronous>, transform_indices = @transform_0, window_bounds = array<i64: 128, 640>}, {pipeline_mode = #tpu.pipeline_mode<synchronous>, transform_indices = @transform_1, window_bounds = array<i64: 640, 128>}, {pipeline_mode = #tpu.pipeline_mode<synchronous>, transform_indices = @transform_2, window_bounds = array<i64: 1, 128>}, {pipeline_mode = #tpu.pipeline_mode<synchronous>, transform_indices = @transform_3, window_bounds = array<i64: 128, 128>}]} {
    %c0 = arith.constant 0 : index
    %c0_0 = arith.constant 0 : index
    %0 = vector.load %arg1[%c0, %c0_0] : memref<128x640xbf16, #tpu.memory_space<vmem>>, vector<128x640xbf16>
    %c0_1 = arith.constant 0 : index
    %c0_2 = arith.constant 0 : index
    %1 = vector.load %arg2[%c0_1, %c0_2] : memref<640x128xbf16, #tpu.memory_space<vmem>>, vector<640x128xbf16>
    %cst = arith.constant dense<0.000000e+00> : vector<128x128xf32>
    %2 = tpu.matmul %0, %1, %cst {dimension_numbers = #tpu.dot_dimension_numbers<[1], [0], [0], [1], [0, 0, 1, 1], [], []>} : vector<128x640xbf16>, vector<640x128xbf16>, vector<128x128xf32> -> vector<128x128xf32>
    %c0_3 = arith.constant 0 : index
    %c0_4 = arith.constant 0 : index
    %3 = vector.load %arg3[%c0_3, %c0_4] : memref<1x128xf32, #tpu.memory_space<vmem>>, vector<1x128xf32>
    %4 = vector.broadcast %3 : vector<1x128xf32> to vector<128x128xf32>
    %5 = arith.addf %2, %4 : vector<128x128xf32>
    %cst_5 = arith.constant 0.000000e+00 : f32
    %6 = vector.broadcast %cst_5 : f32 to vector<128x128xf32>
    %7 = arith.maximumf %5, %6 : vector<128x128xf32>
    %8 = arith.truncf %7 : vector<128x128xf32> to vector<128x128xbf16>
    %c0_6 = arith.constant 0 : index
    %c0_7 = arith.constant 0 : index
    %9 = vector.load %arg4[%c0_6, %c0_7] : memref<128x128xbf16, #tpu.memory_space<vmem>>, vector<128x128xbf16>
    tpu.vector_store %arg4[%c0_6, %c0_7], %8 {strides = array<i32>} : memref<128x128xbf16, #tpu.memory_space<vmem>>, vector<128x128xbf16>,
    return
  }
  func.func @transform_0(%arg0: i32) -> (i32, i32) {
    %c0_i32 = arith.constant 0 : i32
    %c0_i32_0 = arith.constant 0 : i32
    %c0_i32_1 = arith.constant 0 : i32
    return %c0_i32, %c0_i32_0 : i32, i32
  }
  func.func @transform_1(%arg0: i32) -> (i32, i32) {
    %c0_i32 = arith.constant 0 : i32
    %c0_i32_0 = arith.constant 0 : i32
    %c0_i32_1 = arith.constant 0 : i32
    return %c0_i32, %c0_i32_0 : i32, i32
  }
  func.func @transform_2(%arg0: i32) -> (i32, i32) {
    %c0_i32 = arith.constant 0 : i32
    %c0_i32_0 = arith.constant 0 : i32
    %c0_i32_1 = arith.constant 0 : i32
    return %c0_i32, %c0_i32_0 : i32, i32
  }
  func.func @transform_3(%arg0: i32) -> (i32, i32) {
    %c0_i32 = arith.constant 0 : i32
    %c0_i32_0 = arith.constant 0 : i32
    %c0_i32_1 = arith.constant 0 : i32
    return %c0_i32, %c0_i32_0 : i32, i32
  }
}

module attributes {stable_mosaic.version = 11 : i64} {
  func.func @_matmul_fused_kernel(%arg0: i32, %arg1: memref<128x640xbf16, #tpu.memory_space<vmem>>, %arg2: memref<640x128xbf16, #tpu.memory_space<vmem>>, %arg3: memref<1x128xf32, #tpu.memory_space<vmem>>, %arg4: memref<128x128xbf16, #tpu.memory_space<vmem>>, %arg5: memref<128x128xbf16, #tpu.memory_space<vmem>>) attributes {dimension_semantics = [#tpu.dimension_semantics<arbitrary>], iteration_bounds = array<i64: 1>, scalar_prefetch = 0 : i64, scratch_operands = 0 : i64, tpu.core_type = #tpu.core_type<tc>, window_params = [{pipeline_mode = #tpu.pipeline_mode<synchronous>, transform_indices = @transform_0, window_bounds = array<i64: 128, 640>}, {pipeline_mode = #tpu.pipeline_mode<synchronous>, transform_indices = @transform_1, window_bounds = array<i64: 640, 128>}, {pipeline_mode = #tpu.pipeline_mode<synchronous>, transform_indices = @transform_2, window_bounds = array<i64: 1, 128>}, {pipeline_mode = #tpu.pipeline_mode<synchronous>, transform_indices = @transform_3, window_bounds = array<i64: 128, 128>}, {pipeline_mode = #tpu.pipeline_mode<synchronous>, transform_indices = @transform_4, window_bounds = array<i64: 128, 128>}]} {
    %c0 = arith.constant 0 : index
    %c0_0 = arith.constant 0 : index
    %0 = vector.load %arg1[%c0, %c0_0] : memref<128x640xbf16, #tpu.memory_space<vmem>>, vector<128x640xbf16>
    %c0_1 = arith.constant 0 : index
    %c0_2 = arith.constant 0 : index
    %1 = vector.load %arg2[%c0_1, %c0_2] : memref<640x128xbf16, #tpu.memory_space<vmem>>, vector<640x128xbf16>
    %cst = arith.constant dense<0.000000e+00> : vector<128x128xf32>
    %2 = tpu.matmul %0, %1, %cst {dimension_numbers = #tpu.dot_dimension_numbers<[1], [0], [0], [1], [0, 0, 1, 1], [], []>} : vector<128x640xbf16>, vector<640x128xbf16>, vector<128x128xf32> -> vector<128x128xf32>
    %c0_3 = arith.constant 0 : index
    %c0_4 = arith.constant 0 : index
    %3 = vector.load %arg3[%c0_3, %c0_4] : memref<1x128xf32, #tpu.memory_space<vmem>>, vector<1x128xf32>
    %4 = vector.broadcast %3 : vector<1x128xf32> to vector<128x128xf32>
    %5 = arith.addf %2, %4 : vector<128x128xf32>
    %c0_5 = arith.constant 0 : index
    %c0_6 = arith.constant 0 : index
    %6 = vector.load %arg4[%c0_5, %c0_6] : memref<128x128xbf16, #tpu.memory_space<vmem>>, vector<128x128xbf16>
    %7 = arith.extf %6 : vector<128x128xbf16> to vector<128x128xf32>
    %8 = arith.addf %5, %7 : vector<128x128xf32>
    %cst_7 = arith.constant 0.000000e+00 : f32
    %9 = vector.broadcast %cst_7 : f32 to vector<128x128xf32>
    %10 = arith.maximumf %8, %9 : vector<128x128xf32>
    %11 = arith.truncf %10 : vector<128x128xf32> to vector<128x128xbf16>
    %c0_8 = arith.constant 0 : index
    %c0_9 = arith.constant 0 : index
    %12 = vector.load %arg5[%c0_8, %c0_9] : memref<128x128xbf16, #tpu.memory_space<vmem>>, vector<128x128xbf16>
    tpu.vector_store %arg5[%c0_8, %c0_9], %11 {strides = array<i32>} : memref<128x128xbf16, #tpu.memory_space<vmem>>, vector<128x128xbf16>,
    return
  }
  func.func @transform_0(%arg0: i32) -> (i32, i32) {
    %c0_i32 = arith.constant 0 : i32
    %c0_i32_0 = arith.constant 0 : i32
    %c0_i32_1 = arith.constant 0 : i32
    return %c0_i32, %c0_i32_0 : i32, i32
  }
  func.func @transform_1(%arg0: i32) -> (i32, i32) {
    %c0_i32 = arith.constant 0 : i32
    %c0_i32_0 = arith.constant 0 : i32
    %c0_i32_1 = arith.constant 0 : i32
    return %c0_i32, %c0_i32_0 : i32, i32
  }
  func.func @transform_2(%arg0: i32) -> (i32, i32) {
    %c0_i32 = arith.constant 0 : i32
    %c0_i32_0 = arith.constant 0 : i32
    %c0_i32_1 = arith.constant 0 : i32
    return %c0_i32, %c0_i32_0 : i32, i32
  }
  func.func @transform_3(%arg0: i32) -> (i32, i32) {
    %c0_i32 = arith.constant 0 : i32
    %c0_i32_0 = arith.constant 0 : i32
    %c0_i32_1 = arith.constant 0 : i32
    return %c0_i32, %c0_i32_0 : i32, i32
  }
  func.func @transform_4(%arg0: i32) -> (i32, i32) {
    %c0_i32 = arith.constant 0 : i32
    %c0_i32_0 = arith.constant 0 : i32
    %c0_i32_1 = arith.constant 0 : i32
    return %c0_i32, %c0_i32_0 : i32, i32
  }
}

module attributes {stable_mosaic.version = 11 : i64} {
  func.func @_matmul_fused_kernel(%arg0: i32, %arg1: memref<32x640xbf16, #tpu.memory_space<vmem>>, %arg2: memref<640x128xbf16, #tpu.memory_space<vmem>>, %arg3: memref<1x128xf32, #tpu.memory_space<vmem>>, %arg4: memref<32x128xbf16, #tpu.memory_space<vmem>>) attributes {dimension_semantics = [#tpu.dimension_semantics<arbitrary>], iteration_bounds = array<i64: 1>, scalar_prefetch = 0 : i64, scratch_operands = 0 : i64, tpu.core_type = #tpu.core_type<tc>, window_params = [{pipeline_mode = #tpu.pipeline_mode<synchronous>, transform_indices = @transform_0, window_bounds = array<i64: 32, 640>}, {pipeline_mode = #tpu.pipeline_mode<synchronous>, transform_indices = @transform_1, window_bounds = array<i64: 640, 128>}, {pipeline_mode = #tpu.pipeline_mode<synchronous>, transform_indices = @transform_2, window_bounds = array<i64: 1, 128>}, {pipeline_mode = #tpu.pipeline_mode<synchronous>, transform_indices = @transform_3, window_bounds = array<i64: 32, 128>}]} {
    %c0 = arith.constant 0 : index
    %c0_0 = arith.constant 0 : index
    %0 = vector.load %arg1[%c0, %c0_0] : memref<32x640xbf16, #tpu.memory_space<vmem>>, vector<32x640xbf16>
    %c0_1 = arith.constant 0 : index
    %c0_2 = arith.constant 0 : index
    %1 = vector.load %arg2[%c0_1, %c0_2] : memref<640x128xbf16, #tpu.memory_space<vmem>>, vector<640x128xbf16>
    %cst = arith.constant dense<0.000000e+00> : vector<32x128xf32>
    %2 = tpu.matmul %0, %1, %cst {dimension_numbers = #tpu.dot_dimension_numbers<[1], [0], [0], [1], [0, 0, 1, 1], [], []>} : vector<32x640xbf16>, vector<640x128xbf16>, vector<32x128xf32> -> vector<32x128xf32>
    %c0_3 = arith.constant 0 : index
    %c0_4 = arith.constant 0 : index
    %3 = vector.load %arg3[%c0_3, %c0_4] : memref<1x128xf32, #tpu.memory_space<vmem>>, vector<1x128xf32>
    %4 = vector.broadcast %3 : vector<1x128xf32> to vector<32x128xf32>
    %5 = arith.addf %2, %4 : vector<32x128xf32>
    %cst_5 = arith.constant 0.000000e+00 : f32
    %6 = vector.broadcast %cst_5 : f32 to vector<32x128xf32>
    %7 = arith.maximumf %5, %6 : vector<32x128xf32>
    %8 = arith.truncf %7 : vector<32x128xf32> to vector<32x128xbf16>
    %c0_6 = arith.constant 0 : index
    %c0_7 = arith.constant 0 : index
    %9 = vector.load %arg4[%c0_6, %c0_7] : memref<32x128xbf16, #tpu.memory_space<vmem>>, vector<32x128xbf16>
    tpu.vector_store %arg4[%c0_6, %c0_7], %8 {strides = array<i32>} : memref<32x128xbf16, #tpu.memory_space<vmem>>, vector<32x128xbf16>,
    return
  }
  func.func @transform_0(%arg0: i32) -> (i32, i32) {
    %c0_i32 = arith.constant 0 : i32
    %c0_i32_0 = arith.constant 0 : i32
    %c0_i32_1 = arith.constant 0 : i32
    return %c0_i32, %c0_i32_0 : i32, i32
  }
  func.func @transform_1(%arg0: i32) -> (i32, i32) {
    %c0_i32 = arith.constant 0 : i32
    %c0_i32_0 = arith.constant 0 : i32
    %c0_i32_1 = arith.constant 0 : i32
    return %c0_i32, %c0_i32_0 : i32, i32
  }
  func.func @transform_2(%arg0: i32) -> (i32, i32) {
    %c0_i32 = arith.constant 0 : i32
    %c0_i32_0 = arith.constant 0 : i32
    %c0_i32_1 = arith.constant 0 : i32
    return %c0_i32, %c0_i32_0 : i32, i32
  }
  func.func @transform_3(%arg0: i32) -> (i32, i32) {
    %c0_i32 = arith.constant 0 : i32
    %c0_i32_0 = arith.constant 0 : i32
    %c0_i32_1 = arith.constant 0 : i32
    return %c0_i32, %c0_i32_0 : i32, i32
  }
}

module attributes {stable_mosaic.version = 11 : i64} {
  func.func @_matmul_fused_kernel(%arg0: i32, %arg1: memref<32x1152xbf16, #tpu.memory_space<vmem>>, %arg2: memref<1152x128xbf16, #tpu.memory_space<vmem>>, %arg3: memref<1x128xf32, #tpu.memory_space<vmem>>, %arg4: memref<32x128xbf16, #tpu.memory_space<vmem>>, %arg5: memref<32x128xbf16, #tpu.memory_space<vmem>>) attributes {dimension_semantics = [#tpu.dimension_semantics<arbitrary>], iteration_bounds = array<i64: 1>, scalar_prefetch = 0 : i64, scratch_operands = 0 : i64, tpu.core_type = #tpu.core_type<tc>, window_params = [{pipeline_mode = #tpu.pipeline_mode<synchronous>, transform_indices = @transform_0, window_bounds = array<i64: 32, 1152>}, {pipeline_mode = #tpu.pipeline_mode<synchronous>, transform_indices = @transform_1, window_bounds = array<i64: 1152, 128>}, {pipeline_mode = #tpu.pipeline_mode<synchronous>, transform_indices = @transform_2, window_bounds = array<i64: 1, 128>}, {pipeline_mode = #tpu.pipeline_mode<synchronous>, transform_indices = @transform_3, window_bounds = array<i64: 32, 128>}, {pipeline_mode = #tpu.pipeline_mode<synchronous>, transform_indices = @transform_4, window_bounds = array<i64: 32, 128>}]} {
    %c0 = arith.constant 0 : index
    %c0_0 = arith.constant 0 : index
    %0 = vector.load %arg1[%c0, %c0_0] : memref<32x1152xbf16, #tpu.memory_space<vmem>>, vector<32x1152xbf16>
    %c0_1 = arith.constant 0 : index
    %c0_2 = arith.constant 0 : index
    %1 = vector.load %arg2[%c0_1, %c0_2] : memref<1152x128xbf16, #tpu.memory_space<vmem>>, vector<1152x128xbf16>
    %cst = arith.constant dense<0.000000e+00> : vector<32x128xf32>
    %2 = tpu.matmul %0, %1, %cst {dimension_numbers = #tpu.dot_dimension_numbers<[1], [0], [0], [1], [0, 0, 1, 1], [], []>} : vector<32x1152xbf16>, vector<1152x128xbf16>, vector<32x128xf32> -> vector<32x128xf32>
    %c0_3 = arith.constant 0 : index
    %c0_4 = arith.constant 0 : index
    %3 = vector.load %arg3[%c0_3, %c0_4] : memref<1x128xf32, #tpu.memory_space<vmem>>, vector<1x128xf32>
    %4 = vector.broadcast %3 : vector<1x128xf32> to vector<32x128xf32>
    %5 = arith.addf %2, %4 : vector<32x128xf32>
    %c0_5 = arith.constant 0 : index
    %c0_6 = arith.constant 0 : index
    %6 = vector.load %arg4[%c0_5, %c0_6] : memref<32x128xbf16, #tpu.memory_space<vmem>>, vector<32x128xbf16>
    %7 = arith.extf %6 : vector<32x128xbf16> to vector<32x128xf32>
    %8 = arith.addf %5, %7 : vector<32x128xf32>
    %cst_7 = arith.constant 0.000000e+00 : f32
    %9 = vector.broadcast %cst_7 : f32 to vector<32x128xf32>
    %10 = arith.maximumf %8, %9 : vector<32x128xf32>
    %11 = arith.truncf %10 : vector<32x128xf32> to vector<32x128xbf16>
    %c0_8 = arith.constant 0 : index
    %c0_9 = arith.constant 0 : index
    %12 = vector.load %arg5[%c0_8, %c0_9] : memref<32x128xbf16, #tpu.memory_space<vmem>>, vector<32x128xbf16>
    tpu.vector_store %arg5[%c0_8, %c0_9], %11 {strides = array<i32>} : memref<32x128xbf16, #tpu.memory_space<vmem>>, vector<32x128xbf16>,
    return
  }
  func.func @transform_0(%arg0: i32) -> (i32, i32) {
    %c0_i32 = arith.constant 0 : i32
    %c0_i32_0 = arith.constant 0 : i32
    %c0_i32_1 = arith.constant 0 : i32
    return %c0_i32, %c0_i32_0 : i32, i32
  }
  func.func @transform_1(%arg0: i32) -> (i32, i32) {
    %c0_i32 = arith.constant 0 : i32
    %c0_i32_0 = arith.constant 0 : i32
    %c0_i32_1 = arith.constant 0 : i32
    return %c0_i32, %c0_i32_0 : i32, i32
  }
  func.func @transform_2(%arg0: i32) -> (i32, i32) {
    %c0_i32 = arith.constant 0 : i32
    %c0_i32_0 = arith.constant 0 : i32
    %c0_i32_1 = arith.constant 0 : i32
    return %c0_i32, %c0_i32_0 : i32, i32
  }
  func.func @transform_3(%arg0: i32) -> (i32, i32) {
    %c0_i32 = arith.constant 0 : i32
    %c0_i32_0 = arith.constant 0 : i32
    %c0_i32_1 = arith.constant 0 : i32
    return %c0_i32, %c0_i32_0 : i32, i32
  }
  func.func @transform_4(%arg0: i32) -> (i32, i32) {
    %c0_i32 = arith.constant 0 : i32
    %c0_i32_0 = arith.constant 0 : i32
    %c0_i32_1 = arith.constant 0 : i32
    return %c0_i32, %c0_i32_0 : i32, i32
  }
}

module attributes {stable_mosaic.version = 11 : i64} {
  func.func @_matmul_fused_kernel(%arg0: i32, %arg1: memref<32x1152xbf16, #tpu.memory_space<vmem>>, %arg2: memref<1152x128xbf16, #tpu.memory_space<vmem>>, %arg3: memref<1x128xf32, #tpu.memory_space<vmem>>, %arg4: memref<32x128xbf16, #tpu.memory_space<vmem>>) attributes {dimension_semantics = [#tpu.dimension_semantics<arbitrary>], iteration_bounds = array<i64: 1>, scalar_prefetch = 0 : i64, scratch_operands = 0 : i64, tpu.core_type = #tpu.core_type<tc>, window_params = [{pipeline_mode = #tpu.pipeline_mode<synchronous>, transform_indices = @transform_0, window_bounds = array<i64: 32, 1152>}, {pipeline_mode = #tpu.pipeline_mode<synchronous>, transform_indices = @transform_1, window_bounds = array<i64: 1152, 128>}, {pipeline_mode = #tpu.pipeline_mode<synchronous>, transform_indices = @transform_2, window_bounds = array<i64: 1, 128>}, {pipeline_mode = #tpu.pipeline_mode<synchronous>, transform_indices = @transform_3, window_bounds = array<i64: 32, 128>}]} {
    %c0 = arith.constant 0 : index
    %c0_0 = arith.constant 0 : index
    %0 = vector.load %arg1[%c0, %c0_0] : memref<32x1152xbf16, #tpu.memory_space<vmem>>, vector<32x1152xbf16>
    %c0_1 = arith.constant 0 : index
    %c0_2 = arith.constant 0 : index
    %1 = vector.load %arg2[%c0_1, %c0_2] : memref<1152x128xbf16, #tpu.memory_space<vmem>>, vector<1152x128xbf16>
    %cst = arith.constant dense<0.000000e+00> : vector<32x128xf32>
    %2 = tpu.matmul %0, %1, %cst {dimension_numbers = #tpu.dot_dimension_numbers<[1], [0], [0], [1], [0, 0, 1, 1], [], []>} : vector<32x1152xbf16>, vector<1152x128xbf16>, vector<32x128xf32> -> vector<32x128xf32>
    %c0_3 = arith.constant 0 : index
    %c0_4 = arith.constant 0 : index
    %3 = vector.load %arg3[%c0_3, %c0_4] : memref<1x128xf32, #tpu.memory_space<vmem>>, vector<1x128xf32>
    %4 = vector.broadcast %3 : vector<1x128xf32> to vector<32x128xf32>
    %5 = arith.addf %2, %4 : vector<32x128xf32>
    %cst_5 = arith.constant 0.000000e+00 : f32
    %6 = vector.broadcast %cst_5 : f32 to vector<32x128xf32>
    %7 = arith.maximumf %5, %6 : vector<32x128xf32>
    %8 = arith.truncf %7 : vector<32x128xf32> to vector<32x128xbf16>
    %c0_6 = arith.constant 0 : index
    %c0_7 = arith.constant 0 : index
    %9 = vector.load %arg4[%c0_6, %c0_7] : memref<32x128xbf16, #tpu.memory_space<vmem>>, vector<32x128xbf16>
    tpu.vector_store %arg4[%c0_6, %c0_7], %8 {strides = array<i32>} : memref<32x128xbf16, #tpu.memory_space<vmem>>, vector<32x128xbf16>,
    return
  }
  func.func @transform_0(%arg0: i32) -> (i32, i32) {
    %c0_i32 = arith.constant 0 : i32
    %c0_i32_0 = arith.constant 0 : i32
    %c0_i32_1 = arith.constant 0 : i32
    return %c0_i32, %c0_i32_0 : i32, i32
  }
  func.func @transform_1(%arg0: i32) -> (i32, i32) {
    %c0_i32 = arith.constant 0 : i32
    %c0_i32_0 = arith.constant 0 : i32
    %c0_i32_1 = arith.constant 0 : i32
    return %c0_i32, %c0_i32_0 : i32, i32
  }
  func.func @transform_2(%arg0: i32) -> (i32, i32) {
    %c0_i32 = arith.constant 0 : i32
    %c0_i32_0 = arith.constant 0 : i32
    %c0_i32_1 = arith.constant 0 : i32
    return %c0_i32, %c0_i32_0 : i32, i32
  }
  func.func @transform_3(%arg0: i32) -> (i32, i32) {
    %c0_i32 = arith.constant 0 : i32
    %c0_i32_0 = arith.constant 0 : i32
    %c0_i32_1 = arith.constant 0 : i32
    return %c0_i32, %c0_i32_0 : i32, i32
  }
}

module attributes {stable_mosaic.version = 11 : i64} {
  func.func @_matmul_fused_kernel(%arg0: i32, %arg1: memref<32x128xbf16, #tpu.memory_space<vmem>>, %arg2: memref<128x128xbf16, #tpu.memory_space<vmem>>, %arg3: memref<1x128xf32, #tpu.memory_space<vmem>>, %arg4: memref<32x128xbf16, #tpu.memory_space<vmem>>) attributes {dimension_semantics = [#tpu.dimension_semantics<arbitrary>], iteration_bounds = array<i64: 1>, scalar_prefetch = 0 : i64, scratch_operands = 0 : i64, tpu.core_type = #tpu.core_type<tc>, window_params = [{pipeline_mode = #tpu.pipeline_mode<synchronous>, transform_indices = @transform_0, window_bounds = array<i64: 32, 128>}, {pipeline_mode = #tpu.pipeline_mode<synchronous>, transform_indices = @transform_1, window_bounds = array<i64: 128, 128>}, {pipeline_mode = #tpu.pipeline_mode<synchronous>, transform_indices = @transform_2, window_bounds = array<i64: 1, 128>}, {pipeline_mode = #tpu.pipeline_mode<synchronous>, transform_indices = @transform_3, window_bounds = array<i64: 32, 128>}]} {
    %c0 = arith.constant 0 : index
    %c0_0 = arith.constant 0 : index
    %0 = vector.load %arg1[%c0, %c0_0] : memref<32x128xbf16, #tpu.memory_space<vmem>>, vector<32x128xbf16>
    %c0_1 = arith.constant 0 : index
    %c0_2 = arith.constant 0 : index
    %1 = vector.load %arg2[%c0_1, %c0_2] : memref<128x128xbf16, #tpu.memory_space<vmem>>, vector<128x128xbf16>
    %cst = arith.constant dense<0.000000e+00> : vector<32x128xf32>
    %2 = tpu.matmul %0, %1, %cst {dimension_numbers = #tpu.dot_dimension_numbers<[1], [0], [0], [1], [0, 0, 1, 1], [], []>} : vector<32x128xbf16>, vector<128x128xbf16>, vector<32x128xf32> -> vector<32x128xf32>
    %c0_3 = arith.constant 0 : index
    %c0_4 = arith.constant 0 : index
    %3 = vector.load %arg3[%c0_3, %c0_4] : memref<1x128xf32, #tpu.memory_space<vmem>>, vector<1x128xf32>
    %4 = vector.broadcast %3 : vector<1x128xf32> to vector<32x128xf32>
    %5 = arith.addf %2, %4 : vector<32x128xf32>
    %6 = arith.truncf %5 : vector<32x128xf32> to vector<32x128xbf16>
    %c0_5 = arith.constant 0 : index
    %c0_6 = arith.constant 0 : index
    %7 = vector.load %arg4[%c0_5, %c0_6] : memref<32x128xbf16, #tpu.memory_space<vmem>>, vector<32x128xbf16>
    tpu.vector_store %arg4[%c0_5, %c0_6], %6 {strides = array<i32>} : memref<32x128xbf16, #tpu.memory_space<vmem>>, vector<32x128xbf16>,
    return
  }
  func.func @transform_0(%arg0: i32) -> (i32, i32) {
    %c0_i32 = arith.constant 0 : i32
    %c0_i32_0 = arith.constant 0 : i32
    %c0_i32_1 = arith.constant 0 : i32
    return %c0_i32, %c0_i32_0 : i32, i32
  }
  func.func @transform_1(%arg0: i32) -> (i32, i32) {
    %c0_i32 = arith.constant 0 : i32
    %c0_i32_0 = arith.constant 0 : i32
    %c0_i32_1 = arith.constant 0 : i32
    return %c0_i32, %c0_i32_0 : i32, i32
  }
  func.func @transform_2(%arg0: i32) -> (i32, i32) {
    %c0_i32 = arith.constant 0 : i32
    %c0_i32_0 = arith.constant 0 : i32
    %c0_i32_1 = arith.constant 0 : i32
    return %c0_i32, %c0_i32_0 : i32, i32
  }
  func.func @transform_3(%arg0: i32) -> (i32, i32) {
    %c0_i32 = arith.constant 0 : i32
    %c0_i32_0 = arith.constant 0 : i32
    %c0_i32_1 = arith.constant 0 : i32
    return %c0_i32, %c0_i32_0 : i32, i32
  }
}

module attributes {stable_mosaic.version = 11 : i64} {
  func.func @_matmul_fused_kernel(%arg0: i32, %arg1: memref<16x1152xbf16, #tpu.memory_space<vmem>>, %arg2: memref<1152x256xbf16, #tpu.memory_space<vmem>>, %arg3: memref<1x256xf32, #tpu.memory_space<vmem>>, %arg4: memref<16x256xbf16, #tpu.memory_space<vmem>>) attributes {dimension_semantics = [#tpu.dimension_semantics<arbitrary>], iteration_bounds = array<i64: 1>, scalar_prefetch = 0 : i64, scratch_operands = 0 : i64, tpu.core_type = #tpu.core_type<tc>, window_params = [{pipeline_mode = #tpu.pipeline_mode<synchronous>, transform_indices = @transform_0, window_bounds = array<i64: 16, 1152>}, {pipeline_mode = #tpu.pipeline_mode<synchronous>, transform_indices = @transform_1, window_bounds = array<i64: 1152, 256>}, {pipeline_mode = #tpu.pipeline_mode<synchronous>, transform_indices = @transform_2, window_bounds = array<i64: 1, 256>}, {pipeline_mode = #tpu.pipeline_mode<synchronous>, transform_indices = @transform_3, window_bounds = array<i64: 16, 256>}]} {
    %c0 = arith.constant 0 : index
    %c0_0 = arith.constant 0 : index
    %0 = vector.load %arg1[%c0, %c0_0] : memref<16x1152xbf16, #tpu.memory_space<vmem>>, vector<16x1152xbf16>
    %c0_1 = arith.constant 0 : index
    %c0_2 = arith.constant 0 : index
    %1 = vector.load %arg2[%c0_1, %c0_2] : memref<1152x256xbf16, #tpu.memory_space<vmem>>, vector<1152x256xbf16>
    %cst = arith.constant dense<0.000000e+00> : vector<16x256xf32>
    %2 = tpu.matmul %0, %1, %cst {dimension_numbers = #tpu.dot_dimension_numbers<[1], [0], [0], [1], [0, 0, 1, 1], [], []>} : vector<16x1152xbf16>, vector<1152x256xbf16>, vector<16x256xf32> -> vector<16x256xf32>
    %c0_3 = arith.constant 0 : index
    %c0_4 = arith.constant 0 : index
    %3 = vector.load %arg3[%c0_3, %c0_4] : memref<1x256xf32, #tpu.memory_space<vmem>>, vector<1x256xf32>
    %4 = vector.broadcast %3 : vector<1x256xf32> to vector<16x256xf32>
    %5 = arith.addf %2, %4 : vector<16x256xf32>
    %cst_5 = arith.constant 0.000000e+00 : f32
    %6 = vector.broadcast %cst_5 : f32 to vector<16x256xf32>
    %7 = arith.maximumf %5, %6 : vector<16x256xf32>
    %8 = arith.truncf %7 : vector<16x256xf32> to vector<16x256xbf16>
    %c0_6 = arith.constant 0 : index
    %c0_7 = arith.constant 0 : index
    %9 = vector.load %arg4[%c0_6, %c0_7] : memref<16x256xbf16, #tpu.memory_space<vmem>>, vector<16x256xbf16>
    tpu.vector_store %arg4[%c0_6, %c0_7], %8 {strides = array<i32>} : memref<16x256xbf16, #tpu.memory_space<vmem>>, vector<16x256xbf16>,
    return
  }
  func.func @transform_0(%arg0: i32) -> (i32, i32) {
    %c0_i32 = arith.constant 0 : i32
    %c0_i32_0 = arith.constant 0 : i32
    %c0_i32_1 = arith.constant 0 : i32
    return %c0_i32, %c0_i32_0 : i32, i32
  }
  func.func @transform_1(%arg0: i32) -> (i32, i32) {
    %c0_i32 = arith.constant 0 : i32
    %c0_i32_0 = arith.constant 0 : i32
    %c0_i32_1 = arith.constant 0 : i32
    return %c0_i32, %c0_i32_0 : i32, i32
  }
  func.func @transform_2(%arg0: i32) -> (i32, i32) {
    %c0_i32 = arith.constant 0 : i32
    %c0_i32_0 = arith.constant 0 : i32
    %c0_i32_1 = arith.constant 0 : i32
    return %c0_i32, %c0_i32_0 : i32, i32
  }
  func.func @transform_3(%arg0: i32) -> (i32, i32) {
    %c0_i32 = arith.constant 0 : i32
    %c0_i32_0 = arith.constant 0 : i32
    %c0_i32_1 = arith.constant 0 : i32
    return %c0_i32, %c0_i32_0 : i32, i32
  }
}

module attributes {stable_mosaic.version = 11 : i64} {
  func.func @_matmul_fused_kernel(%arg0: i32, %arg1: memref<16x2304xbf16, #tpu.memory_space<vmem>>, %arg2: memref<2304x256xbf16, #tpu.memory_space<vmem>>, %arg3: memref<1x256xf32, #tpu.memory_space<vmem>>, %arg4: memref<16x256xbf16, #tpu.memory_space<vmem>>, %arg5: memref<16x256xbf16, #tpu.memory_space<vmem>>) attributes {dimension_semantics = [#tpu.dimension_semantics<arbitrary>], iteration_bounds = array<i64: 1>, scalar_prefetch = 0 : i64, scratch_operands = 0 : i64, tpu.core_type = #tpu.core_type<tc>, window_params = [{pipeline_mode = #tpu.pipeline_mode<synchronous>, transform_indices = @transform_0, window_bounds = array<i64: 16, 2304>}, {pipeline_mode = #tpu.pipeline_mode<synchronous>, transform_indices = @transform_1, window_bounds = array<i64: 2304, 256>}, {pipeline_mode = #tpu.pipeline_mode<synchronous>, transform_indices = @transform_2, window_bounds = array<i64: 1, 256>}, {pipeline_mode = #tpu.pipeline_mode<synchronous>, transform_indices = @transform_3, window_bounds = array<i64: 16, 256>}, {pipeline_mode = #tpu.pipeline_mode<synchronous>, transform_indices = @transform_4, window_bounds = array<i64: 16, 256>}]} {
    %c0 = arith.constant 0 : index
    %c0_0 = arith.constant 0 : index
    %0 = vector.load %arg1[%c0, %c0_0] : memref<16x2304xbf16, #tpu.memory_space<vmem>>, vector<16x2304xbf16>
    %c0_1 = arith.constant 0 : index
    %c0_2 = arith.constant 0 : index
    %1 = vector.load %arg2[%c0_1, %c0_2] : memref<2304x256xbf16, #tpu.memory_space<vmem>>, vector<2304x256xbf16>
    %cst = arith.constant dense<0.000000e+00> : vector<16x256xf32>
    %2 = tpu.matmul %0, %1, %cst {dimension_numbers = #tpu.dot_dimension_numbers<[1], [0], [0], [1], [0, 0, 1, 1], [], []>} : vector<16x2304xbf16>, vector<2304x256xbf16>, vector<16x256xf32> -> vector<16x256xf32>
    %c0_3 = arith.constant 0 : index
    %c0_4 = arith.constant 0 : index
    %3 = vector.load %arg3[%c0_3, %c0_4] : memref<1x256xf32, #tpu.memory_space<vmem>>, vector<1x256xf32>
    %4 = vector.broadcast %3 : vector<1x256xf32> to vector<16x256xf32>
    %5 = arith.addf %2, %4 : vector<16x256xf32>
    %c0_5 = arith.constant 0 : index
    %c0_6 = arith.constant 0 : index
    %6 = vector.load %arg4[%c0_5, %c0_6] : memref<16x256xbf16, #tpu.memory_space<vmem>>, vector<16x256xbf16>
    %7 = arith.extf %6 : vector<16x256xbf16> to vector<16x256xf32>
    %8 = arith.addf %5, %7 : vector<16x256xf32>
    %cst_7 = arith.constant 0.000000e+00 : f32
    %9 = vector.broadcast %cst_7 : f32 to vector<16x256xf32>
    %10 = arith.maximumf %8, %9 : vector<16x256xf32>
    %11 = arith.truncf %10 : vector<16x256xf32> to vector<16x256xbf16>
    %c0_8 = arith.constant 0 : index
    %c0_9 = arith.constant 0 : index
    %12 = vector.load %arg5[%c0_8, %c0_9] : memref<16x256xbf16, #tpu.memory_space<vmem>>, vector<16x256xbf16>
    tpu.vector_store %arg5[%c0_8, %c0_9], %11 {strides = array<i32>} : memref<16x256xbf16, #tpu.memory_space<vmem>>, vector<16x256xbf16>,
    return
  }
  func.func @transform_0(%arg0: i32) -> (i32, i32) {
    %c0_i32 = arith.constant 0 : i32
    %c0_i32_0 = arith.constant 0 : i32
    %c0_i32_1 = arith.constant 0 : i32
    return %c0_i32, %c0_i32_0 : i32, i32
  }
  func.func @transform_1(%arg0: i32) -> (i32, i32) {
    %c0_i32 = arith.constant 0 : i32
    %c0_i32_0 = arith.constant 0 : i32
    %c0_i32_1 = arith.constant 0 : i32
    return %c0_i32, %c0_i32_0 : i32, i32
  }
  func.func @transform_2(%arg0: i32) -> (i32, i32) {
    %c0_i32 = arith.constant 0 : i32
    %c0_i32_0 = arith.constant 0 : i32
    %c0_i32_1 = arith.constant 0 : i32
    return %c0_i32, %c0_i32_0 : i32, i32
  }
  func.func @transform_3(%arg0: i32) -> (i32, i32) {
    %c0_i32 = arith.constant 0 : i32
    %c0_i32_0 = arith.constant 0 : i32
    %c0_i32_1 = arith.constant 0 : i32
    return %c0_i32, %c0_i32_0 : i32, i32
  }
  func.func @transform_4(%arg0: i32) -> (i32, i32) {
    %c0_i32 = arith.constant 0 : i32
    %c0_i32_0 = arith.constant 0 : i32
    %c0_i32_1 = arith.constant 0 : i32
    return %c0_i32, %c0_i32_0 : i32, i32
  }
}

module attributes {stable_mosaic.version = 11 : i64} {
  func.func @_matmul_fused_kernel(%arg0: i32, %arg1: memref<16x128xbf16, #tpu.memory_space<vmem>>, %arg2: memref<128x256xbf16, #tpu.memory_space<vmem>>, %arg3: memref<1x256xf32, #tpu.memory_space<vmem>>, %arg4: memref<16x256xbf16, #tpu.memory_space<vmem>>) attributes {dimension_semantics = [#tpu.dimension_semantics<arbitrary>], iteration_bounds = array<i64: 1>, scalar_prefetch = 0 : i64, scratch_operands = 0 : i64, tpu.core_type = #tpu.core_type<tc>, window_params = [{pipeline_mode = #tpu.pipeline_mode<synchronous>, transform_indices = @transform_0, window_bounds = array<i64: 16, 128>}, {pipeline_mode = #tpu.pipeline_mode<synchronous>, transform_indices = @transform_1, window_bounds = array<i64: 128, 256>}, {pipeline_mode = #tpu.pipeline_mode<synchronous>, transform_indices = @transform_2, window_bounds = array<i64: 1, 256>}, {pipeline_mode = #tpu.pipeline_mode<synchronous>, transform_indices = @transform_3, window_bounds = array<i64: 16, 256>}]} {
    %c0 = arith.constant 0 : index
    %c0_0 = arith.constant 0 : index
    %0 = vector.load %arg1[%c0, %c0_0] : memref<16x128xbf16, #tpu.memory_space<vmem>>, vector<16x128xbf16>
    %c0_1 = arith.constant 0 : index
    %c0_2 = arith.constant 0 : index
    %1 = vector.load %arg2[%c0_1, %c0_2] : memref<128x256xbf16, #tpu.memory_space<vmem>>, vector<128x256xbf16>
    %cst = arith.constant dense<0.000000e+00> : vector<16x256xf32>
    %2 = tpu.matmul %0, %1, %cst {dimension_numbers = #tpu.dot_dimension_numbers<[1], [0], [0], [1], [0, 0, 1, 1], [], []>} : vector<16x128xbf16>, vector<128x256xbf16>, vector<16x256xf32> -> vector<16x256xf32>
    %c0_3 = arith.constant 0 : index
    %c0_4 = arith.constant 0 : index
    %3 = vector.load %arg3[%c0_3, %c0_4] : memref<1x256xf32, #tpu.memory_space<vmem>>, vector<1x256xf32>
    %4 = vector.broadcast %3 : vector<1x256xf32> to vector<16x256xf32>
    %5 = arith.addf %2, %4 : vector<16x256xf32>
    %6 = arith.truncf %5 : vector<16x256xf32> to vector<16x256xbf16>
    %c0_5 = arith.constant 0 : index
    %c0_6 = arith.constant 0 : index
    %7 = vector.load %arg4[%c0_5, %c0_6] : memref<16x256xbf16, #tpu.memory_space<vmem>>, vector<16x256xbf16>
    tpu.vector_store %arg4[%c0_5, %c0_6], %6 {strides = array<i32>} : memref<16x256xbf16, #tpu.memory_space<vmem>>, vector<16x256xbf16>,
    return
  }
  func.func @transform_0(%arg0: i32) -> (i32, i32) {
    %c0_i32 = arith.constant 0 : i32
    %c0_i32_0 = arith.constant 0 : i32
    %c0_i32_1 = arith.constant 0 : i32
    return %c0_i32, %c0_i32_0 : i32, i32
  }
  func.func @transform_1(%arg0: i32) -> (i32, i32) {
    %c0_i32 = arith.constant 0 : i32
    %c0_i32_0 = arith.constant 0 : i32
    %c0_i32_1 = arith.constant 0 : i32
    return %c0_i32, %c0_i32_0 : i32, i32
  }
  func.func @transform_2(%arg0: i32) -> (i32, i32) {
    %c0_i32 = arith.constant 0 : i32
    %c0_i32_0 = arith.constant 0 : i32
    %c0_i32_1 = arith.constant 0 : i32
    return %c0_i32, %c0_i32_0 : i32, i32
  }
  func.func @transform_3(%arg0: i32) -> (i32, i32) {
    %c0_i32 = arith.constant 0 : i32
    %c0_i32_0 = arith.constant 0 : i32
    %c0_i32_1 = arith.constant 0 : i32
    return %c0_i32, %c0_i32_0 : i32, i32
  }
}

module attributes {stable_mosaic.version = 11 : i64} {
  func.func @_matmul_fused_kernel(%arg0: i32, %arg1: memref<16x2304xbf16, #tpu.memory_space<vmem>>, %arg2: memref<2304x256xbf16, #tpu.memory_space<vmem>>, %arg3: memref<1x256xf32, #tpu.memory_space<vmem>>, %arg4: memref<16x256xbf16, #tpu.memory_space<vmem>>) attributes {dimension_semantics = [#tpu.dimension_semantics<arbitrary>], iteration_bounds = array<i64: 1>, scalar_prefetch = 0 : i64, scratch_operands = 0 : i64, tpu.core_type = #tpu.core_type<tc>, window_params = [{pipeline_mode = #tpu.pipeline_mode<synchronous>, transform_indices = @transform_0, window_bounds = array<i64: 16, 2304>}, {pipeline_mode = #tpu.pipeline_mode<synchronous>, transform_indices = @transform_1, window_bounds = array<i64: 2304, 256>}, {pipeline_mode = #tpu.pipeline_mode<synchronous>, transform_indices = @transform_2, window_bounds = array<i64: 1, 256>}, {pipeline_mode = #tpu.pipeline_mode<synchronous>, transform_indices = @transform_3, window_bounds = array<i64: 16, 256>}]} {
    %c0 = arith.constant 0 : index
    %c0_0 = arith.constant 0 : index
    %0 = vector.load %arg1[%c0, %c0_0] : memref<16x2304xbf16, #tpu.memory_space<vmem>>, vector<16x2304xbf16>
    %c0_1 = arith.constant 0 : index
    %c0_2 = arith.constant 0 : index
    %1 = vector.load %arg2[%c0_1, %c0_2] : memref<2304x256xbf16, #tpu.memory_space<vmem>>, vector<2304x256xbf16>
    %cst = arith.constant dense<0.000000e+00> : vector<16x256xf32>
    %2 = tpu.matmul %0, %1, %cst {dimension_numbers = #tpu.dot_dimension_numbers<[1], [0], [0], [1], [0, 0, 1, 1], [], []>} : vector<16x2304xbf16>, vector<2304x256xbf16>, vector<16x256xf32> -> vector<16x256xf32>
    %c0_3 = arith.constant 0 : index
    %c0_4 = arith.constant 0 : index
    %3 = vector.load %arg3[%c0_3, %c0_4] : memref<1x256xf32, #tpu.memory_space<vmem>>, vector<1x256xf32>
    %4 = vector.broadcast %3 : vector<1x256xf32> to vector<16x256xf32>
    %5 = arith.addf %2, %4 : vector<16x256xf32>
    %cst_5 = arith.constant 0.000000e+00 : f32
    %6 = vector.broadcast %cst_5 : f32 to vector<16x256xf32>
    %7 = arith.maximumf %5, %6 : vector<16x256xf32>
    %8 = arith.truncf %7 : vector<16x256xf32> to vector<16x256xbf16>
    %c0_6 = arith.constant 0 : index
    %c0_7 = arith.constant 0 : index
    %9 = vector.load %arg4[%c0_6, %c0_7] : memref<16x256xbf16, #tpu.memory_space<vmem>>, vector<16x256xbf16>
    tpu.vector_store %arg4[%c0_6, %c0_7], %8 {strides = array<i32>} : memref<16x256xbf16, #tpu.memory_space<vmem>>, vector<16x256xbf16>,
    return
  }
  func.func @transform_0(%arg0: i32) -> (i32, i32) {
    %c0_i32 = arith.constant 0 : i32
    %c0_i32_0 = arith.constant 0 : i32
    %c0_i32_1 = arith.constant 0 : i32
    return %c0_i32, %c0_i32_0 : i32, i32
  }
  func.func @transform_1(%arg0: i32) -> (i32, i32) {
    %c0_i32 = arith.constant 0 : i32
    %c0_i32_0 = arith.constant 0 : i32
    %c0_i32_1 = arith.constant 0 : i32
    return %c0_i32, %c0_i32_0 : i32, i32
  }
  func.func @transform_2(%arg0: i32) -> (i32, i32) {
    %c0_i32 = arith.constant 0 : i32
    %c0_i32_0 = arith.constant 0 : i32
    %c0_i32_1 = arith.constant 0 : i32
    return %c0_i32, %c0_i32_0 : i32, i32
  }
  func.func @transform_3(%arg0: i32) -> (i32, i32) {
    %c0_i32 = arith.constant 0 : i32
    %c0_i32_0 = arith.constant 0 : i32
    %c0_i32_1 = arith.constant 0 : i32
    return %c0_i32, %c0_i32_0 : i32, i32
  }
}

module attributes {stable_mosaic.version = 11 : i64} {
  func.func @_matmul_fused_kernel(%arg0: i32, %arg1: memref<16x256xbf16, #tpu.memory_space<vmem>>, %arg2: memref<256x512xbf16, #tpu.memory_space<vmem>>, %arg3: memref<1x512xf32, #tpu.memory_space<vmem>>, %arg4: memref<16x512xbf16, #tpu.memory_space<vmem>>) attributes {dimension_semantics = [#tpu.dimension_semantics<arbitrary>], iteration_bounds = array<i64: 1>, scalar_prefetch = 0 : i64, scratch_operands = 0 : i64, tpu.core_type = #tpu.core_type<tc>, window_params = [{pipeline_mode = #tpu.pipeline_mode<synchronous>, transform_indices = @transform_0, window_bounds = array<i64: 16, 256>}, {pipeline_mode = #tpu.pipeline_mode<synchronous>, transform_indices = @transform_1, window_bounds = array<i64: 256, 512>}, {pipeline_mode = #tpu.pipeline_mode<synchronous>, transform_indices = @transform_2, window_bounds = array<i64: 1, 512>}, {pipeline_mode = #tpu.pipeline_mode<synchronous>, transform_indices = @transform_3, window_bounds = array<i64: 16, 512>}]} {
    %c0 = arith.constant 0 : index
    %c0_0 = arith.constant 0 : index
    %0 = vector.load %arg1[%c0, %c0_0] : memref<16x256xbf16, #tpu.memory_space<vmem>>, vector<16x256xbf16>
    %c0_1 = arith.constant 0 : index
    %c0_2 = arith.constant 0 : index
    %1 = vector.load %arg2[%c0_1, %c0_2] : memref<256x512xbf16, #tpu.memory_space<vmem>>, vector<256x512xbf16>
    %cst = arith.constant dense<0.000000e+00> : vector<16x512xf32>
    %2 = tpu.matmul %0, %1, %cst {dimension_numbers = #tpu.dot_dimension_numbers<[1], [0], [0], [1], [0, 0, 1, 1], [], []>} : vector<16x256xbf16>, vector<256x512xbf16>, vector<16x512xf32> -> vector<16x512xf32>
    %c0_3 = arith.constant 0 : index
    %c0_4 = arith.constant 0 : index
    %3 = vector.load %arg3[%c0_3, %c0_4] : memref<1x512xf32, #tpu.memory_space<vmem>>, vector<1x512xf32>
    %4 = vector.broadcast %3 : vector<1x512xf32> to vector<16x512xf32>
    %5 = arith.addf %2, %4 : vector<16x512xf32>
    %6 = arith.truncf %5 : vector<16x512xf32> to vector<16x512xbf16>
    %c0_5 = arith.constant 0 : index
    %c0_6 = arith.constant 0 : index
    %7 = vector.load %arg4[%c0_5, %c0_6] : memref<16x512xbf16, #tpu.memory_space<vmem>>, vector<16x512xbf16>
    tpu.vector_store %arg4[%c0_5, %c0_6], %6 {strides = array<i32>} : memref<16x512xbf16, #tpu.memory_space<vmem>>, vector<16x512xbf16>,
    return
  }
  func.func @transform_0(%arg0: i32) -> (i32, i32) {
    %c0_i32 = arith.constant 0 : i32
    %c0_i32_0 = arith.constant 0 : i32
    %c0_i32_1 = arith.constant 0 : i32
    return %c0_i32, %c0_i32_0 : i32, i32
  }
  func.func @transform_1(%arg0: i32) -> (i32, i32) {
    %c0_i32 = arith.constant 0 : i32
    %c0_i32_0 = arith.constant 0 : i32
    %c0_i32_1 = arith.constant 0 : i32
    return %c0_i32, %c0_i32_0 : i32, i32
  }
  func.func @transform_2(%arg0: i32) -> (i32, i32) {
    %c0_i32 = arith.constant 0 : i32
    %c0_i32_0 = arith.constant 0 : i32
    %c0_i32_1 = arith.constant 0 : i32
    return %c0_i32, %c0_i32_0 : i32, i32
  }
  func.func @transform_3(%arg0: i32) -> (i32, i32) {
    %c0_i32 = arith.constant 0 : i32
    %c0_i32_0 = arith.constant 0 : i32
    %c0_i32_1 = arith.constant 0 : i32
    return %c0_i32, %c0_i32_0 : i32, i32
  }
}

module attributes {stable_mosaic.version = 11 : i64} {
  func.func @_matmul_fused_kernel(%arg0: i32, %arg1: memref<16x2304xbf16, #tpu.memory_space<vmem>>, %arg2: memref<2304x512xbf16, #tpu.memory_space<vmem>>, %arg3: memref<1x512xf32, #tpu.memory_space<vmem>>, %arg4: memref<16x512xbf16, #tpu.memory_space<vmem>>) attributes {dimension_semantics = [#tpu.dimension_semantics<arbitrary>], iteration_bounds = array<i64: 1>, scalar_prefetch = 0 : i64, scratch_operands = 0 : i64, tpu.core_type = #tpu.core_type<tc>, window_params = [{pipeline_mode = #tpu.pipeline_mode<synchronous>, transform_indices = @transform_0, window_bounds = array<i64: 16, 2304>}, {pipeline_mode = #tpu.pipeline_mode<synchronous>, transform_indices = @transform_1, window_bounds = array<i64: 2304, 512>}, {pipeline_mode = #tpu.pipeline_mode<synchronous>, transform_indices = @transform_2, window_bounds = array<i64: 1, 512>}, {pipeline_mode = #tpu.pipeline_mode<synchronous>, transform_indices = @transform_3, window_bounds = array<i64: 16, 512>}]} {
    %c0 = arith.constant 0 : index
    %c0_0 = arith.constant 0 : index
    %0 = vector.load %arg1[%c0, %c0_0] : memref<16x2304xbf16, #tpu.memory_space<vmem>>, vector<16x2304xbf16>
    %c0_1 = arith.constant 0 : index
    %c0_2 = arith.constant 0 : index
    %1 = vector.load %arg2[%c0_1, %c0_2] : memref<2304x512xbf16, #tpu.memory_space<vmem>>, vector<2304x512xbf16>
    %cst = arith.constant dense<0.000000e+00> : vector<16x512xf32>
    %2 = tpu.matmul %0, %1, %cst {dimension_numbers = #tpu.dot_dimension_numbers<[1], [0], [0], [1], [0, 0, 1, 1], [], []>} : vector<16x2304xbf16>, vector<2304x512xbf16>, vector<16x512xf32> -> vector<16x512xf32>
    %c0_3 = arith.constant 0 : index
    %c0_4 = arith.constant 0 : index
    %3 = vector.load %arg3[%c0_3, %c0_4] : memref<1x512xf32, #tpu.memory_space<vmem>>, vector<1x512xf32>
    %4 = vector.broadcast %3 : vector<1x512xf32> to vector<16x512xf32>
    %5 = arith.addf %2, %4 : vector<16x512xf32>
    %cst_5 = arith.constant 0.000000e+00 : f32
    %6 = vector.broadcast %cst_5 : f32 to vector<16x512xf32>
    %7 = arith.maximumf %5, %6 : vector<16x512xf32>
    %8 = arith.truncf %7 : vector<16x512xf32> to vector<16x512xbf16>
    %c0_6 = arith.constant 0 : index
    %c0_7 = arith.constant 0 : index
    %9 = vector.load %arg4[%c0_6, %c0_7] : memref<16x512xbf16, #tpu.memory_space<vmem>>, vector<16x512xbf16>
    tpu.vector_store %arg4[%c0_6, %c0_7], %8 {strides = array<i32>} : memref<16x512xbf16, #tpu.memory_space<vmem>>, vector<16x512xbf16>,
    return
  }
  func.func @transform_0(%arg0: i32) -> (i32, i32) {
    %c0_i32 = arith.constant 0 : i32
    %c0_i32_0 = arith.constant 0 : i32
    %c0_i32_1 = arith.constant 0 : i32
    return %c0_i32, %c0_i32_0 : i32, i32
  }
  func.func @transform_1(%arg0: i32) -> (i32, i32) {
    %c0_i32 = arith.constant 0 : i32
    %c0_i32_0 = arith.constant 0 : i32
    %c0_i32_1 = arith.constant 0 : i32
    return %c0_i32, %c0_i32_0 : i32, i32
  }
  func.func @transform_2(%arg0: i32) -> (i32, i32) {
    %c0_i32 = arith.constant 0 : i32
    %c0_i32_0 = arith.constant 0 : i32
    %c0_i32_1 = arith.constant 0 : i32
    return %c0_i32, %c0_i32_0 : i32, i32
  }
  func.func @transform_3(%arg0: i32) -> (i32, i32) {
    %c0_i32 = arith.constant 0 : i32
    %c0_i32_0 = arith.constant 0 : i32
    %c0_i32_1 = arith.constant 0 : i32
    return %c0_i32, %c0_i32_0 : i32, i32
  }
}

module attributes {stable_mosaic.version = 11 : i64} {
  func.func @_matmul_fused_kernel(%arg0: i32, %arg1: memref<16x512xbf16, #tpu.memory_space<vmem>>, %arg2: memref<512x512xbf16, #tpu.memory_space<vmem>>, %arg3: memref<1x512xf32, #tpu.memory_space<vmem>>, %arg4: memref<16x512xbf16, #tpu.memory_space<vmem>>, %arg5: memref<16x512xbf16, #tpu.memory_space<vmem>>) attributes {dimension_semantics = [#tpu.dimension_semantics<arbitrary>], iteration_bounds = array<i64: 1>, scalar_prefetch = 0 : i64, scratch_operands = 0 : i64, tpu.core_type = #tpu.core_type<tc>, window_params = [{pipeline_mode = #tpu.pipeline_mode<synchronous>, transform_indices = @transform_0, window_bounds = array<i64: 16, 512>}, {pipeline_mode = #tpu.pipeline_mode<synchronous>, transform_indices = @transform_1, window_bounds = array<i64: 512, 512>}, {pipeline_mode = #tpu.pipeline_mode<synchronous>, transform_indices = @transform_2, window_bounds = array<i64: 1, 512>}, {pipeline_mode = #tpu.pipeline_mode<synchronous>, transform_indices = @transform_3, window_bounds = array<i64: 16, 512>}, {pipeline_mode = #tpu.pipeline_mode<synchronous>, transform_indices = @transform_4, window_bounds = array<i64: 16, 512>}]} {
    %c0 = arith.constant 0 : index
    %c0_0 = arith.constant 0 : index
    %0 = vector.load %arg1[%c0, %c0_0] : memref<16x512xbf16, #tpu.memory_space<vmem>>, vector<16x512xbf16>
    %c0_1 = arith.constant 0 : index
    %c0_2 = arith.constant 0 : index
    %1 = vector.load %arg2[%c0_1, %c0_2] : memref<512x512xbf16, #tpu.memory_space<vmem>>, vector<512x512xbf16>
    %cst = arith.constant dense<0.000000e+00> : vector<16x512xf32>
    %2 = tpu.matmul %0, %1, %cst {dimension_numbers = #tpu.dot_dimension_numbers<[1], [0], [0], [1], [0, 0, 1, 1], [], []>} : vector<16x512xbf16>, vector<512x512xbf16>, vector<16x512xf32> -> vector<16x512xf32>
    %c0_3 = arith.constant 0 : index
    %c0_4 = arith.constant 0 : index
    %3 = vector.load %arg3[%c0_3, %c0_4] : memref<1x512xf32, #tpu.memory_space<vmem>>, vector<1x512xf32>
    %4 = vector.broadcast %3 : vector<1x512xf32> to vector<16x512xf32>
    %5 = arith.addf %2, %4 : vector<16x512xf32>
    %c0_5 = arith.constant 0 : index
    %c0_6 = arith.constant 0 : index
    %6 = vector.load %arg4[%c0_5, %c0_6] : memref<16x512xbf16, #tpu.memory_space<vmem>>, vector<16x512xbf16>
    %7 = arith.extf %6 : vector<16x512xbf16> to vector<16x512xf32>
    %8 = arith.addf %5, %7 : vector<16x512xf32>
    %cst_7 = arith.constant 0.000000e+00 : f32
    %9 = vector.broadcast %cst_7 : f32 to vector<16x512xf32>
    %10 = arith.maximumf %8, %9 : vector<16x512xf32>
    %11 = arith.truncf %10 : vector<16x512xf32> to vector<16x512xbf16>
    %c0_8 = arith.constant 0 : index
    %c0_9 = arith.constant 0 : index
    %12 = vector.load %arg5[%c0_8, %c0_9] : memref<16x512xbf16, #tpu.memory_space<vmem>>, vector<16x512xbf16>
    tpu.vector_store %arg5[%c0_8, %c0_9], %11 {strides = array<i32>} : memref<16x512xbf16, #tpu.memory_space<vmem>>, vector<16x512xbf16>,
    return
  }
  func.func @transform_0(%arg0: i32) -> (i32, i32) {
    %c0_i32 = arith.constant 0 : i32
    %c0_i32_0 = arith.constant 0 : i32
    %c0_i32_1 = arith.constant 0 : i32
    return %c0_i32, %c0_i32_0 : i32, i32
  }
  func.func @transform_1(%arg0: i32) -> (i32, i32) {
    %c0_i32 = arith.constant 0 : i32
    %c0_i32_0 = arith.constant 0 : i32
    %c0_i32_1 = arith.constant 0 : i32
    return %c0_i32, %c0_i32_0 : i32, i32
  }
  func.func @transform_2(%arg0: i32) -> (i32, i32) {
    %c0_i32 = arith.constant 0 : i32
    %c0_i32_0 = arith.constant 0 : i32
    %c0_i32_1 = arith.constant 0 : i32
    return %c0_i32, %c0_i32_0 : i32, i32
  }
  func.func @transform_3(%arg0: i32) -> (i32, i32) {
    %c0_i32 = arith.constant 0 : i32
    %c0_i32_0 = arith.constant 0 : i32
    %c0_i32_1 = arith.constant 0 : i32
    return %c0_i32, %c0_i32_0 : i32, i32
  }
  func.func @transform_4(%arg0: i32) -> (i32, i32) {
    %c0_i32 = arith.constant 0 : i32
    %c0_i32_0 = arith.constant 0 : i32
    %c0_i32_1 = arith.constant 0 : i32
    return %c0_i32, %c0_i32_0 : i32, i32
  }
}

module attributes {stable_mosaic.version = 11 : i64} {
  func.func @_matmul_fused_kernel(%arg0: i32, %arg1: memref<16x512xbf16, #tpu.memory_space<vmem>>, %arg2: memref<512x512xbf16, #tpu.memory_space<vmem>>, %arg3: memref<1x512xf32, #tpu.memory_space<vmem>>, %arg4: memref<16x512xbf16, #tpu.memory_space<vmem>>) attributes {dimension_semantics = [#tpu.dimension_semantics<arbitrary>], iteration_bounds = array<i64: 1>, scalar_prefetch = 0 : i64, scratch_operands = 0 : i64, tpu.core_type = #tpu.core_type<tc>, window_params = [{pipeline_mode = #tpu.pipeline_mode<synchronous>, transform_indices = @transform_0, window_bounds = array<i64: 16, 512>}, {pipeline_mode = #tpu.pipeline_mode<synchronous>, transform_indices = @transform_1, window_bounds = array<i64: 512, 512>}, {pipeline_mode = #tpu.pipeline_mode<synchronous>, transform_indices = @transform_2, window_bounds = array<i64: 1, 512>}, {pipeline_mode = #tpu.pipeline_mode<synchronous>, transform_indices = @transform_3, window_bounds = array<i64: 16, 512>}]} {
    %c0 = arith.constant 0 : index
    %c0_0 = arith.constant 0 : index
    %0 = vector.load %arg1[%c0, %c0_0] : memref<16x512xbf16, #tpu.memory_space<vmem>>, vector<16x512xbf16>
    %c0_1 = arith.constant 0 : index
    %c0_2 = arith.constant 0 : index
    %1 = vector.load %arg2[%c0_1, %c0_2] : memref<512x512xbf16, #tpu.memory_space<vmem>>, vector<512x512xbf16>
    %cst = arith.constant dense<0.000000e+00> : vector<16x512xf32>
    %2 = tpu.matmul %0, %1, %cst {dimension_numbers = #tpu.dot_dimension_numbers<[1], [0], [0], [1], [0, 0, 1, 1], [], []>} : vector<16x512xbf16>, vector<512x512xbf16>, vector<16x512xf32> -> vector<16x512xf32>
    %c0_3 = arith.constant 0 : index
    %c0_4 = arith.constant 0 : index
    %3 = vector.load %arg3[%c0_3, %c0_4] : memref<1x512xf32, #tpu.memory_space<vmem>>, vector<1x512xf32>
    %4 = vector.broadcast %3 : vector<1x512xf32> to vector<16x512xf32>
    %5 = arith.addf %2, %4 : vector<16x512xf32>
    %cst_5 = arith.constant 0.000000e+00 : f32
    %6 = vector.broadcast %cst_5 : f32 to vector<16x512xf32>
    %7 = arith.maximumf %5, %6 : vector<16x512xf32>
    %8 = arith.truncf %7 : vector<16x512xf32> to vector<16x512xbf16>
    %c0_6 = arith.constant 0 : index
    %c0_7 = arith.constant 0 : index
    %9 = vector.load %arg4[%c0_6, %c0_7] : memref<16x512xbf16, #tpu.memory_space<vmem>>, vector<16x512xbf16>
    tpu.vector_store %arg4[%c0_6, %c0_7], %8 {strides = array<i32>} : memref<16x512xbf16, #tpu.memory_space<vmem>>, vector<16x512xbf16>,
    return
  }
  func.func @transform_0(%arg0: i32) -> (i32, i32) {
    %c0_i32 = arith.constant 0 : i32
    %c0_i32_0 = arith.constant 0 : i32
    %c0_i32_1 = arith.constant 0 : i32
    return %c0_i32, %c0_i32_0 : i32, i32
  }
  func.func @transform_1(%arg0: i32) -> (i32, i32) {
    %c0_i32 = arith.constant 0 : i32
    %c0_i32_0 = arith.constant 0 : i32
    %c0_i32_1 = arith.constant 0 : i32
    return %c0_i32, %c0_i32_0 : i32, i32
  }
  func.func @transform_2(%arg0: i32) -> (i32, i32) {
    %c0_i32 = arith.constant 0 : i32
    %c0_i32_0 = arith.constant 0 : i32
    %c0_i32_1 = arith.constant 0 : i32
    return %c0_i32, %c0_i32_0 : i32, i32
  }
  func.func @transform_3(%arg0: i32) -> (i32, i32) {
    %c0_i32 = arith.constant 0 : i32
    %c0_i32_0 = arith.constant 0 : i32
    %c0_i32_1 = arith.constant 0 : i32
    return %c0_i32, %c0_i32_0 : i32, i32
  }
}

module attributes {stable_mosaic.version = 11 : i64} {
  func.func @_matmul_fused_kernel(%arg0: i32, %arg1: memref<16x512xbf16, #tpu.memory_space<vmem>>, %arg2: memref<512x128xbf16, #tpu.memory_space<vmem>>, %arg3: memref<1x128xf32, #tpu.memory_space<vmem>>, %arg4: memref<16x128xf32, #tpu.memory_space<vmem>>) attributes {dimension_semantics = [#tpu.dimension_semantics<arbitrary>], iteration_bounds = array<i64: 1>, scalar_prefetch = 0 : i64, scratch_operands = 0 : i64, tpu.core_type = #tpu.core_type<tc>, window_params = [{pipeline_mode = #tpu.pipeline_mode<synchronous>, transform_indices = @transform_0, window_bounds = array<i64: 16, 512>}, {pipeline_mode = #tpu.pipeline_mode<synchronous>, transform_indices = @transform_1, window_bounds = array<i64: 512, 128>}, {pipeline_mode = #tpu.pipeline_mode<synchronous>, transform_indices = @transform_2, window_bounds = array<i64: 1, 128>}, {pipeline_mode = #tpu.pipeline_mode<synchronous>, transform_indices = @transform_3, window_bounds = array<i64: 16, 128>}]} {
    %c0 = arith.constant 0 : index
    %c0_0 = arith.constant 0 : index
    %0 = vector.load %arg1[%c0, %c0_0] : memref<16x512xbf16, #tpu.memory_space<vmem>>, vector<16x512xbf16>
    %c0_1 = arith.constant 0 : index
    %c0_2 = arith.constant 0 : index
    %1 = vector.load %arg2[%c0_1, %c0_2] : memref<512x128xbf16, #tpu.memory_space<vmem>>, vector<512x128xbf16>
    %cst = arith.constant dense<0.000000e+00> : vector<16x128xf32>
    %2 = tpu.matmul %0, %1, %cst {dimension_numbers = #tpu.dot_dimension_numbers<[1], [0], [0], [1], [0, 0, 1, 1], [], []>} : vector<16x512xbf16>, vector<512x128xbf16>, vector<16x128xf32> -> vector<16x128xf32>
    %c0_3 = arith.constant 0 : index
    %c0_4 = arith.constant 0 : index
    %3 = vector.load %arg3[%c0_3, %c0_4] : memref<1x128xf32, #tpu.memory_space<vmem>>, vector<1x128xf32>
    %4 = vector.broadcast %3 : vector<1x128xf32> to vector<16x128xf32>
    %5 = arith.addf %2, %4 : vector<16x128xf32>
    %c0_5 = arith.constant 0 : index
    %c0_6 = arith.constant 0 : index
    %6 = vector.load %arg4[%c0_5, %c0_6] : memref<16x128xf32, #tpu.memory_space<vmem>>, vector<16x128xf32>
    tpu.vector_store %arg4[%c0_5, %c0_6], %5 {strides = array<i32>} : memref<16x128xf32, #tpu.memory_space<vmem>>, vector<16x128xf32>,
    return
  }
  func.func @transform_0(%arg0: i32) -> (i32, i32) {
    %c0_i32 = arith.constant 0 : i32
    %c0_i32_0 = arith.constant 0 : i32
    %c0_i32_1 = arith.constant 0 : i32
    return %c0_i32, %c0_i32_0 : i32, i32
  }
  func.func @transform_1(%arg0: i32) -> (i32, i32) {
    %c0_i32 = arith.constant 0 : i32
    %c0_i32_0 = arith.constant 0 : i32
    %c0_i32_1 = arith.constant 0 : i32
    return %c0_i32, %c0_i32_0 : i32, i32
  }
  func.func @transform_2(%arg0: i32) -> (i32, i32) {
    %c0_i32 = arith.constant 0 : i32
    %c0_i32_0 = arith.constant 0 : i32
    %c0_i32_1 = arith.constant 0 : i32
    return %c0_i32, %c0_i32_0 : i32, i32
  }
  func.func @transform_3(%arg0: i32) -> (i32, i32) {
    %c0_i32 = arith.constant 0 : i32
    %c0_i32_0 = arith.constant 0 : i32
    %c0_i32_1 = arith.constant 0 : i32
    return %c0_i32, %c0_i32_0 : i32, i32
  }
}

</mosaic_0001>

<bundles_post_ra>
// kernel: resnet_arcface_forward.21
= control target key start
LH: loop header
LB: loop body
LE: loop exit
PB: predicated region body
PF: predicated region fallthrough
CT: control target
= control target key end

     0   :  { %v1756_v0 = vmov 0   ;;  %s2214_s1 = inlined_call_operand.vmem [shape: bf16[256,128], index: 1, kind: input, shape index: {}]   ;;  %s2215_s0 = inlined_call_operand.vmem [shape: bf16[512,256], index: 0, kind: input, shape index: {}]   ;;  %s2216_s2 = inlined_call_operand.vmem [shape: f32[1,128], index: 2, kind: input, shape index: {}]   ;;  %s2217_s3 = inlined_call_operand.vmem [shape: bf16[512,128], index: 3, kind: output, shape index: {}]  }
   0x1   :  { %534 = vmatprep.subr.bf16.mxu0 %v1756_v0  ;;  %1611 = vmatprep.subr.bf16.mxu1 %v1756_v0  ;;  %v1644_v1 = vld [vmem:[%s2214_s1 + $0x38] sm:$0xff]   ;;  %v1645_v2 = vld [vmem:[%s2214_s1 + $0x30] sm:$0xff]   ;;  %v1646_v3 = vld [vmem:[%s2214_s1 + $0x28] sm:$0xff]  }
   0x2   :  { %535 = vmatpush1.bf16.msra.mxu0 %v1644_v1  ;;  %1627 = vmatpush1.bf16.msra.mxu1 %v1644_v1  ;;  %v1647_v4 = vld [vmem:[%s2214_s1 + $0x20] sm:$0xff]   ;;  %v1648_v5 = vld [vmem:[%s2214_s1 + $0x18] sm:$0xff]   ;;  %v1649_v7 = vld [vmem:[%s2214_s1 + $0x10] sm:$0xff]  }
   0x3   :  { %536 = vmatprep.subr.bf16.mxu0 %v1756_v0  ;;  %1612 = vmatprep.subr.bf16.mxu1 %v1756_v0  ;;  %v1662_v6 = vld [vmem:[%s2215_s0 + $0x4] ss:$8 sps:$4 sm:$0xff]   ;;  %v1652_v11 = vld [vmem:[%s2214_s1 + $0x78] sm:$0xff]   ;;  %v1653_v12 = vld [vmem:[%s2214_s1 + $0x70] sm:$0xff]  }
   0x4   :  { %v1665_v8 = vld [vmem:[%s2215_s0 + $0x104] ss:$8 sps:$4 sm:$0xff]   ;;  %566 = vmatprep.mubr.bf16.mxu0 %v1662_v6  ;;  %v1656_v15 = vld [vmem:[%s2214_s1 + $0x58] sm:$0xff]   ;;  %v1657_v16 = vld [vmem:[%s2214_s1 + $0x50] sm:$0xff]  }
   0x5   :  { %694 = vmatprep.mubr.bf16.mxu1 %v1665_v8  ;;  %v1650_v9 = vld [vmem:[%s2214_s1 + $0x8] sm:$0xff]   ;;  %v1651_v10 = vld [vmem:[%s2214_s1] sm:$0xff]   ;;  %v1666_v21 = vld [vmem:[%s2215_s0 + $0x14] ss:$8 sps:$4 sm:$0xff]  }
   0x6   :  { %537 = vmatpush1.bf16.msra.mxu0 %v1645_v2  ;;  %1628 = vmatpush1.bf16.msra.mxu1 %v1645_v2  ;;  %v1654_v13 = vld [vmem:[%s2214_s1 + $0x68] sm:$0xff]   ;;  %v1655_v14 = vld [vmem:[%s2214_s1 + $0x60] sm:$0xff]   ;;  %v1668_v22 = vld [vmem:[%s2215_s0 + $0x114] ss:$8 sps:$4 sm:$0xff]  }
   0x7   :  { %538 = vmatprep.subr.bf16.mxu0 %v1756_v0  ;;  %1613 = vmatprep.subr.bf16.mxu1 %v1756_v0  ;;  %v1658_v17 = vld [vmem:[%s2214_s1 + $0x48] sm:$0xff]   ;;  %v1659_v18 = vld [vmem:[%s2214_s1 + $0x40] sm:$0xff]   ;;  %v1670_v23 = vld [vmem:[%s2215_s0 + $0x10] ss:$8 sps:$4 sm:$0xff]  }
   0x8   :  { %v1660_v19 = vld [vmem:[%s2215_s0] ss:$8 sps:$4 sm:$0xff]   ;;  %v1671_v24 = vld [vmem:[%s2215_s0 + $0x110] ss:$8 sps:$4 sm:$0xff]   ;;  %v1672_v25 = vld [vmem:[%s2215_s0 + $0x24] ss:$8 sps:$4 sm:$0xff]  }
   0x9   :  { %v1663_v20 = vld [vmem:[%s2215_s0 + $0x100] ss:$8 sps:$4 sm:$0xff]   ;;  %v1674_v26 = vld [vmem:[%s2215_s0 + $0x124] ss:$8 sps:$4 sm:$0xff]   ;;  %v1678_v29 = vld [vmem:[%s2215_s0 + $0x34] ss:$8 sps:$4 sm:$0xff]  }
   0xa   :  { %539 = vmatpush1.bf16.msra.mxu0 %v1646_v3  ;;  %1629 = vmatpush1.bf16.msra.mxu1 %v1646_v3  ;;  %v1676_v27 = vld [vmem:[%s2215_s0 + $0x20] ss:$8 sps:$4 sm:$0xff]   ;;  %v1680_v30 = vld [vmem:[%s2215_s0 + $0x134] ss:$8 sps:$4 sm:$0xff]   ;;  %v1682_v31 = vld [vmem:[%s2215_s0 + $0x30] ss:$8 sps:$4 sm:$0xff]  }
   0xb   :  { %540 = vmatprep.subr.bf16.mxu0 %v1756_v0  ;;  %1614 = vmatprep.subr.bf16.mxu1 %v1756_v0  ;;  %v1677_v28 = vld [vmem:[%s2215_s0 + $0x120] ss:$8 sps:$4 sm:$0xff]   ;;  %v1683_v32 = vld [vmem:[%s2215_s0 + $0x130] ss:$8 sps:$4 sm:$0xff]   ;;  %v1684_v33 = vld [vmem:[%s2215_s0 + $0x44] ss:$8 sps:$4 sm:$0xff]  }
   0xc   :  { %v1686_v34 = vld [vmem:[%s2215_s0 + $0x144] ss:$8 sps:$4 sm:$0xff]   ;;  %v1688_v35 = vld [vmem:[%s2215_s0 + $0x40] ss:$8 sps:$4 sm:$0xff]   ;;  %v1690_v37 = vld [vmem:[%s2215_s0 + $0x54] ss:$8 sps:$4 sm:$0xff]  }
   0xd   :  { %v1689_v36 = vld [vmem:[%s2215_s0 + $0x140] ss:$8 sps:$4 sm:$0xff]   ;;  %v1692_v38 = vld [vmem:[%s2215_s0 + $0x154] ss:$8 sps:$4 sm:$0xff]   ;;  %v1694_v39 = vld [vmem:[%s2215_s0 + $0x50] ss:$8 sps:$4 sm:$0xff]  }
   0xe   :  { %541 = vmatpush1.bf16.msra.mxu0 %v1647_v4  ;;  %1630 = vmatpush1.bf16.msra.mxu1 %v1647_v4  ;;  %v1695_v40 = vld [vmem:[%s2215_s0 + $0x150] ss:$8 sps:$4 sm:$0xff]   ;;  %v1696_v41 = vld [vmem:[%s2215_s0 + $0x64] ss:$8 sps:$4 sm:$0xff]   ;;  %v1700_v43 = vld [vmem:[%s2215_s0 + $0x60] ss:$8 sps:$4 sm:$0xff]  }
   0xf   :  { %542 = vmatprep.subr.bf16.mxu0 %v1756_v0  ;;  %1615 = vmatprep.subr.bf16.mxu1 %v1756_v0  ;;  %v1698_v42 = vld [vmem:[%s2215_s0 + $0x164] ss:$8 sps:$4 sm:$0xff]   ;;  %v1701_v44 = vld [vmem:[%s2215_s0 + $0x160] ss:$8 sps:$4 sm:$0xff]   ;;  %v1702_v45 = vld [vmem:[%s2215_s0 + $0x74] ss:$8 sps:$4 sm:$0xff]  }
  0x10   :  { %v1704_v46 = vld [vmem:[%s2215_s0 + $0x174] ss:$8 sps:$4 sm:$0xff]   ;;  %v1706_v47 = vld [vmem:[%s2215_s0 + $0x70] ss:$8 sps:$4 sm:$0xff]   ;;  %v1708_v49 = vld [vmem:[%s2215_s0 + $0x84] ss:$8 sps:$4 sm:$0xff]  }
  0x11   :  { %v1707_v48 = vld [vmem:[%s2215_s0 + $0x170] ss:$8 sps:$4 sm:$0xff]   ;;  %v1710_v50 = vld [vmem:[%s2215_s0 + $0x184] ss:$8 sps:$4 sm:$0xff]   ;;  %v1712_v51 = vld [vmem:[%s2215_s0 + $0x80] ss:$8 sps:$4 sm:$0xff]  }
  0x12   :  { %543 = vmatpush1.bf16.msra.mxu0 %v1648_v5  ;;  %1631 = vmatpush1.bf16.msra.mxu1 %v1648_v5  ;;  %v1713_v52 = vld [vmem:[%s2215_s0 + $0x180] ss:$8 sps:$4 sm:$0xff]   ;;  %v1714_v53 = vld [vmem:[%s2215_s0 + $0x94] ss:$8 sps:$4 sm:$0xff]   ;;  %v1718_v55 = vld [vmem:[%s2215_s0 + $0x90] ss:$8 sps:$4 sm:$0xff]  }
  0x13   :  { %544 = vmatprep.subr.bf16.mxu0 %v1756_v0  ;;  %1616 = vmatprep.subr.bf16.mxu1 %v1756_v0  ;;  %v1716_v54 = vld [vmem:[%s2215_s0 + $0x194] ss:$8 sps:$4 sm:$0xff]   ;;  %v1719_v56 = vld [vmem:[%s2215_s0 + $0x190] ss:$8 sps:$4 sm:$0xff]   ;;  %v1720_v57 = vld [vmem:[%s2215_s0 + $0xa4] ss:$8 sps:$4 sm:$0xff]  }
  0x14   :  { %v1722_v58 = vld [vmem:[%s2215_s0 + $0x1a4] ss:$8 sps:$4 sm:$0xff]   ;;  %v1724_v59 = vld [vmem:[%s2215_s0 + $0xa0] ss:$8 sps:$4 sm:$0xff]   ;;  %v1726_v61 = vld [vmem:[%s2215_s0 + $0xb4] ss:$8 sps:$4 sm:$0xff]  }
  0x15   :  { %v1725_v60 = vld [vmem:[%s2215_s0 + $0x1a0] ss:$8 sps:$4 sm:$0xff]   ;;  %v1728_v62 = vld [vmem:[%s2215_s0 + $0x1b4] ss:$8 sps:$4 sm:$0xff]   ;;  %v1730_v63 = vld [vmem:[%s2215_s0 + $0xb0] ss:$8 sps:$4 sm:$0xff]  }
  0x16   :  { %545 = vmatpush1.bf16.msra.mxu0 %v1649_v7  ;;  %1632 = vmatpush1.bf16.msra.mxu1 %v1649_v7  ;;  %v1732_v1 = vld [vmem:[%s2215_s0 + $0xc4] ss:$8 sps:$4 sm:$0xff]   ;;  %v1736_v3 = vld [vmem:[%s2215_s0 + $0xc0] ss:$8 sps:$4 sm:$0xff]   ;;  %v1738_v5 = vld [vmem:[%s2215_s0 + $0xd4] ss:$8 sps:$4 sm:$0xff]  }
  0x17   :  { %546 = vmatprep.subr.bf16.mxu0 %v1756_v0  ;;  %1617 = vmatprep.subr.bf16.mxu1 %v1756_v0  ;;  %v1734_v2 = vld [vmem:[%s2215_s0 + $0x1c4] ss:$8 sps:$4 sm:$0xff]   ;;  %v1737_v4 = vld [vmem:[%s2215_s0 + $0x1c0] ss:$8 sps:$4 sm:$0xff]   ;;  %v1740_v6 = vld [vmem:[%s2215_s0 + $0x1d4] ss:$8 sps:$4 sm:$0xff]  }
  0x18   :  { %v1742_v7 = vld [vmem:[%s2215_s0 + $0xd0] ss:$8 sps:$4 sm:$0xff]  }
  0x19   :  { %v1743_v8 = vld [vmem:[%s2215_s0 + $0x1d0] ss:$8 sps:$4 sm:$0xff]  }
  0x1a   :  { %547 = vmatpush1.bf16.msra.mxu0 %v1650_v9  ;;  %1633 = vmatpush1.bf16.msra.mxu1 %v1650_v9  ;;  %v1744_v9 = vld [vmem:[%s2215_s0 + $0xe4] ss:$8 sps:$4 sm:$0xff]  }
  0x1b   :  { %548 = vmatprep.subr.bf16.mxu0 %v1756_v0  ;;  %1618 = vmatprep.subr.bf16.mxu1 %v1756_v0 }
  0x1e   :  { %549 = vmatpush1.bf16.msra.mxu0 %v1651_v10  ;;  %1634 = vmatpush1.bf16.msra.mxu1 %v1651_v10  ;;  %v1746_v10 = vld [vmem:[%s2215_s0 + $0x1e4] ss:$8 sps:$4 sm:$0xff]  }
  0x1f   :  { %550 = vmatprep.subr.bf16.mxu0 %v1756_v0  ;;  %1619 = vmatprep.subr.bf16.mxu1 %v1756_v0 }
  0x22   :  { %551 = vmatpush2.bf16.msra.mxu0 %v1652_v11  ;;  %1635 = vmatpush2.bf16.msra.mxu1 %v1652_v11  ;;  %v1748_v11 = vld [vmem:[%s2215_s0 + $0xe0] ss:$8 sps:$4 sm:$0xff]  }
  0x23   :  { %552 = vmatprep.subr.bf16.mxu0 %v1756_v0  ;;  %1620 = vmatprep.subr.bf16.mxu1 %v1756_v0 }
  0x26   :  { %553 = vmatpush2.bf16.msra.mxu0 %v1653_v12  ;;  %1636 = vmatpush2.bf16.msra.mxu1 %v1653_v12  ;;  %v1749_v12 = vld [vmem:[%s2215_s0 + $0x1e0] ss:$8 sps:$4 sm:$0xff]  }
  0x27   :  { %554 = vmatprep.subr.bf16.mxu0 %v1756_v0  ;;  %1621 = vmatprep.subr.bf16.mxu1 %v1756_v0 }
  0x2a   :  { %555 = vmatpush2.bf16.msra.mxu0 %v1654_v13  ;;  %1637 = vmatpush2.bf16.msra.mxu1 %v1654_v13  ;;  %v1750_v13 = vld [vmem:[%s2215_s0 + $0xf4] ss:$8 sps:$4 sm:$0xff]  }
  0x2b   :  { %556 = vmatprep.subr.bf16.mxu0 %v1756_v0  ;;  %1622 = vmatprep.subr.bf16.mxu1 %v1756_v0 }
  0x2e   :  { %557 = vmatpush2.bf16.msra.mxu0 %v1655_v14  ;;  %1638 = vmatpush2.bf16.msra.mxu1 %v1655_v14  ;;  %v1752_v14 = vld [vmem:[%s2215_s0 + $0x1f4] ss:$8 sps:$4 sm:$0xff]  }
  0x2f   :  { %558 = vmatprep.subr.bf16.mxu0 %v1756_v0  ;;  %1623 = vmatprep.subr.bf16.mxu1 %v1756_v0 }
  0x32   :  { %559 = vmatpush2.bf16.msra.mxu0 %v1656_v15  ;;  %1639 = vmatpush2.bf16.msra.mxu1 %v1656_v15  ;;  %v1754_v15 = vld [vmem:[%s2215_s0 + $0xf0] ss:$8 sps:$4 sm:$0xff]  }
  0x33   :  { %560 = vmatprep.subr.bf16.mxu0 %v1756_v0  ;;  %1624 = vmatprep.subr.bf16.mxu1 %v1756_v0 }
  0x36   :  { %561 = vmatpush2.bf16.msra.mxu0 %v1657_v16  ;;  %1640 = vmatpush2.bf16.msra.mxu1 %v1657_v16  ;;  %v1755_v16 = vld [vmem:[%s2215_s0 + $0x1f0] ss:$8 sps:$4 sm:$0xff]  }
  0x37   :  { %562 = vmatprep.subr.bf16.mxu0 %v1756_v0  ;;  %1625 = vmatprep.subr.bf16.mxu1 %v1756_v0 }
  0x3a   :  { %563 = vmatpush2.bf16.msra.mxu0 %v1658_v17  ;;  %1641 = vmatpush2.bf16.msra.mxu1 %v1658_v17  ;;  %v2052_v17 = vld [vmem:[%s2216_s2] ss:$0 sm:$0xff] }
  0x3b   :  { %564 = vmatprep.subr.bf16.mxu0 %v1756_v0  ;;  %1626 = vmatprep.subr.bf16.mxu1 %v1756_v0  ;;  %v1731_v0 = vld [vmem:[%s2215_s0 + $0x1b0] ss:$8 sps:$4 sm:$0xff]  }
  0x3e   :  { %565 = vmatpush2.bf16.msra.mxu0 %v1659_v18  ;;  %1642 = vmatpush2.bf16.msra.mxu1 %v1659_v18 }
  0x41   :  { %567 = vmatmul.mubr.bf16.vlgmr.msra.gmra.mxu0 %v1660_v19  ;;  %695 = vmatmul.mubr.bf16.vlgmr.msra.gmra.mxu1 %v1663_v20 }
  0x42   :  { %574 = vmatprep.mubr.bf16.mxu0 %v1666_v21  ;;  %702 = vmatprep.mubr.bf16.mxu1 %v1668_v22 }
  0x49   :  { %575 = vmatmul.mubr.bf16.gmra.mxu0 %v1670_v23  ;;  %703 = vmatmul.mubr.bf16.gmra.mxu1 %v1671_v24 }
  0x4a   :  { %582 = vmatprep.mubr.bf16.mxu0 %v1672_v25  ;;  %710 = vmatprep.mubr.bf16.mxu1 %v1674_v26 }
  0x51   :  { %583 = vmatmul.mubr.bf16.gmra.mxu0 %v1676_v27  ;;  %711 = vmatmul.mubr.bf16.gmra.mxu1 %v1677_v28 }
  0x52   :  { %590 = vmatprep.mubr.bf16.mxu0 %v1678_v29  ;;  %718 = vmatprep.mubr.bf16.mxu1 %v1680_v30 }
  0x59   :  { %591 = vmatmul.mubr.bf16.gmra.mxu0 %v1682_v31  ;;  %719 = vmatmul.mubr.bf16.gmra.mxu1 %v1683_v32 }
  0x5a   :  { %598 = vmatprep.mubr.bf16.mxu0 %v1684_v33  ;;  %726 = vmatprep.mubr.bf16.mxu1 %v1686_v34 }
  0x61   :  { %599 = vmatmul.mubr.bf16.gmra.mxu0 %v1688_v35  ;;  %727 = vmatmul.mubr.bf16.gmra.mxu1 %v1689_v36 }
  0x62   :  { %606 = vmatprep.mubr.bf16.mxu0 %v1690_v37  ;;  %734 = vmatprep.mubr.bf16.mxu1 %v1692_v38 }
  0x69   :  { %607 = vmatmul.mubr.bf16.gmra.mxu0 %v1694_v39  ;;  %735 = vmatmul.mubr.bf16.gmra.mxu1 %v1695_v40 }
  0x6a   :  { %614 = vmatprep.mubr.bf16.mxu0 %v1696_v41  ;;  %742 = vmatprep.mubr.bf16.mxu1 %v1698_v42 }
  0x71   :  { %615 = vmatmul.mubr.bf16.gmra.mxu0 %v1700_v43  ;;  %743 = vmatmul.mubr.bf16.gmra.mxu1 %v1701_v44 }
  0x72   :  { %622 = vmatprep.mubr.bf16.mxu0 %v1702_v45  ;;  %750 = vmatprep.mubr.bf16.mxu1 %v1704_v46 }
  0x79   :  { %623 = vmatmul.mubr.bf16.gmra.mxu0 %v1706_v47  ;;  %751 = vmatmul.mubr.bf16.gmra.mxu1 %v1707_v48 }
  0x7a   :  { %630 = vmatprep.mubr.bf16.mxu0 %v1708_v49  ;;  %758 = vmatprep.mubr.bf16.mxu1 %v1710_v50 }
  0x81   :  { %631 = vmatmul.mubr.bf16.gmra.mxu0 %v1712_v51  ;;  %759 = vmatmul.mubr.bf16.gmra.mxu1 %v1713_v52 }
  0x82   :  { %638 = vmatprep.mubr.bf16.mxu0 %v1714_v53  ;;  %766 = vmatprep.mubr.bf16.mxu1 %v1716_v54 }
  0x89   :  { %639 = vmatmul.mubr.bf16.gmra.mxu0 %v1718_v55  ;;  %767 = vmatmul.mubr.bf16.gmra.mxu1 %v1719_v56 }
  0x8a   :  { %646 = vmatprep.mubr.bf16.mxu0 %v1720_v57  ;;  %774 = vmatprep.mubr.bf16.mxu1 %v1722_v58 }
  0x91   :  { %647 = vmatmul.mubr.bf16.gmra.mxu0 %v1724_v59  ;;  %775 = vmatmul.mubr.bf16.gmra.mxu1 %v1725_v60 }
  0x92   :  { %654 = vmatprep.mubr.bf16.mxu0 %v1726_v61  ;;  %782 = vmatprep.mubr.bf16.mxu1 %v1728_v62 }
  0x99   :  { %655 = vmatmul.mubr.bf16.gmra.mxu0 %v1730_v63  ;;  %783 = vmatmul.mubr.bf16.gmra.mxu1 %v1731_v0 }
  0x9a   :  { %662 = vmatprep.mubr.bf16.mxu0 %v1732_v1  ;;  %790 = vmatprep.mubr.bf16.mxu1 %v1734_v2 }
  0xa1   :  { %663 = vmatmul.mubr.bf16.gmra.mxu0 %v1736_v3  ;;  %791 = vmatmul.mubr.bf16.gmra.mxu1 %v1737_v4 }
  0xa2   :  { %670 = vmatprep.mubr.bf16.mxu0 %v1738_v5  ;;  %798 = vmatprep.mubr.bf16.mxu1 %v1740_v6 }
  0xa9   :  { %671 = vmatmul.mubr.bf16.gmra.mxu0 %v1742_v7  ;;  %799 = vmatmul.mubr.bf16.gmra.mxu1 %v1743_v8 }
  0xaa   :  { %678 = vmatprep.mubr.bf16.mxu0 %v1744_v9  ;;  %806 = vmatprep.mubr.bf16.mxu1 %v1746_v10 }
  0xb1   :  { %679 = vmatmul.mubr.bf16.gmra.mxu0 %v1748_v11  ;;  %807 = vmatmul.mubr.bf16.gmra.mxu1 %v1749_v12 }
  0xb2   :  { %686 = vmatprep.mubr.bf16.mxu0 %v1750_v13  ;;  %814 = vmatprep.mubr.bf16.mxu1 %v1752_v14 }
  0xb9   :  { %687 = vmatmul.mubr.bf16.gmra.mxu0 %v1754_v15  ;;  %815 = vmatmul.mubr.bf16.gmra.mxu1 %v1755_v16 }
 0x101   :  { %v568_v18 = vpop.f32.mrf.mxu0  ;;  %v696_v19 = vpop.f32.mrf.mxu1 }
 0x102   :  { %v569_v22 = vadd.f32 %v2052_v17, %v568_v18  ;;  %v697_v23 = vadd.f32 %v2052_v17, %v696_v19 }
 0x103   :  { %v570_v20 = vpop.f32.mrf.mxu0  ;;  %v698_v21 = vpop.f32.mrf.mxu1 }
 0x104   :  { %v823_v30 = vmax.f32 %v569_v22, 0.0  ;;  %v855_v31 = vmax.f32 %v697_v23, 0.0 }
 0x105   :  { %v571_v24 = vpop.f32.mrf.mxu0  ;;  %v699_v25 = vpop.f32.mrf.mxu1 }
 0x106   :  { %v572_v26 = vadd.f32 %v2052_v17, %v571_v24  ;;  %v700_v27 = vadd.f32 %v2052_v17, %v699_v25 }
 0x107   :  { %v573_v28 = vpop.f32.mrf.mxu0  ;;  %v701_v29 = vpop.f32.mrf.mxu1 }
 0x108   :  { %v824_v32 = vmax.f32 %v572_v26, 0.0  ;;  %v856_v33 = vmax.f32 %v700_v27, 0.0 }
 0x109   :  { %v576_v34 = vpop.f32.mrf.mxu0  ;;  %v704_v35 = vpop.f32.mrf.mxu1 }
 0x10a   :  { %v1423_v36 = vpack.c.bf16 %v824_v32, %v823_v30  ;;  %v1503_v37 = vpack.c.bf16 %v856_v33, %v855_v31  ;;  %v577_v40 = vadd.f32 %v2052_v17, %v576_v34  ;;  %v705_v41 = vadd.f32 %v2052_v17, %v704_v35 }
 0x10b   :  { %v578_v38 = vpop.f32.mrf.mxu0  ;;  %v706_v39 = vpop.f32.mrf.mxu1 }
 0x10c   :  { %1424 = vst [vmem:[%s2217_s3] sm:$0xff] %v1423_v36   ;;  %1595 = vst [vmem:[%s2217_s3 + $0x80] sm:$0xff] %v1503_v37   ;;  %v825_v48 = vmax.f32 %v577_v40, 0.0  ;;  %v857_v49 = vmax.f32 %v705_v41, 0.0 }
 0x10d   :  { %v579_v42 = vpop.f32.mrf.mxu0  ;;  %v707_v43 = vpop.f32.mrf.mxu1 }
 0x10e   :  { %v580_v44 = vadd.f32 %v2052_v17, %v579_v42  ;;  %v708_v45 = vadd.f32 %v2052_v17, %v707_v43 }
 0x10f   :  { %v581_v46 = vpop.f32.mrf.mxu0  ;;  %v709_v47 = vpop.f32.mrf.mxu1 }
 0x110   :  { %v826_v50 = vmax.f32 %v580_v44, 0.0  ;;  %v858_v51 = vmax.f32 %v708_v45, 0.0 }
 0x111   :  { %v584_v52 = vpop.f32.mrf.mxu0  ;;  %v712_v53 = vpop.f32.mrf.mxu1 }
 0x112   :  { %v1428_v54 = vpack.c.bf16 %v826_v50, %v825_v48  ;;  %v1508_v55 = vpack.c.bf16 %v858_v51, %v857_v49  ;;  %v585_v58 = vadd.f32 %v2052_v17, %v584_v52  ;;  %v713_v59 = vadd.f32 %v2052_v17, %v712_v53 }
 0x113   :  { %v586_v56 = vpop.f32.mrf.mxu0  ;;  %v714_v57 = vpop.f32.mrf.mxu1 }
 0x114   :  { %1580 = vst [vmem:[%s2217_s3 + $0x8] sm:$0xff] %v1428_v54   ;;  %1596 = vst [vmem:[%s2217_s3 + $0x88] sm:$0xff] %v1508_v55   ;;  %v827_v2 = vmax.f32 %v585_v58, 0.0  ;;  %v859_v3 = vmax.f32 %v713_v59, 0.0 }
 0x115   :  { %v587_v60 = vpop.f32.mrf.mxu0  ;;  %v715_v61 = vpop.f32.mrf.mxu1 }
 0x116   :  { %v588_v62 = vadd.f32 %v2052_v17, %v587_v60  ;;  %v716_v63 = vadd.f32 %v2052_v17, %v715_v61 }
 0x117   :  { %v589_v0 = vpop.f32.mrf.mxu0  ;;  %v717_v1 = vpop.f32.mrf.mxu1 }
 0x118   :  { %v828_v4 = vmax.f32 %v588_v62, 0.0  ;;  %v860_v5 = vmax.f32 %v716_v63, 0.0 }
 0x119   :  { %v592_v6 = vpop.f32.mrf.mxu0  ;;  %v720_v7 = vpop.f32.mrf.mxu1 }
 0x11a   :  { %v1433_v8 = vpack.c.bf16 %v828_v4, %v827_v2  ;;  %v1513_v9 = vpack.c.bf16 %v860_v5, %v859_v3  ;;  %v593_v12 = vadd.f32 %v2052_v17, %v592_v6  ;;  %v721_v13 = vadd.f32 %v2052_v17, %v720_v7 }
 0x11b   :  { %v594_v10 = vpop.f32.mrf.mxu0  ;;  %v722_v11 = vpop.f32.mrf.mxu1 }
 0x11c   :  { %1581 = vst [vmem:[%s2217_s3 + $0x10] sm:$0xff] %v1433_v8   ;;  %1597 = vst [vmem:[%s2217_s3 + $0x90] sm:$0xff] %v1513_v9   ;;  %v829_v21 = vmax.f32 %v593_v12, 0.0  ;;  %v861_v22 = vmax.f32 %v721_v13, 0.0 }
 0x11d   :  { %v595_v14 = vpop.f32.mrf.mxu0  ;;  %v723_v15 = vpop.f32.mrf.mxu1 }
 0x11e   :  { %v596_v16 = vadd.f32 %v2052_v17, %v595_v14  ;;  %v724_v18 = vadd.f32 %v2052_v17, %v723_v15 }
 0x11f   :  { %v597_v19 = vpop.f32.mrf.mxu0  ;;  %v725_v20 = vpop.f32.mrf.mxu1 }
 0x120   :  { %v830_v23 = vmax.f32 %v596_v16, 0.0  ;;  %v862_v24 = vmax.f32 %v724_v18, 0.0 }
 0x121   :  { %v600_v25 = vpop.f32.mrf.mxu0  ;;  %v728_v26 = vpop.f32.mrf.mxu1 }
 0x122   :  { %v1438_v27 = vpack.c.bf16 %v830_v23, %v829_v21  ;;  %v1518_v28 = vpack.c.bf16 %v862_v24, %v861_v22  ;;  %v601_v31 = vadd.f32 %v2052_v17, %v600_v25  ;;  %v729_v32 = vadd.f32 %v2052_v17, %v728_v26 }
 0x123   :  { %v602_v29 = vpop.f32.mrf.mxu0  ;;  %v730_v30 = vpop.f32.mrf.mxu1 }
 0x124   :  { %1582 = vst [vmem:[%s2217_s3 + $0x18] sm:$0xff] %v1438_v27   ;;  %1598 = vst [vmem:[%s2217_s3 + $0x98] sm:$0xff] %v1518_v28   ;;  %v831_v39 = vmax.f32 %v601_v31, 0.0  ;;  %v863_v40 = vmax.f32 %v729_v32, 0.0 }
 0x125   :  { %v603_v33 = vpop.f32.mrf.mxu0  ;;  %v731_v34 = vpop.f32.mrf.mxu1 }
 0x126   :  { %v604_v35 = vadd.f32 %v2052_v17, %v603_v33  ;;  %v732_v36 = vadd.f32 %v2052_v17, %v731_v34 }
 0x127   :  { %v605_v37 = vpop.f32.mrf.mxu0  ;;  %v733_v38 = vpop.f32.mrf.mxu1 }
 0x128   :  { %v832_v41 = vmax.f32 %v604_v35, 0.0  ;;  %v864_v42 = vmax.f32 %v732_v36, 0.0 }
 0x129   :  { %v608_v43 = vpop.f32.mrf.mxu0  ;;  %v736_v44 = vpop.f32.mrf.mxu1 }
 0x12a   :  { %v1443_v45 = vpack.c.bf16 %v832_v41, %v831_v39  ;;  %v1523_v46 = vpack.c.bf16 %v864_v42, %v863_v40  ;;  %v609_v49 = vadd.f32 %v2052_v17, %v608_v43  ;;  %v737_v50 = vadd.f32 %v2052_v17, %v736_v44 }
 0x12b   :  { %v610_v47 = vpop.f32.mrf.mxu0  ;;  %v738_v48 = vpop.f32.mrf.mxu1 }
 0x12c   :  { %1583 = vst [vmem:[%s2217_s3 + $0x20] sm:$0xff] %v1443_v45   ;;  %1599 = vst [vmem:[%s2217_s3 + $0xa0] sm:$0xff] %v1523_v46   ;;  %v833_v57 = vmax.f32 %v609_v49, 0.0  ;;  %v865_v58 = vmax.f32 %v737_v50, 0.0 }
 0x12d   :  { %v611_v51 = vpop.f32.mrf.mxu0  ;;  %v739_v52 = vpop.f32.mrf.mxu1 }
 0x12e   :  { %v612_v53 = vadd.f32 %v2052_v17, %v611_v51  ;;  %v740_v54 = vadd.f32 %v2052_v17, %v739_v52 }
 0x12f   :  { %v613_v55 = vpop.f32.mrf.mxu0  ;;  %v741_v56 = vpop.f32.mrf.mxu1 }
 0x130   :  { %v834_v59 = vmax.f32 %v612_v53, 0.0  ;;  %v866_v60 = vmax.f32 %v740_v54, 0.0 }
 0x131   :  { %v616_v61 = vpop.f32.mrf.mxu0  ;;  %v744_v62 = vpop.f32.mrf.mxu1 }
 0x132   :  { %v1448_v63 = vpack.c.bf16 %v834_v59, %v833_v57  ;;  %v1528_v0 = vpack.c.bf16 %v866_v60, %v865_v58  ;;  %v617_v3 = vadd.f32 %v2052_v17, %v616_v61  ;;  %v745_v4 = vadd.f32 %v2052_v17, %v744_v62 }
 0x133   :  { %v618_v1 = vpop.f32.mrf.mxu0  ;;  %v746_v2 = vpop.f32.mrf.mxu1 }
 0x134   :  { %1584 = vst [vmem:[%s2217_s3 + $0x28] sm:$0xff] %v1448_v63   ;;  %1600 = vst [vmem:[%s2217_s3 + $0xa8] sm:$0xff] %v1528_v0   ;;  %v835_v11 = vmax.f32 %v617_v3, 0.0  ;;  %v867_v12 = vmax.f32 %v745_v4, 0.0 }
 0x135   :  { %v619_v5 = vpop.f32.mrf.mxu0  ;;  %v747_v6 = vpop.f32.mrf.mxu1 }
 0x136   :  { %v620_v7 = vadd.f32 %v2052_v17, %v619_v5  ;;  %v748_v8 = vadd.f32 %v2052_v17, %v747_v6 }
 0x137   :  { %v621_v9 = vpop.f32.mrf.mxu0  ;;  %v749_v10 = vpop.f32.mrf.mxu1 }
 0x138   :  { %v836_v13 = vmax.f32 %v620_v7, 0.0  ;;  %v868_v14 = vmax.f32 %v748_v8, 0.0 }
 0x139   :  { %v624_v15 = vpop.f32.mrf.mxu0  ;;  %v752_v16 = vpop.f32.mrf.mxu1 }
 0x13a   :  { %v1453_v18 = vpack.c.bf16 %v836_v13, %v835_v11  ;;  %v1533_v19 = vpack.c.bf16 %v868_v14, %v867_v12  ;;  %v625_v22 = vadd.f32 %v2052_v17, %v624_v15  ;;  %v753_v23 = vadd.f32 %v2052_v17, %v752_v16 }
 0x13b   :  { %v626_v20 = vpop.f32.mrf.mxu0  ;;  %v754_v21 = vpop.f32.mrf.mxu1 }
 0x13c   :  { %1585 = vst [vmem:[%s2217_s3 + $0x30] sm:$0xff] %v1453_v18   ;;  %1601 = vst [vmem:[%s2217_s3 + $0xb0] sm:$0xff] %v1533_v19   ;;  %v837_v30 = vmax.f32 %v625_v22, 0.0  ;;  %v869_v31 = vmax.f32 %v753_v23, 0.0 }
 0x13d   :  { %v627_v24 = vpop.f32.mrf.mxu0  ;;  %v755_v25 = vpop.f32.mrf.mxu1 }
 0x13e   :  { %v628_v26 = vadd.f32 %v2052_v17, %v627_v24  ;;  %v756_v27 = vadd.f32 %v2052_v17, %v755_v25 }
 0x13f   :  { %v629_v28 = vpop.f32.mrf.mxu0  ;;  %v757_v29 = vpop.f32.mrf.mxu1 }
 0x140   :  { %v838_v32 = vmax.f32 %v628_v26, 0.0  ;;  %v870_v33 = vmax.f32 %v756_v27, 0.0 }
 0x141   :  { %v632_v34 = vpop.f32.mrf.mxu0  ;;  %v760_v35 = vpop.f32.mrf.mxu1 }
 0x142   :  { %v1458_v36 = vpack.c.bf16 %v838_v32, %v837_v30  ;;  %v1538_v37 = vpack.c.bf16 %v870_v33, %v869_v31  ;;  %v633_v40 = vadd.f32 %v2052_v17, %v632_v34  ;;  %v761_v41 = vadd.f32 %v2052_v17, %v760_v35 }
 0x143   :  { %v634_v38 = vpop.f32.mrf.mxu0  ;;  %v762_v39 = vpop.f32.mrf.mxu1 }
 0x144   :  { %1586 = vst [vmem:[%s2217_s3 + $0x38] sm:$0xff] %v1458_v36   ;;  %1602 = vst [vmem:[%s2217_s3 + $0xb8] sm:$0xff] %v1538_v37   ;;  %v839_v48 = vmax.f32 %v633_v40, 0.0  ;;  %v871_v49 = vmax.f32 %v761_v41, 0.0 }
 0x145   :  { %v635_v42 = vpop.f32.mrf.mxu0  ;;  %v763_v43 = vpop.f32.mrf.mxu1 }
 0x146   :  { %v636_v44 = vadd.f32 %v2052_v17, %v635_v42  ;;  %v764_v45 = vadd.f32 %v2052_v17, %v763_v43 }
 0x147   :  { %v637_v46 = vpop.f32.mrf.mxu0  ;;  %v765_v47 = vpop.f32.mrf.mxu1 }
 0x148   :  { %v840_v50 = vmax.f32 %v636_v44, 0.0  ;;  %v872_v51 = vmax.f32 %v764_v45, 0.0 }
 0x149   :  { %v640_v52 = vpop.f32.mrf.mxu0  ;;  %v768_v53 = vpop.f32.mrf.mxu1 }
 0x14a   :  { %v1463_v54 = vpack.c.bf16 %v840_v50, %v839_v48  ;;  %v1543_v55 = vpack.c.bf16 %v872_v51, %v871_v49  ;;  %v641_v58 = vadd.f32 %v2052_v17, %v640_v52  ;;  %v769_v59 = vadd.f32 %v2052_v17, %v768_v53 }
 0x14b   :  { %v642_v56 = vpop.f32.mrf.mxu0  ;;  %v770_v57 = vpop.f32.mrf.mxu1 }
 0x14c   :  { %1587 = vst [vmem:[%s2217_s3 + $0x40] sm:$0xff] %v1463_v54   ;;  %1603 = vst [vmem:[%s2217_s3 + $0xc0] sm:$0xff] %v1543_v55   ;;  %v841_v2 = vmax.f32 %v641_v58, 0.0  ;;  %v873_v3 = vmax.f32 %v769_v59, 0.0 }
 0x14d   :  { %v643_v60 = vpop.f32.mrf.mxu0  ;;  %v771_v61 = vpop.f32.mrf.mxu1 }
 0x14e   :  { %v644_v62 = vadd.f32 %v2052_v17, %v643_v60  ;;  %v772_v63 = vadd.f32 %v2052_v17, %v771_v61 }
 0x14f   :  { %v645_v0 = vpop.f32.mrf.mxu0  ;;  %v773_v1 = vpop.f32.mrf.mxu1 }
 0x150   :  { %v842_v4 = vmax.f32 %v644_v62, 0.0  ;;  %v874_v5 = vmax.f32 %v772_v63, 0.0 }
 0x151   :  { %v648_v6 = vpop.f32.mrf.mxu0  ;;  %v776_v7 = vpop.f32.mrf.mxu1 }
 0x152   :  { %v1468_v8 = vpack.c.bf16 %v842_v4, %v841_v2  ;;  %v1548_v9 = vpack.c.bf16 %v874_v5, %v873_v3  ;;  %v649_v12 = vadd.f32 %v2052_v17, %v648_v6  ;;  %v777_v13 = vadd.f32 %v2052_v17, %v776_v7 }
 0x153   :  { %v650_v10 = vpop.f32.mrf.mxu0  ;;  %v778_v11 = vpop.f32.mrf.mxu1 }
 0x154   :  { %1588 = vst [vmem:[%s2217_s3 + $0x48] sm:$0xff] %v1468_v8   ;;  %1604 = vst [vmem:[%s2217_s3 + $0xc8] sm:$0xff] %v1548_v9   ;;  %v843_v21 = vmax.f32 %v649_v12, 0.0  ;;  %v875_v22 = vmax.f32 %v777_v13, 0.0 }
 0x155   :  { %v651_v14 = vpop.f32.mrf.mxu0  ;;  %v779_v15 = vpop.f32.mrf.mxu1 }
 0x156   :  { %v652_v16 = vadd.f32 %v2052_v17, %v651_v14  ;;  %v780_v18 = vadd.f32 %v2052_v17, %v779_v15 }
 0x157   :  { %v653_v19 = vpop.f32.mrf.mxu0  ;;  %v781_v20 = vpop.f32.mrf.mxu1 }
 0x158   :  { %v844_v23 = vmax.f32 %v652_v16, 0.0  ;;  %v876_v24 = vmax.f32 %v780_v18, 0.0 }
 0x159   :  { %v656_v25 = vpop.f32.mrf.mxu0  ;;  %v784_v26 = vpop.f32.mrf.mxu1 }
 0x15a   :  { %v1473_v27 = vpack.c.bf16 %v844_v23, %v843_v21  ;;  %v1553_v28 = vpack.c.bf16 %v876_v24, %v875_v22  ;;  %v657_v31 = vadd.f32 %v2052_v17, %v656_v25  ;;  %v785_v32 = vadd.f32 %v2052_v17, %v784_v26 }
 0x15b   :  { %v658_v29 = vpop.f32.mrf.mxu0  ;;  %v786_v30 = vpop.f32.mrf.mxu1 }
 0x15c   :  { %1589 = vst [vmem:[%s2217_s3 + $0x50] sm:$0xff] %v1473_v27   ;;  %1605 = vst [vmem:[%s2217_s3 + $0xd0] sm:$0xff] %v1553_v28   ;;  %v845_v39 = vmax.f32 %v657_v31, 0.0  ;;  %v877_v40 = vmax.f32 %v785_v32, 0.0 }
 0x15d   :  { %v659_v33 = vpop.f32.mrf.mxu0  ;;  %v787_v34 = vpop.f32.mrf.mxu1 }
 0x15e   :  { %v660_v35 = vadd.f32 %v2052_v17, %v659_v33  ;;  %v788_v36 = vadd.f32 %v2052_v17, %v787_v34 }
 0x15f   :  { %v661_v37 = vpop.f32.mrf.mxu0  ;;  %v789_v38 = vpop.f32.mrf.mxu1 }
 0x160   :  { %v846_v41 = vmax.f32 %v660_v35, 0.0  ;;  %v878_v42 = vmax.f32 %v788_v36, 0.0 }
 0x161   :  { %v664_v43 = vpop.f32.mrf.mxu0  ;;  %v792_v44 = vpop.f32.mrf.mxu1 }
 0x162   :  { %v1478_v45 = vpack.c.bf16 %v846_v41, %v845_v39  ;;  %v1558_v46 = vpack.c.bf16 %v878_v42, %v877_v40  ;;  %v665_v49 = vadd.f32 %v2052_v17, %v664_v43  ;;  %v793_v50 = vadd.f32 %v2052_v17, %v792_v44 }
 0x163   :  { %v666_v47 = vpop.f32.mrf.mxu0  ;;  %v794_v48 = vpop.f32.mrf.mxu1 }
 0x164   :  { %1590 = vst [vmem:[%s2217_s3 + $0x58] sm:$0xff] %v1478_v45   ;;  %1606 = vst [vmem:[%s2217_s3 + $0xd8] sm:$0xff] %v1558_v46   ;;  %v847_v57 = vmax.f32 %v665_v49, 0.0  ;;  %v879_v58 = vmax.f32 %v793_v50, 0.0 }
 0x165   :  { %v667_v51 = vpop.f32.mrf.mxu0  ;;  %v795_v52 = vpop.f32.mrf.mxu1 }
 0x166   :  { %v668_v53 = vadd.f32 %v2052_v17, %v667_v51  ;;  %v796_v54 = vadd.f32 %v2052_v17, %v795_v52 }
 0x167   :  { %v669_v55 = vpop.f32.mrf.mxu0  ;;  %v797_v56 = vpop.f32.mrf.mxu1 }
 0x168   :  { %v848_v59 = vmax.f32 %v668_v53, 0.0  ;;  %v880_v60 = vmax.f32 %v796_v54, 0.0 }
 0x169   :  { %v672_v61 = vpop.f32.mrf.mxu0  ;;  %v800_v62 = vpop.f32.mrf.mxu1 }
 0x16a   :  { %v1483_v63 = vpack.c.bf16 %v848_v59, %v847_v57  ;;  %v1563_v0 = vpack.c.bf16 %v880_v60, %v879_v58  ;;  %v673_v3 = vadd.f32 %v2052_v17, %v672_v61  ;;  %v801_v4 = vadd.f32 %v2052_v17, %v800_v62 }
 0x16b   :  { %v674_v1 = vpop.f32.mrf.mxu0  ;;  %v802_v2 = vpop.f32.mrf.mxu1 }
 0x16c   :  { %1591 = vst [vmem:[%s2217_s3 + $0x60] sm:$0xff] %v1483_v63   ;;  %1607 = vst [vmem:[%s2217_s3 + $0xe0] sm:$0xff] %v1563_v0   ;;  %v849_v11 = vmax.f32 %v673_v3, 0.0  ;;  %v881_v12 = vmax.f32 %v801_v4, 0.0 }
 0x16d   :  { %v675_v5 = vpop.f32.mrf.mxu0  ;;  %v803_v6 = vpop.f32.mrf.mxu1 }
 0x16e   :  { %v676_v7 = vadd.f32 %v2052_v17, %v675_v5  ;;  %v804_v8 = vadd.f32 %v2052_v17, %v803_v6 }
 0x16f   :  { %v677_v9 = vpop.f32.mrf.mxu0  ;;  %v805_v10 = vpop.f32.mrf.mxu1 }
 0x170   :  { %v850_v13 = vmax.f32 %v676_v7, 0.0  ;;  %v882_v14 = vmax.f32 %v804_v8, 0.0 }
 0x171   :  { %v680_v15 = vpop.f32.mrf.mxu0  ;;  %v808_v16 = vpop.f32.mrf.mxu1 }
 0x172   :  { %v1488_v18 = vpack.c.bf16 %v850_v13, %v849_v11  ;;  %v1568_v19 = vpack.c.bf16 %v882_v14, %v881_v12  ;;  %v681_v22 = vadd.f32 %v2052_v17, %v680_v15  ;;  %v809_v23 = vadd.f32 %v2052_v17, %v808_v16 }
 0x173   :  { %v682_v20 = vpop.f32.mrf.mxu0  ;;  %v810_v21 = vpop.f32.mrf.mxu1 }
 0x174   :  { %1592 = vst [vmem:[%s2217_s3 + $0x68] sm:$0xff] %v1488_v18   ;;  %1608 = vst [vmem:[%s2217_s3 + $0xe8] sm:$0xff] %v1568_v19   ;;  %v851_v30 = vmax.f32 %v681_v22, 0.0  ;;  %v883_v31 = vmax.f32 %v809_v23, 0.0 }
 0x175   :  { %v683_v24 = vpop.f32.mrf.mxu0  ;;  %v811_v25 = vpop.f32.mrf.mxu1 }
 0x176   :  { %v684_v26 = vadd.f32 %v2052_v17, %v683_v24  ;;  %v812_v27 = vadd.f32 %v2052_v17, %v811_v25 }
 0x177   :  { %v685_v28 = vpop.f32.mrf.mxu0  ;;  %v813_v29 = vpop.f32.mrf.mxu1 }
 0x178   :  { %v852_v32 = vmax.f32 %v684_v26, 0.0  ;;  %v884_v33 = vmax.f32 %v812_v27, 0.0 }
 0x179   :  { %v688_v34 = vpop.f32.mrf.mxu0  ;;  %v816_v35 = vpop.f32.mrf.mxu1 }
 0x17a   :  { %v1493_v36 = vpack.c.bf16 %v852_v32, %v851_v30  ;;  %v1573_v37 = vpack.c.bf16 %v884_v33, %v883_v31  ;;  %v689_v40 = vadd.f32 %v2052_v17, %v688_v34  ;;  %v817_v41 = vadd.f32 %v2052_v17, %v816_v35 }
 0x17b   :  { %v690_v38 = vpop.f32.mrf.mxu0  ;;  %v818_v39 = vpop.f32.mrf.mxu1 }
 0x17c   :  { %1593 = vst [vmem:[%s2217_s3 + $0x70] sm:$0xff] %v1493_v36   ;;  %1609 = vst [vmem:[%s2217_s3 + $0xf0] sm:$0xff] %v1573_v37   ;;  %v853_v48 = vmax.f32 %v689_v40, 0.0  ;;  %v885_v49 = vmax.f32 %v817_v41, 0.0 }
 0x17d   :  { %v691_v42 = vpop.f32.mrf.mxu0  ;;  %v819_v43 = vpop.f32.mrf.mxu1 }
 0x17e   :  { %v692_v44 = vadd.f32 %v2052_v17, %v691_v42  ;;  %v820_v45 = vadd.f32 %v2052_v17, %v819_v43 }
 0x17f   :  { %v693_v46 = vpop.f32.mrf.mxu0  ;;  %v821_v47 = vpop.f32.mrf.mxu1 }
 0x180   :  { %v854_v50 = vmax.f32 %v692_v44, 0.0  ;;  %v886_v51 = vmax.f32 %v820_v45, 0.0 }
 0x182   :  { %v1498_v52 = vpack.c.bf16 %v854_v50, %v853_v48  ;;  %v1578_v53 = vpack.c.bf16 %v886_v51, %v885_v49 }
 0x184   :  { %1594 = vst [vmem:[%s2217_s3 + $0x78] sm:$0xff] %v1498_v52   ;;  %1610 = vst [vmem:[%s2217_s3 + $0xf8] sm:$0xff] %v1578_v53  }

// kernel: resnet_arcface_forward.22
= control target key start
LH: loop header
LB: loop body
LE: loop exit
PB: predicated region body
PF: predicated region fallthrough
CT: control target
= control target key end

     0   :  { %s1796_s1 = inlined_call_operand.vmem [shape: bf16[640,128], index: 1, kind: input, shape index: {}]   ;;  %s1797_s0 = inlined_call_operand.vmem [shape: bf16[128,640], index: 0, kind: input, shape index: {}]   ;;  %s1798_s2 = inlined_call_operand.vmem [shape: f32[1,128], index: 2, kind: input, shape index: {}]   ;;  %s1799_s3 = inlined_call_operand.vmem [shape: bf16[128,128], index: 3, kind: output, shape index: {}]  }
   0x1   :  { %v1341_v0 = vld [vmem:[%s1796_s1 + $0x78] sm:$0xff]   ;;  %v1345_v4 = vld [vmem:[%s1796_s1 + $0x70] sm:$0xff]   ;;  %v1349_v8 = vld [vmem:[%s1796_s1 + $0x68] sm:$0xff]  }
   0x2   :  { %v1342_v1 = vld [vmem:[%s1796_s1 + $0xf8] sm:$0xff]   ;;  %1149 = vmatprep.subr.bf16.mxu0 %v1341_v0  ;;  %v1346_v5 = vld [vmem:[%s1796_s1 + $0xf0] sm:$0xff]   ;;  %v1350_v9 = vld [vmem:[%s1796_s1 + $0xe8] sm:$0xff]  }
   0x3   :  { %v1343_v2 = vld [vmem:[%s1796_s1 + $0x38] sm:$0xff]   ;;  %1213 = vmatprep.subr.bf16.mxu1 %v1342_v1  ;;  %v1347_v6 = vld [vmem:[%s1796_s1 + $0x30] sm:$0xff]   ;;  %v1351_v10 = vld [vmem:[%s1796_s1 + $0x28] sm:$0xff]  }
   0x4   :  { %v1344_v3 = vld [vmem:[%s1796_s1 + $0xb8] sm:$0xff]   ;;  %1150 = vmatpush3.bf16.msra.mxu0 %v1343_v2  ;;  %v1348_v7 = vld [vmem:[%s1796_s1 + $0xb0] sm:$0xff]   ;;  %v1352_v11 = vld [vmem:[%s1796_s1 + $0xa8] sm:$0xff]  }
   0x5   :  { %1214 = vmatpush3.bf16.msra.mxu1 %v1344_v3  ;;  %1151 = vmatprep.subr.bf16.mxu0 %v1345_v4  ;;  %v1353_v12 = vld [vmem:[%s1796_s1 + $0x60] sm:$0xff]   ;;  %v1357_v16 = vld [vmem:[%s1796_s1 + $0x58] sm:$0xff]   ;;  %v1361_v20 = vld [vmem:[%s1796_s1 + $0x50] sm:$0xff]  }
   0x6   :  { %1215 = vmatprep.subr.bf16.mxu1 %v1346_v5  ;;  %v1354_v13 = vld [vmem:[%s1796_s1 + $0xe0] sm:$0xff]   ;;  %v1358_v17 = vld [vmem:[%s1796_s1 + $0xd8] sm:$0xff]   ;;  %v1362_v21 = vld [vmem:[%s1796_s1 + $0xd0] sm:$0xff]  }
   0x7   :  { %v1355_v14 = vld [vmem:[%s1796_s1 + $0x20] sm:$0xff]   ;;  %v1359_v18 = vld [vmem:[%s1796_s1 + $0x18] sm:$0xff]   ;;  %v1363_v22 = vld [vmem:[%s1796_s1 + $0x10] sm:$0xff]  }
   0x8   :  { %1152 = vmatpush3.bf16.msra.mxu0 %v1347_v6  ;;  %v1356_v15 = vld [vmem:[%s1796_s1 + $0xa0] sm:$0xff]   ;;  %v1360_v19 = vld [vmem:[%s1796_s1 + $0x98] sm:$0xff]   ;;  %v1364_v23 = vld [vmem:[%s1796_s1 + $0x90] sm:$0xff]  }
   0x9   :  { %1216 = vmatpush3.bf16.msra.mxu1 %v1348_v7  ;;  %1153 = vmatprep.subr.bf16.mxu0 %v1349_v8  ;;  %v1365_v24 = vld [vmem:[%s1796_s1 + $0x48] sm:$0xff]   ;;  %v1369_v28 = vld [vmem:[%s1796_s1 + $0x40] sm:$0xff]   ;;  %v1379_v36 = vld [vmem:[%s1796_s1 + $0x138] sm:$0xff]  }
   0xa   :  { %1217 = vmatprep.subr.bf16.mxu1 %v1350_v9  ;;  %v1366_v25 = vld [vmem:[%s1796_s1 + $0xc8] sm:$0xff]   ;;  %v1370_v29 = vld [vmem:[%s1796_s1 + $0xc0] sm:$0xff]   ;;  %v1386_v39 = vld [vmem:[%s1796_s1 + $0x130] sm:$0xff]  }
   0xb   :  { %v1367_v26 = vld [vmem:[%s1796_s1 + $0x8] sm:$0xff]   ;;  %v1371_v30 = vld [vmem:[%s1796_s1] sm:$0xff]   ;;  %v1389_v43 = vld [vmem:[%s1797_s0 + $0x5c] ss:$20 sps:$4 sm:$0xff]  }
   0xc   :  { %1154 = vmatpush3.bf16.msra.mxu0 %v1351_v10  ;;  %v1368_v27 = vld [vmem:[%s1796_s1 + $0x88] sm:$0xff]   ;;  %v1372_v31 = vld [vmem:[%s1796_s1 + $0x80] sm:$0xff]   ;;  %v1394_v48 = vld [vmem:[%s1797_s0 + $0x7c] ss:$20 sps:$4 sm:$0xff]  }
   0xd   :  { %1218 = vmatpush3.bf16.msra.mxu1 %v1352_v11  ;;  %1155 = vmatprep.subr.bf16.mxu0 %v1353_v12  ;;  %v1373_v32 = vld [vmem:[%s1797_s0] ss:$20 sps:$4 sm:$0xff]   ;;  %v1375_v33 = vld [vmem:[%s1797_s0 + $0x4] ss:$20 sps:$4 sm:$0xff]   ;;  %v1376_v34 = vld [vmem:[%s1797_s0 + $0x8] ss:$20 sps:$4 sm:$0xff]  }
   0xe   :  { %1219 = vmatprep.subr.bf16.mxu1 %v1354_v13  ;;  %v1378_v35 = vld [vmem:[%s1797_s0 + $0xc] ss:$20 sps:$4 sm:$0xff]   ;;  %630 = vmatprep.mubr.bf16.mxu0 %v1375_v33  ;;  %v1382_v38 = vld [vmem:[%s1797_s0 + $0x34] ss:$20 sps:$4 sm:$0xff]   ;;  %v1385_v41 = vld [vmem:[%s1797_s0 + $0x30] ss:$20 sps:$4 sm:$0xff]  }
   0xf   :  { %727 = vmatprep.mubr.bf16.mxu1 %v1378_v35  ;;  %v1380_v37 = vld [vmem:[%s1797_s0 + $0x2c] ss:$20 sps:$4 sm:$0xff]   ;;  %v1384_v40 = vld [vmem:[%s1797_s0 + $0x28] ss:$20 sps:$4 sm:$0xff]   ;;  %v1391_v46 = vld [vmem:[%s1797_s0 + $0x50] ss:$20 sps:$4 sm:$0xff]  }
  0x10   :  { %1156 = vmatpush3.bf16.msra.mxu0 %v1355_v14  ;;  %v1387_v42 = vld [vmem:[%s1797_s0 + $0x54] ss:$20 sps:$4 sm:$0xff]   ;;  %v1400_v45 = vld [vmem:[%s1796_s1 + $0x120] sm:$0xff]   ;;  %v1392_v47 = vld [vmem:[%s1797_s0 + $0x58] ss:$20 sps:$4 sm:$0xff]  }
  0x11   :  { %1220 = vmatpush3.bf16.msra.mxu1 %v1356_v15  ;;  %1157 = vmatprep.subr.bf16.mxu0 %v1357_v16  ;;  %v1393_v44 = vld [vmem:[%s1796_s1 + $0x128] sm:$0xff]   ;;  %v1396_v49 = vld [vmem:[%s1797_s0 + $0x84] ss:$20 sps:$4 sm:$0xff]   ;;  %v1414_v51 = vld [vmem:[%s1796_s1 + $0x110] sm:$0xff]  }
  0x12   :  { %1221 = vmatprep.subr.bf16.mxu1 %v1358_v17  ;;  %v1407_v50 = vld [vmem:[%s1796_s1 + $0x118] sm:$0xff]   ;;  %v1399_v53 = vld [vmem:[%s1797_s0 + $0x80] ss:$20 sps:$4 sm:$0xff]   ;;  %v1421_v55 = vld [vmem:[%s1796_s1 + $0x108] sm:$0xff]  }
  0x13   :  { %v1398_v52 = vld [vmem:[%s1797_s0 + $0x78] ss:$20 sps:$4 sm:$0xff]   ;;  %v1428_v57 = vld [vmem:[%s1796_s1 + $0x100] sm:$0xff]   ;;  %v1406_v59 = vld [vmem:[%s1797_s0 + $0xa8] ss:$20 sps:$4 sm:$0xff]  }
  0x14   :  { %1158 = vmatpush3.bf16.msra.mxu0 %v1359_v18  ;;  %v1401_v54 = vld [vmem:[%s1797_s0 + $0xa4] ss:$20 sps:$4 sm:$0xff]   ;;  %v1403_v56 = vld [vmem:[%s1797_s0 + $0xac] ss:$20 sps:$4 sm:$0xff]   ;;  %v1410_v61 = vld [vmem:[%s1797_s0 + $0xd4] ss:$20 sps:$4 sm:$0xff]  }
  0x15   :  { %1222 = vmatpush3.bf16.msra.mxu1 %v1360_v19  ;;  %1159 = vmatprep.subr.bf16.mxu0 %v1361_v20  ;;  %v1405_v58 = vld [vmem:[%s1797_s0 + $0xa0] ss:$20 sps:$4 sm:$0xff]   ;;  %v1412_v62 = vld [vmem:[%s1797_s0 + $0xc8] ss:$20 sps:$4 sm:$0xff]   ;;  %v1413_v63 = vld [vmem:[%s1797_s0 + $0xd0] ss:$20 sps:$4 sm:$0xff]  }
  0x16   :  { %1223 = vmatprep.subr.bf16.mxu1 %v1362_v21  ;;  %v1408_v60 = vld [vmem:[%s1797_s0 + $0xcc] ss:$20 sps:$4 sm:$0xff]   ;;  %v1415_v0 = vld [vmem:[%s1797_s0 + $0xf4] ss:$20 sps:$4 sm:$0xff]   ;;  %v1417_v1 = vld [vmem:[%s1797_s0 + $0xfc] ss:$20 sps:$4 sm:$0xff]  }
  0x17   :  { %v1419_v2 = vld [vmem:[%s1797_s0 + $0xf0] ss:$20 sps:$4 sm:$0xff]   ;;  %v1420_v3 = vld [vmem:[%s1797_s0 + $0xf8] ss:$20 sps:$4 sm:$0xff]   ;;  %v1427_v7 = vld [vmem:[%s1797_s0 + $0x120] ss:$20 sps:$4 sm:$0xff]  }
  0x18   :  { %1160 = vmatpush3.bf16.msra.mxu0 %v1363_v22  ;;  %v1422_v4 = vld [vmem:[%s1797_s0 + $0x11c] ss:$20 sps:$4 sm:$0xff]   ;;  %v1424_v5 = vld [vmem:[%s1797_s0 + $0x124] ss:$20 sps:$4 sm:$0xff]   ;;  %v1433_v12 = vld [vmem:[%s1797_s0 + $0x60] ss:$20 sps:$4 sm:$0xff]  }
  0x19   :  { %1224 = vmatpush3.bf16.msra.mxu1 %v1364_v23  ;;  %1161 = vmatprep.subr.bf16.mxu0 %v1365_v24  ;;  %v1426_v6 = vld [vmem:[%s1797_s0 + $0x118] ss:$20 sps:$4 sm:$0xff]   ;;  %v1429_v8 = vld [vmem:[%s1797_s0 + $0x10] ss:$20 sps:$4 sm:$0xff]   ;;  %v1434_v13 = vld [vmem:[%s1797_s0 + $0x100] ss:$20 sps:$4 sm:$0xff]  }
  0x1a   :  { %1225 = vmatprep.subr.bf16.mxu1 %v1366_v25  ;;  %v1430_v9 = vld [vmem:[%s1797_s0 + $0xb0] ss:$20 sps:$4 sm:$0xff]   ;;  %v1431_v10 = vld [vmem:[%s1797_s0 + $0x38] ss:$20 sps:$4 sm:$0xff]   ;;  %v1435_v14 = vld [vmem:[%s1797_s0 + $0x88] ss:$20 sps:$4 sm:$0xff]  }
  0x1b   :  { %v1432_v11 = vld [vmem:[%s1797_s0 + $0xd8] ss:$20 sps:$4 sm:$0xff]   ;;  %v1436_v15 = vld [vmem:[%s1797_s0 + $0x128] ss:$20 sps:$4 sm:$0xff]   ;;  %v1700_v18 = vld [vmem:[%s1798_s2] ss:$0 sm:$0xff] }
  0x1c   :  { %1162 = vmatpush3.bf16.msra.mxu0 %v1367_v26 }
  0x1d   :  { %1226 = vmatpush3.bf16.msra.mxu1 %v1368_v27  ;;  %1163 = vmatprep.subr.bf16.mxu0 %v1369_v28 }
  0x1e   :  { %1227 = vmatprep.subr.bf16.mxu1 %v1370_v29 }
  0x20   :  { %1164 = vmatpush3.bf16.msra.mxu0 %v1371_v30 }
  0x21   :  { %1228 = vmatpush3.bf16.msra.mxu1 %v1372_v31  ;;  %1293 = vmatprep.subr.bf16.mxu0 %v1379_v36 }
  0x22   :  { %1325 = vmatprep.subr.bf16.mxu1 %v1379_v36 }
  0x23   :  { %631 = vmatmul.mubr.bf16.vlgmr.msra.gmra.mxu0 %v1373_v32 }
  0x24   :  { %728 = vmatmul.mubr.bf16.vlgmr.msra.gmra.mxu1 %v1376_v34  ;;  %1294 = vmatpush3.bf16.msra.mxu0 %v1379_v36 }
  0x25   :  { %1333 = vmatpush3.bf16.msra.mxu1 %v1379_v36  ;;  %638 = vmatprep.mubr.bf16.mxu0 %v1380_v37 }
  0x26   :  { %735 = vmatprep.mubr.bf16.mxu1 %v1382_v38  ;;  %1295 = vmatprep.subr.bf16.mxu0 %v1386_v39 }
  0x27   :  { %1326 = vmatprep.subr.bf16.mxu1 %v1386_v39 }
  0x28   :  { %1296 = vmatpush3.bf16.msra.mxu0 %v1386_v39 }
  0x29   :  { %1334 = vmatpush3.bf16.msra.mxu1 %v1386_v39  ;;  %1297 = vmatprep.subr.bf16.mxu0 %v1393_v44 }
  0x2a   :  { %1327 = vmatprep.subr.bf16.mxu1 %v1393_v44 }
  0x2b   :  { %639 = vmatmul.mubr.bf16.gmra.mxu0 %v1384_v40 }
  0x2c   :  { %736 = vmatmul.mubr.bf16.gmra.mxu1 %v1385_v41  ;;  %646 = vmatprep.mubr.bf16.mxu0 %v1387_v42 }
  0x2d   :  { %743 = vmatprep.mubr.bf16.mxu1 %v1389_v43  ;;  %1298 = vmatpush3.bf16.msra.mxu0 %v1393_v44 }
  0x2e   :  { %1335 = vmatpush3.bf16.msra.mxu1 %v1393_v44  ;;  %1299 = vmatprep.subr.bf16.mxu0 %v1400_v45 }
  0x2f   :  { %1328 = vmatprep.subr.bf16.mxu1 %v1400_v45 }
  0x31   :  { %1300 = vmatpush3.bf16.msra.mxu0 %v1400_v45 }
  0x32   :  { %1336 = vmatpush3.bf16.msra.mxu1 %v1400_v45  ;;  %1301 = vmatprep.subr.bf16.mxu0 %v1407_v50 }
  0x33   :  { %647 = vmatmul.mubr.bf16.gmra.mxu0 %v1391_v46  ;;  %1329 = vmatprep.subr.bf16.mxu1 %v1407_v50 }
  0x34   :  { %744 = vmatmul.mubr.bf16.gmra.mxu1 %v1392_v47  ;;  %654 = vmatprep.mubr.bf16.mxu0 %v1394_v48 }
  0x35   :  { %751 = vmatprep.mubr.bf16.mxu1 %v1396_v49  ;;  %1302 = vmatpush3.bf16.msra.mxu0 %v1407_v50 }
  0x36   :  { %1337 = vmatpush3.bf16.msra.mxu1 %v1407_v50  ;;  %1303 = vmatprep.subr.bf16.mxu0 %v1414_v51 }
  0x37   :  { %1330 = vmatprep.subr.bf16.mxu1 %v1414_v51 }
  0x39   :  { %1304 = vmatpush3.bf16.msra.mxu0 %v1414_v51 }
  0x3a   :  { %1338 = vmatpush3.bf16.msra.mxu1 %v1414_v51  ;;  %1305 = vmatprep.subr.bf16.mxu0 %v1421_v55 }
  0x3b   :  { %655 = vmatmul.mubr.bf16.gmra.mxu0 %v1398_v52  ;;  %1331 = vmatprep.subr.bf16.mxu1 %v1421_v55 }
  0x3c   :  { %752 = vmatmul.mubr.bf16.gmra.mxu1 %v1399_v53  ;;  %662 = vmatprep.mubr.bf16.mxu0 %v1401_v54 }
  0x3d   :  { %759 = vmatprep.mubr.bf16.mxu1 %v1403_v56  ;;  %1306 = vmatpush3.bf16.msra.mxu0 %v1421_v55 }
  0x3e   :  { %1339 = vmatpush3.bf16.msra.mxu1 %v1421_v55  ;;  %1307 = vmatprep.subr.bf16.mxu0 %v1428_v57 }
  0x3f   :  { %1332 = vmatprep.subr.bf16.mxu1 %v1428_v57 }
  0x41   :  { %1308 = vmatpush3.bf16.msra.mxu0 %v1428_v57 }
  0x42   :  { %1340 = vmatpush3.bf16.msra.mxu1 %v1428_v57 }
  0x43   :  { %663 = vmatmul.mubr.bf16.gmra.mxu0 %v1405_v58 }
  0x44   :  { %760 = vmatmul.mubr.bf16.gmra.mxu1 %v1406_v59  ;;  %670 = vmatprep.mubr.bf16.mxu0 %v1408_v60 }
  0x45   :  { %767 = vmatprep.mubr.bf16.mxu1 %v1410_v61 }
  0x4b   :  { %671 = vmatmul.mubr.bf16.gmra.mxu0 %v1412_v62 }
  0x4c   :  { %768 = vmatmul.mubr.bf16.gmra.mxu1 %v1413_v63  ;;  %678 = vmatprep.mubr.bf16.mxu0 %v1415_v0 }
  0x4d   :  { %775 = vmatprep.mubr.bf16.mxu1 %v1417_v1 }
  0x53   :  { %679 = vmatmul.mubr.bf16.gmra.mxu0 %v1419_v2 }
  0x54   :  { %776 = vmatmul.mubr.bf16.gmra.mxu1 %v1420_v3  ;;  %686 = vmatprep.mubr.bf16.mxu0 %v1422_v4 }
  0x55   :  { %783 = vmatprep.mubr.bf16.mxu1 %v1424_v5 }
  0x5b   :  { %687 = vmatmul.mubr.bf16.gmra.mxu0 %v1426_v6 }
  0x5c   :  { %784 = vmatmul.mubr.bf16.gmra.mxu1 %v1427_v7  ;;  %1309 = vmatprep.mubr.bf16.mxu0 %v1429_v8 }
  0x5d   :  { %1317 = vmatprep.mubr.bf16.mxu1 %v1430_v9 }
  0x63   :  { %1310 = vmatmul.mubr.bf16.vlgmr.msra.gmra.mxu0 %v1431_v10 }
  0x64   :  { %1318 = vmatmul.mubr.bf16.vlgmr.msra.gmra.mxu1 %v1432_v11  ;;  %1313 = vmatprep.mubr.bf16.mxu0 %v1433_v12 }
  0x65   :  { %1321 = vmatprep.mubr.bf16.mxu1 %v1434_v13 }
  0x6b   :  { %1314 = vmatmul.mubr.bf16.gmra.mxu0 %v1435_v14 }
  0x6c   :  { %1322 = vmatmul.mubr.bf16.gmra.mxu1 %v1436_v15 }
  0xe3   :  { %v1165_v16 = vpop.f32.mrf.mxu0 }
  0xe4   :  { %v1229_v17 = vpop.f32.mrf.mxu1 }
  0xe5   :  { %v1166_v19 = vpop.f32.mrf.mxu0 }
  0xe6   :  { %v1167_v20 = vadd.f32 %v1166_v19, %v1165_v16  ;;  %v1230_v21 = vpop.f32.mrf.mxu1 }
  0xe7   :  { %v1168_v22 = vpop.f32.mrf.mxu0  ;;  %v1231_v24 = vadd.f32 %v1230_v21, %v1229_v17 }
  0xe8   :  { %v633_v23 = vadd.f32 %v1167_v20, %v1700_v18  ;;  %v1703_v25 = vpop.f32.mrf.mxu1 }
  0xe9   :  { %v1169_v26 = vpop.f32.mrf.mxu0 }
  0xea   :  { %v1705_v27 = vpop.f32.mrf.mxu1  ;;  %v1707_v28 = vadd.f32 %v1231_v24, %v633_v23  ;;  %v1170_v10 = vadd.f32 %v1169_v26, %v1168_v22 }
  0xeb   :  { %v1171_v29 = vpop.f32.mrf.mxu0 }
  0xec   :  { %1800 = vst [vmem:[#allocation2_spill] sm:$0xff] %v1707_v28  ;;  %v1235_v30 = vpop.f32.mrf.mxu1  ;;  %v636_v19 = vadd.f32 %v1170_v10, %v1700_v18 }
  0xed   :  { %v1172_v31 = vpop.f32.mrf.mxu0 }
  0xee   :  { %v1236_v32 = vpop.f32.mrf.mxu1  ;;  %v1173_v12 = vadd.f32 %v1172_v31, %v1171_v29  ;;  %v1234_v29 = vadd.f32 %v1705_v27, %v1703_v25 }
  0xef   :  { %v1174_v33 = vpop.f32.mrf.mxu0  ;;  %v1237_v31 = vadd.f32 %v1236_v32, %v1235_v30 }
  0xf0   :  { %v1238_v34 = vpop.f32.mrf.mxu1  ;;  %v641_v23 = vadd.f32 %v1173_v12, %v1700_v18 }
  0xf1   :  { %v1175_v35 = vpop.f32.mrf.mxu0 }
  0xf2   :  { %v1239_v36 = vpop.f32.mrf.mxu1  ;;  %v1176_v13 = vadd.f32 %v1175_v35, %v1174_v33 }
  0xf3   :  { %v1177_v37 = vpop.f32.mrf.mxu0  ;;  %v1240_v33 = vadd.f32 %v1239_v36, %v1238_v34 }
  0xf4   :  { %v1241_v38 = vpop.f32.mrf.mxu1  ;;  %v644_v24 = vadd.f32 %v1176_v13, %v1700_v18  ;;  %v733_v13 = vadd.f32 %v1234_v29, %v636_v19 }
  0xf5   :  { %v1178_v39 = vpop.f32.mrf.mxu0 }
  0xf6   :  { %v1242_v40 = vpop.f32.mrf.mxu1  ;;  %v1179_v14 = vadd.f32 %v1178_v39, %v1177_v37  ;;  %v741_v28 = vadd.f32 %v1240_v33, %v644_v24 }
  0xf7   :  { %v1180_v41 = vpop.f32.mrf.mxu0  ;;  %v1243_v39 = vadd.f32 %v1242_v40, %v1241_v38 }
  0xf8   :  { %v1709_v42 = vpop.f32.mrf.mxu1  ;;  %v649_v22 = vadd.f32 %v1179_v14, %v1700_v18  ;;  %v738_v14 = vadd.f32 %v1237_v31, %v641_v23 }
  0xf9   :  { %v1181_v43 = vpop.f32.mrf.mxu0 }
  0xfa   :  { %v1711_v44 = vpop.f32.mrf.mxu1  ;;  %v1182_v10 = vadd.f32 %v1181_v43, %v1180_v41  ;;  %v1741_v25 = vadd.f32 %v1243_v39, %v649_v22 }
  0xfb   :  { %v1183_v45 = vpop.f32.mrf.mxu0  ;;  %v1745_v27 = vadd.f32 %v1711_v44, %v1709_v42 }
  0xfc   :  { %v1713_v46 = vpop.f32.mrf.mxu1  ;;  %v1750_v38 = vadd.f32 %v1182_v10, %v1700_v18 }
  0xfd   :  { %v1184_v47 = vpop.f32.mrf.mxu0 }
  0xfe   :  { %v1248_v48 = vpop.f32.mrf.mxu1  ;;  %v1185_v20 = vadd.f32 %v1184_v47, %v1183_v45 }
  0xff   :  { %v1186_v49 = vpop.f32.mrf.mxu0  ;;  %v1249_v30 = vadd.f32 %v1248_v48, %v1713_v46 }
 0x100   :  { %v1715_v50 = vpop.f32.mrf.mxu1  ;;  %v657_v12 = vadd.f32 %v1185_v20, %v1700_v18 }
 0x101   :  { %v1187_v51 = vpop.f32.mrf.mxu0 }
 0x102   :  { %v1717_v52 = vpop.f32.mrf.mxu1  ;;  %v1188_v32 = vadd.f32 %v1187_v51, %v1186_v49 }
 0x103   :  { %v1189_v53 = vpop.f32.mrf.mxu0  ;;  %v1252_v19 = vadd.f32 %v1717_v52, %v1715_v50 }
 0x104   :  { %v1719_v54 = vpop.f32.mrf.mxu1 }
 0x105   :  { %v1190_v55 = vpop.f32.mrf.mxu0 }
 0x106   :  { %v1254_v56 = vpop.f32.mrf.mxu1  ;;  %v1191_v35 = vadd.f32 %v1190_v55, %v1189_v53 }
 0x107   :  { %v1192_v57 = vpop.f32.mrf.mxu0  ;;  %v1255_v55 = vadd.f32 %v1254_v56, %v1719_v54 }
 0x108   :  { %v1256_v58 = vpop.f32.mrf.mxu1  ;;  %v665_v34 = vadd.f32 %v1191_v35, %v1700_v18 }
 0x109   :  { %v1193_v59 = vpop.f32.mrf.mxu0 }
 0x10a   :  { %v1257_v60 = vpop.f32.mrf.mxu1  ;;  %v1194_v45 = vadd.f32 %v1193_v59, %v1192_v57  ;;  %v754_v59 = vadd.f32 %v1249_v30, %v657_v12 }
 0x10b   :  { %v1195_v61 = vpop.f32.mrf.mxu0  ;;  %v1258_v57 = vadd.f32 %v1257_v60, %v1256_v58 }
 0x10c   :  { %v1259_v62 = vpop.f32.mrf.mxu1  ;;  %v668_v40 = vadd.f32 %v1194_v45, %v1700_v18 }
 0x10d   :  { %v1196_v63 = vpop.f32.mrf.mxu0 }
 0x10e   :  { %v1260_v0 = vpop.f32.mrf.mxu1  ;;  %v1197_v26 = vadd.f32 %v1196_v63, %v1195_v61  ;;  %v765_v58 = vadd.f32 %v1258_v57, %v668_v40 }
 0x10f   :  { %v1198_v1 = vpop.f32.mrf.mxu0  ;;  %v1261_v41 = vadd.f32 %v1260_v0, %v1259_v62  ;;  %v762_v0 = vadd.f32 %v1255_v55, %v665_v34 }
 0x110   :  { %v1262_v2 = vpop.f32.mrf.mxu1  ;;  %v673_v61 = vadd.f32 %v1197_v26, %v1700_v18 }
 0x111   :  { %v1199_v3 = vpop.f32.mrf.mxu0 }
 0x112   :  { %v1263_v4 = vpop.f32.mrf.mxu1  ;;  %v1200_v47 = vadd.f32 %v1199_v3, %v1198_v1  ;;  %v770_v51 = vadd.f32 %v1261_v41, %v673_v61  ;;  %v660_v3 = vadd.f32 %v1188_v32, %v1700_v18 }
 0x113   :  { %v1201_v5 = vpop.f32.mrf.mxu0  ;;  %v1264_v46 = vadd.f32 %v1263_v4, %v1262_v2  ;;  %v1804_v4 = vld [vmem:[#allocation2_spill] sm:$0xff] }
 0x114   :  { %v1721_v6 = vpop.f32.mrf.mxu1  ;;  %v676_v43 = vadd.f32 %v1200_v47, %v1700_v18  ;;  %v757_v41 = vadd.f32 %v1252_v19, %v660_v3 }
 0x115   :  { %v1202_v7 = vpop.f32.mrf.mxu0 }
 0x116   :  { %v1723_v8 = vpop.f32.mrf.mxu1  ;;  %v1203_v48 = vadd.f32 %v1202_v7, %v1201_v5  ;;  %v773_v56 = vadd.f32 %v1264_v46, %v676_v43 }
 0x117   :  { %v1204_v9 = vpop.f32.mrf.mxu0  ;;  %v1267_v60 = vadd.f32 %v1723_v8, %v1721_v6 }
 0x118   :  { %v1725_v11 = vpop.f32.mrf.mxu1 }
 0x119   :  { %1801 = vst [vmem:[#allocation3_spill] sm:$0xff] %v1725_v11  ;;  %v1205_v15 = vpop.f32.mrf.mxu0 }
 0x11a   :  { %v1727_v16 = vpop.f32.mrf.mxu1  ;;  %v1206_v49 = vadd.f32 %v1205_v15, %v1204_v9 }
 0x11b   :  { %1802 = vst [vmem:[#allocation4_spill] sm:$0xff] %v1727_v16  ;;  %v1207_v17 = vpop.f32.mrf.mxu0 }
 0x11c   :  { %v1730_v21 = vpop.f32.mrf.mxu1  ;;  %v684_v50 = vadd.f32 %v1206_v49, %v1700_v18 }
 0x11d   :  { %1803 = vst [vmem:[#allocation5_spill] sm:$0xff] %v1730_v21  ;;  %v1208_v11 = vpop.f32.mrf.mxu0 }
 0x11e   :  { %v1272_v37 = vpop.f32.mrf.mxu1  ;;  %v1209_v42 = vadd.f32 %v1208_v11, %v1207_v17  ;;  %v681_v11 = vadd.f32 %v1203_v48, %v1700_v18  ;;  %v749_v48 = vadd.f32 %v1745_v27, %v1750_v38 }
 0x11f   :  { %v1210_v16 = vpop.f32.mrf.mxu0 }
 0x120   :  { %v1738_v21 = vpop.f32.mrf.mxu1  ;;  %v689_v2 = vadd.f32 %v1209_v42, %v1700_v18  ;;  %v778_v34 = vadd.f32 %v1267_v60, %v681_v11  ;;  %v1806_v43 = vld [vmem:[#allocation3_spill] sm:$0xff] }
 0x121   :  { %v1211_v63 = vpop.f32.mrf.mxu0 }
 0x122   :  { %v1275_v36 = vpop.f32.mrf.mxu1  ;;  %v1212_v23 = vadd.f32 %v1211_v63, %v1210_v16 }
 0x123   :  { %v1311_v53 = vpop.f32.mrf.mxu0  ;;  %v1276_v63 = vadd.f32 %v1275_v36, %v1738_v21 }
 0x124   :  { %v1319_v44 = vpop.f32.mrf.mxu1  ;;  %v835_v62 = vadd.f32 %v1311_v53, %v738_v14  ;;  %v1805_v17 = vld [vmem:[#allocation5_spill] sm:$0xff]  ;;  %v692_v6 = vadd.f32 %v1212_v23, %v1700_v18  ;;  %v1807_v53 = vld [vmem:[#allocation4_spill] sm:$0xff] }
 0x125   :  { %v826_v1 = vpop.f32.mrf.mxu0  ;;  %v867_v24 = vadd.f32 %v1319_v44, %v770_v51  ;;  %v1273_v22 = vadd.f32 %v1272_v37, %v1805_v17  ;;  %v1270_v55 = vadd.f32 %v1807_v53, %v1806_v43 }
 0x126   :  { %v858_v20 = vpop.f32.mrf.mxu1  ;;  %v827_v5 = vadd.f32 %v826_v1, %v1804_v4  ;;  %v891_v26 = vmax.f32 %v835_v62, 0.0  ;;  %v789_v42 = vadd.f32 %v1276_v63, %v692_v6 }
 0x127   :  { %v1312_v54 = vpop.f32.mrf.mxu0  ;;  %v859_v52 = vadd.f32 %v858_v20, %v762_v0  ;;  %v899_v8 = vmax.f32 %v867_v24, 0.0  ;;  %v786_v12 = vadd.f32 %v1273_v22, %v689_v2  ;;  %v781_v3 = vadd.f32 %v1270_v55, %v684_v50 }
 0x128   :  { %v838_v7 = vadd.f32 %v1312_v54, %v741_v28  ;;  %v1320_v9 = vpop.f32.mrf.mxu1  ;;  %v889_v10 = vmax.f32 %v827_v5, 0.0 }
 0x129   :  { %v870_v15 = vadd.f32 %v1320_v9, %v773_v56  ;;  %v829_v16 = vpop.f32.mrf.mxu0  ;;  %v897_v14 = vmax.f32 %v859_v52, 0.0 }
 0x12a   :  { %v892_v29 = vmax.f32 %v838_v7, 0.0  ;;  %v830_v31 = vadd.f32 %v829_v16, %v733_v13  ;;  %v861_v33 = vpop.f32.mrf.mxu1 }
 0x12b   :  { %v900_v35 = vmax.f32 %v870_v15, 0.0  ;;  %v862_v39 = vadd.f32 %v861_v33, %v765_v58  ;;  %v1315_v28 = vpop.f32.mrf.mxu0 }
 0x12c   :  { %v1110_v45 = vpack.c.bf16 %v892_v29, %v891_v26  ;;  %v890_v47 = vmax.f32 %v830_v31, 0.0  ;;  %v1323_v61 = vpop.f32.mrf.mxu1  ;;  %v851_v13 = vadd.f32 %v1315_v28, %v754_v59 }
 0x12d   :  { %v1130_v30 = vpack.c.bf16 %v900_v35, %v899_v8  ;;  %v898_v37 = vmax.f32 %v862_v39, 0.0  ;;  %v842_v32 = vpop.f32.mrf.mxu0  ;;  %v883_v36 = vadd.f32 %v1323_v61, %v786_v12 }
 0x12e   :  { %1142 = vst [vmem:[%s1799_s3 + $0x8] sm:$0xff] %v1110_v45   ;;  %v1105_v18 = vpack.c.bf16 %v890_v47, %v889_v10  ;;  %v874_v40 = vpop.f32.mrf.mxu1  ;;  %v843_v44 = vadd.f32 %v842_v32, %v1741_v25  ;;  %v895_v19 = vmax.f32 %v851_v13, 0.0 }
 0x12f   :  { %1146 = vst [vmem:[%s1799_s3 + $0x28] sm:$0xff] %v1130_v30   ;;  %v1125_v21 = vpack.c.bf16 %v898_v37, %v897_v14  ;;  %v1316_v57 = vpop.f32.mrf.mxu0  ;;  %v875_v49 = vadd.f32 %v874_v40, %v778_v34  ;;  %v903_v23 = vmax.f32 %v883_v36, 0.0 }
 0x130   :  { %1106 = vst [vmem:[%s1799_s3] sm:$0xff] %v1105_v18   ;;  %v854_v59 = vadd.f32 %v1316_v57, %v757_v41  ;;  %v1324_v46 = vpop.f32.mrf.mxu1  ;;  %v893_v54 = vmax.f32 %v843_v44, 0.0 }
 0x131   :  { %1145 = vst [vmem:[%s1799_s3 + $0x20] sm:$0xff] %v1125_v21   ;;  %v886_v51 = vadd.f32 %v1324_v46, %v789_v42  ;;  %v845_v1 = vpop.f32.mrf.mxu0  ;;  %v901_v60 = vmax.f32 %v875_v49, 0.0 }
 0x132   :  { %v896_v62 = vmax.f32 %v854_v59, 0.0  ;;  %v846_v0 = vadd.f32 %v845_v1, %v749_v48  ;;  %v877_v20 = vpop.f32.mrf.mxu1 }
 0x133   :  { %v904_v24 = vmax.f32 %v886_v51, 0.0  ;;  %v878_v25 = vadd.f32 %v877_v20, %v781_v3 }
 0x134   :  { %v1120_v56 = vpack.c.bf16 %v896_v62, %v895_v19  ;;  %v894_v58 = vmax.f32 %v846_v0, 0.0 }
 0x135   :  { %v1140_v27 = vpack.c.bf16 %v904_v24, %v903_v23  ;;  %v902_v38 = vmax.f32 %v878_v25, 0.0 }
 0x136   :  { %1144 = vst [vmem:[%s1799_s3 + $0x18] sm:$0xff] %v1120_v56   ;;  %v1115_v2 = vpack.c.bf16 %v894_v58, %v893_v54 }
 0x137   :  { %1148 = vst [vmem:[%s1799_s3 + $0x38] sm:$0xff] %v1140_v27   ;;  %v1135_v4 = vpack.c.bf16 %v902_v38, %v901_v60 }
 0x138   :  { %1143 = vst [vmem:[%s1799_s3 + $0x10] sm:$0xff] %v1115_v2  }
 0x139   :  { %1147 = vst [vmem:[%s1799_s3 + $0x30] sm:$0xff] %v1135_v4  }

// kernel: resnet_arcface_forward.23
= control target key start
LH: loop header
LB: loop body
LE: loop exit
PB: predicated region body
PF: predicated region fallthrough
CT: control target
= control target key end

     0   :  { %s2042_s1 = inlined_call_operand.vmem [shape: bf16[640,128], index: 1, kind: input, shape index: {}]   ;;  %s2043_s0 = inlined_call_operand.vmem [shape: bf16[128,640], index: 0, kind: input, shape index: {}]   ;;  %s2044_s2 = inlined_call_operand.vmem [shape: f32[1,128], index: 2, kind: input, shape index: {}]   ;;  %s2045_s3 = inlined_call_operand.vmem [shape: bf16[128,128], index: 3, kind: input, shape index: {}]   ;;  %s2046_s4 = inlined_call_operand.vmem [shape: bf16[128,128], index: 4, kind: output, shape index: {}]  }
   0x1   :  { %v1431_v0 = vld [vmem:[%s2042_s1 + $0x78] sm:$0xff]   ;;  %v1435_v4 = vld [vmem:[%s2042_s1 + $0x70] sm:$0xff]   ;;  %v1439_v8 = vld [vmem:[%s2042_s1 + $0x68] sm:$0xff]  }
   0x2   :  { %v1432_v1 = vld [vmem:[%s2042_s1 + $0xf8] sm:$0xff]   ;;  %1239 = vmatprep.subr.bf16.mxu0 %v1431_v0  ;;  %v1436_v5 = vld [vmem:[%s2042_s1 + $0xf0] sm:$0xff]   ;;  %v1440_v9 = vld [vmem:[%s2042_s1 + $0xe8] sm:$0xff]  }
   0x3   :  { %v1433_v2 = vld [vmem:[%s2042_s1 + $0x38] sm:$0xff]   ;;  %1303 = vmatprep.subr.bf16.mxu1 %v1432_v1  ;;  %v1437_v6 = vld [vmem:[%s2042_s1 + $0x30] sm:$0xff]   ;;  %v1441_v10 = vld [vmem:[%s2042_s1 + $0x28] sm:$0xff]  }
   0x4   :  { %v1434_v3 = vld [vmem:[%s2042_s1 + $0xb8] sm:$0xff]   ;;  %1240 = vmatpush3.bf16.msra.mxu0 %v1433_v2  ;;  %v1438_v7 = vld [vmem:[%s2042_s1 + $0xb0] sm:$0xff]   ;;  %v1442_v11 = vld [vmem:[%s2042_s1 + $0xa8] sm:$0xff]  }
   0x5   :  { %1304 = vmatpush3.bf16.msra.mxu1 %v1434_v3  ;;  %1241 = vmatprep.subr.bf16.mxu0 %v1435_v4  ;;  %v1443_v12 = vld [vmem:[%s2042_s1 + $0x60] sm:$0xff]   ;;  %v1447_v16 = vld [vmem:[%s2042_s1 + $0x58] sm:$0xff]   ;;  %v1451_v20 = vld [vmem:[%s2042_s1 + $0x50] sm:$0xff]  }
   0x6   :  { %1305 = vmatprep.subr.bf16.mxu1 %v1436_v5  ;;  %v1444_v13 = vld [vmem:[%s2042_s1 + $0xe0] sm:$0xff]   ;;  %v1448_v17 = vld [vmem:[%s2042_s1 + $0xd8] sm:$0xff]   ;;  %v1452_v21 = vld [vmem:[%s2042_s1 + $0xd0] sm:$0xff]  }
   0x7   :  { %v1445_v14 = vld [vmem:[%s2042_s1 + $0x20] sm:$0xff]   ;;  %v1449_v18 = vld [vmem:[%s2042_s1 + $0x18] sm:$0xff]   ;;  %v1453_v22 = vld [vmem:[%s2042_s1 + $0x10] sm:$0xff]  }
   0x8   :  { %1242 = vmatpush3.bf16.msra.mxu0 %v1437_v6  ;;  %v1446_v15 = vld [vmem:[%s2042_s1 + $0xa0] sm:$0xff]   ;;  %v1450_v19 = vld [vmem:[%s2042_s1 + $0x98] sm:$0xff]   ;;  %v1454_v23 = vld [vmem:[%s2042_s1 + $0x90] sm:$0xff]  }
   0x9   :  { %1306 = vmatpush3.bf16.msra.mxu1 %v1438_v7  ;;  %1243 = vmatprep.subr.bf16.mxu0 %v1439_v8  ;;  %v1455_v24 = vld [vmem:[%s2042_s1 + $0x48] sm:$0xff]   ;;  %v1459_v28 = vld [vmem:[%s2042_s1 + $0x40] sm:$0xff]   ;;  %v1469_v36 = vld [vmem:[%s2042_s1 + $0x138] sm:$0xff]  }
   0xa   :  { %1307 = vmatprep.subr.bf16.mxu1 %v1440_v9  ;;  %v1456_v25 = vld [vmem:[%s2042_s1 + $0xc8] sm:$0xff]   ;;  %v1460_v29 = vld [vmem:[%s2042_s1 + $0xc0] sm:$0xff]   ;;  %v1476_v39 = vld [vmem:[%s2042_s1 + $0x130] sm:$0xff]  }
   0xb   :  { %v1457_v26 = vld [vmem:[%s2042_s1 + $0x8] sm:$0xff]   ;;  %v1461_v30 = vld [vmem:[%s2042_s1] sm:$0xff]   ;;  %v1479_v43 = vld [vmem:[%s2043_s0 + $0x5c] ss:$20 sps:$4 sm:$0xff]  }
   0xc   :  { %1244 = vmatpush3.bf16.msra.mxu0 %v1441_v10  ;;  %v1458_v27 = vld [vmem:[%s2042_s1 + $0x88] sm:$0xff]   ;;  %v1462_v31 = vld [vmem:[%s2042_s1 + $0x80] sm:$0xff]   ;;  %v1484_v48 = vld [vmem:[%s2043_s0 + $0x7c] ss:$20 sps:$4 sm:$0xff]  }
   0xd   :  { %1308 = vmatpush3.bf16.msra.mxu1 %v1442_v11  ;;  %1245 = vmatprep.subr.bf16.mxu0 %v1443_v12  ;;  %v1463_v32 = vld [vmem:[%s2043_s0] ss:$20 sps:$4 sm:$0xff]   ;;  %v1465_v33 = vld [vmem:[%s2043_s0 + $0x4] ss:$20 sps:$4 sm:$0xff]   ;;  %v1466_v34 = vld [vmem:[%s2043_s0 + $0x8] ss:$20 sps:$4 sm:$0xff]  }
   0xe   :  { %1309 = vmatprep.subr.bf16.mxu1 %v1444_v13  ;;  %v1468_v35 = vld [vmem:[%s2043_s0 + $0xc] ss:$20 sps:$4 sm:$0xff]   ;;  %633 = vmatprep.mubr.bf16.mxu0 %v1465_v33  ;;  %v1472_v38 = vld [vmem:[%s2043_s0 + $0x34] ss:$20 sps:$4 sm:$0xff]   ;;  %v1475_v41 = vld [vmem:[%s2043_s0 + $0x30] ss:$20 sps:$4 sm:$0xff]  }
   0xf   :  { %730 = vmatprep.mubr.bf16.mxu1 %v1468_v35  ;;  %v1470_v37 = vld [vmem:[%s2043_s0 + $0x2c] ss:$20 sps:$4 sm:$0xff]   ;;  %v1474_v40 = vld [vmem:[%s2043_s0 + $0x28] ss:$20 sps:$4 sm:$0xff]   ;;  %v1481_v46 = vld [vmem:[%s2043_s0 + $0x50] ss:$20 sps:$4 sm:$0xff]  }
  0x10   :  { %1246 = vmatpush3.bf16.msra.mxu0 %v1445_v14  ;;  %v1477_v42 = vld [vmem:[%s2043_s0 + $0x54] ss:$20 sps:$4 sm:$0xff]   ;;  %v1490_v45 = vld [vmem:[%s2042_s1 + $0x120] sm:$0xff]   ;;  %v1482_v47 = vld [vmem:[%s2043_s0 + $0x58] ss:$20 sps:$4 sm:$0xff]  }
  0x11   :  { %1310 = vmatpush3.bf16.msra.mxu1 %v1446_v15  ;;  %1247 = vmatprep.subr.bf16.mxu0 %v1447_v16  ;;  %v1483_v44 = vld [vmem:[%s2042_s1 + $0x128] sm:$0xff]   ;;  %v1486_v49 = vld [vmem:[%s2043_s0 + $0x84] ss:$20 sps:$4 sm:$0xff]   ;;  %v1504_v51 = vld [vmem:[%s2042_s1 + $0x110] sm:$0xff]  }
  0x12   :  { %1311 = vmatprep.subr.bf16.mxu1 %v1448_v17  ;;  %v1497_v50 = vld [vmem:[%s2042_s1 + $0x118] sm:$0xff]   ;;  %v1489_v53 = vld [vmem:[%s2043_s0 + $0x80] ss:$20 sps:$4 sm:$0xff]   ;;  %v1511_v55 = vld [vmem:[%s2042_s1 + $0x108] sm:$0xff]  }
  0x13   :  { %v1488_v52 = vld [vmem:[%s2043_s0 + $0x78] ss:$20 sps:$4 sm:$0xff]   ;;  %v1518_v57 = vld [vmem:[%s2042_s1 + $0x100] sm:$0xff]   ;;  %v1496_v59 = vld [vmem:[%s2043_s0 + $0xa8] ss:$20 sps:$4 sm:$0xff]  }
  0x14   :  { %1248 = vmatpush3.bf16.msra.mxu0 %v1449_v18  ;;  %v1491_v54 = vld [vmem:[%s2043_s0 + $0xa4] ss:$20 sps:$4 sm:$0xff]   ;;  %v1493_v56 = vld [vmem:[%s2043_s0 + $0xac] ss:$20 sps:$4 sm:$0xff]   ;;  %v1500_v61 = vld [vmem:[%s2043_s0 + $0xd4] ss:$20 sps:$4 sm:$0xff]  }
  0x15   :  { %1312 = vmatpush3.bf16.msra.mxu1 %v1450_v19  ;;  %1249 = vmatprep.subr.bf16.mxu0 %v1451_v20  ;;  %v1495_v58 = vld [vmem:[%s2043_s0 + $0xa0] ss:$20 sps:$4 sm:$0xff]   ;;  %v1502_v62 = vld [vmem:[%s2043_s0 + $0xc8] ss:$20 sps:$4 sm:$0xff]   ;;  %v1503_v63 = vld [vmem:[%s2043_s0 + $0xd0] ss:$20 sps:$4 sm:$0xff]  }
  0x16   :  { %1313 = vmatprep.subr.bf16.mxu1 %v1452_v21  ;;  %v1498_v60 = vld [vmem:[%s2043_s0 + $0xcc] ss:$20 sps:$4 sm:$0xff]   ;;  %v1505_v0 = vld [vmem:[%s2043_s0 + $0xf4] ss:$20 sps:$4 sm:$0xff]   ;;  %v1507_v1 = vld [vmem:[%s2043_s0 + $0xfc] ss:$20 sps:$4 sm:$0xff]  }
  0x17   :  { %v1509_v2 = vld [vmem:[%s2043_s0 + $0xf0] ss:$20 sps:$4 sm:$0xff]   ;;  %v1510_v3 = vld [vmem:[%s2043_s0 + $0xf8] ss:$20 sps:$4 sm:$0xff]   ;;  %v1517_v7 = vld [vmem:[%s2043_s0 + $0x120] ss:$20 sps:$4 sm:$0xff]  }
  0x18   :  { %1250 = vmatpush3.bf16.msra.mxu0 %v1453_v22  ;;  %v1512_v4 = vld [vmem:[%s2043_s0 + $0x11c] ss:$20 sps:$4 sm:$0xff]   ;;  %v1514_v5 = vld [vmem:[%s2043_s0 + $0x124] ss:$20 sps:$4 sm:$0xff]   ;;  %v1523_v12 = vld [vmem:[%s2043_s0 + $0x60] ss:$20 sps:$4 sm:$0xff]  }
  0x19   :  { %1314 = vmatpush3.bf16.msra.mxu1 %v1454_v23  ;;  %1251 = vmatprep.subr.bf16.mxu0 %v1455_v24  ;;  %v1516_v6 = vld [vmem:[%s2043_s0 + $0x118] ss:$20 sps:$4 sm:$0xff]   ;;  %v1519_v8 = vld [vmem:[%s2043_s0 + $0x10] ss:$20 sps:$4 sm:$0xff]   ;;  %v1524_v13 = vld [vmem:[%s2043_s0 + $0x100] ss:$20 sps:$4 sm:$0xff]  }
  0x1a   :  { %1315 = vmatprep.subr.bf16.mxu1 %v1456_v25  ;;  %v1520_v9 = vld [vmem:[%s2043_s0 + $0xb0] ss:$20 sps:$4 sm:$0xff]   ;;  %v1521_v10 = vld [vmem:[%s2043_s0 + $0x38] ss:$20 sps:$4 sm:$0xff]   ;;  %v1525_v14 = vld [vmem:[%s2043_s0 + $0x88] ss:$20 sps:$4 sm:$0xff]  }
  0x1b   :  { %v1522_v11 = vld [vmem:[%s2043_s0 + $0xd8] ss:$20 sps:$4 sm:$0xff]   ;;  %v1526_v15 = vld [vmem:[%s2043_s0 + $0x128] ss:$20 sps:$4 sm:$0xff]   ;;  %v1795_v18 = vld [vmem:[%s2044_s2] ss:$0 sm:$0xff] }
  0x1c   :  { %1252 = vmatpush3.bf16.msra.mxu0 %v1457_v26 }
  0x1d   :  { %1316 = vmatpush3.bf16.msra.mxu1 %v1458_v27  ;;  %1253 = vmatprep.subr.bf16.mxu0 %v1459_v28 }
  0x1e   :  { %1317 = vmatprep.subr.bf16.mxu1 %v1460_v29 }
  0x20   :  { %1254 = vmatpush3.bf16.msra.mxu0 %v1461_v30 }
  0x21   :  { %1318 = vmatpush3.bf16.msra.mxu1 %v1462_v31  ;;  %1383 = vmatprep.subr.bf16.mxu0 %v1469_v36 }
  0x22   :  { %1415 = vmatprep.subr.bf16.mxu1 %v1469_v36 }
  0x23   :  { %634 = vmatmul.mubr.bf16.vlgmr.msra.gmra.mxu0 %v1463_v32 }
  0x24   :  { %731 = vmatmul.mubr.bf16.vlgmr.msra.gmra.mxu1 %v1466_v34  ;;  %1384 = vmatpush3.bf16.msra.mxu0 %v1469_v36 }
  0x25   :  { %1423 = vmatpush3.bf16.msra.mxu1 %v1469_v36  ;;  %641 = vmatprep.mubr.bf16.mxu0 %v1470_v37 }
  0x26   :  { %738 = vmatprep.mubr.bf16.mxu1 %v1472_v38  ;;  %1385 = vmatprep.subr.bf16.mxu0 %v1476_v39 }
  0x27   :  { %1416 = vmatprep.subr.bf16.mxu1 %v1476_v39 }
  0x28   :  { %1386 = vmatpush3.bf16.msra.mxu0 %v1476_v39 }
  0x29   :  { %1424 = vmatpush3.bf16.msra.mxu1 %v1476_v39  ;;  %1387 = vmatprep.subr.bf16.mxu0 %v1483_v44 }
  0x2a   :  { %1417 = vmatprep.subr.bf16.mxu1 %v1483_v44 }
  0x2b   :  { %642 = vmatmul.mubr.bf16.gmra.mxu0 %v1474_v40 }
  0x2c   :  { %739 = vmatmul.mubr.bf16.gmra.mxu1 %v1475_v41  ;;  %649 = vmatprep.mubr.bf16.mxu0 %v1477_v42 }
  0x2d   :  { %746 = vmatprep.mubr.bf16.mxu1 %v1479_v43  ;;  %1388 = vmatpush3.bf16.msra.mxu0 %v1483_v44 }
  0x2e   :  { %1425 = vmatpush3.bf16.msra.mxu1 %v1483_v44  ;;  %1389 = vmatprep.subr.bf16.mxu0 %v1490_v45 }
  0x2f   :  { %1418 = vmatprep.subr.bf16.mxu1 %v1490_v45 }
  0x31   :  { %1390 = vmatpush3.bf16.msra.mxu0 %v1490_v45 }
  0x32   :  { %1426 = vmatpush3.bf16.msra.mxu1 %v1490_v45  ;;  %1391 = vmatprep.subr.bf16.mxu0 %v1497_v50 }
  0x33   :  { %650 = vmatmul.mubr.bf16.gmra.mxu0 %v1481_v46  ;;  %1419 = vmatprep.subr.bf16.mxu1 %v1497_v50 }
  0x34   :  { %747 = vmatmul.mubr.bf16.gmra.mxu1 %v1482_v47  ;;  %657 = vmatprep.mubr.bf16.mxu0 %v1484_v48 }
  0x35   :  { %754 = vmatprep.mubr.bf16.mxu1 %v1486_v49  ;;  %1392 = vmatpush3.bf16.msra.mxu0 %v1497_v50 }
  0x36   :  { %1427 = vmatpush3.bf16.msra.mxu1 %v1497_v50  ;;  %1393 = vmatprep.subr.bf16.mxu0 %v1504_v51 }
  0x37   :  { %1420 = vmatprep.subr.bf16.mxu1 %v1504_v51 }
  0x39   :  { %1394 = vmatpush3.bf16.msra.mxu0 %v1504_v51 }
  0x3a   :  { %1428 = vmatpush3.bf16.msra.mxu1 %v1504_v51  ;;  %1395 = vmatprep.subr.bf16.mxu0 %v1511_v55 }
  0x3b   :  { %658 = vmatmul.mubr.bf16.gmra.mxu0 %v1488_v52  ;;  %1421 = vmatprep.subr.bf16.mxu1 %v1511_v55 }
  0x3c   :  { %755 = vmatmul.mubr.bf16.gmra.mxu1 %v1489_v53  ;;  %665 = vmatprep.mubr.bf16.mxu0 %v1491_v54 }
  0x3d   :  { %762 = vmatprep.mubr.bf16.mxu1 %v1493_v56  ;;  %1396 = vmatpush3.bf16.msra.mxu0 %v1511_v55 }
  0x3e   :  { %1429 = vmatpush3.bf16.msra.mxu1 %v1511_v55  ;;  %1397 = vmatprep.subr.bf16.mxu0 %v1518_v57 }
  0x3f   :  { %1422 = vmatprep.subr.bf16.mxu1 %v1518_v57 }
  0x41   :  { %1398 = vmatpush3.bf16.msra.mxu0 %v1518_v57 }
  0x42   :  { %1430 = vmatpush3.bf16.msra.mxu1 %v1518_v57 }
  0x43   :  { %666 = vmatmul.mubr.bf16.gmra.mxu0 %v1495_v58 }
  0x44   :  { %763 = vmatmul.mubr.bf16.gmra.mxu1 %v1496_v59  ;;  %673 = vmatprep.mubr.bf16.mxu0 %v1498_v60 }
  0x45   :  { %770 = vmatprep.mubr.bf16.mxu1 %v1500_v61 }
  0x4b   :  { %674 = vmatmul.mubr.bf16.gmra.mxu0 %v1502_v62 }
  0x4c   :  { %771 = vmatmul.mubr.bf16.gmra.mxu1 %v1503_v63  ;;  %681 = vmatprep.mubr.bf16.mxu0 %v1505_v0 }
  0x4d   :  { %778 = vmatprep.mubr.bf16.mxu1 %v1507_v1 }
  0x53   :  { %682 = vmatmul.mubr.bf16.gmra.mxu0 %v1509_v2 }
  0x54   :  { %779 = vmatmul.mubr.bf16.gmra.mxu1 %v1510_v3  ;;  %689 = vmatprep.mubr.bf16.mxu0 %v1512_v4 }
  0x55   :  { %786 = vmatprep.mubr.bf16.mxu1 %v1514_v5 }
  0x5b   :  { %690 = vmatmul.mubr.bf16.gmra.mxu0 %v1516_v6  ;;  %v1861_v6 = vld [vmem:[%s2045_s3 + $0x8] sm:$0xff]  }
  0x5c   :  { %787 = vmatmul.mubr.bf16.gmra.mxu1 %v1517_v7  ;;  %1399 = vmatprep.mubr.bf16.mxu0 %v1519_v8  ;;  %2054 = vst [vmem:[#allocation3_spill] sm:$0xff] %v1861_v6  ;;  %v1866_v7 = vld [vmem:[%s2045_s3 + $0x28] sm:$0xff]   ;;  %v1871_v8 = vld [vmem:[%s2045_s3] sm:$0xff]  }
  0x5d   :  { %1407 = vmatprep.mubr.bf16.mxu1 %v1520_v9  ;;  %2055 = vst [vmem:[#allocation4_spill] sm:$0xff] %v1866_v7  ;;  %2056 = vst [vmem:[#allocation5_spill] sm:$0xff] %v1871_v8 }
  0x63   :  { %1400 = vmatmul.mubr.bf16.vlgmr.msra.gmra.mxu0 %v1521_v10  ;;  %v1878_v10 = vld [vmem:[%s2045_s3 + $0x20] sm:$0xff]  }
  0x64   :  { %1408 = vmatmul.mubr.bf16.vlgmr.msra.gmra.mxu1 %v1522_v11  ;;  %1403 = vmatprep.mubr.bf16.mxu0 %v1523_v12 }
  0x65   :  { %1411 = vmatprep.mubr.bf16.mxu1 %v1524_v13 }
  0x6b   :  { %1404 = vmatmul.mubr.bf16.gmra.mxu0 %v1525_v14 }
  0x6c   :  { %1412 = vmatmul.mubr.bf16.gmra.mxu1 %v1526_v15 }
  0xe3   :  { %v1255_v16 = vpop.f32.mrf.mxu0 }
  0xe4   :  { %v1319_v17 = vpop.f32.mrf.mxu1 }
  0xe5   :  { %v1256_v19 = vpop.f32.mrf.mxu0 }
  0xe6   :  { %v1257_v20 = vadd.f32 %v1256_v19, %v1255_v16  ;;  %v1320_v21 = vpop.f32.mrf.mxu1  ;;  %v1893_v19 = vld [vmem:[%s2045_s3 + $0x38] sm:$0xff]   ;;  %v1909_v16 = vld [vmem:[%s2045_s3 + $0x30] sm:$0xff]  }
  0xe7   :  { %v1258_v22 = vpop.f32.mrf.mxu0  ;;  %v1321_v24 = vadd.f32 %v1320_v21, %v1319_v17  ;;  %v1888_v17 = vld [vmem:[%s2045_s3 + $0x18] sm:$0xff]  }
  0xe8   :  { %v636_v23 = vadd.f32 %v1257_v20, %v1795_v18  ;;  %v1798_v25 = vpop.f32.mrf.mxu1 }
  0xe9   :  { %v1259_v26 = vpop.f32.mrf.mxu0 }
  0xea   :  { %v1800_v27 = vpop.f32.mrf.mxu1  ;;  %v1802_v28 = vadd.f32 %v1321_v24, %v636_v23  ;;  %v1260_v11 = vadd.f32 %v1259_v26, %v1258_v22  ;;  %v1904_v26 = vld [vmem:[%s2045_s3 + $0x10] sm:$0xff]   ;;  %v1172_v22 = vunpack.c.h.bf16 %v1878_v10 }
  0xeb   :  { %v1261_v29 = vpop.f32.mrf.mxu0 }
  0xec   :  { %2053 = vst [vmem:[#allocation2_spill] sm:$0xff] %v1802_v28  ;;  %v1804_v30 = vpop.f32.mrf.mxu1  ;;  %v639_v23 = vadd.f32 %v1260_v11, %v1795_v18 }
  0xed   :  { %v1262_v31 = vpop.f32.mrf.mxu0 }
  0xee   :  { %v1806_v32 = vpop.f32.mrf.mxu1  ;;  %v1263_v15 = vadd.f32 %v1262_v31, %v1261_v29  ;;  %v1168_v31 = vunpack.c.h.bf16 %v1888_v17 }
  0xef   :  { %v1264_v33 = vpop.f32.mrf.mxu0 }
  0xf0   :  { %v1808_v34 = vpop.f32.mrf.mxu1  ;;  %v644_v11 = vadd.f32 %v1263_v15, %v1795_v18 }
  0xf1   :  { %v1265_v35 = vpop.f32.mrf.mxu0 }
  0xf2   :  { %v1810_v36 = vpop.f32.mrf.mxu1  ;;  %v1266_v14 = vadd.f32 %v1265_v35, %v1264_v33  ;;  %v1324_v35 = vadd.f32 %v1800_v27, %v1798_v25  ;;  %v1327_v33 = vadd.f32 %v1806_v32, %v1804_v30 }
  0xf3   :  { %v1267_v37 = vpop.f32.mrf.mxu0  ;;  %v1330_v15 = vadd.f32 %v1810_v36, %v1808_v34 }
  0xf4   :  { %v1812_v38 = vpop.f32.mrf.mxu1  ;;  %v647_v6 = vadd.f32 %v1266_v14, %v1795_v18 }
  0xf5   :  { %v1268_v39 = vpop.f32.mrf.mxu0 }
  0xf6   :  { %v1814_v40 = vpop.f32.mrf.mxu1  ;;  %v1269_v28 = vadd.f32 %v1268_v39, %v1267_v37 }
  0xf7   :  { %v1816_v41 = vpop.f32.mrf.mxu0  ;;  %v1333_v14 = vadd.f32 %v1814_v40, %v1812_v38  ;;  %v741_v38 = vadd.f32 %v1327_v33, %v644_v11  ;;  %v744_v40 = vadd.f32 %v1330_v15, %v647_v6 }
  0xf8   :  { %v1818_v42 = vpop.f32.mrf.mxu1 }
  0xf9   :  { %v1820_v43 = vpop.f32.mrf.mxu0 }
  0xfa   :  { %v1822_v44 = vpop.f32.mrf.mxu1  ;;  %v1272_v25 = vadd.f32 %v1820_v43, %v1816_v41 }
  0xfb   :  { %v1273_v45 = vpop.f32.mrf.mxu0 }
  0xfc   :  { %v1824_v46 = vpop.f32.mrf.mxu1 }
  0xfd   :  { %v1274_v47 = vpop.f32.mrf.mxu0 }
  0xfe   :  { %v1826_v48 = vpop.f32.mrf.mxu1  ;;  %v1275_v24 = vadd.f32 %v1274_v47, %v1273_v45  ;;  %v1164_v45 = vunpack.c.h.bf16 %v1904_v26  ;;  %v1180_v47 = vunpack.c.h.bf16 %v1909_v16 }
  0xff   :  { %v1828_v49 = vpop.f32.mrf.mxu0  ;;  %v1339_v41 = vadd.f32 %v1826_v48, %v1824_v46 }
 0x100   :  { %v1830_v50 = vpop.f32.mrf.mxu1  ;;  %v660_v27 = vadd.f32 %v1275_v24, %v1795_v18 }
 0x101   :  { %v1832_v51 = vpop.f32.mrf.mxu0 }
 0x102   :  { %v1834_v52 = vpop.f32.mrf.mxu1 }
 0x103   :  { %v1279_v53 = vpop.f32.mrf.mxu0 }
 0x104   :  { %v1836_v54 = vpop.f32.mrf.mxu1 }
 0x105   :  { %v1280_v55 = vpop.f32.mrf.mxu0 }
 0x106   :  { %v1838_v56 = vpop.f32.mrf.mxu1  ;;  %v1281_v29 = vadd.f32 %v1280_v55, %v1279_v53 }
 0x107   :  { %v1840_v57 = vpop.f32.mrf.mxu0 }
 0x108   :  { %v1842_v58 = vpop.f32.mrf.mxu1  ;;  %v668_v34 = vadd.f32 %v1281_v29, %v1795_v18 }
 0x109   :  { %v1844_v59 = vpop.f32.mrf.mxu0 }
 0x10a   :  { %v1846_v60 = vpop.f32.mrf.mxu1  ;;  %v1284_v30 = vadd.f32 %v1844_v59, %v1840_v57  ;;  %v757_v57 = vadd.f32 %v1339_v41, %v660_v27 }
 0x10b   :  { %v1285_v61 = vpop.f32.mrf.mxu0 }
 0x10c   :  { %v1848_v62 = vpop.f32.mrf.mxu1 }
 0x10d   :  { %v1286_v63 = vpop.f32.mrf.mxu0 }
 0x10e   :  { %v1850_v0 = vpop.f32.mrf.mxu1  ;;  %v1287_v37 = vadd.f32 %v1286_v63, %v1285_v61  ;;  %v1935_v63 = vadd.f32 %v1324_v35, %v639_v23 }
 0x10f   :  { %v1852_v1 = vpop.f32.mrf.mxu0  ;;  %v1351_v46 = vadd.f32 %v1850_v0, %v1848_v62  ;;  %v1342_v62 = vadd.f32 %v1834_v52, %v1830_v50  ;;  %v1348_v0 = vadd.f32 %v1846_v60, %v1842_v58 }
 0x110   :  { %v1854_v2 = vpop.f32.mrf.mxu1  ;;  %v676_v43 = vadd.f32 %v1287_v37, %v1795_v18 }
 0x111   :  { %v1289_v3 = vpop.f32.mrf.mxu0 }
 0x112   :  { %v1856_v4 = vpop.f32.mrf.mxu1  ;;  %v1290_v53 = vadd.f32 %v1289_v3, %v1852_v1  ;;  %v1345_v1 = vadd.f32 %v1838_v56, %v1836_v54  ;;  %v671_v3 = vadd.f32 %v1284_v30, %v1795_v18  ;;  %v773_v29 = vadd.f32 %v1351_v46, %v676_v43 }
 0x113   :  { %v1291_v5 = vpop.f32.mrf.mxu0  ;;  %v1354_v56 = vadd.f32 %v1856_v4, %v1854_v2 }
 0x114   :  { %v1873_v9 = vpop.f32.mrf.mxu1  ;;  %v765_v54 = vadd.f32 %v1345_v1, %v668_v34 }
 0x115   :  { %v1292_v12 = vpop.f32.mrf.mxu0 }
 0x116   :  { %v1880_v13 = vpop.f32.mrf.mxu1  ;;  %v1293_v55 = vadd.f32 %v1292_v12, %v1291_v5  ;;  %v679_v12 = vadd.f32 %v1290_v53, %v1795_v18 }
 0x117   :  { %2057 = vst [vmem:[#allocation6_spill] sm:$0xff] %v1880_v13  ;;  %v1895_v20 = vpop.f32.mrf.mxu0  ;;  %v652_v13 = vadd.f32 %v1269_v28, %v1795_v18  ;;  %v1278_v28 = vadd.f32 %v1832_v51, %v1828_v49  ;;  %v1953_v49 = vadd.f32 %v1272_v25, %v1795_v18  ;;  %v1957_v51 = vadd.f32 %v1822_v44, %v1818_v42 }
 0x118   :  { %2058 = vst [vmem:[#allocation7_spill] sm:$0xff] %v1895_v20  ;;  %v1911_v21 = vpop.f32.mrf.mxu1  ;;  %v776_v43 = vadd.f32 %v1354_v56, %v679_v12 }
 0x119   :  { %v1295_v8 = vpop.f32.mrf.mxu0  ;;  %v1950_v24 = vadd.f32 %v1333_v14, %v652_v13  ;;  %v663_v59 = vadd.f32 %v1278_v28, %v1795_v18  ;;  %v684_v13 = vadd.f32 %v1293_v55, %v1795_v18  ;;  %v2061_v14 = vld [vmem:[#allocation2_spill] sm:$0xff]  ;;  %v768_v28 = vadd.f32 %v1348_v0, %v671_v3 }
 0x11a   :  { %v1917_v20 = vpop.f32.mrf.mxu1 }
 0x11b   :  { %v1297_v39 = vpop.f32.mrf.mxu0  ;;  %v760_v58 = vadd.f32 %v1342_v62, %v663_v59  ;;  %v1360_v4 = vadd.f32 %v1917_v20, %v1911_v21 }
 0x11c   :  { %v1361_v7 = vpop.f32.mrf.mxu1 }
 0x11d   :  { %v1298_v61 = vpop.f32.mrf.mxu0 }
 0x11e   :  { %v1362_v32 = vpop.f32.mrf.mxu1  ;;  %v1299_v5 = vadd.f32 %v1298_v61, %v1297_v39  ;;  %v2059_v37 = vld [vmem:[#allocation6_spill] sm:$0xff] }
 0x11f   :  { %v1300_v23 = vpop.f32.mrf.mxu0  ;;  %v1357_v39 = vadd.f32 %v2059_v37, %v1873_v9  ;;  %v2060_v11 = vld [vmem:[#allocation7_spill] sm:$0xff]  ;;  %v1363_v9 = vadd.f32 %v1362_v32, %v1361_v7 }
 0x120   :  { %v1364_v36 = vpop.f32.mrf.mxu1  ;;  %v1296_v25 = vadd.f32 %v1295_v8, %v2060_v11  ;;  %v692_v15 = vadd.f32 %v1299_v5, %v1795_v18  ;;  %v2062_v8 = vld [vmem:[#allocation3_spill] sm:$0xff] }
 0x121   :  { %v1301_v48 = vpop.f32.mrf.mxu0  ;;  %v781_v2 = vadd.f32 %v1357_v39, %v684_v13  ;;  %v2063_v53 = vunpack.c.l.bf16 %v2062_v8 }
 0x122   :  { %v1365_v6 = vpop.f32.mrf.mxu1  ;;  %v1302_v42 = vadd.f32 %v1301_v48, %v1300_v23  ;;  %v2064_v48 = vld [vmem:[#allocation4_spill] sm:$0xff]  ;;  %v789_v32 = vadd.f32 %v1363_v9, %v692_v15 }
 0x123   :  { %v1401_v44 = vpop.f32.mrf.mxu0  ;;  %v1366_v46 = vadd.f32 %v1365_v6, %v1364_v36  ;;  %v2065_v59 = vunpack.c.l.bf16 %v2064_v48 }
 0x124   :  { %v838_v33 = vadd.f32 %v1401_v44, %v741_v38  ;;  %v1409_v35 = vpop.f32.mrf.mxu1  ;;  %v695_v60 = vadd.f32 %v1302_v42, %v1795_v18  ;;  %v687_v38 = vadd.f32 %v1296_v25, %v1795_v18  ;;  %v2066_v42 = vld [vmem:[#allocation5_spill] sm:$0xff]  ;;  %v2068_v44 = vunpack.c.h.bf16 %v2062_v8 }
 0x125   :  { %v870_v27 = vadd.f32 %v1409_v35, %v773_v29  ;;  %v829_v61 = vpop.f32.mrf.mxu0  ;;  %v2067_v12 = vunpack.c.l.bf16 %v2066_v42  ;;  %v2070_v18 = vunpack.c.h.bf16 %v2064_v48 }
 0x126   :  { %v830_v50 = vadd.f32 %v829_v61, %v2061_v14  ;;  %v861_v52 = vpop.f32.mrf.mxu1  ;;  %v926_v55 = vadd.f32 %v2063_v53, %v838_v33  ;;  %v792_v0 = vadd.f32 %v1366_v46, %v695_v60  ;;  %v784_v48 = vadd.f32 %v1360_v4, %v687_v38 }
 0x127   :  { %v862_v30 = vadd.f32 %v861_v52, %v765_v54  ;;  %v1402_v41 = vpop.f32.mrf.mxu0  ;;  %v934_v1 = vadd.f32 %v2065_v59, %v870_v27  ;;  %v2071_v54 = vunpack.c.h.bf16 %v2066_v42  ;;  %v2076_v4 = vunpack.c.h.bf16 %v1893_v19 }
 0x128   :  { %v841_v23 = vadd.f32 %v1402_v41, %v744_v40  ;;  %v1410_v34 = vpop.f32.mrf.mxu1  ;;  %v924_v13 = vadd.f32 %v2067_v12, %v830_v50  ;;  %v2069_v40 = vunpack.c.l.bf16 %v1878_v10  ;;  %v942_v33 = vmax.f32 %v926_v55, 0.0 }
 0x129   :  { %v873_v3 = vadd.f32 %v1410_v34, %v776_v43  ;;  %v832_v5 = vpop.f32.mrf.mxu0  ;;  %v950_v11 = vmax.f32 %v934_v1, 0.0  ;;  %v2072_v10 = vunpack.c.l.bf16 %v1888_v17  ;;  %v752_v55 = vadd.f32 %v1957_v51, %v1953_v49 }
 0x12a   :  { %v927_v20 = vadd.f32 %v2068_v44, %v841_v23  ;;  %v833_v7 = vadd.f32 %v832_v5, %v1935_v63  ;;  %v864_v21 = vpop.f32.mrf.mxu1  ;;  %v932_v29 = vadd.f32 %v2069_v40, %v862_v30  ;;  %v940_v15 = vmax.f32 %v924_v13, 0.0 }
 0x12b   :  { %v935_v36 = vadd.f32 %v2070_v18, %v873_v3  ;;  %v865_v6 = vadd.f32 %v864_v21, %v768_v28  ;;  %v1405_v62 = vpop.f32.mrf.mxu0  ;;  %v2075_v3 = vunpack.c.l.bf16 %v1909_v16 }
 0x12c   :  { %v943_v35 = vmax.f32 %v927_v20, 0.0  ;;  %v925_v56 = vadd.f32 %v2071_v54, %v833_v7  ;;  %v854_v37 = vadd.f32 %v1405_v62, %v757_v57  ;;  %v1413_v39 = vpop.f32.mrf.mxu1  ;;  %v948_v60 = vmax.f32 %v932_v29, 0.0 }
 0x12d   :  { %v951_v63 = vmax.f32 %v935_v36, 0.0  ;;  %v933_v25 = vadd.f32 %v1172_v22, %v865_v6  ;;  %v886_v27 = vadd.f32 %v1413_v39, %v789_v32  ;;  %v845_v61 = vpop.f32.mrf.mxu0 }
 0x12e   :  { %v1193_v14 = vpack.c.bf16 %v943_v35, %v942_v33  ;;  %v941_v50 = vmax.f32 %v925_v56, 0.0  ;;  %v846_v52 = vadd.f32 %v845_v61, %v1950_v24  ;;  %v877_v28 = vpop.f32.mrf.mxu1  ;;  %v930_v22 = vadd.f32 %v2072_v10, %v854_v37 }
 0x12f   :  { %v1213_v30 = vpack.c.bf16 %v951_v63, %v950_v11  ;;  %v949_v41 = vmax.f32 %v933_v25, 0.0  ;;  %v878_v43 = vadd.f32 %v877_v28, %v781_v2  ;;  %v1406_v9 = vpop.f32.mrf.mxu0  ;;  %v2073_v2 = vunpack.c.l.bf16 %v1893_v19 }
 0x130   :  { %1232 = vst [vmem:[%s2046_s4 + $0x8] sm:$0xff] %v1193_v14   ;;  %v1188_v57 = vpack.c.bf16 %v941_v50, %v940_v15  ;;  %v857_v8 = vadd.f32 %v1406_v9, %v760_v58  ;;  %v1414_v53 = vpop.f32.mrf.mxu1  ;;  %v2074_v58 = vunpack.c.l.bf16 %v1904_v26  ;;  %v946_v12 = vmax.f32 %v930_v22, 0.0 }
 0x131   :  { %1236 = vst [vmem:[%s2046_s4 + $0x28] sm:$0xff] %v1213_v30   ;;  %v1208_v24 = vpack.c.bf16 %v949_v41, %v948_v60  ;;  %v938_v23 = vadd.f32 %v2073_v2, %v886_v27  ;;  %v889_v34 = vadd.f32 %v1414_v53, %v792_v0  ;;  %v848_v46 = vpop.f32.mrf.mxu0  ;;  %v936_v5 = vadd.f32 %v2075_v3, %v878_v43 }
 0x132   :  { %1189 = vst [vmem:[%s2046_s4] sm:$0xff] %v1188_v57   ;;  %v928_v59 = vadd.f32 %v2074_v58, %v846_v52  ;;  %v931_v49 = vadd.f32 %v1168_v31, %v857_v8  ;;  %v849_v51 = vadd.f32 %v848_v46, %v752_v55  ;;  %v880_v1 = vpop.f32.mrf.mxu1 }
 0x133   :  { %1235 = vst [vmem:[%s2046_s4 + $0x20] sm:$0xff] %v1208_v24   ;;  %v939_v38 = vadd.f32 %v2076_v4, %v889_v34  ;;  %v881_v42 = vadd.f32 %v880_v1, %v784_v48  ;;  %v954_v17 = vmax.f32 %v938_v23, 0.0  ;;  %v952_v40 = vmax.f32 %v936_v5, 0.0 }
 0x134   :  { %v947_v13 = vmax.f32 %v931_v49, 0.0  ;;  %v929_v44 = vadd.f32 %v1164_v45, %v849_v51  ;;  %v944_v7 = vmax.f32 %v928_v59, 0.0 }
 0x135   :  { %v955_v31 = vmax.f32 %v939_v38, 0.0  ;;  %v937_v20 = vadd.f32 %v1180_v47, %v881_v42 }
 0x136   :  { %v1203_v21 = vpack.c.bf16 %v947_v13, %v946_v12  ;;  %v945_v32 = vmax.f32 %v929_v44, 0.0 }
 0x137   :  { %v1223_v29 = vpack.c.bf16 %v955_v31, %v954_v17  ;;  %v953_v18 = vmax.f32 %v937_v20, 0.0 }
 0x138   :  { %1234 = vst [vmem:[%s2046_s4 + $0x18] sm:$0xff] %v1203_v21   ;;  %v1198_v19 = vpack.c.bf16 %v945_v32, %v944_v7 }
 0x139   :  { %1238 = vst [vmem:[%s2046_s4 + $0x38] sm:$0xff] %v1223_v29   ;;  %v1218_v26 = vpack.c.bf16 %v953_v18, %v952_v40 }
 0x13a   :  { %1233 = vst [vmem:[%s2046_s4 + $0x10] sm:$0xff] %v1198_v19  }
 0x13b   :  { %1237 = vst [vmem:[%s2046_s4 + $0x30] sm:$0xff] %v1218_v26  }

// kernel: resnet_arcface_forward.28
= control target key start
LH: loop header
LB: loop body
LE: loop exit
PB: predicated region body
PF: predicated region fallthrough
CT: control target
= control target key end

     0   :  { %s1667_s1 = inlined_call_operand.vmem [shape: bf16[1152,128], index: 1, kind: input, shape index: {}]   ;;  %s1668_s0 = inlined_call_operand.vmem [shape: bf16[32,1152], index: 0, kind: input, shape index: {}]   ;;  %s1669_s2 = inlined_call_operand.vmem [shape: f32[1,128], index: 2, kind: input, shape index: {}]   ;;  %s1670_s3 = inlined_call_operand.vmem [shape: bf16[32,128], index: 3, kind: input, shape index: {}]   ;;  %s1671_s4 = inlined_call_operand.vmem [shape: bf16[32,128], index: 4, kind: output, shape index: {}]  }
   0x1   :  { %v1259_v0 = vld [vmem:[%s1667_s1 + $0x78] sm:$0xff]   ;;  %v1263_v4 = vld [vmem:[%s1667_s1 + $0x70] sm:$0xff]   ;;  %v1267_v8 = vld [vmem:[%s1667_s1 + $0x68] sm:$0xff]  }
   0x2   :  { %v1260_v1 = vld [vmem:[%s1667_s1 + $0x38] sm:$0xff]   ;;  %1117 = vmatprep.subr.bf16.mxu0 %v1259_v0  ;;  %v1264_v5 = vld [vmem:[%s1667_s1 + $0x30] sm:$0xff]   ;;  %v1268_v9 = vld [vmem:[%s1667_s1 + $0x28] sm:$0xff]  }
   0x3   :  { %v1261_v2 = vld [vmem:[%s1667_s1 + $0xf8] sm:$0xff]   ;;  %1118 = vmatpush3.bf16.msra.mxu0 %v1260_v1  ;;  %v1265_v6 = vld [vmem:[%s1667_s1 + $0xf0] sm:$0xff]   ;;  %v1269_v10 = vld [vmem:[%s1667_s1 + $0xe8] sm:$0xff]  }
   0x4   :  { %v1262_v3 = vld [vmem:[%s1667_s1 + $0xb8] sm:$0xff]   ;;  %1145 = vmatprep.subr.bf16.mxu1 %v1261_v2  ;;  %1119 = vmatprep.subr.bf16.mxu0 %v1263_v4  ;;  %v1266_v7 = vld [vmem:[%s1667_s1 + $0xb0] sm:$0xff]   ;;  %v1270_v11 = vld [vmem:[%s1667_s1 + $0xa8] sm:$0xff]  }
   0x5   :  { %1146 = vmatpush3.bf16.msra.mxu1 %v1262_v3  ;;  %v1271_v12 = vld [vmem:[%s1667_s1 + $0x60] sm:$0xff]   ;;  %v1275_v16 = vld [vmem:[%s1667_s1 + $0x58] sm:$0xff]   ;;  %v1279_v20 = vld [vmem:[%s1667_s1 + $0x50] sm:$0xff]  }
   0x6   :  { %1147 = vmatprep.subr.bf16.mxu1 %v1265_v6  ;;  %v1272_v13 = vld [vmem:[%s1667_s1 + $0x20] sm:$0xff]   ;;  %v1276_v17 = vld [vmem:[%s1667_s1 + $0x18] sm:$0xff]   ;;  %v1280_v21 = vld [vmem:[%s1667_s1 + $0x10] sm:$0xff]  }
   0x7   :  { %1120 = vmatpush3.bf16.msra.mxu0 %v1264_v5  ;;  %v1273_v14 = vld [vmem:[%s1667_s1 + $0xe0] sm:$0xff]   ;;  %v1277_v18 = vld [vmem:[%s1667_s1 + $0xd8] sm:$0xff]   ;;  %v1281_v22 = vld [vmem:[%s1667_s1 + $0xd0] sm:$0xff]  }
   0x8   :  { %1121 = vmatprep.subr.bf16.mxu0 %v1267_v8  ;;  %v1274_v15 = vld [vmem:[%s1667_s1 + $0xa0] sm:$0xff]   ;;  %v1278_v19 = vld [vmem:[%s1667_s1 + $0x98] sm:$0xff]   ;;  %v1282_v23 = vld [vmem:[%s1667_s1 + $0x90] sm:$0xff]  }
   0x9   :  { %1148 = vmatpush3.bf16.msra.mxu1 %v1266_v7  ;;  %v1283_v24 = vld [vmem:[%s1667_s1 + $0x48] sm:$0xff]   ;;  %v1287_v28 = vld [vmem:[%s1667_s1 + $0x40] sm:$0xff]   ;;  %v1294_v34 = vld [vmem:[%s1667_s1 + $0x178] sm:$0xff]  }
   0xa   :  { %1149 = vmatprep.subr.bf16.mxu1 %v1269_v10  ;;  %v1284_v25 = vld [vmem:[%s1667_s1 + $0x8] sm:$0xff]   ;;  %v1288_v29 = vld [vmem:[%s1667_s1] sm:$0xff]   ;;  %v1298_v37 = vld [vmem:[%s1667_s1 + $0x138] sm:$0xff]  }
   0xb   :  { %1122 = vmatpush3.bf16.msra.mxu0 %v1268_v9  ;;  %v1285_v26 = vld [vmem:[%s1667_s1 + $0xc8] sm:$0xff]   ;;  %v1289_v30 = vld [vmem:[%s1667_s1 + $0xc0] sm:$0xff]   ;;  %v1299_v38 = vld [vmem:[%s1667_s1 + $0x1f8] sm:$0xff]  }
   0xc   :  { %1123 = vmatprep.subr.bf16.mxu0 %v1271_v12  ;;  %v1286_v27 = vld [vmem:[%s1667_s1 + $0x88] sm:$0xff]   ;;  %v1290_v31 = vld [vmem:[%s1668_s0] ss:$36 sps:$4 sm:$0xff]   ;;  %v1300_v39 = vld [vmem:[%s1667_s1 + $0x1b8] sm:$0xff]  }
   0xd   :  { %1150 = vmatpush3.bf16.msra.mxu1 %v1270_v11  ;;  %v1292_v32 = vld [vmem:[%s1668_s0 + $0x4] ss:$36 sps:$4 sm:$0xff]   ;;  %v1297_v36 = vld [vmem:[%s1668_s0 + $0xc] ss:$36 sps:$4 sm:$0xff]   ;;  %v1313_v52 = vld [vmem:[%s1667_s1 + $0x158] sm:$0xff]  }
   0xe   :  { %1151 = vmatprep.subr.bf16.mxu1 %v1273_v14  ;;  %v1293_v33 = vld [vmem:[%s1667_s1 + $0x80] sm:$0xff]   ;;  %745 = vmatprep.mubr.bf16.mxu0 %v1292_v32  ;;  %v1295_v35 = vld [vmem:[%s1668_s0 + $0x8] ss:$36 sps:$4 sm:$0xff]   ;;  %v1301_v40 = vld [vmem:[%s1667_s1 + $0x170] sm:$0xff]  }
   0xf   :  { %1124 = vmatpush3.bf16.msra.mxu0 %v1272_v13  ;;  %794 = vmatprep.mubr.bf16.mxu1 %v1297_v36  ;;  %v1302_v41 = vld [vmem:[%s1667_s1 + $0x130] sm:$0xff]   ;;  %v1305_v44 = vld [vmem:[%s1667_s1 + $0x168] sm:$0xff]   ;;  %v1309_v48 = vld [vmem:[%s1667_s1 + $0x160] sm:$0xff]  }
  0x10   :  { %1125 = vmatprep.subr.bf16.mxu0 %v1275_v16  ;;  %v1303_v42 = vld [vmem:[%s1667_s1 + $0x1f0] sm:$0xff]   ;;  %v1306_v45 = vld [vmem:[%s1667_s1 + $0x128] sm:$0xff]   ;;  %v1310_v49 = vld [vmem:[%s1667_s1 + $0x120] sm:$0xff]  }
  0x11   :  { %1152 = vmatpush3.bf16.msra.mxu1 %v1274_v15  ;;  %v1304_v43 = vld [vmem:[%s1667_s1 + $0x1b0] sm:$0xff]   ;;  %v1307_v46 = vld [vmem:[%s1667_s1 + $0x1e8] sm:$0xff]   ;;  %v1311_v50 = vld [vmem:[%s1667_s1 + $0x1e0] sm:$0xff]  }
  0x12   :  { %1153 = vmatprep.subr.bf16.mxu1 %v1277_v18  ;;  %v1308_v47 = vld [vmem:[%s1667_s1 + $0x1a8] sm:$0xff]   ;;  %v1312_v51 = vld [vmem:[%s1667_s1 + $0x1a0] sm:$0xff]   ;;  %v1314_v53 = vld [vmem:[%s1667_s1 + $0x118] sm:$0xff]  }
  0x13   :  { %1126 = vmatpush3.bf16.msra.mxu0 %v1276_v17  ;;  %v1315_v54 = vld [vmem:[%s1668_s0 + $0x4c] ss:$36 sps:$4 sm:$0xff]   ;;  %v1317_v55 = vld [vmem:[%s1667_s1 + $0x1d8] sm:$0xff]   ;;  %v1331_v4 = vld [vmem:[%s1667_s1 + $0x140] sm:$0xff]  }
  0x14   :  { %1127 = vmatprep.subr.bf16.mxu0 %v1279_v20  ;;  %v1318_v56 = vld [vmem:[%s1668_s0 + $0x48] ss:$36 sps:$4 sm:$0xff]   ;;  %v1319_v57 = vld [vmem:[%s1667_s1 + $0x198] sm:$0xff]   ;;  %v1322_v59 = vld [vmem:[%s1667_s1 + $0x150] sm:$0xff]  }
  0x15   :  { %1154 = vmatpush3.bf16.msra.mxu1 %v1278_v19  ;;  %v1320_v58 = vld [vmem:[%s1668_s0 + $0x54] ss:$36 sps:$4 sm:$0xff]   ;;  %v1327_v0 = vld [vmem:[%s1667_s1 + $0x148] sm:$0xff]   ;;  %v1332_v5 = vld [vmem:[%s1667_s1 + $0x100] sm:$0xff]  }
  0x16   :  { %1155 = vmatprep.subr.bf16.mxu1 %v1281_v22  ;;  %v1323_v60 = vld [vmem:[%s1668_s0 + $0x50] ss:$36 sps:$4 sm:$0xff]   ;;  %v1328_v1 = vld [vmem:[%s1667_s1 + $0x108] sm:$0xff]   ;;  %v1333_v6 = vld [vmem:[%s1667_s1 + $0x1c0] sm:$0xff]  }
  0x17   :  { %1128 = vmatpush3.bf16.msra.mxu0 %v1280_v21  ;;  %v1324_v61 = vld [vmem:[%s1667_s1 + $0x110] sm:$0xff]   ;;  %v1329_v2 = vld [vmem:[%s1667_s1 + $0x1c8] sm:$0xff]   ;;  %v1337_v9 = vld [vmem:[%s1667_s1 + $0x180] sm:$0xff]  }
  0x18   :  { %1129 = vmatprep.subr.bf16.mxu0 %v1283_v24  ;;  %v1325_v62 = vld [vmem:[%s1667_s1 + $0x1d0] sm:$0xff]   ;;  %v1330_v3 = vld [vmem:[%s1667_s1 + $0x188] sm:$0xff]   ;;  %v1338_v10 = vld [vmem:[%s1667_s1 + $0x238] sm:$0xff]  }
  0x19   :  { %1156 = vmatpush3.bf16.msra.mxu1 %v1282_v23  ;;  %v1326_v63 = vld [vmem:[%s1667_s1 + $0x190] sm:$0xff]   ;;  %v1339_v11 = vld [vmem:[%s1668_s0 + $0x18] ss:$36 sps:$4 sm:$0xff]   ;;  %v1346_v16 = vld [vmem:[%s1667_s1 + $0x228] sm:$0xff]  }
  0x1a   :  { %1157 = vmatprep.subr.bf16.mxu1 %v1285_v26  ;;  %v1334_v7 = vld [vmem:[%s1668_s0 + $0x10] ss:$36 sps:$4 sm:$0xff]   ;;  %v1341_v12 = vld [vmem:[%s1668_s0 + $0x1c] ss:$36 sps:$4 sm:$0xff]   ;;  %v1347_v17 = vld [vmem:[%s1668_s0 + $0x64] ss:$36 sps:$4 sm:$0xff]  }
  0x1b   :  { %1130 = vmatpush3.bf16.msra.mxu0 %v1284_v25  ;;  %v1336_v8 = vld [vmem:[%s1668_s0 + $0x14] ss:$36 sps:$4 sm:$0xff]   ;;  %v1343_v14 = vld [vmem:[%s1668_s0 + $0x5c] ss:$36 sps:$4 sm:$0xff]   ;;  %v1353_v23 = vld [vmem:[%s1667_s1 + $0x208] sm:$0xff]  }
  0x1c   :  { %1131 = vmatprep.subr.bf16.mxu0 %v1287_v28  ;;  %v1342_v13 = vld [vmem:[%s1667_s1 + $0x230] sm:$0xff]   ;;  %v1345_v15 = vld [vmem:[%s1668_s0 + $0x58] ss:$36 sps:$4 sm:$0xff]   ;;  %v1349_v18 = vld [vmem:[%s1668_s0 + $0x60] ss:$36 sps:$4 sm:$0xff]  }
  0x1d   :  { %1158 = vmatpush3.bf16.msra.mxu1 %v1286_v27  ;;  %v1350_v19 = vld [vmem:[%s1667_s1 + $0x220] sm:$0xff]   ;;  %v1351_v20 = vld [vmem:[%s1667_s1 + $0x218] sm:$0xff]   ;;  %v1352_v22 = vld [vmem:[%s1667_s1 + $0x210] sm:$0xff]  }
  0x1e   :  { %1159 = vmatprep.subr.bf16.mxu1 %v1289_v30  ;;  %v1355_v21 = vld [vmem:[%s1668_s0 + $0x20] ss:$36 sps:$4 sm:$0xff]   ;;  %v1356_v25 = vld [vmem:[%s1668_s0 + $0x68] ss:$36 sps:$4 sm:$0xff]  }
  0x1f   :  { %1132 = vmatpush3.bf16.msra.mxu0 %v1288_v29  ;;  %v1354_v24 = vld [vmem:[%s1667_s1 + $0x200] sm:$0xff]  }
  0x20   :  { %1173 = vmatprep.subr.bf16.mxu0 %v1294_v34 }
  0x21   :  { %1160 = vmatpush3.bf16.msra.mxu1 %v1293_v33 }
  0x22   :  { %746 = vmatmul.mubr.bf16.vlgmr.msra.gmra.mxu0 %v1290_v31  ;;  %1201 = vmatprep.subr.bf16.mxu1 %v1299_v38 }
  0x23   :  { %1174 = vmatpush3.bf16.msra.mxu0 %v1298_v37  ;;  %753 = vmatprep.mubr.bf16.mxu0 %v1315_v54 }
  0x24   :  { %795 = vmatmul.mubr.bf16.vlgmr.msra.gmra.mxu1 %v1295_v35  ;;  %1175 = vmatprep.subr.bf16.mxu0 %v1301_v40 }
  0x25   :  { %1202 = vmatpush3.bf16.msra.mxu1 %v1300_v39  ;;  %802 = vmatprep.mubr.bf16.mxu1 %v1320_v58 }
  0x26   :  { %1203 = vmatprep.subr.bf16.mxu1 %v1303_v42 }
  0x27   :  { %1176 = vmatpush3.bf16.msra.mxu0 %v1302_v41 }
  0x28   :  { %1177 = vmatprep.subr.bf16.mxu0 %v1305_v44 }
  0x29   :  { %1204 = vmatpush3.bf16.msra.mxu1 %v1304_v43 }
  0x2a   :  { %1205 = vmatprep.subr.bf16.mxu1 %v1307_v46  ;;  %754 = vmatmul.mubr.bf16.gmra.mxu0 %v1318_v56 }
  0x2b   :  { %1178 = vmatpush3.bf16.msra.mxu0 %v1306_v45  ;;  %843 = vmatprep.mubr.bf16.mxu0 %v1336_v8 }
  0x2c   :  { %1179 = vmatprep.subr.bf16.mxu0 %v1309_v48  ;;  %803 = vmatmul.mubr.bf16.gmra.mxu1 %v1323_v60 }
  0x2d   :  { %1206 = vmatpush3.bf16.msra.mxu1 %v1308_v47  ;;  %892 = vmatprep.mubr.bf16.mxu1 %v1341_v12 }
  0x2e   :  { %1207 = vmatprep.subr.bf16.mxu1 %v1311_v50 }
  0x2f   :  { %1180 = vmatpush3.bf16.msra.mxu0 %v1310_v49 }
  0x30   :  { %1181 = vmatprep.subr.bf16.mxu0 %v1313_v52 }
  0x31   :  { %1208 = vmatpush3.bf16.msra.mxu1 %v1312_v51 }
  0x32   :  { %1209 = vmatprep.subr.bf16.mxu1 %v1317_v55  ;;  %v998_v55 = vld [vmem:[%s1669_s2] ss:$0 sm:$0xff] }
  0x33   :  { %1182 = vmatpush3.bf16.msra.mxu0 %v1314_v53 }
  0x34   :  { %1183 = vmatprep.subr.bf16.mxu0 %v1322_v59 }
  0x35   :  { %1210 = vmatpush3.bf16.msra.mxu1 %v1319_v57 }
  0x36   :  { %1211 = vmatprep.subr.bf16.mxu1 %v1325_v62 }
  0x37   :  { %1184 = vmatpush3.bf16.msra.mxu0 %v1324_v61 }
  0x38   :  { %1185 = vmatprep.subr.bf16.mxu0 %v1327_v0 }
  0x39   :  { %1212 = vmatpush3.bf16.msra.mxu1 %v1326_v63 }
  0x3a   :  { %1213 = vmatprep.subr.bf16.mxu1 %v1329_v2 }
  0x3b   :  { %1186 = vmatpush3.bf16.msra.mxu0 %v1328_v1 }
  0x3c   :  { %1187 = vmatprep.subr.bf16.mxu0 %v1331_v4 }
  0x3d   :  { %1214 = vmatpush3.bf16.msra.mxu1 %v1330_v3 }
  0x3e   :  { %1215 = vmatprep.subr.bf16.mxu1 %v1333_v6 }
  0x3f   :  { %1188 = vmatpush3.bf16.msra.mxu0 %v1332_v5 }
  0x40   :  { %1239 = vmatprep.subr.bf16.mxu0 %v1338_v10 }
  0x41   :  { %1216 = vmatpush3.bf16.msra.mxu1 %v1337_v9 }
  0x42   :  { %844 = vmatmul.mubr.bf16.vlgmr.msra.gmra.mxu0 %v1334_v7 }
  0x43   :  { %1240 = vmatpush3.bf16.msra.mxu0 %v1338_v10  ;;  %851 = vmatprep.mubr.bf16.mxu0 %v1343_v14 }
  0x44   :  { %893 = vmatmul.mubr.bf16.vlgmr.msra.gmra.mxu1 %v1339_v11  ;;  %1241 = vmatprep.subr.bf16.mxu0 %v1342_v13 }
  0x45   :  { %900 = vmatprep.mubr.bf16.mxu1 %v1347_v17 }
  0x47   :  { %1242 = vmatpush3.bf16.msra.mxu0 %v1342_v13 }
  0x48   :  { %1243 = vmatprep.subr.bf16.mxu0 %v1346_v16 }
  0x4a   :  { %852 = vmatmul.mubr.bf16.gmra.mxu0 %v1345_v15 }
  0x4b   :  { %1244 = vmatpush3.bf16.msra.mxu0 %v1346_v16  ;;  %1255 = vmatprep.mubr.bf16.mxu0 %v1355_v21 }
  0x4c   :  { %901 = vmatmul.mubr.bf16.gmra.mxu1 %v1349_v18  ;;  %1245 = vmatprep.subr.bf16.mxu0 %v1350_v19  ;;  %v1115_v18 = vld [vmem:[%s1670_s3 + $0x8] sm:$0xff]  }
  0x4f   :  { %1246 = vmatpush3.bf16.msra.mxu0 %v1350_v19 }
  0x50   :  { %1247 = vmatprep.subr.bf16.mxu0 %v1351_v20 }
  0x53   :  { %1248 = vmatpush3.bf16.msra.mxu0 %v1351_v20 }
  0x54   :  { %1249 = vmatprep.subr.bf16.mxu0 %v1352_v22 }
  0x57   :  { %1250 = vmatpush3.bf16.msra.mxu0 %v1352_v22 }
  0x58   :  { %1251 = vmatprep.subr.bf16.mxu0 %v1353_v23 }
  0x5b   :  { %1252 = vmatpush3.bf16.msra.mxu0 %v1353_v23 }
  0x5c   :  { %1253 = vmatprep.subr.bf16.mxu0 %v1354_v24 }
  0x5f   :  { %1254 = vmatpush3.bf16.msra.mxu0 %v1354_v24  ;;  %v1103_v24 = vunpack.c.l.bf16 %v1115_v18 }
  0x62   :  { %1256 = vmatmul.mubr.bf16.vlgmr.msra.gmra.mxu0 %v1356_v25  ;;  %v1098_v25 = vld [vmem:[%s1670_s3] sm:$0xff]  }
  0xe2   :  { %v1133_v26 = vpop.f32.mrf.mxu0 }
  0xe4   :  { %v1161_v27 = vpop.f32.mrf.mxu1  ;;  %v1134_v28 = vpop.f32.mrf.mxu0 }
  0xe5   :  { %v1135_v54 = vadd.f32 %v1134_v28, %v1133_v26 }
  0xe6   :  { %v1162_v29 = vpop.f32.mrf.mxu1  ;;  %v1136_v30 = vpop.f32.mrf.mxu0 }
  0xe7   :  { %v748_v61 = vadd.f32 %v1135_v54, %v998_v55  ;;  %v1163_v62 = vadd.f32 %v1162_v29, %v1161_v27 }
  0xe8   :  { %v1164_v31 = vpop.f32.mrf.mxu1  ;;  %v1137_v32 = vpop.f32.mrf.mxu0 }
  0xe9   :  { %v1138_v63 = vadd.f32 %v1137_v32, %v1136_v30  ;;  %v797_v7 = vadd.f32 %v1163_v62, %v748_v61  ;;  %v1099_v32 = vunpack.c.l.bf16 %v1098_v25 }
  0xea   :  { %v1139_v33 = vpop.f32.mrf.mxu0  ;;  %v1165_v34 = vpop.f32.mrf.mxu1 }
  0xeb   :  { %v751_v8 = vadd.f32 %v1138_v63, %v998_v55  ;;  %v1166_v9 = vadd.f32 %v1165_v34, %v1164_v31  ;;  %v1104_v34 = vunpack.c.h.bf16 %v1115_v18 }
  0xec   :  { %v1167_v35 = vpop.f32.mrf.mxu1  ;;  %v1140_v36 = vpop.f32.mrf.mxu0 }
  0xed   :  { %v1141_v53 = vadd.f32 %v1140_v36, %v1139_v33  ;;  %v800_v19 = vadd.f32 %v1166_v9, %v751_v8 }
  0xee   :  { %v1168_v37 = vpop.f32.mrf.mxu1  ;;  %v1142_v38 = vpop.f32.mrf.mxu0 }
  0xef   :  { %v756_v58 = vadd.f32 %v1141_v53, %v998_v55  ;;  %v1169_v59 = vadd.f32 %v1168_v37, %v1167_v35 }
  0xf0   :  { %v1170_v39 = vpop.f32.mrf.mxu1  ;;  %v1143_v40 = vpop.f32.mrf.mxu0 }
  0xf1   :  { %v1144_v60 = vadd.f32 %v1143_v40, %v1142_v38  ;;  %v805_v3 = vadd.f32 %v1169_v59, %v756_v58 }
  0xf2   :  { %v1171_v42 = vpop.f32.mrf.mxu1 }
  0xf3   :  { %v759_v4 = vadd.f32 %v1144_v60, %v998_v55  ;;  %v1172_v5 = vadd.f32 %v1171_v42, %v1170_v39  ;;  %v1100_v39 = vunpack.c.h.bf16 %v1098_v25 }
  0xf5   :  { %v808_v14 = vadd.f32 %v1172_v5, %v759_v4 }
 0x102   :  { %v1189_v41 = vpop.f32.mrf.mxu0 }
 0x104   :  { %v1190_v43 = vpop.f32.mrf.mxu0  ;;  %v1217_v44 = vpop.f32.mrf.mxu1 }
 0x105   :  { %v1191_v6 = vadd.f32 %v1190_v43, %v1189_v41 }
 0x106   :  { %v1192_v45 = vpop.f32.mrf.mxu0  ;;  %v1218_v46 = vpop.f32.mrf.mxu1 }
 0x107   :  { %v846_v15 = vadd.f32 %v1191_v6, %v797_v7  ;;  %v1219_v16 = vadd.f32 %v1218_v46, %v1217_v44 }
 0x108   :  { %v1193_v47 = vpop.f32.mrf.mxu0  ;;  %v1220_v48 = vpop.f32.mrf.mxu1 }
 0x109   :  { %v1194_v17 = vadd.f32 %v1193_v47, %v1192_v45  ;;  %v895_v29 = vadd.f32 %v1219_v16, %v846_v15 }
 0x10a   :  { %v1195_v49 = vpop.f32.mrf.mxu0  ;;  %v1221_v50 = vpop.f32.mrf.mxu1 }
 0x10b   :  { %v849_v26 = vadd.f32 %v1194_v17, %v800_v19  ;;  %v1222_v27 = vadd.f32 %v1221_v50, %v1220_v48 }
 0x10c   :  { %v1196_v51 = vpop.f32.mrf.mxu0  ;;  %v1223_v52 = vpop.f32.mrf.mxu1 }
 0x10d   :  { %v1197_v0 = vadd.f32 %v1196_v51, %v1195_v49  ;;  %v898_v38 = vadd.f32 %v1222_v27, %v849_v26 }
 0x10e   :  { %v1198_v56 = vpop.f32.mrf.mxu0  ;;  %v1224_v57 = vpop.f32.mrf.mxu1 }
 0x10f   :  { %v854_v10 = vadd.f32 %v1197_v0, %v805_v3  ;;  %v1225_v11 = vadd.f32 %v1224_v57, %v1223_v52 }
 0x110   :  { %v1199_v1 = vpop.f32.mrf.mxu0  ;;  %v1226_v2 = vpop.f32.mrf.mxu1 }
 0x111   :  { %v1200_v12 = vadd.f32 %v1199_v1, %v1198_v56  ;;  %v903_v22 = vadd.f32 %v1225_v11, %v854_v10 }
 0x112   :  { %v1227_v13 = vpop.f32.mrf.mxu1 }
 0x113   :  { %v857_v20 = vadd.f32 %v1200_v12, %v808_v14  ;;  %v1228_v21 = vadd.f32 %v1227_v13, %v1226_v2 }
 0x115   :  { %v906_v33 = vadd.f32 %v1228_v21, %v857_v20 }
 0x122   :  { %v1257_v23 = vpop.f32.mrf.mxu0 }
 0x123   :  { %v952_v28 = vadd.f32 %v1257_v23, %v903_v22 }
 0x124   :  { %v943_v30 = vpop.f32.mrf.mxu0 }
 0x125   :  { %v944_v31 = vadd.f32 %v943_v30, %v895_v29  ;;  %v968_v36 = vadd.f32 %v1103_v24, %v952_v28 }
 0x126   :  { %v1258_v35 = vpop.f32.mrf.mxu0 }
 0x127   :  { %v955_v37 = vadd.f32 %v1258_v35, %v906_v33  ;;  %v966_v41 = vadd.f32 %v1099_v32, %v944_v31  ;;  %v972_v44 = vmax.f32 %v968_v36, 0.0 }
 0x128   :  { %v946_v40 = vpop.f32.mrf.mxu0 }
 0x129   :  { %v969_v42 = vadd.f32 %v1104_v34, %v955_v37  ;;  %v947_v43 = vadd.f32 %v946_v40, %v898_v38  ;;  %v970_v47 = vmax.f32 %v966_v41, 0.0 }
 0x12b   :  { %v973_v45 = vmax.f32 %v969_v42, 0.0  ;;  %v967_v46 = vadd.f32 %v1100_v39, %v947_v43 }
 0x12d   :  { %v1113_v48 = vpack.c.bf16 %v973_v45, %v972_v44  ;;  %v971_v49 = vmax.f32 %v967_v46, 0.0 }
 0x12f   :  { %1116 = vst [vmem:[%s1671_s4 + $0x8] sm:$0xff] %v1113_v48   ;;  %v1108_v50 = vpack.c.bf16 %v971_v49, %v970_v47 }
 0x131   :  { %1109 = vst [vmem:[%s1671_s4] sm:$0xff] %v1108_v50  }

// kernel: resnet_arcface_forward.26
= control target key start
LH: loop header
LB: loop body
LE: loop exit
PB: predicated region body
PF: predicated region fallthrough
CT: control target
= control target key end

     0   :  { %s970_s1 = inlined_call_operand.vmem [shape: bf16[640,128], index: 1, kind: input, shape index: {}]   ;;  %s971_s0 = inlined_call_operand.vmem [shape: bf16[32,640], index: 0, kind: input, shape index: {}]   ;;  %s972_s2 = inlined_call_operand.vmem [shape: f32[1,128], index: 2, kind: input, shape index: {}]   ;;  %s973_s3 = inlined_call_operand.vmem [shape: bf16[32,128], index: 3, kind: output, shape index: {}]  }
   0x1   :  { %v737_v0 = vld [vmem:[%s970_s1 + $0x78] sm:$0xff]   ;;  %v741_v4 = vld [vmem:[%s970_s1 + $0x70] sm:$0xff]   ;;  %v745_v8 = vld [vmem:[%s970_s1 + $0x68] sm:$0xff]  }
   0x2   :  { %v738_v1 = vld [vmem:[%s970_s1 + $0x38] sm:$0xff]   ;;  %651 = vmatprep.subr.bf16.mxu0 %v737_v0  ;;  %v742_v5 = vld [vmem:[%s970_s1 + $0x30] sm:$0xff]   ;;  %v746_v9 = vld [vmem:[%s970_s1 + $0x28] sm:$0xff]  }
   0x3   :  { %v739_v2 = vld [vmem:[%s970_s1 + $0xf8] sm:$0xff]   ;;  %652 = vmatpush3.bf16.msra.mxu0 %v738_v1  ;;  %v743_v6 = vld [vmem:[%s970_s1 + $0xf0] sm:$0xff]   ;;  %v747_v10 = vld [vmem:[%s970_s1 + $0xe8] sm:$0xff]  }
   0x4   :  { %v740_v3 = vld [vmem:[%s970_s1 + $0xb8] sm:$0xff]   ;;  %679 = vmatprep.subr.bf16.mxu1 %v739_v2  ;;  %653 = vmatprep.subr.bf16.mxu0 %v741_v4  ;;  %v744_v7 = vld [vmem:[%s970_s1 + $0xb0] sm:$0xff]   ;;  %v748_v11 = vld [vmem:[%s970_s1 + $0xa8] sm:$0xff]  }
   0x5   :  { %680 = vmatpush3.bf16.msra.mxu1 %v740_v3  ;;  %v749_v12 = vld [vmem:[%s970_s1 + $0x60] sm:$0xff]   ;;  %v753_v16 = vld [vmem:[%s970_s1 + $0x58] sm:$0xff]   ;;  %v757_v20 = vld [vmem:[%s970_s1 + $0x50] sm:$0xff]  }
   0x6   :  { %681 = vmatprep.subr.bf16.mxu1 %v743_v6  ;;  %v750_v13 = vld [vmem:[%s970_s1 + $0x20] sm:$0xff]   ;;  %v754_v17 = vld [vmem:[%s970_s1 + $0x18] sm:$0xff]   ;;  %v758_v21 = vld [vmem:[%s970_s1 + $0x10] sm:$0xff]  }
   0x7   :  { %654 = vmatpush3.bf16.msra.mxu0 %v742_v5  ;;  %v751_v14 = vld [vmem:[%s970_s1 + $0xe0] sm:$0xff]   ;;  %v755_v18 = vld [vmem:[%s970_s1 + $0xd8] sm:$0xff]   ;;  %v759_v22 = vld [vmem:[%s970_s1 + $0xd0] sm:$0xff]  }
   0x8   :  { %655 = vmatprep.subr.bf16.mxu0 %v745_v8  ;;  %v752_v15 = vld [vmem:[%s970_s1 + $0xa0] sm:$0xff]   ;;  %v756_v19 = vld [vmem:[%s970_s1 + $0x98] sm:$0xff]   ;;  %v760_v23 = vld [vmem:[%s970_s1 + $0x90] sm:$0xff]  }
   0x9   :  { %682 = vmatpush3.bf16.msra.mxu1 %v744_v7  ;;  %v761_v24 = vld [vmem:[%s970_s1 + $0x48] sm:$0xff]   ;;  %v765_v28 = vld [vmem:[%s970_s1 + $0x40] sm:$0xff]   ;;  %v772_v34 = vld [vmem:[%s970_s1 + $0x138] sm:$0xff]  }
   0xa   :  { %683 = vmatprep.subr.bf16.mxu1 %v747_v10  ;;  %v762_v25 = vld [vmem:[%s970_s1 + $0x8] sm:$0xff]   ;;  %v766_v29 = vld [vmem:[%s970_s1] sm:$0xff]   ;;  %v776_v37 = vld [vmem:[%s970_s1 + $0x130] sm:$0xff]  }
   0xb   :  { %656 = vmatpush3.bf16.msra.mxu0 %v746_v9  ;;  %v763_v26 = vld [vmem:[%s970_s1 + $0xc8] sm:$0xff]   ;;  %v767_v30 = vld [vmem:[%s970_s1 + $0xc0] sm:$0xff]   ;;  %v779_v44 = vld [vmem:[%s970_s1 + $0x118] sm:$0xff]  }
   0xc   :  { %657 = vmatprep.subr.bf16.mxu0 %v749_v12  ;;  %v764_v27 = vld [vmem:[%s970_s1 + $0x88] sm:$0xff]   ;;  %v768_v31 = vld [vmem:[%s971_s0] ss:$20 sps:$4 sm:$0xff]   ;;  %v770_v32 = vld [vmem:[%s971_s0 + $0x4] ss:$20 sps:$4 sm:$0xff]  }
   0xd   :  { %684 = vmatpush3.bf16.msra.mxu1 %v748_v11  ;;  %v771_v33 = vld [vmem:[%s970_s1 + $0x80] sm:$0xff]   ;;  %438 = vmatprep.mubr.bf16.mxu0 %v770_v32  ;;  %v773_v35 = vld [vmem:[%s971_s0 + $0x8] ss:$20 sps:$4 sm:$0xff]   ;;  %v786_v46 = vld [vmem:[%s970_s1 + $0x110] sm:$0xff]  }
   0xe   :  { %685 = vmatprep.subr.bf16.mxu1 %v751_v14  ;;  %v775_v36 = vld [vmem:[%s971_s0 + $0xc] ss:$20 sps:$4 sm:$0xff]   ;;  %v782_v41 = vld [vmem:[%s971_s0 + $0x28] ss:$20 sps:$4 sm:$0xff]   ;;  %v785_v43 = vld [vmem:[%s971_s0 + $0x30] ss:$20 sps:$4 sm:$0xff]  }
   0xf   :  { %658 = vmatpush3.bf16.msra.mxu0 %v750_v13  ;;  %487 = vmatprep.mubr.bf16.mxu1 %v775_v36  ;;  %v777_v38 = vld [vmem:[%s970_s1 + $0x128] sm:$0xff]   ;;  %v778_v39 = vld [vmem:[%s970_s1 + $0x120] sm:$0xff]  }
  0x10   :  { %659 = vmatprep.subr.bf16.mxu0 %v753_v16  ;;  %v780_v40 = vld [vmem:[%s971_s0 + $0x2c] ss:$20 sps:$4 sm:$0xff]   ;;  %v783_v42 = vld [vmem:[%s971_s0 + $0x34] ss:$20 sps:$4 sm:$0xff]   ;;  %v789_v45 = vld [vmem:[%s971_s0 + $0x10] ss:$20 sps:$4 sm:$0xff]  }
  0x11   :  { %686 = vmatpush3.bf16.msra.mxu1 %v752_v15  ;;  %v787_v47 = vld [vmem:[%s970_s1 + $0x108] sm:$0xff]   ;;  %v788_v48 = vld [vmem:[%s970_s1 + $0x100] sm:$0xff]  }
  0x12   :  { %687 = vmatprep.subr.bf16.mxu1 %v755_v18  ;;  %v790_v49 = vld [vmem:[%s971_s0 + $0x38] ss:$20 sps:$4 sm:$0xff]   ;;  %v581_v4 = vld [vmem:[%s972_s2] ss:$0 sm:$0xff] }
  0x13   :  { %660 = vmatpush3.bf16.msra.mxu0 %v754_v17 }
  0x14   :  { %661 = vmatprep.subr.bf16.mxu0 %v757_v20 }
  0x15   :  { %688 = vmatpush3.bf16.msra.mxu1 %v756_v19 }
  0x16   :  { %689 = vmatprep.subr.bf16.mxu1 %v759_v22 }
  0x17   :  { %662 = vmatpush3.bf16.msra.mxu0 %v758_v21 }
  0x18   :  { %663 = vmatprep.subr.bf16.mxu0 %v761_v24 }
  0x19   :  { %690 = vmatpush3.bf16.msra.mxu1 %v760_v23 }
  0x1a   :  { %691 = vmatprep.subr.bf16.mxu1 %v763_v26 }
  0x1b   :  { %664 = vmatpush3.bf16.msra.mxu0 %v762_v25 }
  0x1c   :  { %665 = vmatprep.subr.bf16.mxu0 %v765_v28 }
  0x1d   :  { %692 = vmatpush3.bf16.msra.mxu1 %v764_v27 }
  0x1e   :  { %693 = vmatprep.subr.bf16.mxu1 %v767_v30 }
  0x1f   :  { %666 = vmatpush3.bf16.msra.mxu0 %v766_v29 }
  0x20   :  { %717 = vmatprep.subr.bf16.mxu0 %v772_v34 }
  0x21   :  { %694 = vmatpush3.bf16.msra.mxu1 %v771_v33 }
  0x22   :  { %439 = vmatmul.mubr.bf16.vlgmr.msra.gmra.mxu0 %v768_v31 }
  0x23   :  { %718 = vmatpush3.bf16.msra.mxu0 %v772_v34  ;;  %446 = vmatprep.mubr.bf16.mxu0 %v780_v40 }
  0x24   :  { %488 = vmatmul.mubr.bf16.vlgmr.msra.gmra.mxu1 %v773_v35  ;;  %719 = vmatprep.subr.bf16.mxu0 %v776_v37 }
  0x25   :  { %495 = vmatprep.mubr.bf16.mxu1 %v783_v42 }
  0x27   :  { %720 = vmatpush3.bf16.msra.mxu0 %v776_v37 }
  0x28   :  { %721 = vmatprep.subr.bf16.mxu0 %v777_v38 }
  0x2a   :  { %447 = vmatmul.mubr.bf16.gmra.mxu0 %v782_v41 }
  0x2b   :  { %722 = vmatpush3.bf16.msra.mxu0 %v777_v38  ;;  %733 = vmatprep.mubr.bf16.mxu0 %v789_v45 }
  0x2c   :  { %723 = vmatprep.subr.bf16.mxu0 %v778_v39  ;;  %496 = vmatmul.mubr.bf16.gmra.mxu1 %v785_v43 }
  0x2f   :  { %724 = vmatpush3.bf16.msra.mxu0 %v778_v39 }
  0x30   :  { %725 = vmatprep.subr.bf16.mxu0 %v779_v44 }
  0x33   :  { %726 = vmatpush3.bf16.msra.mxu0 %v779_v44 }
  0x34   :  { %727 = vmatprep.subr.bf16.mxu0 %v786_v46 }
  0x37   :  { %728 = vmatpush3.bf16.msra.mxu0 %v786_v46 }
  0x38   :  { %729 = vmatprep.subr.bf16.mxu0 %v787_v47 }
  0x3b   :  { %730 = vmatpush3.bf16.msra.mxu0 %v787_v47 }
  0x3c   :  { %731 = vmatprep.subr.bf16.mxu0 %v788_v48 }
  0x3f   :  { %732 = vmatpush3.bf16.msra.mxu0 %v788_v48 }
  0x42   :  { %734 = vmatmul.mubr.bf16.vlgmr.msra.gmra.mxu0 %v790_v49 }
  0xe2   :  { %v667_v50 = vpop.f32.mrf.mxu0 }
  0xe4   :  { %v668_v51 = vpop.f32.mrf.mxu0  ;;  %v695_v52 = vpop.f32.mrf.mxu1 }
  0xe5   :  { %v669_v2 = vadd.f32 %v668_v51, %v667_v50 }
  0xe6   :  { %v670_v53 = vpop.f32.mrf.mxu0  ;;  %v696_v54 = vpop.f32.mrf.mxu1 }
  0xe7   :  { %v441_v9 = vadd.f32 %v669_v2, %v581_v4  ;;  %v697_v10 = vadd.f32 %v696_v54, %v695_v52 }
  0xe8   :  { %v671_v55 = vpop.f32.mrf.mxu0  ;;  %v698_v56 = vpop.f32.mrf.mxu1 }
  0xe9   :  { %v672_v6 = vadd.f32 %v671_v55, %v670_v53  ;;  %v490_v19 = vadd.f32 %v697_v10, %v441_v9 }
  0xea   :  { %v673_v57 = vpop.f32.mrf.mxu0  ;;  %v699_v58 = vpop.f32.mrf.mxu1 }
  0xeb   :  { %v444_v14 = vadd.f32 %v672_v6, %v581_v4  ;;  %v700_v15 = vadd.f32 %v699_v58, %v698_v56 }
  0xec   :  { %v674_v59 = vpop.f32.mrf.mxu0  ;;  %v701_v60 = vpop.f32.mrf.mxu1 }
  0xed   :  { %v675_v1 = vadd.f32 %v674_v59, %v673_v57  ;;  %v493_v24 = vadd.f32 %v700_v15, %v444_v14 }
  0xee   :  { %v676_v61 = vpop.f32.mrf.mxu0  ;;  %v702_v62 = vpop.f32.mrf.mxu1 }
  0xef   :  { %v449_v7 = vadd.f32 %v675_v1, %v581_v4  ;;  %v703_v8 = vadd.f32 %v702_v62, %v701_v60 }
  0xf0   :  { %v677_v63 = vpop.f32.mrf.mxu0  ;;  %v704_v0 = vpop.f32.mrf.mxu1 }
  0xf1   :  { %v678_v3 = vadd.f32 %v677_v63, %v676_v61  ;;  %v498_v16 = vadd.f32 %v703_v8, %v449_v7 }
  0xf2   :  { %v705_v5 = vpop.f32.mrf.mxu1 }
  0xf3   :  { %v452_v11 = vadd.f32 %v678_v3, %v581_v4  ;;  %v706_v12 = vadd.f32 %v705_v5, %v704_v0 }
  0xf5   :  { %v501_v20 = vadd.f32 %v706_v12, %v452_v11 }
 0x102   :  { %v735_v13 = vpop.f32.mrf.mxu0 }
 0x103   :  { %v547_v18 = vadd.f32 %v735_v13, %v498_v16 }
 0x104   :  { %v538_v17 = vpop.f32.mrf.mxu0 }
 0x105   :  { %v539_v22 = vadd.f32 %v538_v17, %v490_v19  ;;  %v555_v26 = vmax.f32 %v547_v18, 0.0 }
 0x106   :  { %v736_v21 = vpop.f32.mrf.mxu0 }
 0x107   :  { %v550_v23 = vadd.f32 %v736_v21, %v501_v20  ;;  %v553_v29 = vmax.f32 %v539_v22, 0.0 }
 0x108   :  { %v541_v25 = vpop.f32.mrf.mxu0 }
 0x109   :  { %v556_v27 = vmax.f32 %v550_v23, 0.0  ;;  %v542_v28 = vadd.f32 %v541_v25, %v493_v24 }
 0x10b   :  { %v648_v30 = vpack.c.bf16 %v556_v27, %v555_v26  ;;  %v554_v31 = vmax.f32 %v542_v28, 0.0 }
 0x10d   :  { %650 = vst [vmem:[%s973_s3 + $0x8] sm:$0xff] %v648_v30   ;;  %v643_v32 = vpack.c.bf16 %v554_v31, %v553_v29 }
 0x10f   :  { %644 = vst [vmem:[%s973_s3] sm:$0xff] %v643_v32  }

// kernel: resnet_arcface_forward.27
= control target key start
LH: loop header
LB: loop body
LE: loop exit
PB: predicated region body
PF: predicated region fallthrough
CT: control target
= control target key end

     0   :  { %s304_s1 = inlined_call_operand.vmem [shape: bf16[128,128], index: 1, kind: input, shape index: {}]   ;;  %s305_s0 = inlined_call_operand.vmem [shape: bf16[32,128], index: 0, kind: input, shape index: {}]   ;;  %s306_s2 = inlined_call_operand.vmem [shape: f32[1,128], index: 2, kind: input, shape index: {}]   ;;  %s307_s3 = inlined_call_operand.vmem [shape: bf16[32,128], index: 3, kind: output, shape index: {}]  }
   0x1   :  { %v235_v0 = vld [vmem:[%s304_s1 + $0x38] sm:$0xff]   ;;  %v236_v1 = vld [vmem:[%s304_s1 + $0x30] sm:$0xff]   ;;  %v237_v2 = vld [vmem:[%s304_s1 + $0x28] sm:$0xff]  }
   0x2   :  { %215 = vmatprep.subr.bf16.mxu0 %v235_v0  ;;  %v238_v3 = vld [vmem:[%s304_s1 + $0x20] sm:$0xff]   ;;  %v239_v5 = vld [vmem:[%s304_s1 + $0x18] sm:$0xff]   ;;  %v240_v6 = vld [vmem:[%s304_s1 + $0x10] sm:$0xff]  }
   0x3   :  { %216 = vmatpush3.bf16.msra.mxu0 %v235_v0  ;;  %v243_v4 = vld [vmem:[%s305_s0] sm:$0xff]   ;;  %v241_v7 = vld [vmem:[%s304_s1 + $0x8] sm:$0xff]  }
   0x4   :  { %217 = vmatprep.subr.bf16.mxu0 %v236_v1  ;;  %231 = vmatprep.mubr.bf16.mxu0 %v243_v4  ;;  %v242_v8 = vld [vmem:[%s304_s1] sm:$0xff]   ;;  %v244_v9 = vld [vmem:[%s305_s0 + $0x8] sm:$0xff]  }
   0x5   :  { %v175_v11 = vld [vmem:[%s306_s2] ss:$0 sm:$0xff] }
   0x7   :  { %218 = vmatpush3.bf16.msra.mxu0 %v236_v1 }
   0x8   :  { %219 = vmatprep.subr.bf16.mxu0 %v237_v2 }
   0xb   :  { %220 = vmatpush3.bf16.msra.mxu0 %v237_v2 }
   0xc   :  { %221 = vmatprep.subr.bf16.mxu0 %v238_v3 }
   0xf   :  { %222 = vmatpush3.bf16.msra.mxu0 %v238_v3 }
  0x10   :  { %223 = vmatprep.subr.bf16.mxu0 %v239_v5 }
  0x13   :  { %224 = vmatpush3.bf16.msra.mxu0 %v239_v5 }
  0x14   :  { %225 = vmatprep.subr.bf16.mxu0 %v240_v6 }
  0x17   :  { %226 = vmatpush3.bf16.msra.mxu0 %v240_v6 }
  0x18   :  { %227 = vmatprep.subr.bf16.mxu0 %v241_v7 }
  0x1b   :  { %228 = vmatpush3.bf16.msra.mxu0 %v241_v7 }
  0x1c   :  { %229 = vmatprep.subr.bf16.mxu0 %v242_v8 }
  0x1f   :  { %230 = vmatpush3.bf16.msra.mxu0 %v242_v8 }
  0x22   :  { %232 = vmatmul.mubr.bf16.vlgmr.msra.gmra.mxu0 %v244_v9 }
  0xe2   :  { %v233_v10 = vpop.f32.mrf.mxu0 }
  0xe3   :  { %v145_v14 = vadd.f32 %v233_v10, %v175_v11 }
  0xe4   :  { %v136_v12 = vpop.f32.mrf.mxu0 }
  0xe5   :  { %v137_v17 = vadd.f32 %v175_v11, %v136_v12 }
  0xe6   :  { %v234_v13 = vpop.f32.mrf.mxu0 }
  0xe7   :  { %v148_v15 = vadd.f32 %v234_v13, %v175_v11 }
  0xe8   :  { %v139_v16 = vpop.f32.mrf.mxu0 }
  0xe9   :  { %v202_v18 = vpack.c.bf16 %v148_v15, %v145_v14  ;;  %v140_v19 = vadd.f32 %v175_v11, %v139_v16 }
  0xeb   :  { %204 = vst [vmem:[%s307_s3 + $0x8] sm:$0xff] %v202_v18   ;;  %v197_v20 = vpack.c.bf16 %v140_v19, %v137_v17 }
  0xed   :  { %198 = vst [vmem:[%s307_s3] sm:$0xff] %v197_v20  }

// kernel: resnet_arcface_forward.29
= control target key start
LH: loop header
LB: loop body
LE: loop exit
PB: predicated region body
PF: predicated region fallthrough
CT: control target
= control target key end

     0   :  { %s1632_s1 = inlined_call_operand.vmem [shape: bf16[1152,128], index: 1, kind: input, shape index: {}]   ;;  %s1633_s0 = inlined_call_operand.vmem [shape: bf16[32,1152], index: 0, kind: input, shape index: {}]   ;;  %s1634_s2 = inlined_call_operand.vmem [shape: f32[1,128], index: 2, kind: input, shape index: {}]   ;;  %s1635_s3 = inlined_call_operand.vmem [shape: bf16[32,128], index: 3, kind: output, shape index: {}]  }
   0x1   :  { %v1235_v0 = vld [vmem:[%s1632_s1 + $0x78] sm:$0xff]   ;;  %v1239_v4 = vld [vmem:[%s1632_s1 + $0x70] sm:$0xff]   ;;  %v1243_v8 = vld [vmem:[%s1632_s1 + $0x68] sm:$0xff]  }
   0x2   :  { %v1236_v1 = vld [vmem:[%s1632_s1 + $0x38] sm:$0xff]   ;;  %1093 = vmatprep.subr.bf16.mxu0 %v1235_v0  ;;  %v1240_v5 = vld [vmem:[%s1632_s1 + $0x30] sm:$0xff]   ;;  %v1244_v9 = vld [vmem:[%s1632_s1 + $0x28] sm:$0xff]  }
   0x3   :  { %v1237_v2 = vld [vmem:[%s1632_s1 + $0xf8] sm:$0xff]   ;;  %1094 = vmatpush3.bf16.msra.mxu0 %v1236_v1  ;;  %v1241_v6 = vld [vmem:[%s1632_s1 + $0xf0] sm:$0xff]   ;;  %v1245_v10 = vld [vmem:[%s1632_s1 + $0xe8] sm:$0xff]  }
   0x4   :  { %v1238_v3 = vld [vmem:[%s1632_s1 + $0xb8] sm:$0xff]   ;;  %1121 = vmatprep.subr.bf16.mxu1 %v1237_v2  ;;  %1095 = vmatprep.subr.bf16.mxu0 %v1239_v4  ;;  %v1242_v7 = vld [vmem:[%s1632_s1 + $0xb0] sm:$0xff]   ;;  %v1246_v11 = vld [vmem:[%s1632_s1 + $0xa8] sm:$0xff]  }
   0x5   :  { %1122 = vmatpush3.bf16.msra.mxu1 %v1238_v3  ;;  %v1247_v12 = vld [vmem:[%s1632_s1 + $0x60] sm:$0xff]   ;;  %v1251_v16 = vld [vmem:[%s1632_s1 + $0x58] sm:$0xff]   ;;  %v1255_v20 = vld [vmem:[%s1632_s1 + $0x50] sm:$0xff]  }
   0x6   :  { %1123 = vmatprep.subr.bf16.mxu1 %v1241_v6  ;;  %v1248_v13 = vld [vmem:[%s1632_s1 + $0x20] sm:$0xff]   ;;  %v1252_v17 = vld [vmem:[%s1632_s1 + $0x18] sm:$0xff]   ;;  %v1256_v21 = vld [vmem:[%s1632_s1 + $0x10] sm:$0xff]  }
   0x7   :  { %1096 = vmatpush3.bf16.msra.mxu0 %v1240_v5  ;;  %v1249_v14 = vld [vmem:[%s1632_s1 + $0xe0] sm:$0xff]   ;;  %v1253_v18 = vld [vmem:[%s1632_s1 + $0xd8] sm:$0xff]   ;;  %v1257_v22 = vld [vmem:[%s1632_s1 + $0xd0] sm:$0xff]  }
   0x8   :  { %1097 = vmatprep.subr.bf16.mxu0 %v1243_v8  ;;  %v1250_v15 = vld [vmem:[%s1632_s1 + $0xa0] sm:$0xff]   ;;  %v1254_v19 = vld [vmem:[%s1632_s1 + $0x98] sm:$0xff]   ;;  %v1258_v23 = vld [vmem:[%s1632_s1 + $0x90] sm:$0xff]  }
   0x9   :  { %1124 = vmatpush3.bf16.msra.mxu1 %v1242_v7  ;;  %v1259_v24 = vld [vmem:[%s1632_s1 + $0x48] sm:$0xff]   ;;  %v1263_v28 = vld [vmem:[%s1632_s1 + $0x40] sm:$0xff]   ;;  %v1270_v34 = vld [vmem:[%s1632_s1 + $0x178] sm:$0xff]  }
   0xa   :  { %1125 = vmatprep.subr.bf16.mxu1 %v1245_v10  ;;  %v1260_v25 = vld [vmem:[%s1632_s1 + $0x8] sm:$0xff]   ;;  %v1264_v29 = vld [vmem:[%s1632_s1] sm:$0xff]   ;;  %v1274_v37 = vld [vmem:[%s1632_s1 + $0x138] sm:$0xff]  }
   0xb   :  { %1098 = vmatpush3.bf16.msra.mxu0 %v1244_v9  ;;  %v1261_v26 = vld [vmem:[%s1632_s1 + $0xc8] sm:$0xff]   ;;  %v1265_v30 = vld [vmem:[%s1632_s1 + $0xc0] sm:$0xff]   ;;  %v1275_v38 = vld [vmem:[%s1632_s1 + $0x1f8] sm:$0xff]  }
   0xc   :  { %1099 = vmatprep.subr.bf16.mxu0 %v1247_v12  ;;  %v1262_v27 = vld [vmem:[%s1632_s1 + $0x88] sm:$0xff]   ;;  %v1266_v31 = vld [vmem:[%s1633_s0] ss:$36 sps:$4 sm:$0xff]   ;;  %v1276_v39 = vld [vmem:[%s1632_s1 + $0x1b8] sm:$0xff]  }
   0xd   :  { %1126 = vmatpush3.bf16.msra.mxu1 %v1246_v11  ;;  %v1268_v32 = vld [vmem:[%s1633_s0 + $0x4] ss:$36 sps:$4 sm:$0xff]   ;;  %v1273_v36 = vld [vmem:[%s1633_s0 + $0xc] ss:$36 sps:$4 sm:$0xff]   ;;  %v1289_v52 = vld [vmem:[%s1632_s1 + $0x158] sm:$0xff]  }
   0xe   :  { %1127 = vmatprep.subr.bf16.mxu1 %v1249_v14  ;;  %v1269_v33 = vld [vmem:[%s1632_s1 + $0x80] sm:$0xff]   ;;  %742 = vmatprep.mubr.bf16.mxu0 %v1268_v32  ;;  %v1271_v35 = vld [vmem:[%s1633_s0 + $0x8] ss:$36 sps:$4 sm:$0xff]   ;;  %v1277_v40 = vld [vmem:[%s1632_s1 + $0x170] sm:$0xff]  }
   0xf   :  { %1100 = vmatpush3.bf16.msra.mxu0 %v1248_v13  ;;  %791 = vmatprep.mubr.bf16.mxu1 %v1273_v36  ;;  %v1278_v41 = vld [vmem:[%s1632_s1 + $0x130] sm:$0xff]   ;;  %v1281_v44 = vld [vmem:[%s1632_s1 + $0x168] sm:$0xff]   ;;  %v1285_v48 = vld [vmem:[%s1632_s1 + $0x160] sm:$0xff]  }
  0x10   :  { %1101 = vmatprep.subr.bf16.mxu0 %v1251_v16  ;;  %v1279_v42 = vld [vmem:[%s1632_s1 + $0x1f0] sm:$0xff]   ;;  %v1282_v45 = vld [vmem:[%s1632_s1 + $0x128] sm:$0xff]   ;;  %v1286_v49 = vld [vmem:[%s1632_s1 + $0x120] sm:$0xff]  }
  0x11   :  { %1128 = vmatpush3.bf16.msra.mxu1 %v1250_v15  ;;  %v1280_v43 = vld [vmem:[%s1632_s1 + $0x1b0] sm:$0xff]   ;;  %v1283_v46 = vld [vmem:[%s1632_s1 + $0x1e8] sm:$0xff]   ;;  %v1287_v50 = vld [vmem:[%s1632_s1 + $0x1e0] sm:$0xff]  }
  0x12   :  { %1129 = vmatprep.subr.bf16.mxu1 %v1253_v18  ;;  %v1284_v47 = vld [vmem:[%s1632_s1 + $0x1a8] sm:$0xff]   ;;  %v1288_v51 = vld [vmem:[%s1632_s1 + $0x1a0] sm:$0xff]   ;;  %v1290_v53 = vld [vmem:[%s1632_s1 + $0x118] sm:$0xff]  }
  0x13   :  { %1102 = vmatpush3.bf16.msra.mxu0 %v1252_v17  ;;  %v1291_v54 = vld [vmem:[%s1633_s0 + $0x4c] ss:$36 sps:$4 sm:$0xff]   ;;  %v1293_v55 = vld [vmem:[%s1632_s1 + $0x1d8] sm:$0xff]   ;;  %v1307_v4 = vld [vmem:[%s1632_s1 + $0x140] sm:$0xff]  }
  0x14   :  { %1103 = vmatprep.subr.bf16.mxu0 %v1255_v20  ;;  %v1294_v56 = vld [vmem:[%s1633_s0 + $0x48] ss:$36 sps:$4 sm:$0xff]   ;;  %v1295_v57 = vld [vmem:[%s1632_s1 + $0x198] sm:$0xff]   ;;  %v1298_v59 = vld [vmem:[%s1632_s1 + $0x150] sm:$0xff]  }
  0x15   :  { %1130 = vmatpush3.bf16.msra.mxu1 %v1254_v19  ;;  %v1296_v58 = vld [vmem:[%s1633_s0 + $0x54] ss:$36 sps:$4 sm:$0xff]   ;;  %v1303_v0 = vld [vmem:[%s1632_s1 + $0x148] sm:$0xff]   ;;  %v1308_v5 = vld [vmem:[%s1632_s1 + $0x100] sm:$0xff]  }
  0x16   :  { %1131 = vmatprep.subr.bf16.mxu1 %v1257_v22  ;;  %v1299_v60 = vld [vmem:[%s1633_s0 + $0x50] ss:$36 sps:$4 sm:$0xff]   ;;  %v1304_v1 = vld [vmem:[%s1632_s1 + $0x108] sm:$0xff]   ;;  %v1309_v6 = vld [vmem:[%s1632_s1 + $0x1c0] sm:$0xff]  }
  0x17   :  { %1104 = vmatpush3.bf16.msra.mxu0 %v1256_v21  ;;  %v1300_v61 = vld [vmem:[%s1632_s1 + $0x110] sm:$0xff]   ;;  %v1305_v2 = vld [vmem:[%s1632_s1 + $0x1c8] sm:$0xff]   ;;  %v1313_v9 = vld [vmem:[%s1632_s1 + $0x180] sm:$0xff]  }
  0x18   :  { %1105 = vmatprep.subr.bf16.mxu0 %v1259_v24  ;;  %v1301_v62 = vld [vmem:[%s1632_s1 + $0x1d0] sm:$0xff]   ;;  %v1306_v3 = vld [vmem:[%s1632_s1 + $0x188] sm:$0xff]   ;;  %v1314_v10 = vld [vmem:[%s1632_s1 + $0x238] sm:$0xff]  }
  0x19   :  { %1132 = vmatpush3.bf16.msra.mxu1 %v1258_v23  ;;  %v1302_v63 = vld [vmem:[%s1632_s1 + $0x190] sm:$0xff]   ;;  %v1315_v11 = vld [vmem:[%s1633_s0 + $0x18] ss:$36 sps:$4 sm:$0xff]   ;;  %v1322_v16 = vld [vmem:[%s1632_s1 + $0x228] sm:$0xff]  }
  0x1a   :  { %1133 = vmatprep.subr.bf16.mxu1 %v1261_v26  ;;  %v1310_v7 = vld [vmem:[%s1633_s0 + $0x10] ss:$36 sps:$4 sm:$0xff]   ;;  %v1317_v12 = vld [vmem:[%s1633_s0 + $0x1c] ss:$36 sps:$4 sm:$0xff]   ;;  %v1323_v17 = vld [vmem:[%s1633_s0 + $0x64] ss:$36 sps:$4 sm:$0xff]  }
  0x1b   :  { %1106 = vmatpush3.bf16.msra.mxu0 %v1260_v25  ;;  %v1312_v8 = vld [vmem:[%s1633_s0 + $0x14] ss:$36 sps:$4 sm:$0xff]   ;;  %v1319_v14 = vld [vmem:[%s1633_s0 + $0x5c] ss:$36 sps:$4 sm:$0xff]   ;;  %v1329_v23 = vld [vmem:[%s1632_s1 + $0x208] sm:$0xff]  }
  0x1c   :  { %1107 = vmatprep.subr.bf16.mxu0 %v1263_v28  ;;  %v1318_v13 = vld [vmem:[%s1632_s1 + $0x230] sm:$0xff]   ;;  %v1321_v15 = vld [vmem:[%s1633_s0 + $0x58] ss:$36 sps:$4 sm:$0xff]   ;;  %v1325_v18 = vld [vmem:[%s1633_s0 + $0x60] ss:$36 sps:$4 sm:$0xff]  }
  0x1d   :  { %1134 = vmatpush3.bf16.msra.mxu1 %v1262_v27  ;;  %v1326_v19 = vld [vmem:[%s1632_s1 + $0x220] sm:$0xff]   ;;  %v1327_v20 = vld [vmem:[%s1632_s1 + $0x218] sm:$0xff]   ;;  %v1328_v22 = vld [vmem:[%s1632_s1 + $0x210] sm:$0xff]  }
  0x1e   :  { %1135 = vmatprep.subr.bf16.mxu1 %v1265_v30  ;;  %v1331_v21 = vld [vmem:[%s1633_s0 + $0x20] ss:$36 sps:$4 sm:$0xff]   ;;  %v1332_v25 = vld [vmem:[%s1633_s0 + $0x68] ss:$36 sps:$4 sm:$0xff]  }
  0x1f   :  { %1108 = vmatpush3.bf16.msra.mxu0 %v1264_v29  ;;  %v1330_v24 = vld [vmem:[%s1632_s1 + $0x200] sm:$0xff]  }
  0x20   :  { %1149 = vmatprep.subr.bf16.mxu0 %v1270_v34 }
  0x21   :  { %1136 = vmatpush3.bf16.msra.mxu1 %v1269_v33 }
  0x22   :  { %743 = vmatmul.mubr.bf16.vlgmr.msra.gmra.mxu0 %v1266_v31  ;;  %1177 = vmatprep.subr.bf16.mxu1 %v1275_v38 }
  0x23   :  { %1150 = vmatpush3.bf16.msra.mxu0 %v1274_v37  ;;  %750 = vmatprep.mubr.bf16.mxu0 %v1291_v54 }
  0x24   :  { %792 = vmatmul.mubr.bf16.vlgmr.msra.gmra.mxu1 %v1271_v35  ;;  %1151 = vmatprep.subr.bf16.mxu0 %v1277_v40 }
  0x25   :  { %1178 = vmatpush3.bf16.msra.mxu1 %v1276_v39  ;;  %799 = vmatprep.mubr.bf16.mxu1 %v1296_v58 }
  0x26   :  { %1179 = vmatprep.subr.bf16.mxu1 %v1279_v42 }
  0x27   :  { %1152 = vmatpush3.bf16.msra.mxu0 %v1278_v41 }
  0x28   :  { %1153 = vmatprep.subr.bf16.mxu0 %v1281_v44 }
  0x29   :  { %1180 = vmatpush3.bf16.msra.mxu1 %v1280_v43 }
  0x2a   :  { %1181 = vmatprep.subr.bf16.mxu1 %v1283_v46  ;;  %751 = vmatmul.mubr.bf16.gmra.mxu0 %v1294_v56 }
  0x2b   :  { %1154 = vmatpush3.bf16.msra.mxu0 %v1282_v45  ;;  %840 = vmatprep.mubr.bf16.mxu0 %v1312_v8 }
  0x2c   :  { %1155 = vmatprep.subr.bf16.mxu0 %v1285_v48  ;;  %800 = vmatmul.mubr.bf16.gmra.mxu1 %v1299_v60 }
  0x2d   :  { %1182 = vmatpush3.bf16.msra.mxu1 %v1284_v47  ;;  %889 = vmatprep.mubr.bf16.mxu1 %v1317_v12 }
  0x2e   :  { %1183 = vmatprep.subr.bf16.mxu1 %v1287_v50 }
  0x2f   :  { %1156 = vmatpush3.bf16.msra.mxu0 %v1286_v49 }
  0x30   :  { %1157 = vmatprep.subr.bf16.mxu0 %v1289_v52 }
  0x31   :  { %1184 = vmatpush3.bf16.msra.mxu1 %v1288_v51 }
  0x32   :  { %1185 = vmatprep.subr.bf16.mxu1 %v1293_v55 }
  0x33   :  { %1158 = vmatpush3.bf16.msra.mxu0 %v1290_v53 }
  0x34   :  { %1159 = vmatprep.subr.bf16.mxu0 %v1298_v59 }
  0x35   :  { %1186 = vmatpush3.bf16.msra.mxu1 %v1295_v57  ;;  %v983_v57 = vld [vmem:[%s1634_s2] ss:$0 sm:$0xff] }
  0x36   :  { %1187 = vmatprep.subr.bf16.mxu1 %v1301_v62 }
  0x37   :  { %1160 = vmatpush3.bf16.msra.mxu0 %v1300_v61 }
  0x38   :  { %1161 = vmatprep.subr.bf16.mxu0 %v1303_v0 }
  0x39   :  { %1188 = vmatpush3.bf16.msra.mxu1 %v1302_v63 }
  0x3a   :  { %1189 = vmatprep.subr.bf16.mxu1 %v1305_v2 }
  0x3b   :  { %1162 = vmatpush3.bf16.msra.mxu0 %v1304_v1 }
  0x3c   :  { %1163 = vmatprep.subr.bf16.mxu0 %v1307_v4 }
  0x3d   :  { %1190 = vmatpush3.bf16.msra.mxu1 %v1306_v3 }
  0x3e   :  { %1191 = vmatprep.subr.bf16.mxu1 %v1309_v6 }
  0x3f   :  { %1164 = vmatpush3.bf16.msra.mxu0 %v1308_v5 }
  0x40   :  { %1215 = vmatprep.subr.bf16.mxu0 %v1314_v10 }
  0x41   :  { %1192 = vmatpush3.bf16.msra.mxu1 %v1313_v9 }
  0x42   :  { %841 = vmatmul.mubr.bf16.vlgmr.msra.gmra.mxu0 %v1310_v7 }
  0x43   :  { %1216 = vmatpush3.bf16.msra.mxu0 %v1314_v10  ;;  %848 = vmatprep.mubr.bf16.mxu0 %v1319_v14 }
  0x44   :  { %890 = vmatmul.mubr.bf16.vlgmr.msra.gmra.mxu1 %v1315_v11  ;;  %1217 = vmatprep.subr.bf16.mxu0 %v1318_v13 }
  0x45   :  { %897 = vmatprep.mubr.bf16.mxu1 %v1323_v17 }
  0x47   :  { %1218 = vmatpush3.bf16.msra.mxu0 %v1318_v13 }
  0x48   :  { %1219 = vmatprep.subr.bf16.mxu0 %v1322_v16 }
  0x4a   :  { %849 = vmatmul.mubr.bf16.gmra.mxu0 %v1321_v15 }
  0x4b   :  { %1220 = vmatpush3.bf16.msra.mxu0 %v1322_v16  ;;  %1231 = vmatprep.mubr.bf16.mxu0 %v1331_v21 }
  0x4c   :  { %898 = vmatmul.mubr.bf16.gmra.mxu1 %v1325_v18  ;;  %1221 = vmatprep.subr.bf16.mxu0 %v1326_v19 }
  0x4f   :  { %1222 = vmatpush3.bf16.msra.mxu0 %v1326_v19 }
  0x50   :  { %1223 = vmatprep.subr.bf16.mxu0 %v1327_v20 }
  0x53   :  { %1224 = vmatpush3.bf16.msra.mxu0 %v1327_v20 }
  0x54   :  { %1225 = vmatprep.subr.bf16.mxu0 %v1328_v22 }
  0x57   :  { %1226 = vmatpush3.bf16.msra.mxu0 %v1328_v22 }
  0x58   :  { %1227 = vmatprep.subr.bf16.mxu0 %v1329_v23 }
  0x5b   :  { %1228 = vmatpush3.bf16.msra.mxu0 %v1329_v23 }
  0x5c   :  { %1229 = vmatprep.subr.bf16.mxu0 %v1330_v24 }
  0x5f   :  { %1230 = vmatpush3.bf16.msra.mxu0 %v1330_v24 }
  0x62   :  { %1232 = vmatmul.mubr.bf16.vlgmr.msra.gmra.mxu0 %v1332_v25 }
  0xe2   :  { %v1109_v26 = vpop.f32.mrf.mxu0 }
  0xe4   :  { %v1137_v27 = vpop.f32.mrf.mxu1  ;;  %v1110_v28 = vpop.f32.mrf.mxu0 }
  0xe5   :  { %v1111_v54 = vadd.f32 %v1110_v28, %v1109_v26 }
  0xe6   :  { %v1138_v29 = vpop.f32.mrf.mxu1  ;;  %v1112_v30 = vpop.f32.mrf.mxu0 }
  0xe7   :  { %v745_v62 = vadd.f32 %v1111_v54, %v983_v57  ;;  %v1139_v63 = vadd.f32 %v1138_v29, %v1137_v27 }
  0xe8   :  { %v1140_v31 = vpop.f32.mrf.mxu1  ;;  %v1113_v32 = vpop.f32.mrf.mxu0 }
  0xe9   :  { %v1114_v59 = vadd.f32 %v1113_v32, %v1112_v30  ;;  %v794_v10 = vadd.f32 %v1139_v63, %v745_v62 }
  0xea   :  { %v1115_v33 = vpop.f32.mrf.mxu0  ;;  %v1141_v34 = vpop.f32.mrf.mxu1 }
  0xeb   :  { %v748_v5 = vadd.f32 %v1114_v59, %v983_v57  ;;  %v1142_v6 = vadd.f32 %v1141_v34, %v1140_v31 }
  0xec   :  { %v1143_v35 = vpop.f32.mrf.mxu1  ;;  %v1116_v36 = vpop.f32.mrf.mxu0 }
  0xed   :  { %v1117_v53 = vadd.f32 %v1116_v36, %v1115_v33  ;;  %v797_v16 = vadd.f32 %v1142_v6, %v748_v5 }
  0xee   :  { %v1144_v37 = vpop.f32.mrf.mxu1  ;;  %v1118_v38 = vpop.f32.mrf.mxu0 }
  0xef   :  { %v753_v60 = vadd.f32 %v1117_v53, %v983_v57  ;;  %v1145_v61 = vadd.f32 %v1144_v37, %v1143_v35 }
  0xf0   :  { %v1146_v39 = vpop.f32.mrf.mxu1  ;;  %v1119_v40 = vpop.f32.mrf.mxu0 }
  0xf1   :  { %v1120_v58 = vadd.f32 %v1119_v40, %v1118_v38  ;;  %v802_v7 = vadd.f32 %v1145_v61, %v753_v60 }
  0xf2   :  { %v1147_v42 = vpop.f32.mrf.mxu1 }
  0xf3   :  { %v756_v2 = vadd.f32 %v1120_v58, %v983_v57  ;;  %v1148_v3 = vadd.f32 %v1147_v42, %v1146_v39 }
  0xf5   :  { %v805_v12 = vadd.f32 %v1148_v3, %v756_v2 }
 0x102   :  { %v1165_v41 = vpop.f32.mrf.mxu0 }
 0x104   :  { %v1166_v43 = vpop.f32.mrf.mxu0  ;;  %v1193_v44 = vpop.f32.mrf.mxu1 }
 0x105   :  { %v1167_v8 = vadd.f32 %v1166_v43, %v1165_v41 }
 0x106   :  { %v1168_v45 = vpop.f32.mrf.mxu0  ;;  %v1194_v46 = vpop.f32.mrf.mxu1 }
 0x107   :  { %v843_v17 = vadd.f32 %v1167_v8, %v794_v10  ;;  %v1195_v18 = vadd.f32 %v1194_v46, %v1193_v44 }
 0x108   :  { %v1169_v47 = vpop.f32.mrf.mxu0  ;;  %v1196_v48 = vpop.f32.mrf.mxu1 }
 0x109   :  { %v1170_v13 = vadd.f32 %v1169_v47, %v1168_v45  ;;  %v892_v27 = vadd.f32 %v1195_v18, %v843_v17 }
 0x10a   :  { %v1171_v49 = vpop.f32.mrf.mxu0  ;;  %v1197_v50 = vpop.f32.mrf.mxu1 }
 0x10b   :  { %v846_v22 = vadd.f32 %v1170_v13, %v797_v16  ;;  %v1198_v23 = vadd.f32 %v1197_v50, %v1196_v48 }
 0x10c   :  { %v1172_v51 = vpop.f32.mrf.mxu0  ;;  %v1199_v52 = vpop.f32.mrf.mxu1 }
 0x10d   :  { %v1173_v4 = vadd.f32 %v1172_v51, %v1171_v49  ;;  %v895_v32 = vadd.f32 %v1198_v23, %v846_v22 }
 0x10e   :  { %v1174_v55 = vpop.f32.mrf.mxu0  ;;  %v1200_v56 = vpop.f32.mrf.mxu1 }
 0x10f   :  { %v851_v14 = vadd.f32 %v1173_v4, %v802_v7  ;;  %v1201_v15 = vadd.f32 %v1200_v56, %v1199_v52 }
 0x110   :  { %v1175_v0 = vpop.f32.mrf.mxu0  ;;  %v1202_v1 = vpop.f32.mrf.mxu1 }
 0x111   :  { %v1176_v9 = vadd.f32 %v1175_v0, %v1174_v55  ;;  %v900_v24 = vadd.f32 %v1201_v15, %v851_v14 }
 0x112   :  { %v1203_v11 = vpop.f32.mrf.mxu1 }
 0x113   :  { %v854_v19 = vadd.f32 %v1176_v9, %v805_v12  ;;  %v1204_v20 = vadd.f32 %v1203_v11, %v1202_v1 }
 0x115   :  { %v903_v28 = vadd.f32 %v1204_v20, %v854_v19 }
 0x122   :  { %v1233_v21 = vpop.f32.mrf.mxu0 }
 0x123   :  { %v949_v26 = vadd.f32 %v1233_v21, %v900_v24 }
 0x124   :  { %v940_v25 = vpop.f32.mrf.mxu0 }
 0x125   :  { %v941_v30 = vadd.f32 %v940_v25, %v892_v27  ;;  %v957_v34 = vmax.f32 %v949_v26, 0.0 }
 0x126   :  { %v1234_v29 = vpop.f32.mrf.mxu0 }
 0x127   :  { %v952_v31 = vadd.f32 %v1234_v29, %v903_v28  ;;  %v955_v37 = vmax.f32 %v941_v30, 0.0 }
 0x128   :  { %v943_v33 = vpop.f32.mrf.mxu0 }
 0x129   :  { %v958_v35 = vmax.f32 %v952_v31, 0.0  ;;  %v944_v36 = vadd.f32 %v943_v33, %v895_v32 }
 0x12b   :  { %v1090_v38 = vpack.c.bf16 %v958_v35, %v957_v34  ;;  %v956_v39 = vmax.f32 %v944_v36, 0.0 }
 0x12d   :  { %1092 = vst [vmem:[%s1635_s3 + $0x8] sm:$0xff] %v1090_v38   ;;  %v1085_v40 = vpack.c.bf16 %v956_v39, %v955_v37 }
 0x12f   :  { %1086 = vst [vmem:[%s1635_s3] sm:$0xff] %v1085_v40  }

// kernel: resnet_arcface_forward.32
= control target key start
LH: loop header
LB: loop body
LE: loop exit
PB: predicated region body
PF: predicated region fallthrough
CT: control target
= control target key end

     0   :  { %v239_v1 = vmov 0   ;;  %v35_v18 = vlaneseq  ;;  %s320_s1 = inlined_call_operand.vmem [shape: bf16[128,256], index: 1, kind: input, shape index: {}]   ;;  %s321_s0 = inlined_call_operand.vmem [shape: bf16[16,128], index: 0, kind: input, shape index: {}]   ;;  %s322_s2 = inlined_call_operand.vmem [shape: f32[1,256], index: 2, kind: input, shape index: {}]   ;;  %s323_s3 = inlined_call_operand.vmem [shape: bf16[16,256], index: 3, kind: output, shape index: {}]  }
   0x1   :  { %v214_v0 = vld [vmem:[%s320_s1 + $0x74] ss:$8 sps:$4 sm:$0xff]   ;;  %163 = vmatprep.mubr.bf16.mxu0 %v239_v1  ;;  %v216_v2 = vld [vmem:[%s320_s1 + $0x70] ss:$8 sps:$4 sm:$0xff]   ;;  %v217_v3 = vld [vmem:[%s320_s1 + $0x64] ss:$8 sps:$4 sm:$0xff]  }
   0x2   :  { %131 = vmatprep.subr.bf16.mxu0 %v214_v0  ;;  %v219_v4 = vld [vmem:[%s320_s1 + $0x60] ss:$8 sps:$4 sm:$0xff]   ;;  %v220_v5 = vld [vmem:[%s320_s1 + $0x54] ss:$8 sps:$4 sm:$0xff]   ;;  %v222_v6 = vld [vmem:[%s320_s1 + $0x50] ss:$8 sps:$4 sm:$0xff]  }
   0x3   :  { %132 = vmatpush1.bf16.msra.mxu0 %v216_v2  ;;  %v223_v7 = vld [vmem:[%s320_s1 + $0x44] ss:$8 sps:$4 sm:$0xff]   ;;  %v225_v8 = vld [vmem:[%s320_s1 + $0x40] ss:$8 sps:$4 sm:$0xff]   ;;  %v226_v9 = vld [vmem:[%s320_s1 + $0x34] ss:$8 sps:$4 sm:$0xff]  }
   0x4   :  { %133 = vmatprep.subr.bf16.mxu0 %v217_v3  ;;  %v228_v10 = vld [vmem:[%s320_s1 + $0x30] ss:$8 sps:$4 sm:$0xff]   ;;  %v229_v11 = vld [vmem:[%s320_s1 + $0x24] ss:$8 sps:$4 sm:$0xff]   ;;  %v231_v12 = vld [vmem:[%s320_s1 + $0x20] ss:$8 sps:$4 sm:$0xff]  }
   0x5   :  { %v232_v13 = vld [vmem:[%s320_s1 + $0x14] ss:$8 sps:$4 sm:$0xff]   ;;  %v234_v14 = vld [vmem:[%s320_s1 + $0x10] ss:$8 sps:$4 sm:$0xff]   ;;  %v235_v15 = vld [vmem:[%s320_s1 + $0x4] ss:$8 sps:$4 sm:$0xff]  }
   0x6   :  { %v237_v16 = vld [vmem:[%s320_s1] ss:$8 sps:$4 sm:$0xff]   ;;  %v36_v19 = vshrl.u32 %v35_v18, 7 }
   0x7   :  { %134 = vmatpush1.bf16.msra.mxu0 %v219_v4  ;;  %v238_v17 = vld [vmem:[%s321_s0] sm:$0xff]  }
   0x8   :  { %135 = vmatprep.subr.bf16.mxu0 %v220_v5  ;;  %v37_v20 = vsub.s32 0, %v36_v19  ;;  %v41_v21 = vsub.s32 1, %v36_v19  ;;  %v33_v22 = vld [vmem:[%s322_s2] sm:$0x3] }
   0xa   :  { %v38_v23 = vrot.slane %v33_v22, %v37_v20  ;;  %v42_v24 = vrot.slane %v33_v22, %v41_v21 }
   0xb   :  { %136 = vmatpush1.bf16.msra.mxu0 %v222_v6 }
   0xc   :  { %137 = vmatprep.subr.bf16.mxu0 %v223_v7 }
   0xf   :  { %138 = vmatpush1.bf16.msra.mxu0 %v225_v8 }
  0x10   :  { %139 = vmatprep.subr.bf16.mxu0 %v226_v9 }
  0x13   :  { %140 = vmatpush1.bf16.msra.mxu0 %v228_v10 }
  0x14   :  { %141 = vmatprep.subr.bf16.mxu0 %v229_v11 }
  0x17   :  { %142 = vmatpush1.bf16.msra.mxu0 %v231_v12 }
  0x18   :  { %143 = vmatprep.subr.bf16.mxu0 %v232_v13 }
  0x1b   :  { %144 = vmatpush1.bf16.msra.mxu0 %v234_v14 }
  0x1c   :  { %145 = vmatprep.subr.bf16.mxu0 %v235_v15 }
  0x1f   :  { %146 = vmatpush1.bf16.msra.mxu0 %v237_v16 }
  0x22   :  { %164 = vmatmul.mubr.bf16.vlgmr.msra.gmra.mxu0 %v238_v17 }
  0xe2   :  { %v165_v25 = vpop.f32.mrf.mxu0 }
  0xe3   :  { %v166_v27 = vadd.f32 %v165_v25, %v38_v23 }
  0xe4   :  { %v167_v26 = vpop.f32.mrf.mxu0 }
  0xe5   :  { %v168_v28 = vadd.f32 %v167_v26, %v42_v24 }
  0xe6   :  { %v169_v29 = vpop.f32.mrf.mxu0 }
  0xe7   :  { %v211_v30 = vpack.c.bf16 %v168_v28, %v166_v27  ;;  %v170_v32 = vadd.f32 %v169_v29, %v38_v23 }
  0xe8   :  { %v171_v31 = vpop.f32.mrf.mxu0 }
  0xe9   :  { %186 = vst [vmem:[%s323_s3] sm:$0xff] %v211_v30  ;;  %v172_v33 = vadd.f32 %v171_v31, %v42_v24 }
  0xeb   :  { %v212_v34 = vpack.c.bf16 %v172_v33, %v170_v32 }
  0xed   :  { %187 = vst [vmem:[%s323_s3 + $0x8] sm:$0xff] %v212_v34 }

// kernel: resnet_arcface_forward.31
= control target key start
LH: loop header
LB: loop body
LE: loop exit
PB: predicated region body
PF: predicated region fallthrough
CT: control target
= control target key end

     0   :  { %s2060_s1 = inlined_call_operand.vmem [shape: bf16[1152,256], index: 1, kind: input, shape index: {}]   ;;  %s2061_s0 = inlined_call_operand.vmem [shape: bf16[16,1152], index: 0, kind: input, shape index: {}]   ;;  %s2062_s2 = inlined_call_operand.vmem [shape: f32[1,256], index: 2, kind: input, shape index: {}]   ;;  %s2063_s3 = inlined_call_operand.vmem [shape: bf16[16,256], index: 3, kind: output, shape index: {}]  }
   0x1   :  { %v1342_v0 = vld [vmem:[%s2060_s1 + $0x74] ss:$8 sps:$4 sm:$0xff]   ;;  %v1344_v1 = vld [vmem:[%s2060_s1 + $0x70] ss:$8 sps:$4 sm:$0xff]   ;;  %v1348_v4 = vld [vmem:[%s2060_s1 + $0x64] ss:$8 sps:$4 sm:$0xff]  }
   0x2   :  { %947 = vmatprep.subr.bf16.mxu0 %v1342_v0  ;;  %v1345_v2 = vld [vmem:[%s2060_s1 + $0x174] ss:$8 sps:$4 sm:$0xff]   ;;  %v1347_v3 = vld [vmem:[%s2060_s1 + $0x170] ss:$8 sps:$4 sm:$0xff]   ;;  %v1350_v5 = vld [vmem:[%s2060_s1 + $0x60] ss:$8 sps:$4 sm:$0xff]  }
   0x3   :  { %948 = vmatpush1.bf16.msra.mxu0 %v1344_v1  ;;  %990 = vmatprep.subr.bf16.mxu1 %v1345_v2  ;;  %v1351_v6 = vld [vmem:[%s2060_s1 + $0x164] ss:$8 sps:$4 sm:$0xff]   ;;  %v1353_v7 = vld [vmem:[%s2060_s1 + $0x160] ss:$8 sps:$4 sm:$0xff]   ;;  %v1354_v8 = vld [vmem:[%s2060_s1 + $0x54] ss:$8 sps:$4 sm:$0xff]  }
   0x4   :  { %991 = vmatpush1.bf16.msra.mxu1 %v1347_v3  ;;  %949 = vmatprep.subr.bf16.mxu0 %v1348_v4  ;;  %v1356_v9 = vld [vmem:[%s2060_s1 + $0x50] ss:$8 sps:$4 sm:$0xff]   ;;  %v1357_v10 = vld [vmem:[%s2060_s1 + $0x154] ss:$8 sps:$4 sm:$0xff]   ;;  %v1360_v11 = vld [vmem:[%s2060_s1 + $0x44] ss:$8 sps:$4 sm:$0xff]  }
   0x5   :  { %992 = vmatprep.subr.bf16.mxu1 %v1351_v6  ;;  %v1359_v12 = vld [vmem:[%s2060_s1 + $0x150] ss:$8 sps:$4 sm:$0xff]   ;;  %v1363_v13 = vld [vmem:[%s2060_s1 + $0x144] ss:$8 sps:$4 sm:$0xff]   ;;  %v1362_v14 = vld [vmem:[%s2060_s1 + $0x40] ss:$8 sps:$4 sm:$0xff]  }
   0x6   :  { %v1366_v15 = vld [vmem:[%s2060_s1 + $0x34] ss:$8 sps:$4 sm:$0xff]   ;;  %v1365_v16 = vld [vmem:[%s2060_s1 + $0x140] ss:$8 sps:$4 sm:$0xff]   ;;  %v1368_v18 = vld [vmem:[%s2060_s1 + $0x30] ss:$8 sps:$4 sm:$0xff]  }
   0x7   :  { %950 = vmatpush1.bf16.msra.mxu0 %v1350_v5  ;;  %v1369_v17 = vld [vmem:[%s2060_s1 + $0x134] ss:$8 sps:$4 sm:$0xff]   ;;  %v1372_v19 = vld [vmem:[%s2060_s1 + $0x24] ss:$8 sps:$4 sm:$0xff]   ;;  %v1371_v20 = vld [vmem:[%s2060_s1 + $0x130] ss:$8 sps:$4 sm:$0xff]  }
   0x8   :  { %951 = vmatprep.subr.bf16.mxu0 %v1354_v8  ;;  %993 = vmatpush1.bf16.msra.mxu1 %v1353_v7  ;;  %v1375_v21 = vld [vmem:[%s2060_s1 + $0x124] ss:$8 sps:$4 sm:$0xff]   ;;  %v1374_v22 = vld [vmem:[%s2060_s1 + $0x20] ss:$8 sps:$4 sm:$0xff]   ;;  %v1378_v23 = vld [vmem:[%s2060_s1 + $0x14] ss:$8 sps:$4 sm:$0xff]  }
   0x9   :  { %994 = vmatprep.subr.bf16.mxu1 %v1357_v10  ;;  %v1377_v24 = vld [vmem:[%s2060_s1 + $0x120] ss:$8 sps:$4 sm:$0xff]   ;;  %v1381_v25 = vld [vmem:[%s2060_s1 + $0x114] ss:$8 sps:$4 sm:$0xff]   ;;  %v1380_v26 = vld [vmem:[%s2060_s1 + $0x10] ss:$8 sps:$4 sm:$0xff]  }
   0xa   :  { %v1384_v27 = vld [vmem:[%s2060_s1 + $0x4] ss:$8 sps:$4 sm:$0xff]   ;;  %v1383_v28 = vld [vmem:[%s2060_s1 + $0x110] ss:$8 sps:$4 sm:$0xff]   ;;  %v1386_v30 = vld [vmem:[%s2060_s1] ss:$8 sps:$4 sm:$0xff]  }
   0xb   :  { %952 = vmatpush1.bf16.msra.mxu0 %v1356_v9  ;;  %v1387_v29 = vld [vmem:[%s2060_s1 + $0x104] ss:$8 sps:$4 sm:$0xff]   ;;  %v1390_v31 = vld [vmem:[%s2060_s1 + $0xf4] ss:$8 sps:$4 sm:$0xff]   ;;  %v1389_v32 = vld [vmem:[%s2060_s1 + $0x100] ss:$8 sps:$4 sm:$0xff]  }
   0xc   :  { %953 = vmatprep.subr.bf16.mxu0 %v1360_v11  ;;  %995 = vmatpush1.bf16.msra.mxu1 %v1359_v12  ;;  %v1393_v33 = vld [vmem:[%s2060_s1 + $0x1f4] ss:$8 sps:$4 sm:$0xff]   ;;  %v1392_v34 = vld [vmem:[%s2060_s1 + $0xf0] ss:$8 sps:$4 sm:$0xff]   ;;  %v1396_v35 = vld [vmem:[%s2060_s1 + $0xe4] ss:$8 sps:$4 sm:$0xff]  }
   0xd   :  { %996 = vmatprep.subr.bf16.mxu1 %v1363_v13  ;;  %v1395_v36 = vld [vmem:[%s2060_s1 + $0x1f0] ss:$8 sps:$4 sm:$0xff]   ;;  %v1399_v37 = vld [vmem:[%s2060_s1 + $0x1e4] ss:$8 sps:$4 sm:$0xff]   ;;  %v1398_v38 = vld [vmem:[%s2060_s1 + $0xe0] ss:$8 sps:$4 sm:$0xff]  }
   0xe   :  { %v1402_v39 = vld [vmem:[%s2060_s1 + $0xd4] ss:$8 sps:$4 sm:$0xff]   ;;  %v1401_v40 = vld [vmem:[%s2060_s1 + $0x1e0] ss:$8 sps:$4 sm:$0xff]   ;;  %v1404_v42 = vld [vmem:[%s2060_s1 + $0xd0] ss:$8 sps:$4 sm:$0xff]  }
   0xf   :  { %954 = vmatpush1.bf16.msra.mxu0 %v1362_v14  ;;  %v1405_v41 = vld [vmem:[%s2060_s1 + $0x1d4] ss:$8 sps:$4 sm:$0xff]   ;;  %v1408_v43 = vld [vmem:[%s2060_s1 + $0xc4] ss:$8 sps:$4 sm:$0xff]   ;;  %v1407_v44 = vld [vmem:[%s2060_s1 + $0x1d0] ss:$8 sps:$4 sm:$0xff]  }
  0x10   :  { %955 = vmatprep.subr.bf16.mxu0 %v1366_v15  ;;  %997 = vmatpush1.bf16.msra.mxu1 %v1365_v16  ;;  %v1411_v45 = vld [vmem:[%s2060_s1 + $0x1c4] ss:$8 sps:$4 sm:$0xff]   ;;  %v1410_v46 = vld [vmem:[%s2060_s1 + $0xc0] ss:$8 sps:$4 sm:$0xff]   ;;  %v1414_v48 = vld [vmem:[%s2060_s1 + $0xb4] ss:$8 sps:$4 sm:$0xff]  }
  0x11   :  { %998 = vmatprep.subr.bf16.mxu1 %v1369_v17  ;;  %v1439_v47 = vld [vmem:[%s2061_s0 + $0x4] ss:$36 sps:$4 sm:$0xff]   ;;  %v1417_v50 = vld [vmem:[%s2060_s1 + $0x1b4] ss:$8 sps:$4 sm:$0xff]   ;;  %v1446_v51 = vld [vmem:[%s2061_s0 + $0xc] ss:$36 sps:$4 sm:$0xff]  }
  0x12   :  { %v1413_v49 = vld [vmem:[%s2060_s1 + $0x1c0] ss:$8 sps:$4 sm:$0xff]   ;;  %979 = vmatprep.mubr.bf16.mxu0 %v1439_v47  ;;  %v1416_v52 = vld [vmem:[%s2060_s1 + $0xb0] ss:$8 sps:$4 sm:$0xff]   ;;  %v1420_v53 = vld [vmem:[%s2060_s1 + $0xa4] ss:$8 sps:$4 sm:$0xff]   ;;  %1022 = vmatprep.mubr.bf16.mxu1 %v1446_v51 }
  0x13   :  { %956 = vmatpush1.bf16.msra.mxu0 %v1368_v18  ;;  %v1419_v54 = vld [vmem:[%s2060_s1 + $0x1b0] ss:$8 sps:$4 sm:$0xff]   ;;  %v1423_v55 = vld [vmem:[%s2060_s1 + $0x1a4] ss:$8 sps:$4 sm:$0xff]   ;;  %v1422_v56 = vld [vmem:[%s2060_s1 + $0xa0] ss:$8 sps:$4 sm:$0xff]  }
  0x14   :  { %957 = vmatprep.subr.bf16.mxu0 %v1372_v19  ;;  %999 = vmatpush1.bf16.msra.mxu1 %v1371_v20  ;;  %v1426_v57 = vld [vmem:[%s2060_s1 + $0x94] ss:$8 sps:$4 sm:$0xff]   ;;  %v1425_v58 = vld [vmem:[%s2060_s1 + $0x1a0] ss:$8 sps:$4 sm:$0xff]   ;;  %v1428_v60 = vld [vmem:[%s2060_s1 + $0x90] ss:$8 sps:$4 sm:$0xff]  }
  0x15   :  { %1000 = vmatprep.subr.bf16.mxu1 %v1375_v21  ;;  %v1429_v59 = vld [vmem:[%s2060_s1 + $0x194] ss:$8 sps:$4 sm:$0xff]   ;;  %v1432_v61 = vld [vmem:[%s2060_s1 + $0x84] ss:$8 sps:$4 sm:$0xff]   ;;  %v1431_v62 = vld [vmem:[%s2060_s1 + $0x190] ss:$8 sps:$4 sm:$0xff]  }
  0x16   :  { %v1435_v63 = vld [vmem:[%s2060_s1 + $0x184] ss:$8 sps:$4 sm:$0xff]   ;;  %v1434_v0 = vld [vmem:[%s2060_s1 + $0x80] ss:$8 sps:$4 sm:$0xff]   ;;  %v1443_v1 = vld [vmem:[%s2060_s1 + $0x274] ss:$8 sps:$4 sm:$0xff]  }
  0x17   :  { %958 = vmatpush1.bf16.msra.mxu0 %v1374_v22  ;;  %v1440_v2 = vld [vmem:[%s2060_s1 + $0x180] ss:$8 sps:$4 sm:$0xff]   ;;  %v1449_v4 = vld [vmem:[%s2060_s1 + $0x374] ss:$8 sps:$4 sm:$0xff]   ;;  %v1441_v5 = vld [vmem:[%s2060_s1 + $0x270] ss:$8 sps:$4 sm:$0xff]  }
  0x18   :  { %959 = vmatprep.subr.bf16.mxu0 %v1378_v23  ;;  %1001 = vmatpush1.bf16.msra.mxu1 %v1377_v24  ;;  %v1437_v3 = vld [vmem:[%s2061_s0] ss:$36 sps:$4 sm:$0xff]   ;;  %v1444_v6 = vld [vmem:[%s2061_s0 + $0x8] ss:$36 sps:$4 sm:$0xff]   ;;  %v1447_v8 = vld [vmem:[%s2060_s1 + $0x370] ss:$8 sps:$4 sm:$0xff]  }
  0x19   :  { %1002 = vmatprep.subr.bf16.mxu1 %v1381_v25  ;;  %v1452_v7 = vld [vmem:[%s2060_s1 + $0x264] ss:$8 sps:$4 sm:$0xff]   ;;  %v1450_v10 = vld [vmem:[%s2060_s1 + $0x260] ss:$8 sps:$4 sm:$0xff]   ;;  %v1458_v11 = vld [vmem:[%s2060_s1 + $0x254] ss:$8 sps:$4 sm:$0xff]  }
  0x1a   :  { %v1455_v9 = vld [vmem:[%s2060_s1 + $0x364] ss:$8 sps:$4 sm:$0xff]   ;;  %v1453_v12 = vld [vmem:[%s2060_s1 + $0x360] ss:$8 sps:$4 sm:$0xff]   ;;  %v1461_v13 = vld [vmem:[%s2060_s1 + $0x354] ss:$8 sps:$4 sm:$0xff]  }
  0x1b   :  { %960 = vmatpush1.bf16.msra.mxu0 %v1380_v26  ;;  %v1456_v14 = vld [vmem:[%s2060_s1 + $0x250] ss:$8 sps:$4 sm:$0xff]   ;;  %v1464_v15 = vld [vmem:[%s2060_s1 + $0x244] ss:$8 sps:$4 sm:$0xff]   ;;  %v1462_v18 = vld [vmem:[%s2060_s1 + $0x240] ss:$8 sps:$4 sm:$0xff]  }
  0x1c   :  { %961 = vmatprep.subr.bf16.mxu0 %v1384_v27  ;;  %1003 = vmatpush1.bf16.msra.mxu1 %v1383_v28  ;;  %v1459_v16 = vld [vmem:[%s2060_s1 + $0x350] ss:$8 sps:$4 sm:$0xff]   ;;  %v1467_v17 = vld [vmem:[%s2060_s1 + $0x344] ss:$8 sps:$4 sm:$0xff]   ;;  %v1470_v19 = vld [vmem:[%s2060_s1 + $0x234] ss:$8 sps:$4 sm:$0xff]  }
  0x1d   :  { %1004 = vmatprep.subr.bf16.mxu1 %v1387_v29  ;;  %v1465_v20 = vld [vmem:[%s2060_s1 + $0x340] ss:$8 sps:$4 sm:$0xff]   ;;  %v1473_v21 = vld [vmem:[%s2060_s1 + $0x334] ss:$8 sps:$4 sm:$0xff]   ;;  %v1468_v22 = vld [vmem:[%s2060_s1 + $0x230] ss:$8 sps:$4 sm:$0xff]  }
  0x1e   :  { %v1476_v23 = vld [vmem:[%s2060_s1 + $0x224] ss:$8 sps:$4 sm:$0xff]   ;;  %v1471_v24 = vld [vmem:[%s2060_s1 + $0x330] ss:$8 sps:$4 sm:$0xff]   ;;  %v1474_v26 = vld [vmem:[%s2060_s1 + $0x220] ss:$8 sps:$4 sm:$0xff]  }
  0x1f   :  { %962 = vmatpush1.bf16.msra.mxu0 %v1386_v30  ;;  %v1479_v25 = vld [vmem:[%s2060_s1 + $0x324] ss:$8 sps:$4 sm:$0xff]   ;;  %v1482_v27 = vld [vmem:[%s2060_s1 + $0x214] ss:$8 sps:$4 sm:$0xff]   ;;  %v1477_v28 = vld [vmem:[%s2060_s1 + $0x320] ss:$8 sps:$4 sm:$0xff]  }
  0x20   :  { %963 = vmatprep.subr.bf16.mxu0 %v1390_v31  ;;  %1005 = vmatpush1.bf16.msra.mxu1 %v1389_v32  ;;  %v1485_v29 = vld [vmem:[%s2060_s1 + $0x314] ss:$8 sps:$4 sm:$0xff]   ;;  %v1480_v30 = vld [vmem:[%s2060_s1 + $0x210] ss:$8 sps:$4 sm:$0xff]   ;;  %v1488_v32 = vld [vmem:[%s2060_s1 + $0x204] ss:$8 sps:$4 sm:$0xff]  }
  0x21   :  { %1006 = vmatprep.subr.bf16.mxu1 %v1393_v33  ;;  %v1483_v31 = vld [vmem:[%s2060_s1 + $0x310] ss:$8 sps:$4 sm:$0xff]   ;;  %v1509_v47 = vld [vmem:[%s2060_s1 + $0x3d4] ss:$8 sps:$4 sm:$0xff]   ;;  %v1515_v51 = vld [vmem:[%s2060_s1 + $0x3c4] ss:$8 sps:$4 sm:$0xff]  }
  0x22   :  { %v1542_v33 = vld [vmem:[%s2061_s0 + $0x14] ss:$36 sps:$4 sm:$0xff]  }
  0x23   :  { %964 = vmatpush2.bf16.msra.mxu0 %v1392_v34  ;;  %v1491_v34 = vld [vmem:[%s2060_s1 + $0x304] ss:$8 sps:$4 sm:$0xff]  }
  0x24   :  { %965 = vmatprep.subr.bf16.mxu0 %v1396_v35  ;;  %1007 = vmatpush2.bf16.msra.mxu1 %v1395_v36  ;;  %v1486_v35 = vld [vmem:[%s2060_s1 + $0x200] ss:$8 sps:$4 sm:$0xff]  }
  0x25   :  { %1008 = vmatprep.subr.bf16.mxu1 %v1399_v37  ;;  %v1548_v36 = vld [vmem:[%s2061_s0 + $0x1c] ss:$36 sps:$4 sm:$0xff]  }
  0x26   :  { %v1494_v37 = vld [vmem:[%s2060_s1 + $0x2f4] ss:$8 sps:$4 sm:$0xff]  }
  0x27   :  { %966 = vmatpush2.bf16.msra.mxu0 %v1398_v38  ;;  %v1489_v38 = vld [vmem:[%s2060_s1 + $0x300] ss:$8 sps:$4 sm:$0xff]  }
  0x28   :  { %967 = vmatprep.subr.bf16.mxu0 %v1402_v39  ;;  %1009 = vmatpush2.bf16.msra.mxu1 %v1401_v40  ;;  %v1497_v39 = vld [vmem:[%s2060_s1 + $0x3f4] ss:$8 sps:$4 sm:$0xff]   ;;  %v1492_v40 = vld [vmem:[%s2060_s1 + $0x2f0] ss:$8 sps:$4 sm:$0xff]  }
  0x29   :  { %1010 = vmatprep.subr.bf16.mxu1 %v1405_v41  ;;  %v1500_v41 = vld [vmem:[%s2060_s1 + $0x2e4] ss:$8 sps:$4 sm:$0xff]  }
  0x2b   :  { %968 = vmatpush2.bf16.msra.mxu0 %v1404_v42  ;;  %v1495_v42 = vld [vmem:[%s2060_s1 + $0x3f0] ss:$8 sps:$4 sm:$0xff]  }
  0x2c   :  { %969 = vmatprep.subr.bf16.mxu0 %v1408_v43  ;;  %1011 = vmatpush2.bf16.msra.mxu1 %v1407_v44  ;;  %v1503_v43 = vld [vmem:[%s2060_s1 + $0x3e4] ss:$8 sps:$4 sm:$0xff]   ;;  %v1498_v44 = vld [vmem:[%s2060_s1 + $0x2e0] ss:$8 sps:$4 sm:$0xff]  }
  0x2d   :  { %1012 = vmatprep.subr.bf16.mxu1 %v1411_v45  ;;  %v1506_v45 = vld [vmem:[%s2060_s1 + $0x2d4] ss:$8 sps:$4 sm:$0xff]  }
  0x2f   :  { %970 = vmatpush2.bf16.msra.mxu0 %v1410_v46  ;;  %v1501_v46 = vld [vmem:[%s2060_s1 + $0x3e0] ss:$8 sps:$4 sm:$0xff]  }
  0x30   :  { %971 = vmatprep.subr.bf16.mxu0 %v1414_v48  ;;  %1013 = vmatpush2.bf16.msra.mxu1 %v1413_v49  ;;  %v1504_v48 = vld [vmem:[%s2060_s1 + $0x2d0] ss:$8 sps:$4 sm:$0xff]   ;;  %v1512_v49 = vld [vmem:[%s2060_s1 + $0x2c4] ss:$8 sps:$4 sm:$0xff]  }
  0x31   :  { %1014 = vmatprep.subr.bf16.mxu1 %v1417_v50  ;;  %v1507_v50 = vld [vmem:[%s2060_s1 + $0x3d0] ss:$8 sps:$4 sm:$0xff]  }
  0x33   :  { %972 = vmatpush2.bf16.msra.mxu0 %v1416_v52  ;;  %v1510_v52 = vld [vmem:[%s2060_s1 + $0x2c0] ss:$8 sps:$4 sm:$0xff]  }
  0x34   :  { %973 = vmatprep.subr.bf16.mxu0 %v1420_v53  ;;  %1015 = vmatpush2.bf16.msra.mxu1 %v1419_v54  ;;  %v1518_v53 = vld [vmem:[%s2060_s1 + $0x2b4] ss:$8 sps:$4 sm:$0xff]   ;;  %v1513_v54 = vld [vmem:[%s2060_s1 + $0x3c0] ss:$8 sps:$4 sm:$0xff]  }
  0x35   :  { %1016 = vmatprep.subr.bf16.mxu1 %v1423_v55  ;;  %v1521_v55 = vld [vmem:[%s2060_s1 + $0x3b4] ss:$8 sps:$4 sm:$0xff]  }
  0x37   :  { %974 = vmatpush2.bf16.msra.mxu0 %v1422_v56  ;;  %v1516_v56 = vld [vmem:[%s2060_s1 + $0x2b0] ss:$8 sps:$4 sm:$0xff]  }
  0x38   :  { %975 = vmatprep.subr.bf16.mxu0 %v1426_v57  ;;  %1017 = vmatpush2.bf16.msra.mxu1 %v1425_v58  ;;  %v1524_v57 = vld [vmem:[%s2060_s1 + $0x2a4] ss:$8 sps:$4 sm:$0xff]   ;;  %v1519_v58 = vld [vmem:[%s2060_s1 + $0x3b0] ss:$8 sps:$4 sm:$0xff]  }
  0x39   :  { %1018 = vmatprep.subr.bf16.mxu1 %v1429_v59  ;;  %v1527_v59 = vld [vmem:[%s2060_s1 + $0x3a4] ss:$8 sps:$4 sm:$0xff]  }
  0x3b   :  { %976 = vmatpush2.bf16.msra.mxu0 %v1428_v60  ;;  %v1522_v60 = vld [vmem:[%s2060_s1 + $0x2a0] ss:$8 sps:$4 sm:$0xff]  }
  0x3c   :  { %977 = vmatprep.subr.bf16.mxu0 %v1432_v61  ;;  %1019 = vmatpush2.bf16.msra.mxu1 %v1431_v62  ;;  %v1530_v61 = vld [vmem:[%s2060_s1 + $0x294] ss:$8 sps:$4 sm:$0xff]   ;;  %v1525_v62 = vld [vmem:[%s2060_s1 + $0x3a0] ss:$8 sps:$4 sm:$0xff]  }
  0x3d   :  { %1020 = vmatprep.subr.bf16.mxu1 %v1435_v63  ;;  %v1533_v63 = vld [vmem:[%s2060_s1 + $0x394] ss:$8 sps:$4 sm:$0xff]  }
  0x3f   :  { %978 = vmatpush2.bf16.msra.mxu0 %v1434_v0  ;;  %v1528_v0 = vld [vmem:[%s2060_s1 + $0x290] ss:$8 sps:$4 sm:$0xff]  }
  0x40   :  { %1033 = vmatprep.subr.bf16.mxu0 %v1443_v1  ;;  %1021 = vmatpush2.bf16.msra.mxu1 %v1440_v2  ;;  %v1536_v1 = vld [vmem:[%s2060_s1 + $0x284] ss:$8 sps:$4 sm:$0xff]   ;;  %v1531_v2 = vld [vmem:[%s2060_s1 + $0x390] ss:$8 sps:$4 sm:$0xff]  }
  0x41   :  { %1076 = vmatprep.subr.bf16.mxu1 %v1449_v4  ;;  %v1534_v4 = vld [vmem:[%s2060_s1 + $0x280] ss:$8 sps:$4 sm:$0xff]  }
  0x42   :  { %980 = vmatmul.mubr.bf16.vlgmr.msra.gmra.mxu0 %v1437_v3  ;;  %v1539_v3 = vld [vmem:[%s2060_s1 + $0x384] ss:$8 sps:$4 sm:$0xff]  }
  0x43   :  { %1034 = vmatpush1.bf16.msra.mxu0 %v1441_v5  ;;  %1023 = vmatmul.mubr.bf16.vlgmr.msra.gmra.mxu1 %v1444_v6  ;;  %v1545_v5 = vld [vmem:[%s2060_s1 + $0x474] ss:$8 sps:$4 sm:$0xff]   ;;  %v1537_v6 = vld [vmem:[%s2060_s1 + $0x380] ss:$8 sps:$4 sm:$0xff]  }
  0x44   :  { %1035 = vmatprep.subr.bf16.mxu0 %v1452_v7  ;;  %1077 = vmatpush1.bf16.msra.mxu1 %v1447_v8  ;;  %v1540_v7 = vld [vmem:[%s2061_s0 + $0x10] ss:$36 sps:$4 sm:$0xff]  }
  0x45   :  { %1078 = vmatprep.subr.bf16.mxu1 %v1455_v9  ;;  %1065 = vmatprep.mubr.bf16.mxu0 %v1542_v33  ;;  %v1543_v8 = vld [vmem:[%s2060_s1 + $0x470] ss:$8 sps:$4 sm:$0xff]  }
  0x46   :  { %1108 = vmatprep.mubr.bf16.mxu1 %v1548_v36  ;;  %v1546_v9 = vld [vmem:[%s2061_s0 + $0x18] ss:$36 sps:$4 sm:$0xff]  }
  0x47   :  { %1036 = vmatpush1.bf16.msra.mxu0 %v1450_v10  ;;  %v1551_v10 = vld [vmem:[%s2060_s1 + $0x464] ss:$8 sps:$4 sm:$0xff]  }
  0x48   :  { %1037 = vmatprep.subr.bf16.mxu0 %v1458_v11  ;;  %1079 = vmatpush1.bf16.msra.mxu1 %v1453_v12  ;;  %v1549_v11 = vld [vmem:[%s2060_s1 + $0x460] ss:$8 sps:$4 sm:$0xff]   ;;  %v1571_v12 = vmov 0  }
  0x49   :  { %1080 = vmatprep.subr.bf16.mxu1 %v1461_v13  ;;  %v1554_v13 = vld [vmem:[%s2060_s1 + $0x454] ss:$8 sps:$4 sm:$0xff]  }
  0x4b   :  { %1038 = vmatpush1.bf16.msra.mxu0 %v1456_v14  ;;  %v1552_v14 = vld [vmem:[%s2060_s1 + $0x450] ss:$8 sps:$4 sm:$0xff]  }
  0x4c   :  { %1039 = vmatprep.subr.bf16.mxu0 %v1464_v15  ;;  %1081 = vmatpush1.bf16.msra.mxu1 %v1459_v16  ;;  %v1557_v15 = vld [vmem:[%s2060_s1 + $0x444] ss:$8 sps:$4 sm:$0xff]   ;;  %v1555_v16 = vld [vmem:[%s2060_s1 + $0x440] ss:$8 sps:$4 sm:$0xff]  }
  0x4d   :  { %1082 = vmatprep.subr.bf16.mxu1 %v1467_v17  ;;  %v1560_v17 = vld [vmem:[%s2060_s1 + $0x434] ss:$8 sps:$4 sm:$0xff]  }
  0x4f   :  { %1040 = vmatpush1.bf16.msra.mxu0 %v1462_v18  ;;  %v1558_v18 = vld [vmem:[%s2060_s1 + $0x430] ss:$8 sps:$4 sm:$0xff]  }
  0x50   :  { %1041 = vmatprep.subr.bf16.mxu0 %v1470_v19  ;;  %1083 = vmatpush1.bf16.msra.mxu1 %v1465_v20  ;;  %v1563_v19 = vld [vmem:[%s2060_s1 + $0x424] ss:$8 sps:$4 sm:$0xff]   ;;  %v1561_v20 = vld [vmem:[%s2060_s1 + $0x420] ss:$8 sps:$4 sm:$0xff]  }
  0x51   :  { %1084 = vmatprep.subr.bf16.mxu1 %v1473_v21  ;;  %v1566_v21 = vld [vmem:[%s2060_s1 + $0x414] ss:$8 sps:$4 sm:$0xff]  }
  0x53   :  { %1042 = vmatpush1.bf16.msra.mxu0 %v1468_v22  ;;  %v1564_v22 = vld [vmem:[%s2060_s1 + $0x410] ss:$8 sps:$4 sm:$0xff]  }
  0x54   :  { %1043 = vmatprep.subr.bf16.mxu0 %v1476_v23  ;;  %1085 = vmatpush1.bf16.msra.mxu1 %v1471_v24  ;;  %v1569_v23 = vld [vmem:[%s2060_s1 + $0x404] ss:$8 sps:$4 sm:$0xff]   ;;  %v1567_v24 = vld [vmem:[%s2060_s1 + $0x400] ss:$8 sps:$4 sm:$0xff]  }
  0x55   :  { %1086 = vmatprep.subr.bf16.mxu1 %v1479_v25  ;;  %v1570_v25 = vld [vmem:[%s2061_s0 + $0x20] ss:$36 sps:$4 sm:$0xff]  }
  0x57   :  { %1044 = vmatpush1.bf16.msra.mxu0 %v1474_v26 }
  0x58   :  { %1045 = vmatprep.subr.bf16.mxu0 %v1482_v27  ;;  %1087 = vmatpush1.bf16.msra.mxu1 %v1477_v28  ;;  %v171_v27 = vlaneseq }
  0x59   :  { %1088 = vmatprep.subr.bf16.mxu1 %v1485_v29 }
  0x5b   :  { %1046 = vmatpush1.bf16.msra.mxu0 %v1480_v30  ;;  %v172_v30 = vshrl.u32 %v171_v27, 7 }
  0x5c   :  { %1047 = vmatprep.subr.bf16.mxu0 %v1488_v32  ;;  %1089 = vmatpush1.bf16.msra.mxu1 %v1483_v31 }
  0x5d   :  { %1090 = vmatprep.subr.bf16.mxu1 %v1491_v34  ;;  %v173_v33 = vsub.s32 0, %v172_v30  ;;  %v169_v34 = vld [vmem:[%s2062_s2] sm:$0x3] }
  0x5f   :  { %1048 = vmatpush1.bf16.msra.mxu0 %v1486_v35  ;;  %v177_v35 = vsub.s32 1, %v172_v30 }
  0x60   :  { %1049 = vmatprep.subr.bf16.mxu0 %v1494_v37  ;;  %1091 = vmatpush1.bf16.msra.mxu1 %v1489_v38  ;;  %v174_v38 = vrot.slane %v169_v34, %v173_v33 }
  0x61   :  { %1092 = vmatprep.subr.bf16.mxu1 %v1497_v39 }
  0x63   :  { %1050 = vmatpush2.bf16.msra.mxu0 %v1492_v40  ;;  %v178_v40 = vrot.slane %v169_v34, %v177_v35 }
  0x64   :  { %1051 = vmatprep.subr.bf16.mxu0 %v1500_v41  ;;  %1093 = vmatpush2.bf16.msra.mxu1 %v1495_v42 }
  0x65   :  { %1094 = vmatprep.subr.bf16.mxu1 %v1503_v43 }
  0x67   :  { %1052 = vmatpush2.bf16.msra.mxu0 %v1498_v44 }
  0x68   :  { %1053 = vmatprep.subr.bf16.mxu0 %v1506_v45  ;;  %1095 = vmatpush2.bf16.msra.mxu1 %v1501_v46 }
  0x69   :  { %1096 = vmatprep.subr.bf16.mxu1 %v1509_v47 }
  0x6b   :  { %1054 = vmatpush2.bf16.msra.mxu0 %v1504_v48 }
  0x6c   :  { %1055 = vmatprep.subr.bf16.mxu0 %v1512_v49  ;;  %1097 = vmatpush2.bf16.msra.mxu1 %v1507_v50 }
  0x6d   :  { %1098 = vmatprep.subr.bf16.mxu1 %v1515_v51 }
  0x6f   :  { %1056 = vmatpush2.bf16.msra.mxu0 %v1510_v52 }
  0x70   :  { %1057 = vmatprep.subr.bf16.mxu0 %v1518_v53  ;;  %1099 = vmatpush2.bf16.msra.mxu1 %v1513_v54 }
  0x71   :  { %1100 = vmatprep.subr.bf16.mxu1 %v1521_v55 }
  0x73   :  { %1058 = vmatpush2.bf16.msra.mxu0 %v1516_v56 }
  0x74   :  { %1059 = vmatprep.subr.bf16.mxu0 %v1524_v57  ;;  %1101 = vmatpush2.bf16.msra.mxu1 %v1519_v58 }
  0x75   :  { %1102 = vmatprep.subr.bf16.mxu1 %v1527_v59 }
  0x77   :  { %1060 = vmatpush2.bf16.msra.mxu0 %v1522_v60 }
  0x78   :  { %1061 = vmatprep.subr.bf16.mxu0 %v1530_v61  ;;  %1103 = vmatpush2.bf16.msra.mxu1 %v1525_v62 }
  0x79   :  { %1104 = vmatprep.subr.bf16.mxu1 %v1533_v63 }
  0x7b   :  { %1062 = vmatpush2.bf16.msra.mxu0 %v1528_v0 }
  0x7c   :  { %1063 = vmatprep.subr.bf16.mxu0 %v1536_v1  ;;  %1105 = vmatpush2.bf16.msra.mxu1 %v1531_v2 }
  0x7d   :  { %1106 = vmatprep.subr.bf16.mxu1 %v1539_v3 }
  0x7f   :  { %1064 = vmatpush2.bf16.msra.mxu0 %v1534_v4 }
  0x80   :  { %1119 = vmatprep.subr.bf16.mxu0 %v1545_v5  ;;  %1107 = vmatpush2.bf16.msra.mxu1 %v1537_v6 }
  0x82   :  { %1066 = vmatmul.mubr.bf16.vlgmr.msra.gmra.mxu0 %v1540_v7 }
  0x83   :  { %1120 = vmatpush1.bf16.msra.mxu0 %v1543_v8  ;;  %1151 = vmatprep.mubr.bf16.mxu0 %v1571_v12 }
  0x84   :  { %1109 = vmatmul.mubr.bf16.vlgmr.msra.gmra.mxu1 %v1546_v9  ;;  %1121 = vmatprep.subr.bf16.mxu0 %v1551_v10 }
  0x87   :  { %1122 = vmatpush1.bf16.msra.mxu0 %v1549_v11 }
  0x88   :  { %1123 = vmatprep.subr.bf16.mxu0 %v1554_v13 }
  0x8b   :  { %1124 = vmatpush1.bf16.msra.mxu0 %v1552_v14 }
  0x8c   :  { %1125 = vmatprep.subr.bf16.mxu0 %v1557_v15 }
  0x8f   :  { %1126 = vmatpush1.bf16.msra.mxu0 %v1555_v16 }
  0x90   :  { %1127 = vmatprep.subr.bf16.mxu0 %v1560_v17 }
  0x93   :  { %1128 = vmatpush1.bf16.msra.mxu0 %v1558_v18 }
  0x94   :  { %1129 = vmatprep.subr.bf16.mxu0 %v1563_v19 }
  0x97   :  { %1130 = vmatpush1.bf16.msra.mxu0 %v1561_v20 }
  0x98   :  { %1131 = vmatprep.subr.bf16.mxu0 %v1566_v21 }
  0x9b   :  { %1132 = vmatpush1.bf16.msra.mxu0 %v1564_v22 }
  0x9c   :  { %1133 = vmatprep.subr.bf16.mxu0 %v1569_v23 }
  0x9f   :  { %1134 = vmatpush1.bf16.msra.mxu0 %v1567_v24 }
  0xa2   :  { %1152 = vmatmul.mubr.bf16.vlgmr.msra.gmra.mxu0 %v1570_v25 }
 0x102   :  { %v981_v26 = vpop.f32.mrf.mxu0 }
 0x103   :  { %v1024_v29 = vpop.f32.mrf.mxu1  ;;  %v982_v42 = vadd.f32 %v981_v26, %v174_v38 }
 0x104   :  { %v983_v28 = vpop.f32.mrf.mxu0 }
 0x105   :  { %v1026_v32 = vpop.f32.mrf.mxu1  ;;  %v984_v45 = vadd.f32 %v983_v28, %v178_v40  ;;  %v1025_v46 = vadd.f32 %v1024_v29, %v982_v42 }
 0x106   :  { %v985_v31 = vpop.f32.mrf.mxu0 }
 0x107   :  { %v1028_v37 = vpop.f32.mrf.mxu1  ;;  %v986_v47 = vadd.f32 %v985_v31, %v174_v38  ;;  %v1027_v50 = vadd.f32 %v1026_v32, %v984_v45 }
 0x108   :  { %v987_v36 = vpop.f32.mrf.mxu0 }
 0x109   :  { %v1030_v41 = vpop.f32.mrf.mxu1  ;;  %v988_v51 = vadd.f32 %v987_v36, %v178_v40  ;;  %v1029_v53 = vadd.f32 %v1028_v37, %v986_v47 }
 0x10b   :  { %v1031_v57 = vadd.f32 %v1030_v41, %v988_v51 }
 0x142   :  { %v1067_v39 = vpop.f32.mrf.mxu0 }
 0x143   :  { %v1068_v52 = vadd.f32 %v1067_v39, %v1025_v46 }
 0x144   :  { %v1069_v43 = vpop.f32.mrf.mxu0  ;;  %v1110_v44 = vpop.f32.mrf.mxu1 }
 0x145   :  { %v1070_v54 = vadd.f32 %v1069_v43, %v1027_v50  ;;  %v1111_v58 = vadd.f32 %v1110_v44, %v1068_v52 }
 0x146   :  { %v1071_v48 = vpop.f32.mrf.mxu0  ;;  %v1112_v49 = vpop.f32.mrf.mxu1 }
 0x147   :  { %v1072_v59 = vadd.f32 %v1071_v48, %v1029_v53  ;;  %v1113_v61 = vadd.f32 %v1112_v49, %v1070_v54 }
 0x148   :  { %v1073_v55 = vpop.f32.mrf.mxu0  ;;  %v1114_v56 = vpop.f32.mrf.mxu1 }
 0x149   :  { %v1074_v62 = vadd.f32 %v1073_v55, %v1031_v57  ;;  %v1115_v2 = vadd.f32 %v1114_v56, %v1072_v59 }
 0x14a   :  { %v1116_v0 = vpop.f32.mrf.mxu1 }
 0x14b   :  { %v1117_v5 = vadd.f32 %v1116_v0, %v1074_v62 }
 0x162   :  { %v1153_v60 = vpop.f32.mrf.mxu0 }
 0x163   :  { %v1154_v63 = vadd.f32 %v1153_v60, %v1111_v58 }
 0x164   :  { %v1155_v1 = vpop.f32.mrf.mxu0 }
 0x165   :  { %v1156_v3 = vadd.f32 %v1155_v1, %v1113_v61  ;;  %v1162_v6 = vmax.f32 %v1154_v63, 0.0 }
 0x166   :  { %v1157_v4 = vpop.f32.mrf.mxu0 }
 0x167   :  { %v1163_v7 = vmax.f32 %v1156_v3, 0.0  ;;  %v1158_v8 = vadd.f32 %v1157_v4, %v1115_v2 }
 0x168   :  { %v1159_v9 = vpop.f32.mrf.mxu0 }
 0x169   :  { %v1339_v10 = vpack.c.bf16 %v1163_v7, %v1162_v6  ;;  %v1160_v11 = vadd.f32 %v1159_v9, %v1117_v5  ;;  %v1164_v12 = vmax.f32 %v1158_v8, 0.0 }
 0x16b   :  { %1178 = vst [vmem:[%s2063_s3] sm:$0xff] %v1339_v10  ;;  %v1165_v13 = vmax.f32 %v1160_v11, 0.0 }
 0x16d   :  { %v1340_v14 = vpack.c.bf16 %v1165_v13, %v1164_v12 }
 0x16f   :  { %1179 = vst [vmem:[%s2063_s3 + $0x8] sm:$0xff] %v1340_v14 }

// kernel: resnet_arcface_forward.33
= control target key start
LH: loop header
LB: loop body
LE: loop exit
PB: predicated region body
PF: predicated region fallthrough
CT: control target
= control target key end

     0   :  { %s4011_s1 = inlined_call_operand.vmem [shape: bf16[2304,256], index: 1, kind: input, shape index: {}]   ;;  %s4012_s0 = inlined_call_operand.vmem [shape: bf16[16,2304], index: 0, kind: input, shape index: {}]   ;;  %s4013_s2 = inlined_call_operand.vmem [shape: f32[1,256], index: 2, kind: input, shape index: {}]   ;;  %s4014_s3 = inlined_call_operand.vmem [shape: bf16[16,256], index: 3, kind: input, shape index: {}]   ;;  %s4015_s4 = inlined_call_operand.vmem [shape: bf16[16,256], index: 4, kind: output, shape index: {}]  }
   0x1   :  { %v2594_v0 = vld [vmem:[%s4011_s1 + $0x74] ss:$8 sps:$4 sm:$0xff]   ;;  %v2596_v1 = vld [vmem:[%s4011_s1 + $0x70] ss:$8 sps:$4 sm:$0xff]   ;;  %v2600_v4 = vld [vmem:[%s4011_s1 + $0x64] ss:$8 sps:$4 sm:$0xff]  }
   0x2   :  { %1865 = vmatprep.subr.bf16.mxu0 %v2594_v0  ;;  %v2597_v2 = vld [vmem:[%s4011_s1 + $0x174] ss:$8 sps:$4 sm:$0xff]   ;;  %v2599_v3 = vld [vmem:[%s4011_s1 + $0x170] ss:$8 sps:$4 sm:$0xff]   ;;  %v2602_v5 = vld [vmem:[%s4011_s1 + $0x60] ss:$8 sps:$4 sm:$0xff]  }
   0x3   :  { %1866 = vmatpush1.bf16.msra.mxu0 %v2596_v1  ;;  %1908 = vmatprep.subr.bf16.mxu1 %v2597_v2  ;;  %v2603_v6 = vld [vmem:[%s4011_s1 + $0x164] ss:$8 sps:$4 sm:$0xff]   ;;  %v2605_v7 = vld [vmem:[%s4011_s1 + $0x160] ss:$8 sps:$4 sm:$0xff]   ;;  %v2606_v8 = vld [vmem:[%s4011_s1 + $0x54] ss:$8 sps:$4 sm:$0xff]  }
   0x4   :  { %1909 = vmatpush1.bf16.msra.mxu1 %v2599_v3  ;;  %1867 = vmatprep.subr.bf16.mxu0 %v2600_v4  ;;  %v2608_v9 = vld [vmem:[%s4011_s1 + $0x50] ss:$8 sps:$4 sm:$0xff]   ;;  %v2609_v10 = vld [vmem:[%s4011_s1 + $0x154] ss:$8 sps:$4 sm:$0xff]   ;;  %v2612_v11 = vld [vmem:[%s4011_s1 + $0x44] ss:$8 sps:$4 sm:$0xff]  }
   0x5   :  { %1910 = vmatprep.subr.bf16.mxu1 %v2603_v6  ;;  %v2611_v12 = vld [vmem:[%s4011_s1 + $0x150] ss:$8 sps:$4 sm:$0xff]   ;;  %v2615_v13 = vld [vmem:[%s4011_s1 + $0x144] ss:$8 sps:$4 sm:$0xff]   ;;  %v2614_v14 = vld [vmem:[%s4011_s1 + $0x40] ss:$8 sps:$4 sm:$0xff]  }
   0x6   :  { %v2618_v15 = vld [vmem:[%s4011_s1 + $0x34] ss:$8 sps:$4 sm:$0xff]   ;;  %v2617_v16 = vld [vmem:[%s4011_s1 + $0x140] ss:$8 sps:$4 sm:$0xff]   ;;  %v2620_v18 = vld [vmem:[%s4011_s1 + $0x30] ss:$8 sps:$4 sm:$0xff]  }
   0x7   :  { %1868 = vmatpush1.bf16.msra.mxu0 %v2602_v5  ;;  %v2621_v17 = vld [vmem:[%s4011_s1 + $0x134] ss:$8 sps:$4 sm:$0xff]   ;;  %v2624_v19 = vld [vmem:[%s4011_s1 + $0x24] ss:$8 sps:$4 sm:$0xff]   ;;  %v2623_v20 = vld [vmem:[%s4011_s1 + $0x130] ss:$8 sps:$4 sm:$0xff]  }
   0x8   :  { %1869 = vmatprep.subr.bf16.mxu0 %v2606_v8  ;;  %1911 = vmatpush1.bf16.msra.mxu1 %v2605_v7  ;;  %v2627_v21 = vld [vmem:[%s4011_s1 + $0x124] ss:$8 sps:$4 sm:$0xff]   ;;  %v2626_v22 = vld [vmem:[%s4011_s1 + $0x20] ss:$8 sps:$4 sm:$0xff]   ;;  %v2630_v23 = vld [vmem:[%s4011_s1 + $0x14] ss:$8 sps:$4 sm:$0xff]  }
   0x9   :  { %1912 = vmatprep.subr.bf16.mxu1 %v2609_v10  ;;  %v2629_v24 = vld [vmem:[%s4011_s1 + $0x120] ss:$8 sps:$4 sm:$0xff]   ;;  %v2633_v25 = vld [vmem:[%s4011_s1 + $0x114] ss:$8 sps:$4 sm:$0xff]   ;;  %v2632_v26 = vld [vmem:[%s4011_s1 + $0x10] ss:$8 sps:$4 sm:$0xff]  }
   0xa   :  { %v2636_v27 = vld [vmem:[%s4011_s1 + $0x4] ss:$8 sps:$4 sm:$0xff]   ;;  %v2635_v28 = vld [vmem:[%s4011_s1 + $0x110] ss:$8 sps:$4 sm:$0xff]   ;;  %v2638_v30 = vld [vmem:[%s4011_s1] ss:$8 sps:$4 sm:$0xff]  }
   0xb   :  { %1870 = vmatpush1.bf16.msra.mxu0 %v2608_v9  ;;  %v2639_v29 = vld [vmem:[%s4011_s1 + $0x104] ss:$8 sps:$4 sm:$0xff]   ;;  %v2642_v31 = vld [vmem:[%s4011_s1 + $0xf4] ss:$8 sps:$4 sm:$0xff]   ;;  %v2641_v32 = vld [vmem:[%s4011_s1 + $0x100] ss:$8 sps:$4 sm:$0xff]  }
   0xc   :  { %1871 = vmatprep.subr.bf16.mxu0 %v2612_v11  ;;  %1913 = vmatpush1.bf16.msra.mxu1 %v2611_v12  ;;  %v2645_v33 = vld [vmem:[%s4011_s1 + $0x1f4] ss:$8 sps:$4 sm:$0xff]   ;;  %v2644_v34 = vld [vmem:[%s4011_s1 + $0xf0] ss:$8 sps:$4 sm:$0xff]   ;;  %v2648_v35 = vld [vmem:[%s4011_s1 + $0xe4] ss:$8 sps:$4 sm:$0xff]  }
   0xd   :  { %1914 = vmatprep.subr.bf16.mxu1 %v2615_v13  ;;  %v2647_v36 = vld [vmem:[%s4011_s1 + $0x1f0] ss:$8 sps:$4 sm:$0xff]   ;;  %v2651_v37 = vld [vmem:[%s4011_s1 + $0x1e4] ss:$8 sps:$4 sm:$0xff]   ;;  %v2650_v38 = vld [vmem:[%s4011_s1 + $0xe0] ss:$8 sps:$4 sm:$0xff]  }
   0xe   :  { %v2654_v39 = vld [vmem:[%s4011_s1 + $0xd4] ss:$8 sps:$4 sm:$0xff]   ;;  %v2653_v40 = vld [vmem:[%s4011_s1 + $0x1e0] ss:$8 sps:$4 sm:$0xff]   ;;  %v2656_v42 = vld [vmem:[%s4011_s1 + $0xd0] ss:$8 sps:$4 sm:$0xff]  }
   0xf   :  { %1872 = vmatpush1.bf16.msra.mxu0 %v2614_v14  ;;  %v2657_v41 = vld [vmem:[%s4011_s1 + $0x1d4] ss:$8 sps:$4 sm:$0xff]   ;;  %v2660_v43 = vld [vmem:[%s4011_s1 + $0xc4] ss:$8 sps:$4 sm:$0xff]   ;;  %v2659_v44 = vld [vmem:[%s4011_s1 + $0x1d0] ss:$8 sps:$4 sm:$0xff]  }
  0x10   :  { %1873 = vmatprep.subr.bf16.mxu0 %v2618_v15  ;;  %1915 = vmatpush1.bf16.msra.mxu1 %v2617_v16  ;;  %v2663_v45 = vld [vmem:[%s4011_s1 + $0x1c4] ss:$8 sps:$4 sm:$0xff]   ;;  %v2662_v46 = vld [vmem:[%s4011_s1 + $0xc0] ss:$8 sps:$4 sm:$0xff]   ;;  %v2666_v48 = vld [vmem:[%s4011_s1 + $0xb4] ss:$8 sps:$4 sm:$0xff]  }
  0x11   :  { %1916 = vmatprep.subr.bf16.mxu1 %v2621_v17  ;;  %v2691_v47 = vld [vmem:[%s4012_s0 + $0x4] ss:$72 sps:$4 sm:$0xff]   ;;  %v2665_v49 = vld [vmem:[%s4011_s1 + $0x1c0] ss:$8 sps:$4 sm:$0xff]   ;;  %v2669_v50 = vld [vmem:[%s4011_s1 + $0x1b4] ss:$8 sps:$4 sm:$0xff]  }
  0x12   :  { %1897 = vmatprep.mubr.bf16.mxu0 %v2691_v47  ;;  %v2698_v51 = vld [vmem:[%s4012_s0 + $0xc] ss:$72 sps:$4 sm:$0xff]   ;;  %v2668_v52 = vld [vmem:[%s4011_s1 + $0xb0] ss:$8 sps:$4 sm:$0xff]   ;;  %v2674_v56 = vld [vmem:[%s4011_s1 + $0xa0] ss:$8 sps:$4 sm:$0xff]  }
  0x13   :  { %1874 = vmatpush1.bf16.msra.mxu0 %v2620_v18  ;;  %v2672_v53 = vld [vmem:[%s4011_s1 + $0xa4] ss:$8 sps:$4 sm:$0xff]   ;;  %1940 = vmatprep.mubr.bf16.mxu1 %v2698_v51  ;;  %v2671_v54 = vld [vmem:[%s4011_s1 + $0x1b0] ss:$8 sps:$4 sm:$0xff]   ;;  %v2678_v57 = vld [vmem:[%s4011_s1 + $0x94] ss:$8 sps:$4 sm:$0xff]  }
  0x14   :  { %1875 = vmatprep.subr.bf16.mxu0 %v2624_v19  ;;  %1917 = vmatpush1.bf16.msra.mxu1 %v2623_v20  ;;  %v2675_v55 = vld [vmem:[%s4011_s1 + $0x1a4] ss:$8 sps:$4 sm:$0xff]   ;;  %v2677_v58 = vld [vmem:[%s4011_s1 + $0x1a0] ss:$8 sps:$4 sm:$0xff]   ;;  %v2681_v59 = vld [vmem:[%s4011_s1 + $0x194] ss:$8 sps:$4 sm:$0xff]  }
  0x15   :  { %1918 = vmatprep.subr.bf16.mxu1 %v2627_v21  ;;  %v2680_v60 = vld [vmem:[%s4011_s1 + $0x90] ss:$8 sps:$4 sm:$0xff]   ;;  %v2684_v61 = vld [vmem:[%s4011_s1 + $0x84] ss:$8 sps:$4 sm:$0xff]   ;;  %v2686_v0 = vld [vmem:[%s4011_s1 + $0x80] ss:$8 sps:$4 sm:$0xff]  }
  0x16   :  { %v2683_v62 = vld [vmem:[%s4011_s1 + $0x190] ss:$8 sps:$4 sm:$0xff]   ;;  %v2687_v63 = vld [vmem:[%s4011_s1 + $0x184] ss:$8 sps:$4 sm:$0xff]   ;;  %v2695_v1 = vld [vmem:[%s4011_s1 + $0x274] ss:$8 sps:$4 sm:$0xff]  }
  0x17   :  { %1876 = vmatpush1.bf16.msra.mxu0 %v2626_v22  ;;  %v2692_v2 = vld [vmem:[%s4011_s1 + $0x180] ss:$8 sps:$4 sm:$0xff]   ;;  %v2701_v4 = vld [vmem:[%s4011_s1 + $0x374] ss:$8 sps:$4 sm:$0xff]   ;;  %v2693_v5 = vld [vmem:[%s4011_s1 + $0x270] ss:$8 sps:$4 sm:$0xff]  }
  0x18   :  { %1877 = vmatprep.subr.bf16.mxu0 %v2630_v23  ;;  %1919 = vmatpush1.bf16.msra.mxu1 %v2629_v24  ;;  %v2689_v3 = vld [vmem:[%s4012_s0] ss:$72 sps:$4 sm:$0xff]   ;;  %v2704_v7 = vld [vmem:[%s4011_s1 + $0x264] ss:$8 sps:$4 sm:$0xff]   ;;  %v2699_v8 = vld [vmem:[%s4011_s1 + $0x370] ss:$8 sps:$4 sm:$0xff]  }
  0x19   :  { %1920 = vmatprep.subr.bf16.mxu1 %v2633_v25  ;;  %v2696_v6 = vld [vmem:[%s4012_s0 + $0x8] ss:$72 sps:$4 sm:$0xff]   ;;  %v2707_v9 = vld [vmem:[%s4011_s1 + $0x364] ss:$8 sps:$4 sm:$0xff]   ;;  %v2710_v11 = vld [vmem:[%s4011_s1 + $0x254] ss:$8 sps:$4 sm:$0xff]  }
  0x1a   :  { %v2702_v10 = vld [vmem:[%s4011_s1 + $0x260] ss:$8 sps:$4 sm:$0xff]   ;;  %v2713_v13 = vld [vmem:[%s4011_s1 + $0x354] ss:$8 sps:$4 sm:$0xff]   ;;  %v2708_v14 = vld [vmem:[%s4011_s1 + $0x250] ss:$8 sps:$4 sm:$0xff]  }
  0x1b   :  { %1878 = vmatpush1.bf16.msra.mxu0 %v2632_v26  ;;  %v2705_v12 = vld [vmem:[%s4011_s1 + $0x360] ss:$8 sps:$4 sm:$0xff]   ;;  %v2716_v15 = vld [vmem:[%s4011_s1 + $0x244] ss:$8 sps:$4 sm:$0xff]   ;;  %v2711_v16 = vld [vmem:[%s4011_s1 + $0x350] ss:$8 sps:$4 sm:$0xff]  }
  0x1c   :  { %1879 = vmatprep.subr.bf16.mxu0 %v2636_v27  ;;  %1921 = vmatpush1.bf16.msra.mxu1 %v2635_v28  ;;  %v2719_v17 = vld [vmem:[%s4011_s1 + $0x344] ss:$8 sps:$4 sm:$0xff]   ;;  %v2714_v18 = vld [vmem:[%s4011_s1 + $0x240] ss:$8 sps:$4 sm:$0xff]   ;;  %v2722_v19 = vld [vmem:[%s4011_s1 + $0x234] ss:$8 sps:$4 sm:$0xff]  }
  0x1d   :  { %1922 = vmatprep.subr.bf16.mxu1 %v2639_v29  ;;  %v2717_v20 = vld [vmem:[%s4011_s1 + $0x340] ss:$8 sps:$4 sm:$0xff]   ;;  %v2725_v21 = vld [vmem:[%s4011_s1 + $0x334] ss:$8 sps:$4 sm:$0xff]   ;;  %v2720_v22 = vld [vmem:[%s4011_s1 + $0x230] ss:$8 sps:$4 sm:$0xff]  }
  0x1e   :  { %v2728_v23 = vld [vmem:[%s4011_s1 + $0x224] ss:$8 sps:$4 sm:$0xff]   ;;  %v2723_v24 = vld [vmem:[%s4011_s1 + $0x330] ss:$8 sps:$4 sm:$0xff]   ;;  %v2726_v26 = vld [vmem:[%s4011_s1 + $0x220] ss:$8 sps:$4 sm:$0xff]  }
  0x1f   :  { %1880 = vmatpush1.bf16.msra.mxu0 %v2638_v30  ;;  %v2731_v25 = vld [vmem:[%s4011_s1 + $0x324] ss:$8 sps:$4 sm:$0xff]   ;;  %v2734_v27 = vld [vmem:[%s4011_s1 + $0x214] ss:$8 sps:$4 sm:$0xff]   ;;  %v2729_v28 = vld [vmem:[%s4011_s1 + $0x320] ss:$8 sps:$4 sm:$0xff]  }
  0x20   :  { %1881 = vmatprep.subr.bf16.mxu0 %v2642_v31  ;;  %1923 = vmatpush1.bf16.msra.mxu1 %v2641_v32  ;;  %v2737_v29 = vld [vmem:[%s4011_s1 + $0x314] ss:$8 sps:$4 sm:$0xff]   ;;  %v2732_v30 = vld [vmem:[%s4011_s1 + $0x210] ss:$8 sps:$4 sm:$0xff]   ;;  %v2740_v32 = vld [vmem:[%s4011_s1 + $0x204] ss:$8 sps:$4 sm:$0xff]  }
  0x21   :  { %1924 = vmatprep.subr.bf16.mxu1 %v2645_v33  ;;  %v2735_v31 = vld [vmem:[%s4011_s1 + $0x310] ss:$8 sps:$4 sm:$0xff]   ;;  %v2794_v33 = vld [vmem:[%s4012_s0 + $0x14] ss:$72 sps:$4 sm:$0xff]   ;;  %v2767_v51 = vld [vmem:[%s4011_s1 + $0x3c4] ss:$8 sps:$4 sm:$0xff]  }
  0x22   :  { %v2761_v47 = vld [vmem:[%s4011_s1 + $0x3d4] ss:$8 sps:$4 sm:$0xff]  }
  0x23   :  { %1882 = vmatpush2.bf16.msra.mxu0 %v2644_v34  ;;  %v2743_v34 = vld [vmem:[%s4011_s1 + $0x304] ss:$8 sps:$4 sm:$0xff]  }
  0x24   :  { %1883 = vmatprep.subr.bf16.mxu0 %v2648_v35  ;;  %1925 = vmatpush2.bf16.msra.mxu1 %v2647_v36  ;;  %v2738_v35 = vld [vmem:[%s4011_s1 + $0x200] ss:$8 sps:$4 sm:$0xff]   ;;  %v2800_v36 = vld [vmem:[%s4012_s0 + $0x1c] ss:$72 sps:$4 sm:$0xff]  }
  0x25   :  { %1926 = vmatprep.subr.bf16.mxu1 %v2651_v37  ;;  %v2746_v37 = vld [vmem:[%s4011_s1 + $0x2f4] ss:$8 sps:$4 sm:$0xff]  }
  0x27   :  { %1884 = vmatpush2.bf16.msra.mxu0 %v2650_v38  ;;  %v2741_v38 = vld [vmem:[%s4011_s1 + $0x300] ss:$8 sps:$4 sm:$0xff]  }
  0x28   :  { %1885 = vmatprep.subr.bf16.mxu0 %v2654_v39  ;;  %1927 = vmatpush2.bf16.msra.mxu1 %v2653_v40  ;;  %v2749_v39 = vld [vmem:[%s4011_s1 + $0x3f4] ss:$8 sps:$4 sm:$0xff]   ;;  %v2744_v40 = vld [vmem:[%s4011_s1 + $0x2f0] ss:$8 sps:$4 sm:$0xff]  }
  0x29   :  { %1928 = vmatprep.subr.bf16.mxu1 %v2657_v41  ;;  %v2752_v41 = vld [vmem:[%s4011_s1 + $0x2e4] ss:$8 sps:$4 sm:$0xff]  }
  0x2b   :  { %1886 = vmatpush2.bf16.msra.mxu0 %v2656_v42  ;;  %v2747_v42 = vld [vmem:[%s4011_s1 + $0x3f0] ss:$8 sps:$4 sm:$0xff]  }
  0x2c   :  { %1887 = vmatprep.subr.bf16.mxu0 %v2660_v43  ;;  %1929 = vmatpush2.bf16.msra.mxu1 %v2659_v44  ;;  %v2755_v43 = vld [vmem:[%s4011_s1 + $0x3e4] ss:$8 sps:$4 sm:$0xff]   ;;  %v2750_v44 = vld [vmem:[%s4011_s1 + $0x2e0] ss:$8 sps:$4 sm:$0xff]  }
  0x2d   :  { %1930 = vmatprep.subr.bf16.mxu1 %v2663_v45  ;;  %v2758_v45 = vld [vmem:[%s4011_s1 + $0x2d4] ss:$8 sps:$4 sm:$0xff]  }
  0x2f   :  { %1888 = vmatpush2.bf16.msra.mxu0 %v2662_v46  ;;  %v2753_v46 = vld [vmem:[%s4011_s1 + $0x3e0] ss:$8 sps:$4 sm:$0xff]  }
  0x30   :  { %1889 = vmatprep.subr.bf16.mxu0 %v2666_v48  ;;  %1931 = vmatpush2.bf16.msra.mxu1 %v2665_v49  ;;  %v2756_v48 = vld [vmem:[%s4011_s1 + $0x2d0] ss:$8 sps:$4 sm:$0xff]   ;;  %v2764_v49 = vld [vmem:[%s4011_s1 + $0x2c4] ss:$8 sps:$4 sm:$0xff]  }
  0x31   :  { %1932 = vmatprep.subr.bf16.mxu1 %v2669_v50  ;;  %v2759_v50 = vld [vmem:[%s4011_s1 + $0x3d0] ss:$8 sps:$4 sm:$0xff]  }
  0x33   :  { %1890 = vmatpush2.bf16.msra.mxu0 %v2668_v52  ;;  %v2762_v52 = vld [vmem:[%s4011_s1 + $0x2c0] ss:$8 sps:$4 sm:$0xff]  }
  0x34   :  { %1891 = vmatprep.subr.bf16.mxu0 %v2672_v53  ;;  %1933 = vmatpush2.bf16.msra.mxu1 %v2671_v54  ;;  %v2770_v53 = vld [vmem:[%s4011_s1 + $0x2b4] ss:$8 sps:$4 sm:$0xff]   ;;  %v2765_v54 = vld [vmem:[%s4011_s1 + $0x3c0] ss:$8 sps:$4 sm:$0xff]  }
  0x35   :  { %1934 = vmatprep.subr.bf16.mxu1 %v2675_v55  ;;  %v2773_v55 = vld [vmem:[%s4011_s1 + $0x3b4] ss:$8 sps:$4 sm:$0xff]  }
  0x37   :  { %1892 = vmatpush2.bf16.msra.mxu0 %v2674_v56  ;;  %v2768_v56 = vld [vmem:[%s4011_s1 + $0x2b0] ss:$8 sps:$4 sm:$0xff]  }
  0x38   :  { %1893 = vmatprep.subr.bf16.mxu0 %v2678_v57  ;;  %1935 = vmatpush2.bf16.msra.mxu1 %v2677_v58  ;;  %v2776_v57 = vld [vmem:[%s4011_s1 + $0x2a4] ss:$8 sps:$4 sm:$0xff]   ;;  %v2771_v58 = vld [vmem:[%s4011_s1 + $0x3b0] ss:$8 sps:$4 sm:$0xff]  }
  0x39   :  { %1936 = vmatprep.subr.bf16.mxu1 %v2681_v59  ;;  %v2779_v59 = vld [vmem:[%s4011_s1 + $0x3a4] ss:$8 sps:$4 sm:$0xff]  }
  0x3b   :  { %1894 = vmatpush2.bf16.msra.mxu0 %v2680_v60  ;;  %v2774_v60 = vld [vmem:[%s4011_s1 + $0x2a0] ss:$8 sps:$4 sm:$0xff]  }
  0x3c   :  { %1895 = vmatprep.subr.bf16.mxu0 %v2684_v61  ;;  %1937 = vmatpush2.bf16.msra.mxu1 %v2683_v62  ;;  %v2782_v61 = vld [vmem:[%s4011_s1 + $0x294] ss:$8 sps:$4 sm:$0xff]   ;;  %v2777_v62 = vld [vmem:[%s4011_s1 + $0x3a0] ss:$8 sps:$4 sm:$0xff]  }
  0x3d   :  { %1938 = vmatprep.subr.bf16.mxu1 %v2687_v63  ;;  %v2785_v63 = vld [vmem:[%s4011_s1 + $0x394] ss:$8 sps:$4 sm:$0xff]  }
  0x3f   :  { %1896 = vmatpush2.bf16.msra.mxu0 %v2686_v0  ;;  %v2780_v0 = vld [vmem:[%s4011_s1 + $0x290] ss:$8 sps:$4 sm:$0xff]  }
  0x40   :  { %1951 = vmatprep.subr.bf16.mxu0 %v2695_v1  ;;  %1939 = vmatpush2.bf16.msra.mxu1 %v2692_v2  ;;  %v2788_v1 = vld [vmem:[%s4011_s1 + $0x284] ss:$8 sps:$4 sm:$0xff]   ;;  %v2783_v2 = vld [vmem:[%s4011_s1 + $0x390] ss:$8 sps:$4 sm:$0xff]  }
  0x41   :  { %1994 = vmatprep.subr.bf16.mxu1 %v2701_v4  ;;  %v2786_v4 = vld [vmem:[%s4011_s1 + $0x280] ss:$8 sps:$4 sm:$0xff]  }
  0x42   :  { %1898 = vmatmul.mubr.bf16.vlgmr.msra.gmra.mxu0 %v2689_v3  ;;  %v2791_v3 = vld [vmem:[%s4011_s1 + $0x384] ss:$8 sps:$4 sm:$0xff]  }
  0x43   :  { %1952 = vmatpush1.bf16.msra.mxu0 %v2693_v5  ;;  %1941 = vmatmul.mubr.bf16.vlgmr.msra.gmra.mxu1 %v2696_v6  ;;  %v2797_v5 = vld [vmem:[%s4011_s1 + $0x474] ss:$8 sps:$4 sm:$0xff]   ;;  %v2789_v6 = vld [vmem:[%s4011_s1 + $0x380] ss:$8 sps:$4 sm:$0xff]  }
  0x44   :  { %1953 = vmatprep.subr.bf16.mxu0 %v2704_v7  ;;  %1995 = vmatpush1.bf16.msra.mxu1 %v2699_v8  ;;  %v2792_v7 = vld [vmem:[%s4012_s0 + $0x10] ss:$72 sps:$4 sm:$0xff]   ;;  %v2803_v8 = vld [vmem:[%s4011_s1 + $0x574] ss:$8 sps:$4 sm:$0xff]  }
  0x45   :  { %1996 = vmatprep.subr.bf16.mxu1 %v2707_v9  ;;  %1983 = vmatprep.mubr.bf16.mxu0 %v2794_v33  ;;  %v2795_v9 = vld [vmem:[%s4011_s1 + $0x470] ss:$8 sps:$4 sm:$0xff]   ;;  %v2836_v33 = vld [vmem:[%s4011_s1 + $0x414] ss:$8 sps:$4 sm:$0xff]  }
  0x46   :  { %2026 = vmatprep.mubr.bf16.mxu1 %v2800_v36  ;;  %v2834_v36 = vld [vmem:[%s4011_s1 + $0x410] ss:$8 sps:$4 sm:$0xff]  }
  0x47   :  { %1954 = vmatpush1.bf16.msra.mxu0 %v2702_v10  ;;  %v2798_v10 = vld [vmem:[%s4012_s0 + $0x18] ss:$72 sps:$4 sm:$0xff]  }
  0x48   :  { %1955 = vmatprep.subr.bf16.mxu0 %v2710_v11  ;;  %1997 = vmatpush1.bf16.msra.mxu1 %v2705_v12  ;;  %v2806_v11 = vld [vmem:[%s4011_s1 + $0x464] ss:$8 sps:$4 sm:$0xff]   ;;  %v2801_v12 = vld [vmem:[%s4011_s1 + $0x570] ss:$8 sps:$4 sm:$0xff]  }
  0x49   :  { %1998 = vmatprep.subr.bf16.mxu1 %v2713_v13  ;;  %v2809_v13 = vld [vmem:[%s4011_s1 + $0x564] ss:$8 sps:$4 sm:$0xff]  }
  0x4b   :  { %1956 = vmatpush1.bf16.msra.mxu0 %v2708_v14  ;;  %v2804_v14 = vld [vmem:[%s4011_s1 + $0x460] ss:$8 sps:$4 sm:$0xff]  }
  0x4c   :  { %1957 = vmatprep.subr.bf16.mxu0 %v2716_v15  ;;  %1999 = vmatpush1.bf16.msra.mxu1 %v2711_v16  ;;  %v2812_v15 = vld [vmem:[%s4011_s1 + $0x454] ss:$8 sps:$4 sm:$0xff]   ;;  %v2807_v16 = vld [vmem:[%s4011_s1 + $0x560] ss:$8 sps:$4 sm:$0xff]  }
  0x4d   :  { %2000 = vmatprep.subr.bf16.mxu1 %v2719_v17  ;;  %v2815_v17 = vld [vmem:[%s4011_s1 + $0x554] ss:$8 sps:$4 sm:$0xff]  }
  0x4f   :  { %1958 = vmatpush1.bf16.msra.mxu0 %v2714_v18  ;;  %v2896_v18 = vld [vmem:[%s4012_s0 + $0x24] ss:$72 sps:$4 sm:$0xff]  }
  0x50   :  { %1959 = vmatprep.subr.bf16.mxu0 %v2722_v19  ;;  %2001 = vmatpush1.bf16.msra.mxu1 %v2717_v20  ;;  %v2810_v19 = vld [vmem:[%s4011_s1 + $0x450] ss:$8 sps:$4 sm:$0xff]  }
  0x51   :  { %2002 = vmatprep.subr.bf16.mxu1 %v2725_v21  ;;  %v2813_v20 = vld [vmem:[%s4011_s1 + $0x550] ss:$8 sps:$4 sm:$0xff]   ;;  %v2818_v21 = vld [vmem:[%s4011_s1 + $0x444] ss:$8 sps:$4 sm:$0xff]  }
  0x53   :  { %1960 = vmatpush1.bf16.msra.mxu0 %v2720_v22  ;;  %v2902_v22 = vld [vmem:[%s4012_s0 + $0x2c] ss:$72 sps:$4 sm:$0xff]  }
  0x54   :  { %1961 = vmatprep.subr.bf16.mxu0 %v2728_v23  ;;  %2003 = vmatpush1.bf16.msra.mxu1 %v2723_v24  ;;  %v2821_v23 = vld [vmem:[%s4011_s1 + $0x544] ss:$8 sps:$4 sm:$0xff]   ;;  %v2816_v24 = vld [vmem:[%s4011_s1 + $0x440] ss:$8 sps:$4 sm:$0xff]  }
  0x55   :  { %2004 = vmatprep.subr.bf16.mxu1 %v2731_v25  ;;  %v2824_v25 = vld [vmem:[%s4011_s1 + $0x434] ss:$8 sps:$4 sm:$0xff]  }
  0x57   :  { %1962 = vmatpush1.bf16.msra.mxu0 %v2726_v26  ;;  %v2819_v26 = vld [vmem:[%s4011_s1 + $0x540] ss:$8 sps:$4 sm:$0xff]  }
  0x58   :  { %1963 = vmatprep.subr.bf16.mxu0 %v2734_v27  ;;  %2005 = vmatpush1.bf16.msra.mxu1 %v2729_v28  ;;  %v2827_v27 = vld [vmem:[%s4011_s1 + $0x534] ss:$8 sps:$4 sm:$0xff]   ;;  %v2822_v28 = vld [vmem:[%s4011_s1 + $0x430] ss:$8 sps:$4 sm:$0xff]  }
  0x59   :  { %2006 = vmatprep.subr.bf16.mxu1 %v2737_v29  ;;  %v2830_v29 = vld [vmem:[%s4011_s1 + $0x424] ss:$8 sps:$4 sm:$0xff]  }
  0x5b   :  { %1964 = vmatpush1.bf16.msra.mxu0 %v2732_v30  ;;  %v2825_v30 = vld [vmem:[%s4011_s1 + $0x530] ss:$8 sps:$4 sm:$0xff]  }
  0x5c   :  { %1965 = vmatprep.subr.bf16.mxu0 %v2740_v32  ;;  %2007 = vmatpush1.bf16.msra.mxu1 %v2735_v31  ;;  %v2833_v31 = vld [vmem:[%s4011_s1 + $0x524] ss:$8 sps:$4 sm:$0xff]   ;;  %v2828_v32 = vld [vmem:[%s4011_s1 + $0x420] ss:$8 sps:$4 sm:$0xff]  }
  0x5d   :  { %2008 = vmatprep.subr.bf16.mxu1 %v2743_v34  ;;  %v2831_v34 = vld [vmem:[%s4011_s1 + $0x520] ss:$8 sps:$4 sm:$0xff]  }
  0x5f   :  { %1966 = vmatpush1.bf16.msra.mxu0 %v2738_v35  ;;  %v2839_v35 = vld [vmem:[%s4011_s1 + $0x514] ss:$8 sps:$4 sm:$0xff]  }
  0x60   :  { %1967 = vmatprep.subr.bf16.mxu0 %v2746_v37  ;;  %2009 = vmatpush1.bf16.msra.mxu1 %v2741_v38  ;;  %v2842_v37 = vld [vmem:[%s4011_s1 + $0x404] ss:$8 sps:$4 sm:$0xff]   ;;  %v2837_v38 = vld [vmem:[%s4011_s1 + $0x510] ss:$8 sps:$4 sm:$0xff]  }
  0x61   :  { %2010 = vmatprep.subr.bf16.mxu1 %v2749_v39  ;;  %v2845_v39 = vld [vmem:[%s4011_s1 + $0x504] ss:$8 sps:$4 sm:$0xff]  }
  0x63   :  { %1968 = vmatpush2.bf16.msra.mxu0 %v2744_v40  ;;  %v2840_v40 = vld [vmem:[%s4011_s1 + $0x400] ss:$8 sps:$4 sm:$0xff]  }
  0x64   :  { %1969 = vmatprep.subr.bf16.mxu0 %v2752_v41  ;;  %2011 = vmatpush2.bf16.msra.mxu1 %v2747_v42  ;;  %v2848_v41 = vld [vmem:[%s4011_s1 + $0x4f4] ss:$8 sps:$4 sm:$0xff]   ;;  %v2843_v42 = vld [vmem:[%s4011_s1 + $0x500] ss:$8 sps:$4 sm:$0xff]  }
  0x65   :  { %2012 = vmatprep.subr.bf16.mxu1 %v2755_v43  ;;  %v2851_v43 = vld [vmem:[%s4011_s1 + $0x5f4] ss:$8 sps:$4 sm:$0xff]  }
  0x67   :  { %1970 = vmatpush2.bf16.msra.mxu0 %v2750_v44  ;;  %v2846_v44 = vld [vmem:[%s4011_s1 + $0x4f0] ss:$8 sps:$4 sm:$0xff]  }
  0x68   :  { %1971 = vmatprep.subr.bf16.mxu0 %v2758_v45  ;;  %2013 = vmatpush2.bf16.msra.mxu1 %v2753_v46  ;;  %v2854_v45 = vld [vmem:[%s4011_s1 + $0x4e4] ss:$8 sps:$4 sm:$0xff]   ;;  %v2849_v46 = vld [vmem:[%s4011_s1 + $0x5f0] ss:$8 sps:$4 sm:$0xff]  }
  0x69   :  { %2014 = vmatprep.subr.bf16.mxu1 %v2761_v47  ;;  %v2857_v47 = vld [vmem:[%s4011_s1 + $0x5e4] ss:$8 sps:$4 sm:$0xff]  }
  0x6b   :  { %1972 = vmatpush2.bf16.msra.mxu0 %v2756_v48  ;;  %v2852_v48 = vld [vmem:[%s4011_s1 + $0x4e0] ss:$8 sps:$4 sm:$0xff]  }
  0x6c   :  { %1973 = vmatprep.subr.bf16.mxu0 %v2764_v49  ;;  %2015 = vmatpush2.bf16.msra.mxu1 %v2759_v50  ;;  %v2860_v49 = vld [vmem:[%s4011_s1 + $0x4d4] ss:$8 sps:$4 sm:$0xff]   ;;  %v2855_v50 = vld [vmem:[%s4011_s1 + $0x5e0] ss:$8 sps:$4 sm:$0xff]  }
  0x6d   :  { %2016 = vmatprep.subr.bf16.mxu1 %v2767_v51  ;;  %v2863_v51 = vld [vmem:[%s4011_s1 + $0x5d4] ss:$8 sps:$4 sm:$0xff]  }
  0x6f   :  { %1974 = vmatpush2.bf16.msra.mxu0 %v2762_v52  ;;  %v2858_v52 = vld [vmem:[%s4011_s1 + $0x4d0] ss:$8 sps:$4 sm:$0xff]  }
  0x70   :  { %1975 = vmatprep.subr.bf16.mxu0 %v2770_v53  ;;  %2017 = vmatpush2.bf16.msra.mxu1 %v2765_v54  ;;  %v2866_v53 = vld [vmem:[%s4011_s1 + $0x4c4] ss:$8 sps:$4 sm:$0xff]   ;;  %v2861_v54 = vld [vmem:[%s4011_s1 + $0x5d0] ss:$8 sps:$4 sm:$0xff]  }
  0x71   :  { %2018 = vmatprep.subr.bf16.mxu1 %v2773_v55  ;;  %v2869_v55 = vld [vmem:[%s4011_s1 + $0x5c4] ss:$8 sps:$4 sm:$0xff]  }
  0x73   :  { %1976 = vmatpush2.bf16.msra.mxu0 %v2768_v56  ;;  %v2864_v56 = vld [vmem:[%s4011_s1 + $0x4c0] ss:$8 sps:$4 sm:$0xff]  }
  0x74   :  { %1977 = vmatprep.subr.bf16.mxu0 %v2776_v57  ;;  %2019 = vmatpush2.bf16.msra.mxu1 %v2771_v58  ;;  %v2872_v57 = vld [vmem:[%s4011_s1 + $0x4b4] ss:$8 sps:$4 sm:$0xff]   ;;  %v2867_v58 = vld [vmem:[%s4011_s1 + $0x5c0] ss:$8 sps:$4 sm:$0xff]  }
  0x75   :  { %2020 = vmatprep.subr.bf16.mxu1 %v2779_v59  ;;  %v2875_v59 = vld [vmem:[%s4011_s1 + $0x5b4] ss:$8 sps:$4 sm:$0xff]  }
  0x77   :  { %1978 = vmatpush2.bf16.msra.mxu0 %v2774_v60  ;;  %v2870_v60 = vld [vmem:[%s4011_s1 + $0x4b0] ss:$8 sps:$4 sm:$0xff]  }
  0x78   :  { %1979 = vmatprep.subr.bf16.mxu0 %v2782_v61  ;;  %2021 = vmatpush2.bf16.msra.mxu1 %v2777_v62  ;;  %v2878_v61 = vld [vmem:[%s4011_s1 + $0x4a4] ss:$8 sps:$4 sm:$0xff]   ;;  %v2873_v62 = vld [vmem:[%s4011_s1 + $0x5b0] ss:$8 sps:$4 sm:$0xff]  }
  0x79   :  { %2022 = vmatprep.subr.bf16.mxu1 %v2785_v63  ;;  %v2881_v63 = vld [vmem:[%s4011_s1 + $0x5a4] ss:$8 sps:$4 sm:$0xff]  }
  0x7b   :  { %1980 = vmatpush2.bf16.msra.mxu0 %v2780_v0  ;;  %v2876_v0 = vld [vmem:[%s4011_s1 + $0x4a0] ss:$8 sps:$4 sm:$0xff]  }
  0x7c   :  { %1981 = vmatprep.subr.bf16.mxu0 %v2788_v1  ;;  %2023 = vmatpush2.bf16.msra.mxu1 %v2783_v2  ;;  %v2884_v1 = vld [vmem:[%s4011_s1 + $0x494] ss:$8 sps:$4 sm:$0xff]   ;;  %v2879_v2 = vld [vmem:[%s4011_s1 + $0x5a0] ss:$8 sps:$4 sm:$0xff]  }
  0x7d   :  { %2024 = vmatprep.subr.bf16.mxu1 %v2791_v3  ;;  %v2887_v3 = vld [vmem:[%s4011_s1 + $0x594] ss:$8 sps:$4 sm:$0xff]  }
  0x7f   :  { %1982 = vmatpush2.bf16.msra.mxu0 %v2786_v4  ;;  %v2882_v4 = vld [vmem:[%s4011_s1 + $0x490] ss:$8 sps:$4 sm:$0xff]  }
  0x80   :  { %2037 = vmatprep.subr.bf16.mxu0 %v2797_v5  ;;  %2025 = vmatpush2.bf16.msra.mxu1 %v2789_v6  ;;  %v2890_v5 = vld [vmem:[%s4011_s1 + $0x484] ss:$8 sps:$4 sm:$0xff]   ;;  %v2885_v6 = vld [vmem:[%s4011_s1 + $0x590] ss:$8 sps:$4 sm:$0xff]  }
  0x81   :  { %2080 = vmatprep.subr.bf16.mxu1 %v2803_v8  ;;  %v2893_v8 = vld [vmem:[%s4011_s1 + $0x584] ss:$8 sps:$4 sm:$0xff]  }
  0x82   :  { %1984 = vmatmul.mubr.bf16.vlgmr.msra.gmra.mxu0 %v2792_v7  ;;  %v2888_v7 = vld [vmem:[%s4011_s1 + $0x480] ss:$8 sps:$4 sm:$0xff]  }
  0x83   :  { %2038 = vmatpush1.bf16.msra.mxu0 %v2795_v9  ;;  %2027 = vmatmul.mubr.bf16.vlgmr.msra.gmra.mxu1 %v2798_v10  ;;  %v2891_v9 = vld [vmem:[%s4011_s1 + $0x580] ss:$8 sps:$4 sm:$0xff]   ;;  %v2899_v10 = vld [vmem:[%s4011_s1 + $0x674] ss:$8 sps:$4 sm:$0xff]  }
  0x84   :  { %2039 = vmatprep.subr.bf16.mxu0 %v2806_v11  ;;  %2081 = vmatpush1.bf16.msra.mxu1 %v2801_v12  ;;  %v2894_v11 = vld [vmem:[%s4012_s0 + $0x20] ss:$72 sps:$4 sm:$0xff]   ;;  %v2897_v12 = vld [vmem:[%s4011_s1 + $0x670] ss:$8 sps:$4 sm:$0xff]  }
  0x85   :  { %2082 = vmatprep.subr.bf16.mxu1 %v2809_v13  ;;  %2069 = vmatprep.mubr.bf16.mxu0 %v2896_v18  ;;  %v2900_v13 = vld [vmem:[%s4012_s0 + $0x28] ss:$72 sps:$4 sm:$0xff]   ;;  %v3004_v18 = vld [vmem:[%s4012_s0 + $0x3c] ss:$72 sps:$4 sm:$0xff]  }
  0x86   :  { %2112 = vmatprep.mubr.bf16.mxu1 %v2902_v22  ;;  %v2909_v22 = vld [vmem:[%s4011_s1 + $0x760] ss:$8 sps:$4 sm:$0xff]  }
  0x87   :  { %2040 = vmatpush1.bf16.msra.mxu0 %v2804_v14  ;;  %v2905_v14 = vld [vmem:[%s4011_s1 + $0x774] ss:$8 sps:$4 sm:$0xff]  }
  0x88   :  { %2041 = vmatprep.subr.bf16.mxu0 %v2812_v15  ;;  %2083 = vmatpush1.bf16.msra.mxu1 %v2807_v16  ;;  %v2998_v15 = vld [vmem:[%s4012_s0 + $0x34] ss:$72 sps:$4 sm:$0xff]   ;;  %v2908_v16 = vld [vmem:[%s4011_s1 + $0x664] ss:$8 sps:$4 sm:$0xff]  }
  0x89   :  { %2084 = vmatprep.subr.bf16.mxu1 %v2815_v17  ;;  %v2903_v17 = vld [vmem:[%s4011_s1 + $0x770] ss:$8 sps:$4 sm:$0xff]  }
  0x8b   :  { %2042 = vmatpush1.bf16.msra.mxu0 %v2810_v19  ;;  %v2911_v19 = vld [vmem:[%s4011_s1 + $0x764] ss:$8 sps:$4 sm:$0xff]  }
  0x8c   :  { %2043 = vmatprep.subr.bf16.mxu0 %v2818_v21  ;;  %2085 = vmatpush1.bf16.msra.mxu1 %v2813_v20  ;;  %v2906_v20 = vld [vmem:[%s4011_s1 + $0x660] ss:$8 sps:$4 sm:$0xff]   ;;  %v2914_v21 = vld [vmem:[%s4011_s1 + $0x654] ss:$8 sps:$4 sm:$0xff]  }
  0x8d   :  { %2086 = vmatprep.subr.bf16.mxu1 %v2821_v23  ;;  %v2917_v23 = vld [vmem:[%s4011_s1 + $0x754] ss:$8 sps:$4 sm:$0xff]  }
  0x8f   :  { %2044 = vmatpush1.bf16.msra.mxu0 %v2816_v24  ;;  %v2912_v24 = vld [vmem:[%s4011_s1 + $0x650] ss:$8 sps:$4 sm:$0xff]  }
  0x90   :  { %2045 = vmatprep.subr.bf16.mxu0 %v2824_v25  ;;  %2087 = vmatpush1.bf16.msra.mxu1 %v2819_v26  ;;  %v2920_v25 = vld [vmem:[%s4011_s1 + $0x644] ss:$8 sps:$4 sm:$0xff]   ;;  %v2915_v26 = vld [vmem:[%s4011_s1 + $0x750] ss:$8 sps:$4 sm:$0xff]  }
  0x91   :  { %2088 = vmatprep.subr.bf16.mxu1 %v2827_v27  ;;  %v2923_v27 = vld [vmem:[%s4011_s1 + $0x744] ss:$8 sps:$4 sm:$0xff]  }
  0x93   :  { %2046 = vmatpush1.bf16.msra.mxu0 %v2822_v28  ;;  %v2918_v28 = vld [vmem:[%s4011_s1 + $0x640] ss:$8 sps:$4 sm:$0xff]  }
  0x94   :  { %2047 = vmatprep.subr.bf16.mxu0 %v2830_v29  ;;  %2089 = vmatpush1.bf16.msra.mxu1 %v2825_v30  ;;  %v2926_v29 = vld [vmem:[%s4011_s1 + $0x634] ss:$8 sps:$4 sm:$0xff]   ;;  %v2921_v30 = vld [vmem:[%s4011_s1 + $0x740] ss:$8 sps:$4 sm:$0xff]  }
  0x95   :  { %2090 = vmatprep.subr.bf16.mxu1 %v2833_v31  ;;  %v2929_v31 = vld [vmem:[%s4011_s1 + $0x734] ss:$8 sps:$4 sm:$0xff]  }
  0x97   :  { %2048 = vmatpush1.bf16.msra.mxu0 %v2828_v32  ;;  %v2924_v32 = vld [vmem:[%s4011_s1 + $0x630] ss:$8 sps:$4 sm:$0xff]  }
  0x98   :  { %2049 = vmatprep.subr.bf16.mxu0 %v2836_v33  ;;  %2091 = vmatpush1.bf16.msra.mxu1 %v2831_v34  ;;  %v2932_v33 = vld [vmem:[%s4011_s1 + $0x624] ss:$8 sps:$4 sm:$0xff]   ;;  %v2927_v34 = vld [vmem:[%s4011_s1 + $0x730] ss:$8 sps:$4 sm:$0xff]  }
  0x99   :  { %2092 = vmatprep.subr.bf16.mxu1 %v2839_v35  ;;  %v2935_v35 = vld [vmem:[%s4011_s1 + $0x724] ss:$8 sps:$4 sm:$0xff]  }
  0x9b   :  { %2050 = vmatpush1.bf16.msra.mxu0 %v2834_v36  ;;  %v2930_v36 = vld [vmem:[%s4011_s1 + $0x620] ss:$8 sps:$4 sm:$0xff]  }
  0x9c   :  { %2051 = vmatprep.subr.bf16.mxu0 %v2842_v37  ;;  %2093 = vmatpush1.bf16.msra.mxu1 %v2837_v38  ;;  %v2938_v37 = vld [vmem:[%s4011_s1 + $0x614] ss:$8 sps:$4 sm:$0xff]   ;;  %v2933_v38 = vld [vmem:[%s4011_s1 + $0x720] ss:$8 sps:$4 sm:$0xff]  }
  0x9d   :  { %2094 = vmatprep.subr.bf16.mxu1 %v2845_v39  ;;  %v2941_v39 = vld [vmem:[%s4011_s1 + $0x714] ss:$8 sps:$4 sm:$0xff]  }
  0x9f   :  { %2052 = vmatpush1.bf16.msra.mxu0 %v2840_v40  ;;  %v2936_v40 = vld [vmem:[%s4011_s1 + $0x610] ss:$8 sps:$4 sm:$0xff]  }
  0xa0   :  { %2053 = vmatprep.subr.bf16.mxu0 %v2848_v41  ;;  %2095 = vmatpush1.bf16.msra.mxu1 %v2843_v42  ;;  %v2944_v41 = vld [vmem:[%s4011_s1 + $0x604] ss:$8 sps:$4 sm:$0xff]   ;;  %v2939_v42 = vld [vmem:[%s4011_s1 + $0x710] ss:$8 sps:$4 sm:$0xff]  }
  0xa1   :  { %2096 = vmatprep.subr.bf16.mxu1 %v2851_v43  ;;  %v2947_v43 = vld [vmem:[%s4011_s1 + $0x704] ss:$8 sps:$4 sm:$0xff]  }
  0xa3   :  { %2054 = vmatpush2.bf16.msra.mxu0 %v2846_v44  ;;  %v2942_v44 = vld [vmem:[%s4011_s1 + $0x600] ss:$8 sps:$4 sm:$0xff]  }
  0xa4   :  { %2055 = vmatprep.subr.bf16.mxu0 %v2854_v45  ;;  %2097 = vmatpush2.bf16.msra.mxu1 %v2849_v46  ;;  %v2950_v45 = vld [vmem:[%s4011_s1 + $0x6f4] ss:$8 sps:$4 sm:$0xff]   ;;  %v2945_v46 = vld [vmem:[%s4011_s1 + $0x700] ss:$8 sps:$4 sm:$0xff]  }
  0xa5   :  { %2098 = vmatprep.subr.bf16.mxu1 %v2857_v47  ;;  %v2953_v47 = vld [vmem:[%s4011_s1 + $0x7f4] ss:$8 sps:$4 sm:$0xff]  }
  0xa7   :  { %2056 = vmatpush2.bf16.msra.mxu0 %v2852_v48  ;;  %v2948_v48 = vld [vmem:[%s4011_s1 + $0x6f0] ss:$8 sps:$4 sm:$0xff]  }
  0xa8   :  { %2057 = vmatprep.subr.bf16.mxu0 %v2860_v49  ;;  %2099 = vmatpush2.bf16.msra.mxu1 %v2855_v50  ;;  %v2956_v49 = vld [vmem:[%s4011_s1 + $0x6e4] ss:$8 sps:$4 sm:$0xff]   ;;  %v2951_v50 = vld [vmem:[%s4011_s1 + $0x7f0] ss:$8 sps:$4 sm:$0xff]  }
  0xa9   :  { %2100 = vmatprep.subr.bf16.mxu1 %v2863_v51  ;;  %v2959_v51 = vld [vmem:[%s4011_s1 + $0x7e4] ss:$8 sps:$4 sm:$0xff]  }
  0xab   :  { %2058 = vmatpush2.bf16.msra.mxu0 %v2858_v52  ;;  %v2954_v52 = vld [vmem:[%s4011_s1 + $0x6e0] ss:$8 sps:$4 sm:$0xff]  }
  0xac   :  { %2059 = vmatprep.subr.bf16.mxu0 %v2866_v53  ;;  %2101 = vmatpush2.bf16.msra.mxu1 %v2861_v54  ;;  %v2962_v53 = vld [vmem:[%s4011_s1 + $0x6d4] ss:$8 sps:$4 sm:$0xff]   ;;  %v2957_v54 = vld [vmem:[%s4011_s1 + $0x7e0] ss:$8 sps:$4 sm:$0xff]  }
  0xad   :  { %2102 = vmatprep.subr.bf16.mxu1 %v2869_v55  ;;  %v2965_v55 = vld [vmem:[%s4011_s1 + $0x7d4] ss:$8 sps:$4 sm:$0xff]  }
  0xaf   :  { %2060 = vmatpush2.bf16.msra.mxu0 %v2864_v56  ;;  %v2960_v56 = vld [vmem:[%s4011_s1 + $0x6d0] ss:$8 sps:$4 sm:$0xff]  }
  0xb0   :  { %2061 = vmatprep.subr.bf16.mxu0 %v2872_v57  ;;  %2103 = vmatpush2.bf16.msra.mxu1 %v2867_v58  ;;  %v2968_v57 = vld [vmem:[%s4011_s1 + $0x6c4] ss:$8 sps:$4 sm:$0xff]   ;;  %v2963_v58 = vld [vmem:[%s4011_s1 + $0x7d0] ss:$8 sps:$4 sm:$0xff]  }
  0xb1   :  { %2104 = vmatprep.subr.bf16.mxu1 %v2875_v59  ;;  %v2971_v59 = vld [vmem:[%s4011_s1 + $0x7c4] ss:$8 sps:$4 sm:$0xff]  }
  0xb3   :  { %2062 = vmatpush2.bf16.msra.mxu0 %v2870_v60  ;;  %v2966_v60 = vld [vmem:[%s4011_s1 + $0x6c0] ss:$8 sps:$4 sm:$0xff]  }
  0xb4   :  { %2063 = vmatprep.subr.bf16.mxu0 %v2878_v61  ;;  %2105 = vmatpush2.bf16.msra.mxu1 %v2873_v62  ;;  %v2974_v61 = vld [vmem:[%s4011_s1 + $0x6b4] ss:$8 sps:$4 sm:$0xff]   ;;  %v2969_v62 = vld [vmem:[%s4011_s1 + $0x7c0] ss:$8 sps:$4 sm:$0xff]  }
  0xb5   :  { %2106 = vmatprep.subr.bf16.mxu1 %v2881_v63  ;;  %v2977_v63 = vld [vmem:[%s4011_s1 + $0x7b4] ss:$8 sps:$4 sm:$0xff]  }
  0xb7   :  { %2064 = vmatpush2.bf16.msra.mxu0 %v2876_v0  ;;  %v2972_v0 = vld [vmem:[%s4011_s1 + $0x6b0] ss:$8 sps:$4 sm:$0xff]  }
  0xb8   :  { %2065 = vmatprep.subr.bf16.mxu0 %v2884_v1  ;;  %2107 = vmatpush2.bf16.msra.mxu1 %v2879_v2  ;;  %v2980_v1 = vld [vmem:[%s4011_s1 + $0x6a4] ss:$8 sps:$4 sm:$0xff]   ;;  %v2975_v2 = vld [vmem:[%s4011_s1 + $0x7b0] ss:$8 sps:$4 sm:$0xff]  }
  0xb9   :  { %2108 = vmatprep.subr.bf16.mxu1 %v2887_v3  ;;  %v2983_v3 = vld [vmem:[%s4011_s1 + $0x7a4] ss:$8 sps:$4 sm:$0xff]  }
  0xbb   :  { %2066 = vmatpush2.bf16.msra.mxu0 %v2882_v4  ;;  %v2978_v4 = vld [vmem:[%s4011_s1 + $0x6a0] ss:$8 sps:$4 sm:$0xff]  }
  0xbc   :  { %2067 = vmatprep.subr.bf16.mxu0 %v2890_v5  ;;  %2109 = vmatpush2.bf16.msra.mxu1 %v2885_v6  ;;  %v2986_v5 = vld [vmem:[%s4011_s1 + $0x694] ss:$8 sps:$4 sm:$0xff]   ;;  %v2981_v6 = vld [vmem:[%s4011_s1 + $0x7a0] ss:$8 sps:$4 sm:$0xff]  }
  0xbd   :  { %2110 = vmatprep.subr.bf16.mxu1 %v2893_v8  ;;  %v2984_v8 = vld [vmem:[%s4011_s1 + $0x690] ss:$8 sps:$4 sm:$0xff]  }
  0xbf   :  { %2068 = vmatpush2.bf16.msra.mxu0 %v2888_v7  ;;  %v2989_v7 = vld [vmem:[%s4011_s1 + $0x794] ss:$8 sps:$4 sm:$0xff]  }
  0xc0   :  { %2123 = vmatprep.subr.bf16.mxu0 %v2899_v10  ;;  %2111 = vmatpush2.bf16.msra.mxu1 %v2891_v9  ;;  %v2992_v9 = vld [vmem:[%s4011_s1 + $0x684] ss:$8 sps:$4 sm:$0xff]   ;;  %v2987_v10 = vld [vmem:[%s4011_s1 + $0x790] ss:$8 sps:$4 sm:$0xff]  }
  0xc1   :  { %2166 = vmatprep.subr.bf16.mxu1 %v2905_v14  ;;  %v2993_v14 = vld [vmem:[%s4011_s1 + $0x780] ss:$8 sps:$4 sm:$0xff]  }
  0xc2   :  { %2070 = vmatmul.mubr.bf16.vlgmr.msra.gmra.mxu0 %v2894_v11  ;;  %v2995_v11 = vld [vmem:[%s4011_s1 + $0x784] ss:$8 sps:$4 sm:$0xff]  }
  0xc3   :  { %2124 = vmatpush1.bf16.msra.mxu0 %v2897_v12  ;;  %2155 = vmatprep.mubr.bf16.mxu0 %v2998_v15  ;;  %v2990_v12 = vld [vmem:[%s4011_s1 + $0x680] ss:$8 sps:$4 sm:$0xff]   ;;  %v2996_v15 = vld [vmem:[%s4012_s0 + $0x30] ss:$72 sps:$4 sm:$0xff]  }
  0xc4   :  { %2113 = vmatmul.mubr.bf16.vlgmr.msra.gmra.mxu1 %v2900_v13  ;;  %2125 = vmatprep.subr.bf16.mxu0 %v2908_v16  ;;  %v3001_v13 = vld [vmem:[%s4011_s1 + $0x874] ss:$8 sps:$4 sm:$0xff]   ;;  %v2999_v16 = vld [vmem:[%s4011_s1 + $0x870] ss:$8 sps:$4 sm:$0xff]  }
  0xc5   :  { %2167 = vmatpush1.bf16.msra.mxu1 %v2903_v17  ;;  %2198 = vmatprep.mubr.bf16.mxu1 %v3004_v18  ;;  %v3052_v17 = vld [vmem:[%s4012_s0 + $0x44] ss:$72 sps:$4 sm:$0xff]   ;;  %v3002_v18 = vld [vmem:[%s4012_s0 + $0x38] ss:$72 sps:$4 sm:$0xff]  }
  0xc6   :  { %2168 = vmatprep.subr.bf16.mxu1 %v2911_v19  ;;  %v3007_v19 = vld [vmem:[%s4011_s1 + $0x864] ss:$8 sps:$4 sm:$0xff]  }
  0xc7   :  { %2126 = vmatpush1.bf16.msra.mxu0 %v2906_v20  ;;  %v3005_v20 = vld [vmem:[%s4011_s1 + $0x860] ss:$8 sps:$4 sm:$0xff]  }
  0xc8   :  { %2127 = vmatprep.subr.bf16.mxu0 %v2914_v21  ;;  %v3010_v21 = vld [vmem:[%s4011_s1 + $0x854] ss:$8 sps:$4 sm:$0xff]  }
  0xc9   :  { %2169 = vmatpush1.bf16.msra.mxu1 %v2909_v22  ;;  %v3008_v22 = vld [vmem:[%s4011_s1 + $0x850] ss:$8 sps:$4 sm:$0xff]  }
  0xca   :  { %2170 = vmatprep.subr.bf16.mxu1 %v2917_v23  ;;  %v3013_v23 = vld [vmem:[%s4011_s1 + $0x844] ss:$8 sps:$4 sm:$0xff]  }
  0xcb   :  { %2128 = vmatpush1.bf16.msra.mxu0 %v2912_v24  ;;  %v3011_v24 = vld [vmem:[%s4011_s1 + $0x840] ss:$8 sps:$4 sm:$0xff]  }
  0xcc   :  { %2129 = vmatprep.subr.bf16.mxu0 %v2920_v25  ;;  %v3016_v25 = vld [vmem:[%s4011_s1 + $0x834] ss:$8 sps:$4 sm:$0xff]  }
  0xcd   :  { %2171 = vmatpush1.bf16.msra.mxu1 %v2915_v26  ;;  %v3014_v26 = vld [vmem:[%s4011_s1 + $0x830] ss:$8 sps:$4 sm:$0xff]  }
  0xce   :  { %2172 = vmatprep.subr.bf16.mxu1 %v2923_v27  ;;  %v3019_v27 = vld [vmem:[%s4011_s1 + $0x824] ss:$8 sps:$4 sm:$0xff]  }
  0xcf   :  { %2130 = vmatpush1.bf16.msra.mxu0 %v2918_v28  ;;  %v3017_v28 = vld [vmem:[%s4011_s1 + $0x820] ss:$8 sps:$4 sm:$0xff]  }
  0xd0   :  { %2131 = vmatprep.subr.bf16.mxu0 %v2926_v29  ;;  %v3022_v29 = vld [vmem:[%s4011_s1 + $0x814] ss:$8 sps:$4 sm:$0xff]  }
  0xd1   :  { %2173 = vmatpush1.bf16.msra.mxu1 %v2921_v30  ;;  %v3020_v30 = vld [vmem:[%s4011_s1 + $0x810] ss:$8 sps:$4 sm:$0xff]  }
  0xd2   :  { %2174 = vmatprep.subr.bf16.mxu1 %v2929_v31  ;;  %v3025_v31 = vld [vmem:[%s4011_s1 + $0x804] ss:$8 sps:$4 sm:$0xff]  }
  0xd3   :  { %2132 = vmatpush1.bf16.msra.mxu0 %v2924_v32  ;;  %v3023_v32 = vld [vmem:[%s4011_s1 + $0x800] ss:$8 sps:$4 sm:$0xff]  }
  0xd4   :  { %2133 = vmatprep.subr.bf16.mxu0 %v2932_v33  ;;  %v3028_v33 = vld [vmem:[%s4011_s1 + $0x8f4] ss:$8 sps:$4 sm:$0xff]  }
  0xd5   :  { %2175 = vmatpush1.bf16.msra.mxu1 %v2927_v34  ;;  %v3026_v34 = vld [vmem:[%s4011_s1 + $0x8f0] ss:$8 sps:$4 sm:$0xff]  }
  0xd6   :  { %2176 = vmatprep.subr.bf16.mxu1 %v2935_v35  ;;  %v3031_v35 = vld [vmem:[%s4011_s1 + $0x8e4] ss:$8 sps:$4 sm:$0xff]  }
  0xd7   :  { %2134 = vmatpush1.bf16.msra.mxu0 %v2930_v36  ;;  %v3029_v36 = vld [vmem:[%s4011_s1 + $0x8e0] ss:$8 sps:$4 sm:$0xff]  }
  0xd8   :  { %2135 = vmatprep.subr.bf16.mxu0 %v2938_v37  ;;  %v3034_v37 = vld [vmem:[%s4011_s1 + $0x8d4] ss:$8 sps:$4 sm:$0xff]  }
  0xd9   :  { %2177 = vmatpush1.bf16.msra.mxu1 %v2933_v38  ;;  %v3032_v38 = vld [vmem:[%s4011_s1 + $0x8d0] ss:$8 sps:$4 sm:$0xff]  }
  0xda   :  { %2178 = vmatprep.subr.bf16.mxu1 %v2941_v39  ;;  %v3037_v39 = vld [vmem:[%s4011_s1 + $0x8c4] ss:$8 sps:$4 sm:$0xff]  }
  0xdb   :  { %2136 = vmatpush1.bf16.msra.mxu0 %v2936_v40  ;;  %v3035_v40 = vld [vmem:[%s4011_s1 + $0x8c0] ss:$8 sps:$4 sm:$0xff]  }
  0xdc   :  { %2137 = vmatprep.subr.bf16.mxu0 %v2944_v41  ;;  %v3040_v41 = vld [vmem:[%s4011_s1 + $0x8b4] ss:$8 sps:$4 sm:$0xff]  }
  0xdd   :  { %2179 = vmatpush1.bf16.msra.mxu1 %v2939_v42  ;;  %v3038_v42 = vld [vmem:[%s4011_s1 + $0x8b0] ss:$8 sps:$4 sm:$0xff]  }
  0xde   :  { %2180 = vmatprep.subr.bf16.mxu1 %v2947_v43  ;;  %v3043_v43 = vld [vmem:[%s4011_s1 + $0x8a4] ss:$8 sps:$4 sm:$0xff]  }
  0xdf   :  { %2138 = vmatpush1.bf16.msra.mxu0 %v2942_v44  ;;  %v3041_v44 = vld [vmem:[%s4011_s1 + $0x8a0] ss:$8 sps:$4 sm:$0xff]  }
  0xe0   :  { %2139 = vmatprep.subr.bf16.mxu0 %v2950_v45  ;;  %v3046_v45 = vld [vmem:[%s4011_s1 + $0x894] ss:$8 sps:$4 sm:$0xff]  }
  0xe1   :  { %2181 = vmatpush1.bf16.msra.mxu1 %v2945_v46  ;;  %v3044_v46 = vld [vmem:[%s4011_s1 + $0x890] ss:$8 sps:$4 sm:$0xff]  }
  0xe2   :  { %2182 = vmatprep.subr.bf16.mxu1 %v2953_v47  ;;  %v3049_v47 = vld [vmem:[%s4011_s1 + $0x884] ss:$8 sps:$4 sm:$0xff]  }
  0xe3   :  { %2140 = vmatpush2.bf16.msra.mxu0 %v2948_v48  ;;  %v3047_v48 = vld [vmem:[%s4011_s1 + $0x880] ss:$8 sps:$4 sm:$0xff]  }
  0xe4   :  { %2141 = vmatprep.subr.bf16.mxu0 %v2956_v49  ;;  %v3050_v49 = vld [vmem:[%s4012_s0 + $0x40] ss:$72 sps:$4 sm:$0xff]  }
  0xe5   :  { %2183 = vmatpush2.bf16.msra.mxu1 %v2951_v50 }
  0xe6   :  { %2184 = vmatprep.subr.bf16.mxu1 %v2959_v51 }
  0xe7   :  { %2142 = vmatpush2.bf16.msra.mxu0 %v2954_v52 }
  0xe8   :  { %2143 = vmatprep.subr.bf16.mxu0 %v2962_v53 }
  0xe9   :  { %2185 = vmatpush2.bf16.msra.mxu1 %v2957_v54 }
  0xea   :  { %2186 = vmatprep.subr.bf16.mxu1 %v2965_v55 }
  0xeb   :  { %2144 = vmatpush2.bf16.msra.mxu0 %v2960_v56 }
  0xec   :  { %2145 = vmatprep.subr.bf16.mxu0 %v2968_v57 }
  0xed   :  { %2187 = vmatpush2.bf16.msra.mxu1 %v2963_v58 }
  0xee   :  { %2188 = vmatprep.subr.bf16.mxu1 %v2971_v59  ;;  %v325_v59 = vlaneseq }
  0xef   :  { %2146 = vmatpush2.bf16.msra.mxu0 %v2966_v60 }
  0xf0   :  { %2147 = vmatprep.subr.bf16.mxu0 %v2974_v61 }
  0xf1   :  { %2189 = vmatpush2.bf16.msra.mxu1 %v2969_v62  ;;  %v326_v62 = vshrl.u32 %v325_v59, 7 }
  0xf2   :  { %2190 = vmatprep.subr.bf16.mxu1 %v2977_v63 }
  0xf3   :  { %2148 = vmatpush2.bf16.msra.mxu0 %v2972_v0 }
  0xf4   :  { %2149 = vmatprep.subr.bf16.mxu0 %v2980_v1  ;;  %v327_v1 = vsub.s32 0, %v326_v62 }
  0xf5   :  { %2191 = vmatpush2.bf16.msra.mxu1 %v2975_v2  ;;  %v323_v2 = vld [vmem:[%s4013_s2] sm:$0x3] }
  0xf6   :  { %2192 = vmatprep.subr.bf16.mxu1 %v2983_v3 }
  0xf7   :  { %2150 = vmatpush2.bf16.msra.mxu0 %v2978_v4 }
  0xf8   :  { %2151 = vmatprep.subr.bf16.mxu0 %v2986_v5  ;;  %v331_v5 = vsub.s32 1, %v326_v62 }
  0xf9   :  { %2193 = vmatpush2.bf16.msra.mxu1 %v2981_v6 }
  0xfa   :  { %2194 = vmatprep.subr.bf16.mxu1 %v2989_v7  ;;  %v328_v7 = vrot.slane %v323_v2, %v327_v1 }
  0xfb   :  { %2152 = vmatpush2.bf16.msra.mxu0 %v2984_v8 }
  0xfc   :  { %2153 = vmatprep.subr.bf16.mxu0 %v2992_v9  ;;  %v332_v9 = vrot.slane %v323_v2, %v331_v5 }
  0xfd   :  { %2195 = vmatpush2.bf16.msra.mxu1 %v2987_v10 }
  0xfe   :  { %2196 = vmatprep.subr.bf16.mxu1 %v2995_v11 }
  0xff   :  { %2154 = vmatpush2.bf16.msra.mxu0 %v2990_v12 }
 0x100   :  { %2209 = vmatprep.subr.bf16.mxu0 %v3001_v13 }
 0x101   :  { %2197 = vmatpush2.bf16.msra.mxu1 %v2993_v14 }
 0x102   :  { %2156 = vmatmul.mubr.bf16.vlgmr.msra.gmra.mxu0 %v2996_v15  ;;  %v1899_v50 = vpop.f32.mrf.mxu0 }
 0x103   :  { %2210 = vmatpush1.bf16.msra.mxu0 %v2999_v16  ;;  %2241 = vmatprep.mubr.bf16.mxu0 %v3052_v17  ;;  %v1942_v52 = vpop.f32.mrf.mxu1  ;;  %v1900_v12 = vadd.f32 %v1899_v50, %v328_v7 }
 0x104   :  { %2199 = vmatmul.mubr.bf16.vlgmr.msra.gmra.mxu1 %v3002_v18  ;;  %2211 = vmatprep.subr.bf16.mxu0 %v3007_v19  ;;  %v1901_v51 = vpop.f32.mrf.mxu0 }
 0x105   :  { %v1944_v54 = vpop.f32.mrf.mxu1  ;;  %v1902_v13 = vadd.f32 %v1901_v51, %v332_v9  ;;  %v1943_v16 = vadd.f32 %v1942_v52, %v1900_v12 }
 0x106   :  { %v1903_v53 = vpop.f32.mrf.mxu0 }
 0x107   :  { %2212 = vmatpush1.bf16.msra.mxu0 %v3005_v20  ;;  %v1946_v56 = vpop.f32.mrf.mxu1  ;;  %v1904_v17 = vadd.f32 %v1903_v53, %v328_v7  ;;  %v1945_v18 = vadd.f32 %v1944_v54, %v1902_v13 }
 0x108   :  { %2213 = vmatprep.subr.bf16.mxu0 %v3010_v21  ;;  %v1905_v55 = vpop.f32.mrf.mxu0 }
 0x109   :  { %v1948_v58 = vpop.f32.mrf.mxu1  ;;  %v1906_v19 = vadd.f32 %v1905_v55, %v332_v9  ;;  %v2253_v55 = vld [vmem:[%s4014_s3 + $0x8] sm:$0xff] }
 0x10a   :  { %v2256_v1 = vunpack.c.l.bf16 %v2253_v55 }
 0x10b   :  { %2214 = vmatpush1.bf16.msra.mxu0 %v3008_v22 }
 0x10c   :  { %2215 = vmatprep.subr.bf16.mxu0 %v3013_v23  ;;  %v1947_v23 = vadd.f32 %v1946_v56, %v1904_v17 }
 0x10f   :  { %2216 = vmatpush1.bf16.msra.mxu0 %v3011_v24 }
 0x110   :  { %2217 = vmatprep.subr.bf16.mxu0 %v3016_v25 }
 0x113   :  { %2218 = vmatpush1.bf16.msra.mxu0 %v3014_v26  ;;  %v1949_v26 = vadd.f32 %v1948_v58, %v1906_v19 }
 0x114   :  { %2219 = vmatprep.subr.bf16.mxu0 %v3019_v27 }
 0x117   :  { %2220 = vmatpush1.bf16.msra.mxu0 %v3017_v28 }
 0x118   :  { %2221 = vmatprep.subr.bf16.mxu0 %v3022_v29 }
 0x11b   :  { %2222 = vmatpush1.bf16.msra.mxu0 %v3020_v30 }
 0x11c   :  { %2223 = vmatprep.subr.bf16.mxu0 %v3025_v31 }
 0x11f   :  { %2224 = vmatpush1.bf16.msra.mxu0 %v3023_v32 }
 0x120   :  { %2225 = vmatprep.subr.bf16.mxu0 %v3028_v33 }
 0x123   :  { %2226 = vmatpush2.bf16.msra.mxu0 %v3026_v34 }
 0x124   :  { %2227 = vmatprep.subr.bf16.mxu0 %v3031_v35 }
 0x127   :  { %2228 = vmatpush2.bf16.msra.mxu0 %v3029_v36 }
 0x128   :  { %2229 = vmatprep.subr.bf16.mxu0 %v3034_v37 }
 0x12b   :  { %2230 = vmatpush2.bf16.msra.mxu0 %v3032_v38 }
 0x12c   :  { %2231 = vmatprep.subr.bf16.mxu0 %v3037_v39 }
 0x12f   :  { %2232 = vmatpush2.bf16.msra.mxu0 %v3035_v40 }
 0x130   :  { %2233 = vmatprep.subr.bf16.mxu0 %v3040_v41 }
 0x133   :  { %2234 = vmatpush2.bf16.msra.mxu0 %v3038_v42 }
 0x134   :  { %2235 = vmatprep.subr.bf16.mxu0 %v3043_v43 }
 0x137   :  { %2236 = vmatpush2.bf16.msra.mxu0 %v3041_v44 }
 0x138   :  { %2237 = vmatprep.subr.bf16.mxu0 %v3046_v45  ;;  %v2252_v45 = vld [vmem:[%s4014_s3] sm:$0xff] }
 0x139   :  { %v2254_v53 = vunpack.c.l.bf16 %v2252_v45  ;;  %v2255_v59 = vunpack.c.h.bf16 %v2252_v45 }
 0x13b   :  { %2238 = vmatpush2.bf16.msra.mxu0 %v3044_v46 }
 0x13c   :  { %2239 = vmatprep.subr.bf16.mxu0 %v3049_v47 }
 0x13f   :  { %2240 = vmatpush2.bf16.msra.mxu0 %v3047_v48 }
 0x142   :  { %2242 = vmatmul.mubr.bf16.vlgmr.msra.gmra.mxu0 %v3050_v49  ;;  %v1985_v57 = vpop.f32.mrf.mxu0 }
 0x143   :  { %v2028_v61 = vpop.f32.mrf.mxu1  ;;  %v1986_v20 = vadd.f32 %v1985_v57, %v1943_v16 }
 0x144   :  { %v1987_v60 = vpop.f32.mrf.mxu0 }
 0x145   :  { %v2030_v0 = vpop.f32.mrf.mxu1  ;;  %v1988_v24 = vadd.f32 %v1987_v60, %v1945_v18  ;;  %v2029_v27 = vadd.f32 %v2028_v61, %v1986_v20 }
 0x146   :  { %v1989_v63 = vpop.f32.mrf.mxu0 }
 0x147   :  { %v2032_v4 = vpop.f32.mrf.mxu1  ;;  %v1990_v28 = vadd.f32 %v1989_v63, %v1947_v23  ;;  %v2031_v30 = vadd.f32 %v2030_v0, %v1988_v24 }
 0x148   :  { %v1991_v3 = vpop.f32.mrf.mxu0 }
 0x149   :  { %v2034_v8 = vpop.f32.mrf.mxu1  ;;  %v1992_v31 = vadd.f32 %v1991_v3, %v1949_v26  ;;  %v2033_v35 = vadd.f32 %v2032_v4, %v1990_v28 }
 0x14b   :  { %v2035_v37 = vadd.f32 %v2034_v8, %v1992_v31 }
 0x182   :  { %v2071_v6 = vpop.f32.mrf.mxu0 }
 0x183   :  { %v2072_v32 = vadd.f32 %v2071_v6, %v2029_v27  ;;  %v2257_v6 = vunpack.c.h.bf16 %v2253_v55 }
 0x184   :  { %v2073_v10 = vpop.f32.mrf.mxu0  ;;  %v2114_v11 = vpop.f32.mrf.mxu1 }
 0x185   :  { %v2074_v36 = vadd.f32 %v2073_v10, %v2031_v30  ;;  %v2115_v38 = vadd.f32 %v2114_v11, %v2072_v32 }
 0x186   :  { %v2075_v14 = vpop.f32.mrf.mxu0  ;;  %v2116_v15 = vpop.f32.mrf.mxu1 }
 0x187   :  { %v2076_v39 = vadd.f32 %v2075_v14, %v2033_v35  ;;  %v2117_v42 = vadd.f32 %v2116_v15, %v2074_v36 }
 0x188   :  { %v2077_v21 = vpop.f32.mrf.mxu0  ;;  %v2118_v22 = vpop.f32.mrf.mxu1 }
 0x189   :  { %v2078_v43 = vadd.f32 %v2077_v21, %v2035_v37  ;;  %v2119_v46 = vadd.f32 %v2118_v22, %v2076_v39 }
 0x18a   :  { %v2120_v29 = vpop.f32.mrf.mxu1 }
 0x18b   :  { %v2121_v50 = vadd.f32 %v2120_v29, %v2078_v43 }
 0x1c2   :  { %v2157_v25 = vpop.f32.mrf.mxu0 }
 0x1c3   :  { %v2158_v44 = vadd.f32 %v2157_v25, %v2115_v38 }
 0x1c4   :  { %v2159_v33 = vpop.f32.mrf.mxu0  ;;  %v2200_v34 = vpop.f32.mrf.mxu1 }
 0x1c5   :  { %v2160_v47 = vadd.f32 %v2159_v33, %v2117_v42  ;;  %v2201_v51 = vadd.f32 %v2200_v34, %v2158_v44 }
 0x1c6   :  { %v2161_v40 = vpop.f32.mrf.mxu0  ;;  %v2202_v41 = vpop.f32.mrf.mxu1 }
 0x1c7   :  { %v2162_v52 = vadd.f32 %v2161_v40, %v2119_v46  ;;  %v2203_v56 = vadd.f32 %v2202_v41, %v2160_v47 }
 0x1c8   :  { %v2163_v48 = vpop.f32.mrf.mxu0  ;;  %v2204_v49 = vpop.f32.mrf.mxu1 }
 0x1c9   :  { %v2164_v57 = vadd.f32 %v2163_v48, %v2121_v50  ;;  %v2205_v62 = vadd.f32 %v2204_v49, %v2162_v52 }
 0x1ca   :  { %v2206_v60 = vpop.f32.mrf.mxu1 }
 0x1cb   :  { %v2207_v3 = vadd.f32 %v2206_v60, %v2164_v57 }
 0x202   :  { %v2243_v54 = vpop.f32.mrf.mxu0 }
 0x203   :  { %v2244_v58 = vadd.f32 %v2243_v54, %v2201_v51 }
 0x204   :  { %v2245_v61 = vpop.f32.mrf.mxu0 }
 0x205   :  { %v2258_v63 = vadd.f32 %v2254_v53, %v2244_v58  ;;  %v2246_v0 = vadd.f32 %v2245_v61, %v2203_v56 }
 0x206   :  { %v2247_v2 = vpop.f32.mrf.mxu0 }
 0x207   :  { %v2259_v4 = vadd.f32 %v2255_v59, %v2246_v0  ;;  %v2248_v5 = vadd.f32 %v2247_v2, %v2205_v62  ;;  %v2262_v8 = vmax.f32 %v2258_v63, 0.0 }
 0x208   :  { %v2249_v7 = vpop.f32.mrf.mxu0 }
 0x209   :  { %v2263_v9 = vmax.f32 %v2259_v4, 0.0  ;;  %v2260_v10 = vadd.f32 %v2256_v1, %v2248_v5  ;;  %v2250_v11 = vadd.f32 %v2249_v7, %v2207_v3 }
 0x20b   :  { %v2592_v12 = vpack.c.bf16 %v2263_v9, %v2262_v8  ;;  %v2261_v13 = vadd.f32 %v2257_v6, %v2250_v11  ;;  %v2264_v14 = vmax.f32 %v2260_v10, 0.0 }
 0x20d   :  { %2278 = vst [vmem:[%s4015_s4] sm:$0xff] %v2592_v12  ;;  %v2265_v15 = vmax.f32 %v2261_v13, 0.0 }
 0x20f   :  { %v2593_v16 = vpack.c.bf16 %v2265_v15, %v2264_v14 }
 0x211   :  { %2279 = vst [vmem:[%s4015_s4 + $0x8] sm:$0xff] %v2593_v16 }

// kernel: resnet_arcface_forward.37
= control target key start
LH: loop header
LB: loop body
LE: loop exit
PB: predicated region body
PF: predicated region fallthrough
CT: control target
= control target key end

     0   :  { %s956_s1 = inlined_call_operand.vmem [shape: bf16[256,512], index: 1, kind: input, shape index: {}]   ;;  %s957_s0 = inlined_call_operand.vmem [shape: bf16[16,256], index: 0, kind: input, shape index: {}]   ;;  %s958_s2 = inlined_call_operand.vmem [shape: f32[1,512], index: 2, kind: input, shape index: {}]   ;;  %s959_s3 = inlined_call_operand.vmem [shape: bf16[16,512], index: 3, kind: output, shape index: {}]  }
   0x1   :  { %v624_v0 = vld [vmem:[%s956_s1 + $0xe4] ss:$16 sps:$4 sm:$0xff]   ;;  %v626_v1 = vld [vmem:[%s956_s1 + $0xec] ss:$16 sps:$4 sm:$0xff]   ;;  %v628_v2 = vld [vmem:[%s956_s1 + $0xe0] ss:$16 sps:$4 sm:$0xff]  }
   0x2   :  { %432 = vmatprep.subr.bf16.mxu0 %v624_v0  ;;  %v629_v3 = vld [vmem:[%s956_s1 + $0xe8] ss:$16 sps:$4 sm:$0xff]   ;;  %475 = vmatprep.subr.bf16.mxu1 %v626_v1  ;;  %v630_v4 = vld [vmem:[%s956_s1 + $0xc4] ss:$16 sps:$4 sm:$0xff]   ;;  %v632_v5 = vld [vmem:[%s956_s1 + $0xcc] ss:$16 sps:$4 sm:$0xff]  }
   0x3   :  { %433 = vmatpush1.bf16.msra.mxu0 %v628_v2  ;;  %476 = vmatpush1.bf16.msra.mxu1 %v629_v3  ;;  %v634_v6 = vld [vmem:[%s956_s1 + $0xc0] ss:$16 sps:$4 sm:$0xff]   ;;  %v635_v7 = vld [vmem:[%s956_s1 + $0xc8] ss:$16 sps:$4 sm:$0xff]   ;;  %v636_v8 = vld [vmem:[%s956_s1 + $0xa4] ss:$16 sps:$4 sm:$0xff]   ;;  %v82_v2 = vlaneseq }
   0x4   :  { %434 = vmatprep.subr.bf16.mxu0 %v630_v4  ;;  %477 = vmatprep.subr.bf16.mxu1 %v632_v5  ;;  %v638_v9 = vld [vmem:[%s956_s1 + $0xac] ss:$16 sps:$4 sm:$0xff]   ;;  %v640_v10 = vld [vmem:[%s956_s1 + $0xa0] ss:$16 sps:$4 sm:$0xff]   ;;  %v641_v11 = vld [vmem:[%s956_s1 + $0xa8] ss:$16 sps:$4 sm:$0xff]  }
   0x5   :  { %v642_v12 = vld [vmem:[%s956_s1 + $0x84] ss:$16 sps:$4 sm:$0xff]   ;;  %v644_v13 = vld [vmem:[%s956_s1 + $0x8c] ss:$16 sps:$4 sm:$0xff]   ;;  %v646_v14 = vld [vmem:[%s956_s1 + $0x80] ss:$16 sps:$4 sm:$0xff]  }
   0x6   :  { %v647_v15 = vld [vmem:[%s956_s1 + $0x88] ss:$16 sps:$4 sm:$0xff]   ;;  %v648_v16 = vld [vmem:[%s956_s1 + $0x64] ss:$16 sps:$4 sm:$0xff]   ;;  %v650_v17 = vld [vmem:[%s956_s1 + $0x6c] ss:$16 sps:$4 sm:$0xff]  }
   0x7   :  { %435 = vmatpush1.bf16.msra.mxu0 %v634_v6  ;;  %478 = vmatpush1.bf16.msra.mxu1 %v635_v7  ;;  %v652_v18 = vld [vmem:[%s956_s1 + $0x60] ss:$16 sps:$4 sm:$0xff]   ;;  %v653_v19 = vld [vmem:[%s956_s1 + $0x68] ss:$16 sps:$4 sm:$0xff]   ;;  %v654_v20 = vld [vmem:[%s956_s1 + $0x44] ss:$16 sps:$4 sm:$0xff]  }
   0x8   :  { %436 = vmatprep.subr.bf16.mxu0 %v636_v8  ;;  %479 = vmatprep.subr.bf16.mxu1 %v638_v9  ;;  %v656_v21 = vld [vmem:[%s956_s1 + $0x4c] ss:$16 sps:$4 sm:$0xff]   ;;  %v658_v22 = vld [vmem:[%s956_s1 + $0x40] ss:$16 sps:$4 sm:$0xff]   ;;  %v659_v23 = vld [vmem:[%s956_s1 + $0x48] ss:$16 sps:$4 sm:$0xff]  }
   0x9   :  { %v660_v24 = vld [vmem:[%s956_s1 + $0x24] ss:$16 sps:$4 sm:$0xff]   ;;  %v662_v25 = vld [vmem:[%s956_s1 + $0x2c] ss:$16 sps:$4 sm:$0xff]   ;;  %v664_v26 = vld [vmem:[%s956_s1 + $0x20] ss:$16 sps:$4 sm:$0xff]  }
   0xa   :  { %v665_v27 = vld [vmem:[%s956_s1 + $0x28] ss:$16 sps:$4 sm:$0xff]   ;;  %v666_v28 = vld [vmem:[%s956_s1 + $0x4] ss:$16 sps:$4 sm:$0xff]   ;;  %v668_v29 = vld [vmem:[%s956_s1 + $0xc] ss:$16 sps:$4 sm:$0xff]  }
   0xb   :  { %437 = vmatpush1.bf16.msra.mxu0 %v640_v10  ;;  %480 = vmatpush1.bf16.msra.mxu1 %v641_v11  ;;  %v670_v30 = vld [vmem:[%s956_s1] ss:$16 sps:$4 sm:$0xff]   ;;  %v671_v31 = vld [vmem:[%s956_s1 + $0x8] ss:$16 sps:$4 sm:$0xff]   ;;  %v672_v32 = vld [vmem:[%s956_s1 + $0x1e4] ss:$16 sps:$4 sm:$0xff]  }
   0xc   :  { %438 = vmatprep.subr.bf16.mxu0 %v642_v12  ;;  %481 = vmatprep.subr.bf16.mxu1 %v644_v13  ;;  %v674_v33 = vld [vmem:[%s956_s1 + $0x1ec] ss:$16 sps:$4 sm:$0xff]   ;;  %v676_v34 = vld [vmem:[%s956_s1 + $0x1e0] ss:$16 sps:$4 sm:$0xff]   ;;  %v677_v35 = vld [vmem:[%s956_s1 + $0x1e8] ss:$16 sps:$4 sm:$0xff]  }
   0xd   :  { %v678_v36 = vld [vmem:[%s956_s1 + $0x1c4] ss:$16 sps:$4 sm:$0xff]   ;;  %v680_v37 = vld [vmem:[%s956_s1 + $0x1cc] ss:$16 sps:$4 sm:$0xff]   ;;  %v682_v38 = vld [vmem:[%s956_s1 + $0x1c0] ss:$16 sps:$4 sm:$0xff]  }
   0xe   :  { %v683_v39 = vld [vmem:[%s956_s1 + $0x1c8] ss:$16 sps:$4 sm:$0xff]   ;;  %v684_v40 = vld [vmem:[%s956_s1 + $0x1a4] ss:$16 sps:$4 sm:$0xff]   ;;  %v686_v41 = vld [vmem:[%s956_s1 + $0x1ac] ss:$16 sps:$4 sm:$0xff]  }
   0xf   :  { %439 = vmatpush1.bf16.msra.mxu0 %v646_v14  ;;  %482 = vmatpush1.bf16.msra.mxu1 %v647_v15  ;;  %v688_v42 = vld [vmem:[%s956_s1 + $0x1a0] ss:$16 sps:$4 sm:$0xff]   ;;  %v689_v43 = vld [vmem:[%s956_s1 + $0x1a8] ss:$16 sps:$4 sm:$0xff]   ;;  %v690_v44 = vld [vmem:[%s956_s1 + $0x184] ss:$16 sps:$4 sm:$0xff]  }
  0x10   :  { %440 = vmatprep.subr.bf16.mxu0 %v648_v16  ;;  %483 = vmatprep.subr.bf16.mxu1 %v650_v17  ;;  %v692_v45 = vld [vmem:[%s956_s1 + $0x18c] ss:$16 sps:$4 sm:$0xff]   ;;  %v694_v47 = vld [vmem:[%s956_s1 + $0x180] ss:$16 sps:$4 sm:$0xff]   ;;  %v695_v48 = vld [vmem:[%s956_s1 + $0x188] ss:$16 sps:$4 sm:$0xff]  }
  0x11   :  { %v722_v46 = vld [vmem:[%s957_s0 + $0x4] ss:$8 sps:$4 sm:$0xff]   ;;  %v700_v51 = vld [vmem:[%s956_s1 + $0x160] ss:$16 sps:$4 sm:$0xff]   ;;  %v701_v52 = vld [vmem:[%s956_s1 + $0x168] ss:$16 sps:$4 sm:$0xff]  }
  0x12   :  { %v696_v49 = vld [vmem:[%s956_s1 + $0x164] ss:$16 sps:$4 sm:$0xff]   ;;  %v698_v50 = vld [vmem:[%s956_s1 + $0x16c] ss:$16 sps:$4 sm:$0xff]   ;;  %464 = vmatprep.mubr.bf16.mxu0 %v722_v46  ;;  %507 = vmatprep.mubr.bf16.mxu1 %v722_v46  ;;  %v706_v55 = vld [vmem:[%s956_s1 + $0x140] ss:$16 sps:$4 sm:$0xff]  }
  0x13   :  { %441 = vmatpush1.bf16.msra.mxu0 %v652_v18  ;;  %484 = vmatpush1.bf16.msra.mxu1 %v653_v19  ;;  %v702_v53 = vld [vmem:[%s956_s1 + $0x144] ss:$16 sps:$4 sm:$0xff]   ;;  %v704_v54 = vld [vmem:[%s956_s1 + $0x14c] ss:$16 sps:$4 sm:$0xff]   ;;  %v707_v56 = vld [vmem:[%s956_s1 + $0x148] ss:$16 sps:$4 sm:$0xff]  }
  0x14   :  { %442 = vmatprep.subr.bf16.mxu0 %v654_v20  ;;  %485 = vmatprep.subr.bf16.mxu1 %v656_v21  ;;  %v708_v57 = vld [vmem:[%s956_s1 + $0x124] ss:$16 sps:$4 sm:$0xff]   ;;  %v710_v58 = vld [vmem:[%s956_s1 + $0x12c] ss:$16 sps:$4 sm:$0xff]   ;;  %v712_v59 = vld [vmem:[%s956_s1 + $0x120] ss:$16 sps:$4 sm:$0xff]  }
  0x15   :  { %v713_v60 = vld [vmem:[%s956_s1 + $0x128] ss:$16 sps:$4 sm:$0xff]   ;;  %v714_v61 = vld [vmem:[%s956_s1 + $0x104] ss:$16 sps:$4 sm:$0xff]   ;;  %v716_v62 = vld [vmem:[%s956_s1 + $0x10c] ss:$16 sps:$4 sm:$0xff]  }
  0x16   :  { %v718_v63 = vld [vmem:[%s956_s1 + $0x100] ss:$16 sps:$4 sm:$0xff]   ;;  %v719_v0 = vld [vmem:[%s956_s1 + $0x108] ss:$16 sps:$4 sm:$0xff]   ;;  %v83_v3 = vshrl.u32 %v82_v2, 7 }
  0x17   :  { %443 = vmatpush1.bf16.msra.mxu0 %v658_v22  ;;  %486 = vmatpush1.bf16.msra.mxu1 %v659_v23  ;;  %v720_v1 = vld [vmem:[%s957_s0] ss:$8 sps:$4 sm:$0xff]  }
  0x18   :  { %444 = vmatprep.subr.bf16.mxu0 %v660_v24  ;;  %487 = vmatprep.subr.bf16.mxu1 %v662_v25  ;;  %v84_v4 = vsub.s32 0, %v83_v3  ;;  %v92_v5 = vsub.s32 2, %v83_v3  ;;  %v88_v6 = vsub.s32 1, %v83_v3  ;;  %v96_v7 = vsub.s32 3, %v83_v3  ;;  %v80_v8 = vld [vmem:[%s958_s2] sm:$0xf] }
  0x1a   :  { %v85_v9 = vrot.slane %v80_v8, %v84_v4  ;;  %v93_v10 = vrot.slane %v80_v8, %v92_v5  ;;  %v89_v11 = vrot.slane %v80_v8, %v88_v6  ;;  %v97_v12 = vrot.slane %v80_v8, %v96_v7 }
  0x1b   :  { %445 = vmatpush1.bf16.msra.mxu0 %v664_v26  ;;  %488 = vmatpush1.bf16.msra.mxu1 %v665_v27 }
  0x1c   :  { %446 = vmatprep.subr.bf16.mxu0 %v666_v28  ;;  %489 = vmatprep.subr.bf16.mxu1 %v668_v29 }
  0x1f   :  { %447 = vmatpush1.bf16.msra.mxu0 %v670_v30  ;;  %490 = vmatpush1.bf16.msra.mxu1 %v671_v31 }
  0x20   :  { %448 = vmatprep.subr.bf16.mxu0 %v672_v32  ;;  %491 = vmatprep.subr.bf16.mxu1 %v674_v33 }
  0x23   :  { %449 = vmatpush2.bf16.msra.mxu0 %v676_v34  ;;  %492 = vmatpush2.bf16.msra.mxu1 %v677_v35 }
  0x24   :  { %450 = vmatprep.subr.bf16.mxu0 %v678_v36  ;;  %493 = vmatprep.subr.bf16.mxu1 %v680_v37 }
  0x27   :  { %451 = vmatpush2.bf16.msra.mxu0 %v682_v38  ;;  %494 = vmatpush2.bf16.msra.mxu1 %v683_v39 }
  0x28   :  { %452 = vmatprep.subr.bf16.mxu0 %v684_v40  ;;  %495 = vmatprep.subr.bf16.mxu1 %v686_v41 }
  0x2b   :  { %453 = vmatpush2.bf16.msra.mxu0 %v688_v42  ;;  %496 = vmatpush2.bf16.msra.mxu1 %v689_v43 }
  0x2c   :  { %454 = vmatprep.subr.bf16.mxu0 %v690_v44  ;;  %497 = vmatprep.subr.bf16.mxu1 %v692_v45 }
  0x2f   :  { %455 = vmatpush2.bf16.msra.mxu0 %v694_v47  ;;  %498 = vmatpush2.bf16.msra.mxu1 %v695_v48 }
  0x30   :  { %456 = vmatprep.subr.bf16.mxu0 %v696_v49  ;;  %499 = vmatprep.subr.bf16.mxu1 %v698_v50 }
  0x33   :  { %457 = vmatpush2.bf16.msra.mxu0 %v700_v51  ;;  %500 = vmatpush2.bf16.msra.mxu1 %v701_v52 }
  0x34   :  { %458 = vmatprep.subr.bf16.mxu0 %v702_v53  ;;  %501 = vmatprep.subr.bf16.mxu1 %v704_v54 }
  0x37   :  { %459 = vmatpush2.bf16.msra.mxu0 %v706_v55  ;;  %502 = vmatpush2.bf16.msra.mxu1 %v707_v56 }
  0x38   :  { %460 = vmatprep.subr.bf16.mxu0 %v708_v57  ;;  %503 = vmatprep.subr.bf16.mxu1 %v710_v58 }
  0x3b   :  { %461 = vmatpush2.bf16.msra.mxu0 %v712_v59  ;;  %504 = vmatpush2.bf16.msra.mxu1 %v713_v60 }
  0x3c   :  { %462 = vmatprep.subr.bf16.mxu0 %v714_v61  ;;  %505 = vmatprep.subr.bf16.mxu1 %v716_v62 }
  0x3f   :  { %463 = vmatpush2.bf16.msra.mxu0 %v718_v63  ;;  %506 = vmatpush2.bf16.msra.mxu1 %v719_v0 }
  0x42   :  { %465 = vmatmul.mubr.bf16.vlgmr.msra.gmra.mxu0 %v720_v1  ;;  %508 = vmatmul.mubr.bf16.vlgmr.msra.gmra.mxu1 %v720_v1 }
 0x102   :  { %v466_v13 = vpop.f32.mrf.mxu0  ;;  %v509_v14 = vpop.f32.mrf.mxu1 }
 0x103   :  { %v467_v17 = vadd.f32 %v466_v13, %v85_v9  ;;  %v510_v18 = vadd.f32 %v509_v14, %v93_v10 }
 0x104   :  { %v468_v15 = vpop.f32.mrf.mxu0  ;;  %v511_v16 = vpop.f32.mrf.mxu1 }
 0x105   :  { %v469_v19 = vadd.f32 %v468_v15, %v89_v11  ;;  %v512_v20 = vadd.f32 %v511_v16, %v97_v12 }
 0x106   :  { %v470_v21 = vpop.f32.mrf.mxu0  ;;  %v513_v22 = vpop.f32.mrf.mxu1 }
 0x107   :  { %v620_v23 = vpack.c.bf16 %v469_v19, %v467_v17  ;;  %v621_v24 = vpack.c.bf16 %v512_v20, %v510_v18  ;;  %v471_v27 = vadd.f32 %v470_v21, %v85_v9  ;;  %v514_v28 = vadd.f32 %v513_v22, %v93_v10 }
 0x108   :  { %v472_v25 = vpop.f32.mrf.mxu0  ;;  %v515_v26 = vpop.f32.mrf.mxu1 }
 0x109   :  { %542 = vst [vmem:[%s959_s3] sm:$0xff] %v620_v23  ;;  %543 = vst [vmem:[%s959_s3 + $0x8] sm:$0xff] %v621_v24  ;;  %v473_v29 = vadd.f32 %v472_v25, %v89_v11  ;;  %v516_v30 = vadd.f32 %v515_v26, %v97_v12 }
 0x10b   :  { %v622_v31 = vpack.c.bf16 %v473_v29, %v471_v27  ;;  %v623_v32 = vpack.c.bf16 %v516_v30, %v514_v28 }
 0x10d   :  { %544 = vst [vmem:[%s959_s3 + $0x10] sm:$0xff] %v622_v31  ;;  %545 = vst [vmem:[%s959_s3 + $0x18] sm:$0xff] %v623_v32 }

// kernel: resnet_arcface_forward.34
= control target key start
LH: loop header
LB: loop body
LE: loop exit
PB: predicated region body
PF: predicated region fallthrough
CT: control target
= control target key end

     0   :  { %s3987_s1 = inlined_call_operand.vmem [shape: bf16[2304,256], index: 1, kind: input, shape index: {}]   ;;  %s3988_s0 = inlined_call_operand.vmem [shape: bf16[16,2304], index: 0, kind: input, shape index: {}]   ;;  %s3989_s2 = inlined_call_operand.vmem [shape: f32[1,256], index: 2, kind: input, shape index: {}]   ;;  %s3990_s3 = inlined_call_operand.vmem [shape: bf16[16,256], index: 3, kind: output, shape index: {}]  }
   0x1   :  { %v2581_v0 = vld [vmem:[%s3987_s1 + $0x74] ss:$8 sps:$4 sm:$0xff]   ;;  %v2583_v1 = vld [vmem:[%s3987_s1 + $0x70] ss:$8 sps:$4 sm:$0xff]   ;;  %v2587_v4 = vld [vmem:[%s3987_s1 + $0x64] ss:$8 sps:$4 sm:$0xff]  }
   0x2   :  { %1862 = vmatprep.subr.bf16.mxu0 %v2581_v0  ;;  %v2584_v2 = vld [vmem:[%s3987_s1 + $0x174] ss:$8 sps:$4 sm:$0xff]   ;;  %v2586_v3 = vld [vmem:[%s3987_s1 + $0x170] ss:$8 sps:$4 sm:$0xff]   ;;  %v2589_v5 = vld [vmem:[%s3987_s1 + $0x60] ss:$8 sps:$4 sm:$0xff]  }
   0x3   :  { %1863 = vmatpush1.bf16.msra.mxu0 %v2583_v1  ;;  %1905 = vmatprep.subr.bf16.mxu1 %v2584_v2  ;;  %v2590_v6 = vld [vmem:[%s3987_s1 + $0x164] ss:$8 sps:$4 sm:$0xff]   ;;  %v2592_v7 = vld [vmem:[%s3987_s1 + $0x160] ss:$8 sps:$4 sm:$0xff]   ;;  %v2593_v8 = vld [vmem:[%s3987_s1 + $0x54] ss:$8 sps:$4 sm:$0xff]  }
   0x4   :  { %1906 = vmatpush1.bf16.msra.mxu1 %v2586_v3  ;;  %1864 = vmatprep.subr.bf16.mxu0 %v2587_v4  ;;  %v2595_v9 = vld [vmem:[%s3987_s1 + $0x50] ss:$8 sps:$4 sm:$0xff]   ;;  %v2596_v10 = vld [vmem:[%s3987_s1 + $0x154] ss:$8 sps:$4 sm:$0xff]   ;;  %v2599_v11 = vld [vmem:[%s3987_s1 + $0x44] ss:$8 sps:$4 sm:$0xff]  }
   0x5   :  { %1907 = vmatprep.subr.bf16.mxu1 %v2590_v6  ;;  %v2598_v12 = vld [vmem:[%s3987_s1 + $0x150] ss:$8 sps:$4 sm:$0xff]   ;;  %v2602_v13 = vld [vmem:[%s3987_s1 + $0x144] ss:$8 sps:$4 sm:$0xff]   ;;  %v2601_v14 = vld [vmem:[%s3987_s1 + $0x40] ss:$8 sps:$4 sm:$0xff]  }
   0x6   :  { %v2605_v15 = vld [vmem:[%s3987_s1 + $0x34] ss:$8 sps:$4 sm:$0xff]   ;;  %v2604_v16 = vld [vmem:[%s3987_s1 + $0x140] ss:$8 sps:$4 sm:$0xff]   ;;  %v2607_v18 = vld [vmem:[%s3987_s1 + $0x30] ss:$8 sps:$4 sm:$0xff]  }
   0x7   :  { %1865 = vmatpush1.bf16.msra.mxu0 %v2589_v5  ;;  %v2608_v17 = vld [vmem:[%s3987_s1 + $0x134] ss:$8 sps:$4 sm:$0xff]   ;;  %v2611_v19 = vld [vmem:[%s3987_s1 + $0x24] ss:$8 sps:$4 sm:$0xff]   ;;  %v2610_v20 = vld [vmem:[%s3987_s1 + $0x130] ss:$8 sps:$4 sm:$0xff]  }
   0x8   :  { %1866 = vmatprep.subr.bf16.mxu0 %v2593_v8  ;;  %1908 = vmatpush1.bf16.msra.mxu1 %v2592_v7  ;;  %v2614_v21 = vld [vmem:[%s3987_s1 + $0x124] ss:$8 sps:$4 sm:$0xff]   ;;  %v2613_v22 = vld [vmem:[%s3987_s1 + $0x20] ss:$8 sps:$4 sm:$0xff]   ;;  %v2617_v23 = vld [vmem:[%s3987_s1 + $0x14] ss:$8 sps:$4 sm:$0xff]  }
   0x9   :  { %1909 = vmatprep.subr.bf16.mxu1 %v2596_v10  ;;  %v2616_v24 = vld [vmem:[%s3987_s1 + $0x120] ss:$8 sps:$4 sm:$0xff]   ;;  %v2620_v25 = vld [vmem:[%s3987_s1 + $0x114] ss:$8 sps:$4 sm:$0xff]   ;;  %v2619_v26 = vld [vmem:[%s3987_s1 + $0x10] ss:$8 sps:$4 sm:$0xff]  }
   0xa   :  { %v2623_v27 = vld [vmem:[%s3987_s1 + $0x4] ss:$8 sps:$4 sm:$0xff]   ;;  %v2622_v28 = vld [vmem:[%s3987_s1 + $0x110] ss:$8 sps:$4 sm:$0xff]   ;;  %v2625_v30 = vld [vmem:[%s3987_s1] ss:$8 sps:$4 sm:$0xff]  }
   0xb   :  { %1867 = vmatpush1.bf16.msra.mxu0 %v2595_v9  ;;  %v2626_v29 = vld [vmem:[%s3987_s1 + $0x104] ss:$8 sps:$4 sm:$0xff]   ;;  %v2629_v31 = vld [vmem:[%s3987_s1 + $0xf4] ss:$8 sps:$4 sm:$0xff]   ;;  %v2628_v32 = vld [vmem:[%s3987_s1 + $0x100] ss:$8 sps:$4 sm:$0xff]  }
   0xc   :  { %1868 = vmatprep.subr.bf16.mxu0 %v2599_v11  ;;  %1910 = vmatpush1.bf16.msra.mxu1 %v2598_v12  ;;  %v2632_v33 = vld [vmem:[%s3987_s1 + $0x1f4] ss:$8 sps:$4 sm:$0xff]   ;;  %v2631_v34 = vld [vmem:[%s3987_s1 + $0xf0] ss:$8 sps:$4 sm:$0xff]   ;;  %v2635_v35 = vld [vmem:[%s3987_s1 + $0xe4] ss:$8 sps:$4 sm:$0xff]  }
   0xd   :  { %1911 = vmatprep.subr.bf16.mxu1 %v2602_v13  ;;  %v2634_v36 = vld [vmem:[%s3987_s1 + $0x1f0] ss:$8 sps:$4 sm:$0xff]   ;;  %v2638_v37 = vld [vmem:[%s3987_s1 + $0x1e4] ss:$8 sps:$4 sm:$0xff]   ;;  %v2637_v38 = vld [vmem:[%s3987_s1 + $0xe0] ss:$8 sps:$4 sm:$0xff]  }
   0xe   :  { %v2641_v39 = vld [vmem:[%s3987_s1 + $0xd4] ss:$8 sps:$4 sm:$0xff]   ;;  %v2640_v40 = vld [vmem:[%s3987_s1 + $0x1e0] ss:$8 sps:$4 sm:$0xff]   ;;  %v2643_v42 = vld [vmem:[%s3987_s1 + $0xd0] ss:$8 sps:$4 sm:$0xff]  }
   0xf   :  { %1869 = vmatpush1.bf16.msra.mxu0 %v2601_v14  ;;  %v2644_v41 = vld [vmem:[%s3987_s1 + $0x1d4] ss:$8 sps:$4 sm:$0xff]   ;;  %v2647_v43 = vld [vmem:[%s3987_s1 + $0xc4] ss:$8 sps:$4 sm:$0xff]   ;;  %v2646_v44 = vld [vmem:[%s3987_s1 + $0x1d0] ss:$8 sps:$4 sm:$0xff]  }
  0x10   :  { %1870 = vmatprep.subr.bf16.mxu0 %v2605_v15  ;;  %1912 = vmatpush1.bf16.msra.mxu1 %v2604_v16  ;;  %v2650_v45 = vld [vmem:[%s3987_s1 + $0x1c4] ss:$8 sps:$4 sm:$0xff]   ;;  %v2649_v46 = vld [vmem:[%s3987_s1 + $0xc0] ss:$8 sps:$4 sm:$0xff]   ;;  %v2653_v48 = vld [vmem:[%s3987_s1 + $0xb4] ss:$8 sps:$4 sm:$0xff]  }
  0x11   :  { %1913 = vmatprep.subr.bf16.mxu1 %v2608_v17  ;;  %v2678_v47 = vld [vmem:[%s3988_s0 + $0x4] ss:$72 sps:$4 sm:$0xff]   ;;  %v2652_v49 = vld [vmem:[%s3987_s1 + $0x1c0] ss:$8 sps:$4 sm:$0xff]   ;;  %v2656_v50 = vld [vmem:[%s3987_s1 + $0x1b4] ss:$8 sps:$4 sm:$0xff]  }
  0x12   :  { %1894 = vmatprep.mubr.bf16.mxu0 %v2678_v47  ;;  %v2685_v51 = vld [vmem:[%s3988_s0 + $0xc] ss:$72 sps:$4 sm:$0xff]   ;;  %v2655_v52 = vld [vmem:[%s3987_s1 + $0xb0] ss:$8 sps:$4 sm:$0xff]   ;;  %v2661_v56 = vld [vmem:[%s3987_s1 + $0xa0] ss:$8 sps:$4 sm:$0xff]  }
  0x13   :  { %1871 = vmatpush1.bf16.msra.mxu0 %v2607_v18  ;;  %v2659_v53 = vld [vmem:[%s3987_s1 + $0xa4] ss:$8 sps:$4 sm:$0xff]   ;;  %1937 = vmatprep.mubr.bf16.mxu1 %v2685_v51  ;;  %v2658_v54 = vld [vmem:[%s3987_s1 + $0x1b0] ss:$8 sps:$4 sm:$0xff]   ;;  %v2665_v57 = vld [vmem:[%s3987_s1 + $0x94] ss:$8 sps:$4 sm:$0xff]  }
  0x14   :  { %1872 = vmatprep.subr.bf16.mxu0 %v2611_v19  ;;  %1914 = vmatpush1.bf16.msra.mxu1 %v2610_v20  ;;  %v2662_v55 = vld [vmem:[%s3987_s1 + $0x1a4] ss:$8 sps:$4 sm:$0xff]   ;;  %v2664_v58 = vld [vmem:[%s3987_s1 + $0x1a0] ss:$8 sps:$4 sm:$0xff]   ;;  %v2668_v59 = vld [vmem:[%s3987_s1 + $0x194] ss:$8 sps:$4 sm:$0xff]  }
  0x15   :  { %1915 = vmatprep.subr.bf16.mxu1 %v2614_v21  ;;  %v2667_v60 = vld [vmem:[%s3987_s1 + $0x90] ss:$8 sps:$4 sm:$0xff]   ;;  %v2671_v61 = vld [vmem:[%s3987_s1 + $0x84] ss:$8 sps:$4 sm:$0xff]   ;;  %v2673_v0 = vld [vmem:[%s3987_s1 + $0x80] ss:$8 sps:$4 sm:$0xff]  }
  0x16   :  { %v2670_v62 = vld [vmem:[%s3987_s1 + $0x190] ss:$8 sps:$4 sm:$0xff]   ;;  %v2674_v63 = vld [vmem:[%s3987_s1 + $0x184] ss:$8 sps:$4 sm:$0xff]   ;;  %v2682_v1 = vld [vmem:[%s3987_s1 + $0x274] ss:$8 sps:$4 sm:$0xff]  }
  0x17   :  { %1873 = vmatpush1.bf16.msra.mxu0 %v2613_v22  ;;  %v2679_v2 = vld [vmem:[%s3987_s1 + $0x180] ss:$8 sps:$4 sm:$0xff]   ;;  %v2688_v4 = vld [vmem:[%s3987_s1 + $0x374] ss:$8 sps:$4 sm:$0xff]   ;;  %v2680_v5 = vld [vmem:[%s3987_s1 + $0x270] ss:$8 sps:$4 sm:$0xff]  }
  0x18   :  { %1874 = vmatprep.subr.bf16.mxu0 %v2617_v23  ;;  %1916 = vmatpush1.bf16.msra.mxu1 %v2616_v24  ;;  %v2676_v3 = vld [vmem:[%s3988_s0] ss:$72 sps:$4 sm:$0xff]   ;;  %v2691_v7 = vld [vmem:[%s3987_s1 + $0x264] ss:$8 sps:$4 sm:$0xff]   ;;  %v2686_v8 = vld [vmem:[%s3987_s1 + $0x370] ss:$8 sps:$4 sm:$0xff]  }
  0x19   :  { %1917 = vmatprep.subr.bf16.mxu1 %v2620_v25  ;;  %v2683_v6 = vld [vmem:[%s3988_s0 + $0x8] ss:$72 sps:$4 sm:$0xff]   ;;  %v2694_v9 = vld [vmem:[%s3987_s1 + $0x364] ss:$8 sps:$4 sm:$0xff]   ;;  %v2697_v11 = vld [vmem:[%s3987_s1 + $0x254] ss:$8 sps:$4 sm:$0xff]  }
  0x1a   :  { %v2689_v10 = vld [vmem:[%s3987_s1 + $0x260] ss:$8 sps:$4 sm:$0xff]   ;;  %v2700_v13 = vld [vmem:[%s3987_s1 + $0x354] ss:$8 sps:$4 sm:$0xff]   ;;  %v2695_v14 = vld [vmem:[%s3987_s1 + $0x250] ss:$8 sps:$4 sm:$0xff]  }
  0x1b   :  { %1875 = vmatpush1.bf16.msra.mxu0 %v2619_v26  ;;  %v2692_v12 = vld [vmem:[%s3987_s1 + $0x360] ss:$8 sps:$4 sm:$0xff]   ;;  %v2703_v15 = vld [vmem:[%s3987_s1 + $0x244] ss:$8 sps:$4 sm:$0xff]   ;;  %v2698_v16 = vld [vmem:[%s3987_s1 + $0x350] ss:$8 sps:$4 sm:$0xff]  }
  0x1c   :  { %1876 = vmatprep.subr.bf16.mxu0 %v2623_v27  ;;  %1918 = vmatpush1.bf16.msra.mxu1 %v2622_v28  ;;  %v2706_v17 = vld [vmem:[%s3987_s1 + $0x344] ss:$8 sps:$4 sm:$0xff]   ;;  %v2701_v18 = vld [vmem:[%s3987_s1 + $0x240] ss:$8 sps:$4 sm:$0xff]   ;;  %v2709_v19 = vld [vmem:[%s3987_s1 + $0x234] ss:$8 sps:$4 sm:$0xff]  }
  0x1d   :  { %1919 = vmatprep.subr.bf16.mxu1 %v2626_v29  ;;  %v2704_v20 = vld [vmem:[%s3987_s1 + $0x340] ss:$8 sps:$4 sm:$0xff]   ;;  %v2712_v21 = vld [vmem:[%s3987_s1 + $0x334] ss:$8 sps:$4 sm:$0xff]   ;;  %v2707_v22 = vld [vmem:[%s3987_s1 + $0x230] ss:$8 sps:$4 sm:$0xff]  }
  0x1e   :  { %v2715_v23 = vld [vmem:[%s3987_s1 + $0x224] ss:$8 sps:$4 sm:$0xff]   ;;  %v2710_v24 = vld [vmem:[%s3987_s1 + $0x330] ss:$8 sps:$4 sm:$0xff]   ;;  %v2713_v26 = vld [vmem:[%s3987_s1 + $0x220] ss:$8 sps:$4 sm:$0xff]  }
  0x1f   :  { %1877 = vmatpush1.bf16.msra.mxu0 %v2625_v30  ;;  %v2718_v25 = vld [vmem:[%s3987_s1 + $0x324] ss:$8 sps:$4 sm:$0xff]   ;;  %v2721_v27 = vld [vmem:[%s3987_s1 + $0x214] ss:$8 sps:$4 sm:$0xff]   ;;  %v2716_v28 = vld [vmem:[%s3987_s1 + $0x320] ss:$8 sps:$4 sm:$0xff]  }
  0x20   :  { %1878 = vmatprep.subr.bf16.mxu0 %v2629_v31  ;;  %1920 = vmatpush1.bf16.msra.mxu1 %v2628_v32  ;;  %v2724_v29 = vld [vmem:[%s3987_s1 + $0x314] ss:$8 sps:$4 sm:$0xff]   ;;  %v2719_v30 = vld [vmem:[%s3987_s1 + $0x210] ss:$8 sps:$4 sm:$0xff]   ;;  %v2727_v32 = vld [vmem:[%s3987_s1 + $0x204] ss:$8 sps:$4 sm:$0xff]  }
  0x21   :  { %1921 = vmatprep.subr.bf16.mxu1 %v2632_v33  ;;  %v2722_v31 = vld [vmem:[%s3987_s1 + $0x310] ss:$8 sps:$4 sm:$0xff]   ;;  %v2781_v33 = vld [vmem:[%s3988_s0 + $0x14] ss:$72 sps:$4 sm:$0xff]   ;;  %v2754_v51 = vld [vmem:[%s3987_s1 + $0x3c4] ss:$8 sps:$4 sm:$0xff]  }
  0x22   :  { %v2748_v47 = vld [vmem:[%s3987_s1 + $0x3d4] ss:$8 sps:$4 sm:$0xff]  }
  0x23   :  { %1879 = vmatpush2.bf16.msra.mxu0 %v2631_v34  ;;  %v2730_v34 = vld [vmem:[%s3987_s1 + $0x304] ss:$8 sps:$4 sm:$0xff]  }
  0x24   :  { %1880 = vmatprep.subr.bf16.mxu0 %v2635_v35  ;;  %1922 = vmatpush2.bf16.msra.mxu1 %v2634_v36  ;;  %v2725_v35 = vld [vmem:[%s3987_s1 + $0x200] ss:$8 sps:$4 sm:$0xff]   ;;  %v2787_v36 = vld [vmem:[%s3988_s0 + $0x1c] ss:$72 sps:$4 sm:$0xff]  }
  0x25   :  { %1923 = vmatprep.subr.bf16.mxu1 %v2638_v37  ;;  %v2733_v37 = vld [vmem:[%s3987_s1 + $0x2f4] ss:$8 sps:$4 sm:$0xff]  }
  0x27   :  { %1881 = vmatpush2.bf16.msra.mxu0 %v2637_v38  ;;  %v2728_v38 = vld [vmem:[%s3987_s1 + $0x300] ss:$8 sps:$4 sm:$0xff]  }
  0x28   :  { %1882 = vmatprep.subr.bf16.mxu0 %v2641_v39  ;;  %1924 = vmatpush2.bf16.msra.mxu1 %v2640_v40  ;;  %v2736_v39 = vld [vmem:[%s3987_s1 + $0x3f4] ss:$8 sps:$4 sm:$0xff]   ;;  %v2731_v40 = vld [vmem:[%s3987_s1 + $0x2f0] ss:$8 sps:$4 sm:$0xff]  }
  0x29   :  { %1925 = vmatprep.subr.bf16.mxu1 %v2644_v41  ;;  %v2739_v41 = vld [vmem:[%s3987_s1 + $0x2e4] ss:$8 sps:$4 sm:$0xff]  }
  0x2b   :  { %1883 = vmatpush2.bf16.msra.mxu0 %v2643_v42  ;;  %v2734_v42 = vld [vmem:[%s3987_s1 + $0x3f0] ss:$8 sps:$4 sm:$0xff]  }
  0x2c   :  { %1884 = vmatprep.subr.bf16.mxu0 %v2647_v43  ;;  %1926 = vmatpush2.bf16.msra.mxu1 %v2646_v44  ;;  %v2742_v43 = vld [vmem:[%s3987_s1 + $0x3e4] ss:$8 sps:$4 sm:$0xff]   ;;  %v2737_v44 = vld [vmem:[%s3987_s1 + $0x2e0] ss:$8 sps:$4 sm:$0xff]  }
  0x2d   :  { %1927 = vmatprep.subr.bf16.mxu1 %v2650_v45  ;;  %v2745_v45 = vld [vmem:[%s3987_s1 + $0x2d4] ss:$8 sps:$4 sm:$0xff]  }
  0x2f   :  { %1885 = vmatpush2.bf16.msra.mxu0 %v2649_v46  ;;  %v2740_v46 = vld [vmem:[%s3987_s1 + $0x3e0] ss:$8 sps:$4 sm:$0xff]  }
  0x30   :  { %1886 = vmatprep.subr.bf16.mxu0 %v2653_v48  ;;  %1928 = vmatpush2.bf16.msra.mxu1 %v2652_v49  ;;  %v2743_v48 = vld [vmem:[%s3987_s1 + $0x2d0] ss:$8 sps:$4 sm:$0xff]   ;;  %v2751_v49 = vld [vmem:[%s3987_s1 + $0x2c4] ss:$8 sps:$4 sm:$0xff]  }
  0x31   :  { %1929 = vmatprep.subr.bf16.mxu1 %v2656_v50  ;;  %v2746_v50 = vld [vmem:[%s3987_s1 + $0x3d0] ss:$8 sps:$4 sm:$0xff]  }
  0x33   :  { %1887 = vmatpush2.bf16.msra.mxu0 %v2655_v52  ;;  %v2749_v52 = vld [vmem:[%s3987_s1 + $0x2c0] ss:$8 sps:$4 sm:$0xff]  }
  0x34   :  { %1888 = vmatprep.subr.bf16.mxu0 %v2659_v53  ;;  %1930 = vmatpush2.bf16.msra.mxu1 %v2658_v54  ;;  %v2757_v53 = vld [vmem:[%s3987_s1 + $0x2b4] ss:$8 sps:$4 sm:$0xff]   ;;  %v2752_v54 = vld [vmem:[%s3987_s1 + $0x3c0] ss:$8 sps:$4 sm:$0xff]  }
  0x35   :  { %1931 = vmatprep.subr.bf16.mxu1 %v2662_v55  ;;  %v2760_v55 = vld [vmem:[%s3987_s1 + $0x3b4] ss:$8 sps:$4 sm:$0xff]  }
  0x37   :  { %1889 = vmatpush2.bf16.msra.mxu0 %v2661_v56  ;;  %v2755_v56 = vld [vmem:[%s3987_s1 + $0x2b0] ss:$8 sps:$4 sm:$0xff]  }
  0x38   :  { %1890 = vmatprep.subr.bf16.mxu0 %v2665_v57  ;;  %1932 = vmatpush2.bf16.msra.mxu1 %v2664_v58  ;;  %v2763_v57 = vld [vmem:[%s3987_s1 + $0x2a4] ss:$8 sps:$4 sm:$0xff]   ;;  %v2758_v58 = vld [vmem:[%s3987_s1 + $0x3b0] ss:$8 sps:$4 sm:$0xff]  }
  0x39   :  { %1933 = vmatprep.subr.bf16.mxu1 %v2668_v59  ;;  %v2766_v59 = vld [vmem:[%s3987_s1 + $0x3a4] ss:$8 sps:$4 sm:$0xff]  }
  0x3b   :  { %1891 = vmatpush2.bf16.msra.mxu0 %v2667_v60  ;;  %v2761_v60 = vld [vmem:[%s3987_s1 + $0x2a0] ss:$8 sps:$4 sm:$0xff]  }
  0x3c   :  { %1892 = vmatprep.subr.bf16.mxu0 %v2671_v61  ;;  %1934 = vmatpush2.bf16.msra.mxu1 %v2670_v62  ;;  %v2769_v61 = vld [vmem:[%s3987_s1 + $0x294] ss:$8 sps:$4 sm:$0xff]   ;;  %v2764_v62 = vld [vmem:[%s3987_s1 + $0x3a0] ss:$8 sps:$4 sm:$0xff]  }
  0x3d   :  { %1935 = vmatprep.subr.bf16.mxu1 %v2674_v63  ;;  %v2772_v63 = vld [vmem:[%s3987_s1 + $0x394] ss:$8 sps:$4 sm:$0xff]  }
  0x3f   :  { %1893 = vmatpush2.bf16.msra.mxu0 %v2673_v0  ;;  %v2767_v0 = vld [vmem:[%s3987_s1 + $0x290] ss:$8 sps:$4 sm:$0xff]  }
  0x40   :  { %1948 = vmatprep.subr.bf16.mxu0 %v2682_v1  ;;  %1936 = vmatpush2.bf16.msra.mxu1 %v2679_v2  ;;  %v2775_v1 = vld [vmem:[%s3987_s1 + $0x284] ss:$8 sps:$4 sm:$0xff]   ;;  %v2770_v2 = vld [vmem:[%s3987_s1 + $0x390] ss:$8 sps:$4 sm:$0xff]  }
  0x41   :  { %1991 = vmatprep.subr.bf16.mxu1 %v2688_v4  ;;  %v2773_v4 = vld [vmem:[%s3987_s1 + $0x280] ss:$8 sps:$4 sm:$0xff]  }
  0x42   :  { %1895 = vmatmul.mubr.bf16.vlgmr.msra.gmra.mxu0 %v2676_v3  ;;  %v2778_v3 = vld [vmem:[%s3987_s1 + $0x384] ss:$8 sps:$4 sm:$0xff]  }
  0x43   :  { %1949 = vmatpush1.bf16.msra.mxu0 %v2680_v5  ;;  %1938 = vmatmul.mubr.bf16.vlgmr.msra.gmra.mxu1 %v2683_v6  ;;  %v2784_v5 = vld [vmem:[%s3987_s1 + $0x474] ss:$8 sps:$4 sm:$0xff]   ;;  %v2776_v6 = vld [vmem:[%s3987_s1 + $0x380] ss:$8 sps:$4 sm:$0xff]  }
  0x44   :  { %1950 = vmatprep.subr.bf16.mxu0 %v2691_v7  ;;  %1992 = vmatpush1.bf16.msra.mxu1 %v2686_v8  ;;  %v2779_v7 = vld [vmem:[%s3988_s0 + $0x10] ss:$72 sps:$4 sm:$0xff]   ;;  %v2790_v8 = vld [vmem:[%s3987_s1 + $0x574] ss:$8 sps:$4 sm:$0xff]  }
  0x45   :  { %1993 = vmatprep.subr.bf16.mxu1 %v2694_v9  ;;  %1980 = vmatprep.mubr.bf16.mxu0 %v2781_v33  ;;  %v2782_v9 = vld [vmem:[%s3987_s1 + $0x470] ss:$8 sps:$4 sm:$0xff]   ;;  %v2823_v33 = vld [vmem:[%s3987_s1 + $0x414] ss:$8 sps:$4 sm:$0xff]  }
  0x46   :  { %2023 = vmatprep.mubr.bf16.mxu1 %v2787_v36  ;;  %v2821_v36 = vld [vmem:[%s3987_s1 + $0x410] ss:$8 sps:$4 sm:$0xff]  }
  0x47   :  { %1951 = vmatpush1.bf16.msra.mxu0 %v2689_v10  ;;  %v2785_v10 = vld [vmem:[%s3988_s0 + $0x18] ss:$72 sps:$4 sm:$0xff]  }
  0x48   :  { %1952 = vmatprep.subr.bf16.mxu0 %v2697_v11  ;;  %1994 = vmatpush1.bf16.msra.mxu1 %v2692_v12  ;;  %v2793_v11 = vld [vmem:[%s3987_s1 + $0x464] ss:$8 sps:$4 sm:$0xff]   ;;  %v2788_v12 = vld [vmem:[%s3987_s1 + $0x570] ss:$8 sps:$4 sm:$0xff]  }
  0x49   :  { %1995 = vmatprep.subr.bf16.mxu1 %v2700_v13  ;;  %v2796_v13 = vld [vmem:[%s3987_s1 + $0x564] ss:$8 sps:$4 sm:$0xff]  }
  0x4b   :  { %1953 = vmatpush1.bf16.msra.mxu0 %v2695_v14  ;;  %v2791_v14 = vld [vmem:[%s3987_s1 + $0x460] ss:$8 sps:$4 sm:$0xff]  }
  0x4c   :  { %1954 = vmatprep.subr.bf16.mxu0 %v2703_v15  ;;  %1996 = vmatpush1.bf16.msra.mxu1 %v2698_v16  ;;  %v2799_v15 = vld [vmem:[%s3987_s1 + $0x454] ss:$8 sps:$4 sm:$0xff]   ;;  %v2794_v16 = vld [vmem:[%s3987_s1 + $0x560] ss:$8 sps:$4 sm:$0xff]  }
  0x4d   :  { %1997 = vmatprep.subr.bf16.mxu1 %v2706_v17  ;;  %v2802_v17 = vld [vmem:[%s3987_s1 + $0x554] ss:$8 sps:$4 sm:$0xff]  }
  0x4f   :  { %1955 = vmatpush1.bf16.msra.mxu0 %v2701_v18  ;;  %v2883_v18 = vld [vmem:[%s3988_s0 + $0x24] ss:$72 sps:$4 sm:$0xff]  }
  0x50   :  { %1956 = vmatprep.subr.bf16.mxu0 %v2709_v19  ;;  %1998 = vmatpush1.bf16.msra.mxu1 %v2704_v20  ;;  %v2797_v19 = vld [vmem:[%s3987_s1 + $0x450] ss:$8 sps:$4 sm:$0xff]  }
  0x51   :  { %1999 = vmatprep.subr.bf16.mxu1 %v2712_v21  ;;  %v2800_v20 = vld [vmem:[%s3987_s1 + $0x550] ss:$8 sps:$4 sm:$0xff]   ;;  %v2805_v21 = vld [vmem:[%s3987_s1 + $0x444] ss:$8 sps:$4 sm:$0xff]  }
  0x53   :  { %1957 = vmatpush1.bf16.msra.mxu0 %v2707_v22  ;;  %v2889_v22 = vld [vmem:[%s3988_s0 + $0x2c] ss:$72 sps:$4 sm:$0xff]  }
  0x54   :  { %1958 = vmatprep.subr.bf16.mxu0 %v2715_v23  ;;  %2000 = vmatpush1.bf16.msra.mxu1 %v2710_v24  ;;  %v2808_v23 = vld [vmem:[%s3987_s1 + $0x544] ss:$8 sps:$4 sm:$0xff]   ;;  %v2803_v24 = vld [vmem:[%s3987_s1 + $0x440] ss:$8 sps:$4 sm:$0xff]  }
  0x55   :  { %2001 = vmatprep.subr.bf16.mxu1 %v2718_v25  ;;  %v2811_v25 = vld [vmem:[%s3987_s1 + $0x434] ss:$8 sps:$4 sm:$0xff]  }
  0x57   :  { %1959 = vmatpush1.bf16.msra.mxu0 %v2713_v26  ;;  %v2806_v26 = vld [vmem:[%s3987_s1 + $0x540] ss:$8 sps:$4 sm:$0xff]  }
  0x58   :  { %1960 = vmatprep.subr.bf16.mxu0 %v2721_v27  ;;  %2002 = vmatpush1.bf16.msra.mxu1 %v2716_v28  ;;  %v2814_v27 = vld [vmem:[%s3987_s1 + $0x534] ss:$8 sps:$4 sm:$0xff]   ;;  %v2809_v28 = vld [vmem:[%s3987_s1 + $0x430] ss:$8 sps:$4 sm:$0xff]  }
  0x59   :  { %2003 = vmatprep.subr.bf16.mxu1 %v2724_v29  ;;  %v2817_v29 = vld [vmem:[%s3987_s1 + $0x424] ss:$8 sps:$4 sm:$0xff]  }
  0x5b   :  { %1961 = vmatpush1.bf16.msra.mxu0 %v2719_v30  ;;  %v2812_v30 = vld [vmem:[%s3987_s1 + $0x530] ss:$8 sps:$4 sm:$0xff]  }
  0x5c   :  { %1962 = vmatprep.subr.bf16.mxu0 %v2727_v32  ;;  %2004 = vmatpush1.bf16.msra.mxu1 %v2722_v31  ;;  %v2820_v31 = vld [vmem:[%s3987_s1 + $0x524] ss:$8 sps:$4 sm:$0xff]   ;;  %v2815_v32 = vld [vmem:[%s3987_s1 + $0x420] ss:$8 sps:$4 sm:$0xff]  }
  0x5d   :  { %2005 = vmatprep.subr.bf16.mxu1 %v2730_v34  ;;  %v2818_v34 = vld [vmem:[%s3987_s1 + $0x520] ss:$8 sps:$4 sm:$0xff]  }
  0x5f   :  { %1963 = vmatpush1.bf16.msra.mxu0 %v2725_v35  ;;  %v2826_v35 = vld [vmem:[%s3987_s1 + $0x514] ss:$8 sps:$4 sm:$0xff]  }
  0x60   :  { %1964 = vmatprep.subr.bf16.mxu0 %v2733_v37  ;;  %2006 = vmatpush1.bf16.msra.mxu1 %v2728_v38  ;;  %v2829_v37 = vld [vmem:[%s3987_s1 + $0x404] ss:$8 sps:$4 sm:$0xff]   ;;  %v2824_v38 = vld [vmem:[%s3987_s1 + $0x510] ss:$8 sps:$4 sm:$0xff]  }
  0x61   :  { %2007 = vmatprep.subr.bf16.mxu1 %v2736_v39  ;;  %v2832_v39 = vld [vmem:[%s3987_s1 + $0x504] ss:$8 sps:$4 sm:$0xff]  }
  0x63   :  { %1965 = vmatpush2.bf16.msra.mxu0 %v2731_v40  ;;  %v2827_v40 = vld [vmem:[%s3987_s1 + $0x400] ss:$8 sps:$4 sm:$0xff]  }
  0x64   :  { %1966 = vmatprep.subr.bf16.mxu0 %v2739_v41  ;;  %2008 = vmatpush2.bf16.msra.mxu1 %v2734_v42  ;;  %v2835_v41 = vld [vmem:[%s3987_s1 + $0x4f4] ss:$8 sps:$4 sm:$0xff]   ;;  %v2830_v42 = vld [vmem:[%s3987_s1 + $0x500] ss:$8 sps:$4 sm:$0xff]  }
  0x65   :  { %2009 = vmatprep.subr.bf16.mxu1 %v2742_v43  ;;  %v2838_v43 = vld [vmem:[%s3987_s1 + $0x5f4] ss:$8 sps:$4 sm:$0xff]  }
  0x67   :  { %1967 = vmatpush2.bf16.msra.mxu0 %v2737_v44  ;;  %v2833_v44 = vld [vmem:[%s3987_s1 + $0x4f0] ss:$8 sps:$4 sm:$0xff]  }
  0x68   :  { %1968 = vmatprep.subr.bf16.mxu0 %v2745_v45  ;;  %2010 = vmatpush2.bf16.msra.mxu1 %v2740_v46  ;;  %v2841_v45 = vld [vmem:[%s3987_s1 + $0x4e4] ss:$8 sps:$4 sm:$0xff]   ;;  %v2836_v46 = vld [vmem:[%s3987_s1 + $0x5f0] ss:$8 sps:$4 sm:$0xff]  }
  0x69   :  { %2011 = vmatprep.subr.bf16.mxu1 %v2748_v47  ;;  %v2844_v47 = vld [vmem:[%s3987_s1 + $0x5e4] ss:$8 sps:$4 sm:$0xff]  }
  0x6b   :  { %1969 = vmatpush2.bf16.msra.mxu0 %v2743_v48  ;;  %v2839_v48 = vld [vmem:[%s3987_s1 + $0x4e0] ss:$8 sps:$4 sm:$0xff]  }
  0x6c   :  { %1970 = vmatprep.subr.bf16.mxu0 %v2751_v49  ;;  %2012 = vmatpush2.bf16.msra.mxu1 %v2746_v50  ;;  %v2847_v49 = vld [vmem:[%s3987_s1 + $0x4d4] ss:$8 sps:$4 sm:$0xff]   ;;  %v2842_v50 = vld [vmem:[%s3987_s1 + $0x5e0] ss:$8 sps:$4 sm:$0xff]  }
  0x6d   :  { %2013 = vmatprep.subr.bf16.mxu1 %v2754_v51  ;;  %v2850_v51 = vld [vmem:[%s3987_s1 + $0x5d4] ss:$8 sps:$4 sm:$0xff]  }
  0x6f   :  { %1971 = vmatpush2.bf16.msra.mxu0 %v2749_v52  ;;  %v2845_v52 = vld [vmem:[%s3987_s1 + $0x4d0] ss:$8 sps:$4 sm:$0xff]  }
  0x70   :  { %1972 = vmatprep.subr.bf16.mxu0 %v2757_v53  ;;  %2014 = vmatpush2.bf16.msra.mxu1 %v2752_v54  ;;  %v2853_v53 = vld [vmem:[%s3987_s1 + $0x4c4] ss:$8 sps:$4 sm:$0xff]   ;;  %v2848_v54 = vld [vmem:[%s3987_s1 + $0x5d0] ss:$8 sps:$4 sm:$0xff]  }
  0x71   :  { %2015 = vmatprep.subr.bf16.mxu1 %v2760_v55  ;;  %v2856_v55 = vld [vmem:[%s3987_s1 + $0x5c4] ss:$8 sps:$4 sm:$0xff]  }
  0x73   :  { %1973 = vmatpush2.bf16.msra.mxu0 %v2755_v56  ;;  %v2851_v56 = vld [vmem:[%s3987_s1 + $0x4c0] ss:$8 sps:$4 sm:$0xff]  }
  0x74   :  { %1974 = vmatprep.subr.bf16.mxu0 %v2763_v57  ;;  %2016 = vmatpush2.bf16.msra.mxu1 %v2758_v58  ;;  %v2859_v57 = vld [vmem:[%s3987_s1 + $0x4b4] ss:$8 sps:$4 sm:$0xff]   ;;  %v2854_v58 = vld [vmem:[%s3987_s1 + $0x5c0] ss:$8 sps:$4 sm:$0xff]  }
  0x75   :  { %2017 = vmatprep.subr.bf16.mxu1 %v2766_v59  ;;  %v2862_v59 = vld [vmem:[%s3987_s1 + $0x5b4] ss:$8 sps:$4 sm:$0xff]  }
  0x77   :  { %1975 = vmatpush2.bf16.msra.mxu0 %v2761_v60  ;;  %v2857_v60 = vld [vmem:[%s3987_s1 + $0x4b0] ss:$8 sps:$4 sm:$0xff]  }
  0x78   :  { %1976 = vmatprep.subr.bf16.mxu0 %v2769_v61  ;;  %2018 = vmatpush2.bf16.msra.mxu1 %v2764_v62  ;;  %v2865_v61 = vld [vmem:[%s3987_s1 + $0x4a4] ss:$8 sps:$4 sm:$0xff]   ;;  %v2860_v62 = vld [vmem:[%s3987_s1 + $0x5b0] ss:$8 sps:$4 sm:$0xff]  }
  0x79   :  { %2019 = vmatprep.subr.bf16.mxu1 %v2772_v63  ;;  %v2868_v63 = vld [vmem:[%s3987_s1 + $0x5a4] ss:$8 sps:$4 sm:$0xff]  }
  0x7b   :  { %1977 = vmatpush2.bf16.msra.mxu0 %v2767_v0  ;;  %v2863_v0 = vld [vmem:[%s3987_s1 + $0x4a0] ss:$8 sps:$4 sm:$0xff]  }
  0x7c   :  { %1978 = vmatprep.subr.bf16.mxu0 %v2775_v1  ;;  %2020 = vmatpush2.bf16.msra.mxu1 %v2770_v2  ;;  %v2871_v1 = vld [vmem:[%s3987_s1 + $0x494] ss:$8 sps:$4 sm:$0xff]   ;;  %v2866_v2 = vld [vmem:[%s3987_s1 + $0x5a0] ss:$8 sps:$4 sm:$0xff]  }
  0x7d   :  { %2021 = vmatprep.subr.bf16.mxu1 %v2778_v3  ;;  %v2874_v3 = vld [vmem:[%s3987_s1 + $0x594] ss:$8 sps:$4 sm:$0xff]  }
  0x7f   :  { %1979 = vmatpush2.bf16.msra.mxu0 %v2773_v4  ;;  %v2869_v4 = vld [vmem:[%s3987_s1 + $0x490] ss:$8 sps:$4 sm:$0xff]  }
  0x80   :  { %2034 = vmatprep.subr.bf16.mxu0 %v2784_v5  ;;  %2022 = vmatpush2.bf16.msra.mxu1 %v2776_v6  ;;  %v2877_v5 = vld [vmem:[%s3987_s1 + $0x484] ss:$8 sps:$4 sm:$0xff]   ;;  %v2872_v6 = vld [vmem:[%s3987_s1 + $0x590] ss:$8 sps:$4 sm:$0xff]  }
  0x81   :  { %2077 = vmatprep.subr.bf16.mxu1 %v2790_v8  ;;  %v2880_v8 = vld [vmem:[%s3987_s1 + $0x584] ss:$8 sps:$4 sm:$0xff]  }
  0x82   :  { %1981 = vmatmul.mubr.bf16.vlgmr.msra.gmra.mxu0 %v2779_v7  ;;  %v2875_v7 = vld [vmem:[%s3987_s1 + $0x480] ss:$8 sps:$4 sm:$0xff]  }
  0x83   :  { %2035 = vmatpush1.bf16.msra.mxu0 %v2782_v9  ;;  %2024 = vmatmul.mubr.bf16.vlgmr.msra.gmra.mxu1 %v2785_v10  ;;  %v2878_v9 = vld [vmem:[%s3987_s1 + $0x580] ss:$8 sps:$4 sm:$0xff]   ;;  %v2886_v10 = vld [vmem:[%s3987_s1 + $0x674] ss:$8 sps:$4 sm:$0xff]  }
  0x84   :  { %2036 = vmatprep.subr.bf16.mxu0 %v2793_v11  ;;  %2078 = vmatpush1.bf16.msra.mxu1 %v2788_v12  ;;  %v2881_v11 = vld [vmem:[%s3988_s0 + $0x20] ss:$72 sps:$4 sm:$0xff]   ;;  %v2884_v12 = vld [vmem:[%s3987_s1 + $0x670] ss:$8 sps:$4 sm:$0xff]  }
  0x85   :  { %2079 = vmatprep.subr.bf16.mxu1 %v2796_v13  ;;  %2066 = vmatprep.mubr.bf16.mxu0 %v2883_v18  ;;  %v2887_v13 = vld [vmem:[%s3988_s0 + $0x28] ss:$72 sps:$4 sm:$0xff]   ;;  %v2991_v18 = vld [vmem:[%s3988_s0 + $0x3c] ss:$72 sps:$4 sm:$0xff]  }
  0x86   :  { %2109 = vmatprep.mubr.bf16.mxu1 %v2889_v22  ;;  %v2896_v22 = vld [vmem:[%s3987_s1 + $0x760] ss:$8 sps:$4 sm:$0xff]  }
  0x87   :  { %2037 = vmatpush1.bf16.msra.mxu0 %v2791_v14  ;;  %v2892_v14 = vld [vmem:[%s3987_s1 + $0x774] ss:$8 sps:$4 sm:$0xff]  }
  0x88   :  { %2038 = vmatprep.subr.bf16.mxu0 %v2799_v15  ;;  %2080 = vmatpush1.bf16.msra.mxu1 %v2794_v16  ;;  %v2985_v15 = vld [vmem:[%s3988_s0 + $0x34] ss:$72 sps:$4 sm:$0xff]   ;;  %v2895_v16 = vld [vmem:[%s3987_s1 + $0x664] ss:$8 sps:$4 sm:$0xff]  }
  0x89   :  { %2081 = vmatprep.subr.bf16.mxu1 %v2802_v17  ;;  %v2890_v17 = vld [vmem:[%s3987_s1 + $0x770] ss:$8 sps:$4 sm:$0xff]  }
  0x8b   :  { %2039 = vmatpush1.bf16.msra.mxu0 %v2797_v19  ;;  %v2898_v19 = vld [vmem:[%s3987_s1 + $0x764] ss:$8 sps:$4 sm:$0xff]  }
  0x8c   :  { %2040 = vmatprep.subr.bf16.mxu0 %v2805_v21  ;;  %2082 = vmatpush1.bf16.msra.mxu1 %v2800_v20  ;;  %v2893_v20 = vld [vmem:[%s3987_s1 + $0x660] ss:$8 sps:$4 sm:$0xff]   ;;  %v2901_v21 = vld [vmem:[%s3987_s1 + $0x654] ss:$8 sps:$4 sm:$0xff]  }
  0x8d   :  { %2083 = vmatprep.subr.bf16.mxu1 %v2808_v23  ;;  %v2904_v23 = vld [vmem:[%s3987_s1 + $0x754] ss:$8 sps:$4 sm:$0xff]  }
  0x8f   :  { %2041 = vmatpush1.bf16.msra.mxu0 %v2803_v24  ;;  %v2899_v24 = vld [vmem:[%s3987_s1 + $0x650] ss:$8 sps:$4 sm:$0xff]  }
  0x90   :  { %2042 = vmatprep.subr.bf16.mxu0 %v2811_v25  ;;  %2084 = vmatpush1.bf16.msra.mxu1 %v2806_v26  ;;  %v2907_v25 = vld [vmem:[%s3987_s1 + $0x644] ss:$8 sps:$4 sm:$0xff]   ;;  %v2902_v26 = vld [vmem:[%s3987_s1 + $0x750] ss:$8 sps:$4 sm:$0xff]  }
  0x91   :  { %2085 = vmatprep.subr.bf16.mxu1 %v2814_v27  ;;  %v2910_v27 = vld [vmem:[%s3987_s1 + $0x744] ss:$8 sps:$4 sm:$0xff]  }
  0x93   :  { %2043 = vmatpush1.bf16.msra.mxu0 %v2809_v28  ;;  %v2905_v28 = vld [vmem:[%s3987_s1 + $0x640] ss:$8 sps:$4 sm:$0xff]  }
  0x94   :  { %2044 = vmatprep.subr.bf16.mxu0 %v2817_v29  ;;  %2086 = vmatpush1.bf16.msra.mxu1 %v2812_v30  ;;  %v2913_v29 = vld [vmem:[%s3987_s1 + $0x634] ss:$8 sps:$4 sm:$0xff]   ;;  %v2908_v30 = vld [vmem:[%s3987_s1 + $0x740] ss:$8 sps:$4 sm:$0xff]  }
  0x95   :  { %2087 = vmatprep.subr.bf16.mxu1 %v2820_v31  ;;  %v2916_v31 = vld [vmem:[%s3987_s1 + $0x734] ss:$8 sps:$4 sm:$0xff]  }
  0x97   :  { %2045 = vmatpush1.bf16.msra.mxu0 %v2815_v32  ;;  %v2911_v32 = vld [vmem:[%s3987_s1 + $0x630] ss:$8 sps:$4 sm:$0xff]  }
  0x98   :  { %2046 = vmatprep.subr.bf16.mxu0 %v2823_v33  ;;  %2088 = vmatpush1.bf16.msra.mxu1 %v2818_v34  ;;  %v2919_v33 = vld [vmem:[%s3987_s1 + $0x624] ss:$8 sps:$4 sm:$0xff]   ;;  %v2914_v34 = vld [vmem:[%s3987_s1 + $0x730] ss:$8 sps:$4 sm:$0xff]  }
  0x99   :  { %2089 = vmatprep.subr.bf16.mxu1 %v2826_v35  ;;  %v2922_v35 = vld [vmem:[%s3987_s1 + $0x724] ss:$8 sps:$4 sm:$0xff]  }
  0x9b   :  { %2047 = vmatpush1.bf16.msra.mxu0 %v2821_v36  ;;  %v2917_v36 = vld [vmem:[%s3987_s1 + $0x620] ss:$8 sps:$4 sm:$0xff]  }
  0x9c   :  { %2048 = vmatprep.subr.bf16.mxu0 %v2829_v37  ;;  %2090 = vmatpush1.bf16.msra.mxu1 %v2824_v38  ;;  %v2925_v37 = vld [vmem:[%s3987_s1 + $0x614] ss:$8 sps:$4 sm:$0xff]   ;;  %v2920_v38 = vld [vmem:[%s3987_s1 + $0x720] ss:$8 sps:$4 sm:$0xff]  }
  0x9d   :  { %2091 = vmatprep.subr.bf16.mxu1 %v2832_v39  ;;  %v2928_v39 = vld [vmem:[%s3987_s1 + $0x714] ss:$8 sps:$4 sm:$0xff]  }
  0x9f   :  { %2049 = vmatpush1.bf16.msra.mxu0 %v2827_v40  ;;  %v2923_v40 = vld [vmem:[%s3987_s1 + $0x610] ss:$8 sps:$4 sm:$0xff]  }
  0xa0   :  { %2050 = vmatprep.subr.bf16.mxu0 %v2835_v41  ;;  %2092 = vmatpush1.bf16.msra.mxu1 %v2830_v42  ;;  %v2931_v41 = vld [vmem:[%s3987_s1 + $0x604] ss:$8 sps:$4 sm:$0xff]   ;;  %v2926_v42 = vld [vmem:[%s3987_s1 + $0x710] ss:$8 sps:$4 sm:$0xff]  }
  0xa1   :  { %2093 = vmatprep.subr.bf16.mxu1 %v2838_v43  ;;  %v2934_v43 = vld [vmem:[%s3987_s1 + $0x704] ss:$8 sps:$4 sm:$0xff]  }
  0xa3   :  { %2051 = vmatpush2.bf16.msra.mxu0 %v2833_v44  ;;  %v2929_v44 = vld [vmem:[%s3987_s1 + $0x600] ss:$8 sps:$4 sm:$0xff]  }
  0xa4   :  { %2052 = vmatprep.subr.bf16.mxu0 %v2841_v45  ;;  %2094 = vmatpush2.bf16.msra.mxu1 %v2836_v46  ;;  %v2937_v45 = vld [vmem:[%s3987_s1 + $0x6f4] ss:$8 sps:$4 sm:$0xff]   ;;  %v2932_v46 = vld [vmem:[%s3987_s1 + $0x700] ss:$8 sps:$4 sm:$0xff]  }
  0xa5   :  { %2095 = vmatprep.subr.bf16.mxu1 %v2844_v47  ;;  %v2940_v47 = vld [vmem:[%s3987_s1 + $0x7f4] ss:$8 sps:$4 sm:$0xff]  }
  0xa7   :  { %2053 = vmatpush2.bf16.msra.mxu0 %v2839_v48  ;;  %v2935_v48 = vld [vmem:[%s3987_s1 + $0x6f0] ss:$8 sps:$4 sm:$0xff]  }
  0xa8   :  { %2054 = vmatprep.subr.bf16.mxu0 %v2847_v49  ;;  %2096 = vmatpush2.bf16.msra.mxu1 %v2842_v50  ;;  %v2943_v49 = vld [vmem:[%s3987_s1 + $0x6e4] ss:$8 sps:$4 sm:$0xff]   ;;  %v2938_v50 = vld [vmem:[%s3987_s1 + $0x7f0] ss:$8 sps:$4 sm:$0xff]  }
  0xa9   :  { %2097 = vmatprep.subr.bf16.mxu1 %v2850_v51  ;;  %v2946_v51 = vld [vmem:[%s3987_s1 + $0x7e4] ss:$8 sps:$4 sm:$0xff]  }
  0xab   :  { %2055 = vmatpush2.bf16.msra.mxu0 %v2845_v52  ;;  %v2941_v52 = vld [vmem:[%s3987_s1 + $0x6e0] ss:$8 sps:$4 sm:$0xff]  }
  0xac   :  { %2056 = vmatprep.subr.bf16.mxu0 %v2853_v53  ;;  %2098 = vmatpush2.bf16.msra.mxu1 %v2848_v54  ;;  %v2949_v53 = vld [vmem:[%s3987_s1 + $0x6d4] ss:$8 sps:$4 sm:$0xff]   ;;  %v2944_v54 = vld [vmem:[%s3987_s1 + $0x7e0] ss:$8 sps:$4 sm:$0xff]  }
  0xad   :  { %2099 = vmatprep.subr.bf16.mxu1 %v2856_v55  ;;  %v2952_v55 = vld [vmem:[%s3987_s1 + $0x7d4] ss:$8 sps:$4 sm:$0xff]  }
  0xaf   :  { %2057 = vmatpush2.bf16.msra.mxu0 %v2851_v56  ;;  %v2947_v56 = vld [vmem:[%s3987_s1 + $0x6d0] ss:$8 sps:$4 sm:$0xff]  }
  0xb0   :  { %2058 = vmatprep.subr.bf16.mxu0 %v2859_v57  ;;  %2100 = vmatpush2.bf16.msra.mxu1 %v2854_v58  ;;  %v2955_v57 = vld [vmem:[%s3987_s1 + $0x6c4] ss:$8 sps:$4 sm:$0xff]   ;;  %v2950_v58 = vld [vmem:[%s3987_s1 + $0x7d0] ss:$8 sps:$4 sm:$0xff]  }
  0xb1   :  { %2101 = vmatprep.subr.bf16.mxu1 %v2862_v59  ;;  %v2958_v59 = vld [vmem:[%s3987_s1 + $0x7c4] ss:$8 sps:$4 sm:$0xff]  }
  0xb3   :  { %2059 = vmatpush2.bf16.msra.mxu0 %v2857_v60  ;;  %v2953_v60 = vld [vmem:[%s3987_s1 + $0x6c0] ss:$8 sps:$4 sm:$0xff]  }
  0xb4   :  { %2060 = vmatprep.subr.bf16.mxu0 %v2865_v61  ;;  %2102 = vmatpush2.bf16.msra.mxu1 %v2860_v62  ;;  %v2961_v61 = vld [vmem:[%s3987_s1 + $0x6b4] ss:$8 sps:$4 sm:$0xff]   ;;  %v2956_v62 = vld [vmem:[%s3987_s1 + $0x7c0] ss:$8 sps:$4 sm:$0xff]  }
  0xb5   :  { %2103 = vmatprep.subr.bf16.mxu1 %v2868_v63  ;;  %v2964_v63 = vld [vmem:[%s3987_s1 + $0x7b4] ss:$8 sps:$4 sm:$0xff]  }
  0xb7   :  { %2061 = vmatpush2.bf16.msra.mxu0 %v2863_v0  ;;  %v2959_v0 = vld [vmem:[%s3987_s1 + $0x6b0] ss:$8 sps:$4 sm:$0xff]  }
  0xb8   :  { %2062 = vmatprep.subr.bf16.mxu0 %v2871_v1  ;;  %2104 = vmatpush2.bf16.msra.mxu1 %v2866_v2  ;;  %v2967_v1 = vld [vmem:[%s3987_s1 + $0x6a4] ss:$8 sps:$4 sm:$0xff]   ;;  %v2962_v2 = vld [vmem:[%s3987_s1 + $0x7b0] ss:$8 sps:$4 sm:$0xff]  }
  0xb9   :  { %2105 = vmatprep.subr.bf16.mxu1 %v2874_v3  ;;  %v2970_v3 = vld [vmem:[%s3987_s1 + $0x7a4] ss:$8 sps:$4 sm:$0xff]  }
  0xbb   :  { %2063 = vmatpush2.bf16.msra.mxu0 %v2869_v4  ;;  %v2965_v4 = vld [vmem:[%s3987_s1 + $0x6a0] ss:$8 sps:$4 sm:$0xff]  }
  0xbc   :  { %2064 = vmatprep.subr.bf16.mxu0 %v2877_v5  ;;  %2106 = vmatpush2.bf16.msra.mxu1 %v2872_v6  ;;  %v2973_v5 = vld [vmem:[%s3987_s1 + $0x694] ss:$8 sps:$4 sm:$0xff]   ;;  %v2968_v6 = vld [vmem:[%s3987_s1 + $0x7a0] ss:$8 sps:$4 sm:$0xff]  }
  0xbd   :  { %2107 = vmatprep.subr.bf16.mxu1 %v2880_v8  ;;  %v2971_v8 = vld [vmem:[%s3987_s1 + $0x690] ss:$8 sps:$4 sm:$0xff]  }
  0xbf   :  { %2065 = vmatpush2.bf16.msra.mxu0 %v2875_v7  ;;  %v2976_v7 = vld [vmem:[%s3987_s1 + $0x794] ss:$8 sps:$4 sm:$0xff]  }
  0xc0   :  { %2120 = vmatprep.subr.bf16.mxu0 %v2886_v10  ;;  %2108 = vmatpush2.bf16.msra.mxu1 %v2878_v9  ;;  %v2979_v9 = vld [vmem:[%s3987_s1 + $0x684] ss:$8 sps:$4 sm:$0xff]   ;;  %v2974_v10 = vld [vmem:[%s3987_s1 + $0x790] ss:$8 sps:$4 sm:$0xff]  }
  0xc1   :  { %2163 = vmatprep.subr.bf16.mxu1 %v2892_v14  ;;  %v2980_v14 = vld [vmem:[%s3987_s1 + $0x780] ss:$8 sps:$4 sm:$0xff]  }
  0xc2   :  { %2067 = vmatmul.mubr.bf16.vlgmr.msra.gmra.mxu0 %v2881_v11  ;;  %v2982_v11 = vld [vmem:[%s3987_s1 + $0x784] ss:$8 sps:$4 sm:$0xff]  }
  0xc3   :  { %2121 = vmatpush1.bf16.msra.mxu0 %v2884_v12  ;;  %2152 = vmatprep.mubr.bf16.mxu0 %v2985_v15  ;;  %v2977_v12 = vld [vmem:[%s3987_s1 + $0x680] ss:$8 sps:$4 sm:$0xff]   ;;  %v2983_v15 = vld [vmem:[%s3988_s0 + $0x30] ss:$72 sps:$4 sm:$0xff]  }
  0xc4   :  { %2110 = vmatmul.mubr.bf16.vlgmr.msra.gmra.mxu1 %v2887_v13  ;;  %2122 = vmatprep.subr.bf16.mxu0 %v2895_v16  ;;  %v2988_v13 = vld [vmem:[%s3987_s1 + $0x874] ss:$8 sps:$4 sm:$0xff]   ;;  %v2986_v16 = vld [vmem:[%s3987_s1 + $0x870] ss:$8 sps:$4 sm:$0xff]  }
  0xc5   :  { %2164 = vmatpush1.bf16.msra.mxu1 %v2890_v17  ;;  %2195 = vmatprep.mubr.bf16.mxu1 %v2991_v18  ;;  %v3039_v17 = vld [vmem:[%s3988_s0 + $0x44] ss:$72 sps:$4 sm:$0xff]   ;;  %v2989_v18 = vld [vmem:[%s3988_s0 + $0x38] ss:$72 sps:$4 sm:$0xff]  }
  0xc6   :  { %2165 = vmatprep.subr.bf16.mxu1 %v2898_v19  ;;  %v2994_v19 = vld [vmem:[%s3987_s1 + $0x864] ss:$8 sps:$4 sm:$0xff]  }
  0xc7   :  { %2123 = vmatpush1.bf16.msra.mxu0 %v2893_v20  ;;  %v2992_v20 = vld [vmem:[%s3987_s1 + $0x860] ss:$8 sps:$4 sm:$0xff]  }
  0xc8   :  { %2124 = vmatprep.subr.bf16.mxu0 %v2901_v21  ;;  %v2997_v21 = vld [vmem:[%s3987_s1 + $0x854] ss:$8 sps:$4 sm:$0xff]  }
  0xc9   :  { %2166 = vmatpush1.bf16.msra.mxu1 %v2896_v22  ;;  %v2995_v22 = vld [vmem:[%s3987_s1 + $0x850] ss:$8 sps:$4 sm:$0xff]  }
  0xca   :  { %2167 = vmatprep.subr.bf16.mxu1 %v2904_v23  ;;  %v3000_v23 = vld [vmem:[%s3987_s1 + $0x844] ss:$8 sps:$4 sm:$0xff]  }
  0xcb   :  { %2125 = vmatpush1.bf16.msra.mxu0 %v2899_v24  ;;  %v2998_v24 = vld [vmem:[%s3987_s1 + $0x840] ss:$8 sps:$4 sm:$0xff]  }
  0xcc   :  { %2126 = vmatprep.subr.bf16.mxu0 %v2907_v25  ;;  %v3003_v25 = vld [vmem:[%s3987_s1 + $0x834] ss:$8 sps:$4 sm:$0xff]  }
  0xcd   :  { %2168 = vmatpush1.bf16.msra.mxu1 %v2902_v26  ;;  %v3001_v26 = vld [vmem:[%s3987_s1 + $0x830] ss:$8 sps:$4 sm:$0xff]  }
  0xce   :  { %2169 = vmatprep.subr.bf16.mxu1 %v2910_v27  ;;  %v3006_v27 = vld [vmem:[%s3987_s1 + $0x824] ss:$8 sps:$4 sm:$0xff]  }
  0xcf   :  { %2127 = vmatpush1.bf16.msra.mxu0 %v2905_v28  ;;  %v3004_v28 = vld [vmem:[%s3987_s1 + $0x820] ss:$8 sps:$4 sm:$0xff]  }
  0xd0   :  { %2128 = vmatprep.subr.bf16.mxu0 %v2913_v29  ;;  %v3009_v29 = vld [vmem:[%s3987_s1 + $0x814] ss:$8 sps:$4 sm:$0xff]  }
  0xd1   :  { %2170 = vmatpush1.bf16.msra.mxu1 %v2908_v30  ;;  %v3007_v30 = vld [vmem:[%s3987_s1 + $0x810] ss:$8 sps:$4 sm:$0xff]  }
  0xd2   :  { %2171 = vmatprep.subr.bf16.mxu1 %v2916_v31  ;;  %v3012_v31 = vld [vmem:[%s3987_s1 + $0x804] ss:$8 sps:$4 sm:$0xff]  }
  0xd3   :  { %2129 = vmatpush1.bf16.msra.mxu0 %v2911_v32  ;;  %v3010_v32 = vld [vmem:[%s3987_s1 + $0x800] ss:$8 sps:$4 sm:$0xff]  }
  0xd4   :  { %2130 = vmatprep.subr.bf16.mxu0 %v2919_v33  ;;  %v3015_v33 = vld [vmem:[%s3987_s1 + $0x8f4] ss:$8 sps:$4 sm:$0xff]  }
  0xd5   :  { %2172 = vmatpush1.bf16.msra.mxu1 %v2914_v34  ;;  %v3013_v34 = vld [vmem:[%s3987_s1 + $0x8f0] ss:$8 sps:$4 sm:$0xff]  }
  0xd6   :  { %2173 = vmatprep.subr.bf16.mxu1 %v2922_v35  ;;  %v3018_v35 = vld [vmem:[%s3987_s1 + $0x8e4] ss:$8 sps:$4 sm:$0xff]  }
  0xd7   :  { %2131 = vmatpush1.bf16.msra.mxu0 %v2917_v36  ;;  %v3016_v36 = vld [vmem:[%s3987_s1 + $0x8e0] ss:$8 sps:$4 sm:$0xff]  }
  0xd8   :  { %2132 = vmatprep.subr.bf16.mxu0 %v2925_v37  ;;  %v3021_v37 = vld [vmem:[%s3987_s1 + $0x8d4] ss:$8 sps:$4 sm:$0xff]  }
  0xd9   :  { %2174 = vmatpush1.bf16.msra.mxu1 %v2920_v38  ;;  %v3019_v38 = vld [vmem:[%s3987_s1 + $0x8d0] ss:$8 sps:$4 sm:$0xff]  }
  0xda   :  { %2175 = vmatprep.subr.bf16.mxu1 %v2928_v39  ;;  %v3024_v39 = vld [vmem:[%s3987_s1 + $0x8c4] ss:$8 sps:$4 sm:$0xff]  }
  0xdb   :  { %2133 = vmatpush1.bf16.msra.mxu0 %v2923_v40  ;;  %v3022_v40 = vld [vmem:[%s3987_s1 + $0x8c0] ss:$8 sps:$4 sm:$0xff]  }
  0xdc   :  { %2134 = vmatprep.subr.bf16.mxu0 %v2931_v41  ;;  %v3027_v41 = vld [vmem:[%s3987_s1 + $0x8b4] ss:$8 sps:$4 sm:$0xff]  }
  0xdd   :  { %2176 = vmatpush1.bf16.msra.mxu1 %v2926_v42  ;;  %v3025_v42 = vld [vmem:[%s3987_s1 + $0x8b0] ss:$8 sps:$4 sm:$0xff]  }
  0xde   :  { %2177 = vmatprep.subr.bf16.mxu1 %v2934_v43  ;;  %v3030_v43 = vld [vmem:[%s3987_s1 + $0x8a4] ss:$8 sps:$4 sm:$0xff]  }
  0xdf   :  { %2135 = vmatpush1.bf16.msra.mxu0 %v2929_v44  ;;  %v3028_v44 = vld [vmem:[%s3987_s1 + $0x8a0] ss:$8 sps:$4 sm:$0xff]  }
  0xe0   :  { %2136 = vmatprep.subr.bf16.mxu0 %v2937_v45  ;;  %v3033_v45 = vld [vmem:[%s3987_s1 + $0x894] ss:$8 sps:$4 sm:$0xff]  }
  0xe1   :  { %2178 = vmatpush1.bf16.msra.mxu1 %v2932_v46  ;;  %v3031_v46 = vld [vmem:[%s3987_s1 + $0x890] ss:$8 sps:$4 sm:$0xff]  }
  0xe2   :  { %2179 = vmatprep.subr.bf16.mxu1 %v2940_v47  ;;  %v3036_v47 = vld [vmem:[%s3987_s1 + $0x884] ss:$8 sps:$4 sm:$0xff]  }
  0xe3   :  { %2137 = vmatpush2.bf16.msra.mxu0 %v2935_v48  ;;  %v3034_v48 = vld [vmem:[%s3987_s1 + $0x880] ss:$8 sps:$4 sm:$0xff]  }
  0xe4   :  { %2138 = vmatprep.subr.bf16.mxu0 %v2943_v49  ;;  %v3037_v49 = vld [vmem:[%s3988_s0 + $0x40] ss:$72 sps:$4 sm:$0xff]  }
  0xe5   :  { %2180 = vmatpush2.bf16.msra.mxu1 %v2938_v50 }
  0xe6   :  { %2181 = vmatprep.subr.bf16.mxu1 %v2946_v51 }
  0xe7   :  { %2139 = vmatpush2.bf16.msra.mxu0 %v2941_v52 }
  0xe8   :  { %2140 = vmatprep.subr.bf16.mxu0 %v2949_v53 }
  0xe9   :  { %2182 = vmatpush2.bf16.msra.mxu1 %v2944_v54 }
  0xea   :  { %2183 = vmatprep.subr.bf16.mxu1 %v2952_v55 }
  0xeb   :  { %2141 = vmatpush2.bf16.msra.mxu0 %v2947_v56 }
  0xec   :  { %2142 = vmatprep.subr.bf16.mxu0 %v2955_v57 }
  0xed   :  { %2184 = vmatpush2.bf16.msra.mxu1 %v2950_v58 }
  0xee   :  { %2185 = vmatprep.subr.bf16.mxu1 %v2958_v59  ;;  %v322_v59 = vlaneseq }
  0xef   :  { %2143 = vmatpush2.bf16.msra.mxu0 %v2953_v60 }
  0xf0   :  { %2144 = vmatprep.subr.bf16.mxu0 %v2961_v61 }
  0xf1   :  { %2186 = vmatpush2.bf16.msra.mxu1 %v2956_v62  ;;  %v323_v62 = vshrl.u32 %v322_v59, 7 }
  0xf2   :  { %2187 = vmatprep.subr.bf16.mxu1 %v2964_v63 }
  0xf3   :  { %2145 = vmatpush2.bf16.msra.mxu0 %v2959_v0 }
  0xf4   :  { %2146 = vmatprep.subr.bf16.mxu0 %v2967_v1  ;;  %v324_v1 = vsub.s32 0, %v323_v62 }
  0xf5   :  { %2188 = vmatpush2.bf16.msra.mxu1 %v2962_v2  ;;  %v320_v2 = vld [vmem:[%s3989_s2] sm:$0x3] }
  0xf6   :  { %2189 = vmatprep.subr.bf16.mxu1 %v2970_v3 }
  0xf7   :  { %2147 = vmatpush2.bf16.msra.mxu0 %v2965_v4 }
  0xf8   :  { %2148 = vmatprep.subr.bf16.mxu0 %v2973_v5  ;;  %v328_v5 = vsub.s32 1, %v323_v62 }
  0xf9   :  { %2190 = vmatpush2.bf16.msra.mxu1 %v2968_v6 }
  0xfa   :  { %2191 = vmatprep.subr.bf16.mxu1 %v2976_v7  ;;  %v325_v7 = vrot.slane %v320_v2, %v324_v1 }
  0xfb   :  { %2149 = vmatpush2.bf16.msra.mxu0 %v2971_v8 }
  0xfc   :  { %2150 = vmatprep.subr.bf16.mxu0 %v2979_v9  ;;  %v329_v9 = vrot.slane %v320_v2, %v328_v5 }
  0xfd   :  { %2192 = vmatpush2.bf16.msra.mxu1 %v2974_v10 }
  0xfe   :  { %2193 = vmatprep.subr.bf16.mxu1 %v2982_v11 }
  0xff   :  { %2151 = vmatpush2.bf16.msra.mxu0 %v2977_v12 }
 0x100   :  { %2206 = vmatprep.subr.bf16.mxu0 %v2988_v13 }
 0x101   :  { %2194 = vmatpush2.bf16.msra.mxu1 %v2980_v14 }
 0x102   :  { %2153 = vmatmul.mubr.bf16.vlgmr.msra.gmra.mxu0 %v2983_v15  ;;  %v1896_v50 = vpop.f32.mrf.mxu0 }
 0x103   :  { %2207 = vmatpush1.bf16.msra.mxu0 %v2986_v16  ;;  %2238 = vmatprep.mubr.bf16.mxu0 %v3039_v17  ;;  %v1939_v52 = vpop.f32.mrf.mxu1  ;;  %v1897_v12 = vadd.f32 %v1896_v50, %v325_v7 }
 0x104   :  { %2196 = vmatmul.mubr.bf16.vlgmr.msra.gmra.mxu1 %v2989_v18  ;;  %2208 = vmatprep.subr.bf16.mxu0 %v2994_v19  ;;  %v1898_v51 = vpop.f32.mrf.mxu0 }
 0x105   :  { %v1941_v54 = vpop.f32.mrf.mxu1  ;;  %v1899_v13 = vadd.f32 %v1898_v51, %v329_v9  ;;  %v1940_v16 = vadd.f32 %v1939_v52, %v1897_v12 }
 0x106   :  { %v1900_v53 = vpop.f32.mrf.mxu0 }
 0x107   :  { %2209 = vmatpush1.bf16.msra.mxu0 %v2992_v20  ;;  %v1943_v56 = vpop.f32.mrf.mxu1  ;;  %v1901_v17 = vadd.f32 %v1900_v53, %v325_v7  ;;  %v1942_v18 = vadd.f32 %v1941_v54, %v1899_v13 }
 0x108   :  { %2210 = vmatprep.subr.bf16.mxu0 %v2997_v21  ;;  %v1902_v55 = vpop.f32.mrf.mxu0 }
 0x109   :  { %v1945_v58 = vpop.f32.mrf.mxu1  ;;  %v1903_v19 = vadd.f32 %v1902_v55, %v329_v9 }
 0x10b   :  { %2211 = vmatpush1.bf16.msra.mxu0 %v2995_v22 }
 0x10c   :  { %2212 = vmatprep.subr.bf16.mxu0 %v3000_v23  ;;  %v1944_v23 = vadd.f32 %v1943_v56, %v1901_v17 }
 0x10f   :  { %2213 = vmatpush1.bf16.msra.mxu0 %v2998_v24 }
 0x110   :  { %2214 = vmatprep.subr.bf16.mxu0 %v3003_v25 }
 0x113   :  { %2215 = vmatpush1.bf16.msra.mxu0 %v3001_v26  ;;  %v1946_v26 = vadd.f32 %v1945_v58, %v1903_v19 }
 0x114   :  { %2216 = vmatprep.subr.bf16.mxu0 %v3006_v27 }
 0x117   :  { %2217 = vmatpush1.bf16.msra.mxu0 %v3004_v28 }
 0x118   :  { %2218 = vmatprep.subr.bf16.mxu0 %v3009_v29 }
 0x11b   :  { %2219 = vmatpush1.bf16.msra.mxu0 %v3007_v30 }
 0x11c   :  { %2220 = vmatprep.subr.bf16.mxu0 %v3012_v31 }
 0x11f   :  { %2221 = vmatpush1.bf16.msra.mxu0 %v3010_v32 }
 0x120   :  { %2222 = vmatprep.subr.bf16.mxu0 %v3015_v33 }
 0x123   :  { %2223 = vmatpush2.bf16.msra.mxu0 %v3013_v34 }
 0x124   :  { %2224 = vmatprep.subr.bf16.mxu0 %v3018_v35 }
 0x127   :  { %2225 = vmatpush2.bf16.msra.mxu0 %v3016_v36 }
 0x128   :  { %2226 = vmatprep.subr.bf16.mxu0 %v3021_v37 }
 0x12b   :  { %2227 = vmatpush2.bf16.msra.mxu0 %v3019_v38 }
 0x12c   :  { %2228 = vmatprep.subr.bf16.mxu0 %v3024_v39 }
 0x12f   :  { %2229 = vmatpush2.bf16.msra.mxu0 %v3022_v40 }
 0x130   :  { %2230 = vmatprep.subr.bf16.mxu0 %v3027_v41 }
 0x133   :  { %2231 = vmatpush2.bf16.msra.mxu0 %v3025_v42 }
 0x134   :  { %2232 = vmatprep.subr.bf16.mxu0 %v3030_v43 }
 0x137   :  { %2233 = vmatpush2.bf16.msra.mxu0 %v3028_v44 }
 0x138   :  { %2234 = vmatprep.subr.bf16.mxu0 %v3033_v45 }
 0x13b   :  { %2235 = vmatpush2.bf16.msra.mxu0 %v3031_v46 }
 0x13c   :  { %2236 = vmatprep.subr.bf16.mxu0 %v3036_v47 }
 0x13f   :  { %2237 = vmatpush2.bf16.msra.mxu0 %v3034_v48 }
 0x142   :  { %2239 = vmatmul.mubr.bf16.vlgmr.msra.gmra.mxu0 %v3037_v49  ;;  %v1982_v57 = vpop.f32.mrf.mxu0 }
 0x143   :  { %v2025_v61 = vpop.f32.mrf.mxu1  ;;  %v1983_v20 = vadd.f32 %v1982_v57, %v1940_v16 }
 0x144   :  { %v1984_v60 = vpop.f32.mrf.mxu0 }
 0x145   :  { %v2027_v0 = vpop.f32.mrf.mxu1  ;;  %v1985_v24 = vadd.f32 %v1984_v60, %v1942_v18  ;;  %v2026_v27 = vadd.f32 %v2025_v61, %v1983_v20 }
 0x146   :  { %v1986_v63 = vpop.f32.mrf.mxu0 }
 0x147   :  { %v2029_v4 = vpop.f32.mrf.mxu1  ;;  %v1987_v28 = vadd.f32 %v1986_v63, %v1944_v23  ;;  %v2028_v30 = vadd.f32 %v2027_v0, %v1985_v24 }
 0x148   :  { %v1988_v3 = vpop.f32.mrf.mxu0 }
 0x149   :  { %v2031_v8 = vpop.f32.mrf.mxu1  ;;  %v1989_v31 = vadd.f32 %v1988_v3, %v1946_v26  ;;  %v2030_v35 = vadd.f32 %v2029_v4, %v1987_v28 }
 0x14b   :  { %v2032_v37 = vadd.f32 %v2031_v8, %v1989_v31 }
 0x182   :  { %v2068_v6 = vpop.f32.mrf.mxu0 }
 0x183   :  { %v2069_v32 = vadd.f32 %v2068_v6, %v2026_v27 }
 0x184   :  { %v2070_v10 = vpop.f32.mrf.mxu0  ;;  %v2111_v11 = vpop.f32.mrf.mxu1 }
 0x185   :  { %v2071_v36 = vadd.f32 %v2070_v10, %v2028_v30  ;;  %v2112_v38 = vadd.f32 %v2111_v11, %v2069_v32 }
 0x186   :  { %v2072_v14 = vpop.f32.mrf.mxu0  ;;  %v2113_v15 = vpop.f32.mrf.mxu1 }
 0x187   :  { %v2073_v39 = vadd.f32 %v2072_v14, %v2030_v35  ;;  %v2114_v42 = vadd.f32 %v2113_v15, %v2071_v36 }
 0x188   :  { %v2074_v21 = vpop.f32.mrf.mxu0  ;;  %v2115_v22 = vpop.f32.mrf.mxu1 }
 0x189   :  { %v2075_v43 = vadd.f32 %v2074_v21, %v2032_v37  ;;  %v2116_v45 = vadd.f32 %v2115_v22, %v2073_v39 }
 0x18a   :  { %v2117_v29 = vpop.f32.mrf.mxu1 }
 0x18b   :  { %v2118_v49 = vadd.f32 %v2117_v29, %v2075_v43 }
 0x1c2   :  { %v2154_v25 = vpop.f32.mrf.mxu0 }
 0x1c3   :  { %v2155_v44 = vadd.f32 %v2154_v25, %v2112_v38 }
 0x1c4   :  { %v2156_v33 = vpop.f32.mrf.mxu0  ;;  %v2197_v34 = vpop.f32.mrf.mxu1 }
 0x1c5   :  { %v2157_v46 = vadd.f32 %v2156_v33, %v2114_v42  ;;  %v2198_v50 = vadd.f32 %v2197_v34, %v2155_v44 }
 0x1c6   :  { %v2158_v40 = vpop.f32.mrf.mxu0  ;;  %v2199_v41 = vpop.f32.mrf.mxu1 }
 0x1c7   :  { %v2159_v51 = vadd.f32 %v2158_v40, %v2116_v45  ;;  %v2200_v53 = vadd.f32 %v2199_v41, %v2157_v46 }
 0x1c8   :  { %v2160_v47 = vpop.f32.mrf.mxu0  ;;  %v2201_v48 = vpop.f32.mrf.mxu1 }
 0x1c9   :  { %v2161_v54 = vadd.f32 %v2160_v47, %v2118_v49  ;;  %v2202_v58 = vadd.f32 %v2201_v48, %v2159_v51 }
 0x1ca   :  { %v2203_v56 = vpop.f32.mrf.mxu1 }
 0x1cb   :  { %v2204_v61 = vadd.f32 %v2203_v56, %v2161_v54 }
 0x202   :  { %v2240_v52 = vpop.f32.mrf.mxu0 }
 0x203   :  { %v2241_v55 = vadd.f32 %v2240_v52, %v2198_v50 }
 0x204   :  { %v2242_v57 = vpop.f32.mrf.mxu0 }
 0x205   :  { %v2243_v59 = vadd.f32 %v2242_v57, %v2200_v53  ;;  %v2249_v62 = vmax.f32 %v2241_v55, 0.0 }
 0x206   :  { %v2244_v60 = vpop.f32.mrf.mxu0 }
 0x207   :  { %v2250_v63 = vmax.f32 %v2243_v59, 0.0  ;;  %v2245_v0 = vadd.f32 %v2244_v60, %v2202_v58 }
 0x208   :  { %v2246_v1 = vpop.f32.mrf.mxu0 }
 0x209   :  { %v2579_v2 = vpack.c.bf16 %v2250_v63, %v2249_v62  ;;  %v2247_v3 = vadd.f32 %v2246_v1, %v2204_v61  ;;  %v2251_v4 = vmax.f32 %v2245_v0, 0.0 }
 0x20b   :  { %2265 = vst [vmem:[%s3990_s3] sm:$0xff] %v2579_v2  ;;  %v2252_v5 = vmax.f32 %v2247_v3, 0.0 }
 0x20d   :  { %v2580_v6 = vpack.c.bf16 %v2252_v5, %v2251_v4 }
 0x20f   :  { %2266 = vst [vmem:[%s3990_s3 + $0x8] sm:$0xff] %v2580_v6 }

// kernel: resnet_arcface_forward.38
= control target key start
LH: loop header
LB: loop body
LE: loop exit
PB: predicated region body
PF: predicated region fallthrough
CT: control target
= control target key end

     0   :  { %s1857_s1 = inlined_call_operand.vmem [shape: bf16[512,512], index: 1, kind: input, shape index: {}]   ;;  %s1858_s0 = inlined_call_operand.vmem [shape: bf16[16,512], index: 0, kind: input, shape index: {}]   ;;  %s1859_s2 = inlined_call_operand.vmem [shape: f32[1,512], index: 2, kind: input, shape index: {}]   ;;  %s1860_s3 = inlined_call_operand.vmem [shape: bf16[16,512], index: 3, kind: input, shape index: {}]   ;;  %s1861_s4 = inlined_call_operand.vmem [shape: bf16[16,512], index: 4, kind: output, shape index: {}]  }
   0x1   :  { %v1203_v0 = vld [vmem:[%s1857_s1 + $0xe4] ss:$16 sps:$4 sm:$0xff]   ;;  %v1207_v2 = vld [vmem:[%s1857_s1 + $0xe0] ss:$16 sps:$4 sm:$0xff]   ;;  %v1304_v51 = vld [vmem:[%s1858_s0 + $0xc] ss:$16 sps:$4 sm:$0xff]  }
   0x2   :  { %v1205_v1 = vld [vmem:[%s1857_s1 + $0x2e4] ss:$16 sps:$4 sm:$0xff]   ;;  %831 = vmatprep.subr.bf16.mxu0 %v1203_v0  ;;  %v1208_v3 = vld [vmem:[%s1857_s1 + $0x2e0] ss:$16 sps:$4 sm:$0xff]   ;;  %906 = vmatprep.mubr.bf16.mxu1 %v1304_v51 }
   0x3   :  { %874 = vmatprep.subr.bf16.mxu1 %v1205_v1  ;;  %v1209_v4 = vld [vmem:[%s1857_s1 + $0xc4] ss:$16 sps:$4 sm:$0xff]   ;;  %832 = vmatpush1.bf16.msra.mxu0 %v1207_v2  ;;  %v1213_v6 = vld [vmem:[%s1857_s1 + $0xc0] ss:$16 sps:$4 sm:$0xff]   ;;  %v1307_v2 = vld [vmem:[%s1857_s1 + $0xec] ss:$16 sps:$4 sm:$0xff]  }
   0x4   :  { %875 = vmatpush1.bf16.msra.mxu1 %v1208_v3  ;;  %v1211_v5 = vld [vmem:[%s1857_s1 + $0x2c4] ss:$16 sps:$4 sm:$0xff]   ;;  %833 = vmatprep.subr.bf16.mxu0 %v1209_v4  ;;  %v1214_v7 = vld [vmem:[%s1857_s1 + $0x2c0] ss:$16 sps:$4 sm:$0xff]   ;;  %v1310_v3 = vld [vmem:[%s1857_s1 + $0x2ec] ss:$16 sps:$4 sm:$0xff]  }
   0x5   :  { %876 = vmatprep.subr.bf16.mxu1 %v1211_v5  ;;  %v1215_v8 = vld [vmem:[%s1857_s1 + $0xa4] ss:$16 sps:$4 sm:$0xff]   ;;  %v1219_v10 = vld [vmem:[%s1857_s1 + $0xa0] ss:$16 sps:$4 sm:$0xff]   ;;  %v1638_v5 = vld [vmem:[%s1858_s0 + $0x8] ss:$16 sps:$4 sm:$0xff]  }
   0x6   :  { %v1217_v9 = vld [vmem:[%s1857_s1 + $0x2a4] ss:$16 sps:$4 sm:$0xff]   ;;  %v1220_v11 = vld [vmem:[%s1857_s1 + $0x2a0] ss:$16 sps:$4 sm:$0xff]  }
   0x7   :  { %834 = vmatpush1.bf16.msra.mxu0 %v1213_v6  ;;  %v1221_v12 = vld [vmem:[%s1857_s1 + $0x84] ss:$16 sps:$4 sm:$0xff]   ;;  %v1225_v14 = vld [vmem:[%s1857_s1 + $0x80] ss:$16 sps:$4 sm:$0xff]   ;;  %v1305_v6 = vld [vmem:[%s1857_s1 + $0xe8] ss:$16 sps:$4 sm:$0xff]  }
   0x8   :  { %877 = vmatpush1.bf16.msra.mxu1 %v1214_v7  ;;  %835 = vmatprep.subr.bf16.mxu0 %v1215_v8  ;;  %v1223_v13 = vld [vmem:[%s1857_s1 + $0x284] ss:$16 sps:$4 sm:$0xff]   ;;  %v1226_v15 = vld [vmem:[%s1857_s1 + $0x280] ss:$16 sps:$4 sm:$0xff]   ;;  %v1308_v7 = vld [vmem:[%s1857_s1 + $0x2e8] ss:$16 sps:$4 sm:$0xff]  }
   0x9   :  { %878 = vmatprep.subr.bf16.mxu1 %v1217_v9  ;;  %v1227_v16 = vld [vmem:[%s1857_s1 + $0x64] ss:$16 sps:$4 sm:$0xff]   ;;  %v1231_v18 = vld [vmem:[%s1857_s1 + $0x60] ss:$16 sps:$4 sm:$0xff]   ;;  %v1313_v8 = vld [vmem:[%s1857_s1 + $0xcc] ss:$16 sps:$4 sm:$0xff]  }
   0xa   :  { %v1229_v17 = vld [vmem:[%s1857_s1 + $0x264] ss:$16 sps:$4 sm:$0xff]   ;;  %v1232_v19 = vld [vmem:[%s1857_s1 + $0x260] ss:$16 sps:$4 sm:$0xff]   ;;  %v1316_v9 = vld [vmem:[%s1857_s1 + $0x2cc] ss:$16 sps:$4 sm:$0xff]  }
   0xb   :  { %836 = vmatpush1.bf16.msra.mxu0 %v1219_v10  ;;  %v1233_v20 = vld [vmem:[%s1857_s1 + $0x44] ss:$16 sps:$4 sm:$0xff]   ;;  %v1237_v22 = vld [vmem:[%s1857_s1 + $0x40] ss:$16 sps:$4 sm:$0xff]   ;;  %v1311_v10 = vld [vmem:[%s1857_s1 + $0xc8] ss:$16 sps:$4 sm:$0xff]  }
   0xc   :  { %879 = vmatpush1.bf16.msra.mxu1 %v1220_v11  ;;  %837 = vmatprep.subr.bf16.mxu0 %v1221_v12  ;;  %v1235_v21 = vld [vmem:[%s1857_s1 + $0x244] ss:$16 sps:$4 sm:$0xff]   ;;  %v1238_v23 = vld [vmem:[%s1857_s1 + $0x240] ss:$16 sps:$4 sm:$0xff]   ;;  %v1314_v11 = vld [vmem:[%s1857_s1 + $0x2c8] ss:$16 sps:$4 sm:$0xff]  }
   0xd   :  { %880 = vmatprep.subr.bf16.mxu1 %v1223_v13  ;;  %v1239_v24 = vld [vmem:[%s1857_s1 + $0x24] ss:$16 sps:$4 sm:$0xff]   ;;  %v1243_v26 = vld [vmem:[%s1857_s1 + $0x20] ss:$16 sps:$4 sm:$0xff]   ;;  %v1319_v12 = vld [vmem:[%s1857_s1 + $0xac] ss:$16 sps:$4 sm:$0xff]  }
   0xe   :  { %v1241_v25 = vld [vmem:[%s1857_s1 + $0x224] ss:$16 sps:$4 sm:$0xff]   ;;  %v1244_v27 = vld [vmem:[%s1857_s1 + $0x220] ss:$16 sps:$4 sm:$0xff]   ;;  %v1322_v13 = vld [vmem:[%s1857_s1 + $0x2ac] ss:$16 sps:$4 sm:$0xff]  }
   0xf   :  { %838 = vmatpush1.bf16.msra.mxu0 %v1225_v14  ;;  %v1245_v28 = vld [vmem:[%s1857_s1 + $0x4] ss:$16 sps:$4 sm:$0xff]   ;;  %v1249_v30 = vld [vmem:[%s1857_s1] ss:$16 sps:$4 sm:$0xff]   ;;  %v1317_v14 = vld [vmem:[%s1857_s1 + $0xa8] ss:$16 sps:$4 sm:$0xff]  }
  0x10   :  { %881 = vmatpush1.bf16.msra.mxu1 %v1226_v15  ;;  %839 = vmatprep.subr.bf16.mxu0 %v1227_v16  ;;  %v1247_v29 = vld [vmem:[%s1857_s1 + $0x204] ss:$16 sps:$4 sm:$0xff]   ;;  %v1250_v31 = vld [vmem:[%s1857_s1 + $0x200] ss:$16 sps:$4 sm:$0xff]   ;;  %v1320_v15 = vld [vmem:[%s1857_s1 + $0x2a8] ss:$16 sps:$4 sm:$0xff]  }
  0x11   :  { %882 = vmatprep.subr.bf16.mxu1 %v1229_v17  ;;  %v1251_v32 = vld [vmem:[%s1857_s1 + $0x1e4] ss:$16 sps:$4 sm:$0xff]   ;;  %v1255_v34 = vld [vmem:[%s1857_s1 + $0x1e0] ss:$16 sps:$4 sm:$0xff]   ;;  %v1325_v16 = vld [vmem:[%s1857_s1 + $0x8c] ss:$16 sps:$4 sm:$0xff]  }
  0x12   :  { %v1253_v33 = vld [vmem:[%s1857_s1 + $0x3e4] ss:$16 sps:$4 sm:$0xff]   ;;  %v1256_v35 = vld [vmem:[%s1857_s1 + $0x3e0] ss:$16 sps:$4 sm:$0xff]   ;;  %v1328_v17 = vld [vmem:[%s1857_s1 + $0x28c] ss:$16 sps:$4 sm:$0xff]  }
  0x13   :  { %840 = vmatpush1.bf16.msra.mxu0 %v1231_v18  ;;  %v1257_v36 = vld [vmem:[%s1857_s1 + $0x1c4] ss:$16 sps:$4 sm:$0xff]   ;;  %v1261_v38 = vld [vmem:[%s1857_s1 + $0x1c0] ss:$16 sps:$4 sm:$0xff]   ;;  %v1323_v18 = vld [vmem:[%s1857_s1 + $0x88] ss:$16 sps:$4 sm:$0xff]  }
  0x14   :  { %883 = vmatpush1.bf16.msra.mxu1 %v1232_v19  ;;  %841 = vmatprep.subr.bf16.mxu0 %v1233_v20  ;;  %v1259_v37 = vld [vmem:[%s1857_s1 + $0x3c4] ss:$16 sps:$4 sm:$0xff]   ;;  %v1262_v39 = vld [vmem:[%s1857_s1 + $0x3c0] ss:$16 sps:$4 sm:$0xff]   ;;  %v1326_v19 = vld [vmem:[%s1857_s1 + $0x288] ss:$16 sps:$4 sm:$0xff]  }
  0x15   :  { %884 = vmatprep.subr.bf16.mxu1 %v1235_v21  ;;  %v1263_v40 = vld [vmem:[%s1857_s1 + $0x1a4] ss:$16 sps:$4 sm:$0xff]   ;;  %v1267_v42 = vld [vmem:[%s1857_s1 + $0x1a0] ss:$16 sps:$4 sm:$0xff]   ;;  %v1331_v20 = vld [vmem:[%s1857_s1 + $0x6c] ss:$16 sps:$4 sm:$0xff]  }
  0x16   :  { %v1265_v41 = vld [vmem:[%s1857_s1 + $0x3a4] ss:$16 sps:$4 sm:$0xff]   ;;  %v1268_v43 = vld [vmem:[%s1857_s1 + $0x3a0] ss:$16 sps:$4 sm:$0xff]   ;;  %v1334_v21 = vld [vmem:[%s1857_s1 + $0x26c] ss:$16 sps:$4 sm:$0xff]  }
  0x17   :  { %842 = vmatpush1.bf16.msra.mxu0 %v1237_v22  ;;  %v1269_v44 = vld [vmem:[%s1857_s1 + $0x184] ss:$16 sps:$4 sm:$0xff]   ;;  %v1273_v46 = vld [vmem:[%s1857_s1 + $0x180] ss:$16 sps:$4 sm:$0xff]   ;;  %v1329_v22 = vld [vmem:[%s1857_s1 + $0x68] ss:$16 sps:$4 sm:$0xff]  }
  0x18   :  { %885 = vmatpush1.bf16.msra.mxu1 %v1238_v23  ;;  %843 = vmatprep.subr.bf16.mxu0 %v1239_v24  ;;  %v1271_v45 = vld [vmem:[%s1857_s1 + $0x384] ss:$16 sps:$4 sm:$0xff]   ;;  %v1274_v47 = vld [vmem:[%s1857_s1 + $0x380] ss:$16 sps:$4 sm:$0xff]   ;;  %v1332_v23 = vld [vmem:[%s1857_s1 + $0x268] ss:$16 sps:$4 sm:$0xff]  }
  0x19   :  { %886 = vmatprep.subr.bf16.mxu1 %v1241_v25  ;;  %v1275_v48 = vld [vmem:[%s1857_s1 + $0x164] ss:$16 sps:$4 sm:$0xff]   ;;  %v1279_v52 = vld [vmem:[%s1857_s1 + $0x160] ss:$16 sps:$4 sm:$0xff]   ;;  %v1337_v24 = vld [vmem:[%s1857_s1 + $0x4c] ss:$16 sps:$4 sm:$0xff]  }
  0x1a   :  { %v1301_v49 = vld [vmem:[%s1858_s0 + $0x4] ss:$16 sps:$4 sm:$0xff]   ;;  %v1280_v53 = vld [vmem:[%s1857_s1 + $0x360] ss:$16 sps:$4 sm:$0xff]   ;;  %v1340_v25 = vld [vmem:[%s1857_s1 + $0x24c] ss:$16 sps:$4 sm:$0xff]  }
  0x1b   :  { %844 = vmatpush1.bf16.msra.mxu0 %v1243_v26  ;;  %v1277_v50 = vld [vmem:[%s1857_s1 + $0x364] ss:$16 sps:$4 sm:$0xff]   ;;  %863 = vmatprep.mubr.bf16.mxu0 %v1301_v49  ;;  %v1285_v56 = vld [vmem:[%s1857_s1 + $0x140] ss:$16 sps:$4 sm:$0xff]   ;;  %v1335_v26 = vld [vmem:[%s1857_s1 + $0x48] ss:$16 sps:$4 sm:$0xff]  }
  0x1c   :  { %887 = vmatpush1.bf16.msra.mxu1 %v1244_v27  ;;  %845 = vmatprep.subr.bf16.mxu0 %v1245_v28  ;;  %v1281_v54 = vld [vmem:[%s1857_s1 + $0x144] ss:$16 sps:$4 sm:$0xff]   ;;  %v1286_v57 = vld [vmem:[%s1857_s1 + $0x340] ss:$16 sps:$4 sm:$0xff]   ;;  %v1338_v27 = vld [vmem:[%s1857_s1 + $0x248] ss:$16 sps:$4 sm:$0xff]  }
  0x1d   :  { %888 = vmatprep.subr.bf16.mxu1 %v1247_v29  ;;  %v1283_v55 = vld [vmem:[%s1857_s1 + $0x344] ss:$16 sps:$4 sm:$0xff]   ;;  %v1291_v60 = vld [vmem:[%s1857_s1 + $0x120] ss:$16 sps:$4 sm:$0xff]   ;;  %v1343_v28 = vld [vmem:[%s1857_s1 + $0x2c] ss:$16 sps:$4 sm:$0xff]  }
  0x1e   :  { %v1287_v58 = vld [vmem:[%s1857_s1 + $0x124] ss:$16 sps:$4 sm:$0xff]   ;;  %v1292_v61 = vld [vmem:[%s1857_s1 + $0x320] ss:$16 sps:$4 sm:$0xff]   ;;  %v1346_v29 = vld [vmem:[%s1857_s1 + $0x22c] ss:$16 sps:$4 sm:$0xff]  }
  0x1f   :  { %846 = vmatpush1.bf16.msra.mxu0 %v1249_v30  ;;  %v1289_v59 = vld [vmem:[%s1857_s1 + $0x324] ss:$16 sps:$4 sm:$0xff]   ;;  %v1297_v0 = vld [vmem:[%s1857_s1 + $0x100] ss:$16 sps:$4 sm:$0xff]   ;;  %v1341_v30 = vld [vmem:[%s1857_s1 + $0x28] ss:$16 sps:$4 sm:$0xff]  }
  0x20   :  { %889 = vmatpush1.bf16.msra.mxu1 %v1250_v31  ;;  %847 = vmatprep.subr.bf16.mxu0 %v1251_v32  ;;  %v1293_v62 = vld [vmem:[%s1857_s1 + $0x104] ss:$16 sps:$4 sm:$0xff]   ;;  %v1298_v1 = vld [vmem:[%s1857_s1 + $0x300] ss:$16 sps:$4 sm:$0xff]   ;;  %v1344_v31 = vld [vmem:[%s1857_s1 + $0x228] ss:$16 sps:$4 sm:$0xff]  }
  0x21   :  { %890 = vmatprep.subr.bf16.mxu1 %v1253_v33  ;;  %v1295_v63 = vld [vmem:[%s1857_s1 + $0x304] ss:$16 sps:$4 sm:$0xff]   ;;  %v1633_v4 = vld [vmem:[%s1858_s0] ss:$16 sps:$4 sm:$0xff]   ;;  %v1349_v32 = vld [vmem:[%s1857_s1 + $0xc] ss:$16 sps:$4 sm:$0xff]  }
  0x22   :  { %v1352_v33 = vld [vmem:[%s1857_s1 + $0x20c] ss:$16 sps:$4 sm:$0xff]  }
  0x23   :  { %848 = vmatpush2.bf16.msra.mxu0 %v1255_v34  ;;  %v1347_v34 = vld [vmem:[%s1857_s1 + $0x8] ss:$16 sps:$4 sm:$0xff]  }
  0x24   :  { %891 = vmatpush2.bf16.msra.mxu1 %v1256_v35  ;;  %849 = vmatprep.subr.bf16.mxu0 %v1257_v36  ;;  %v1350_v35 = vld [vmem:[%s1857_s1 + $0x208] ss:$16 sps:$4 sm:$0xff]   ;;  %v1355_v36 = vld [vmem:[%s1857_s1 + $0x1ec] ss:$16 sps:$4 sm:$0xff]  }
  0x25   :  { %892 = vmatprep.subr.bf16.mxu1 %v1259_v37  ;;  %v1358_v37 = vld [vmem:[%s1857_s1 + $0x3ec] ss:$16 sps:$4 sm:$0xff]  }
  0x27   :  { %850 = vmatpush2.bf16.msra.mxu0 %v1261_v38  ;;  %v1353_v38 = vld [vmem:[%s1857_s1 + $0x1e8] ss:$16 sps:$4 sm:$0xff]  }
  0x28   :  { %893 = vmatpush2.bf16.msra.mxu1 %v1262_v39  ;;  %851 = vmatprep.subr.bf16.mxu0 %v1263_v40  ;;  %v1356_v39 = vld [vmem:[%s1857_s1 + $0x3e8] ss:$16 sps:$4 sm:$0xff]   ;;  %v1361_v40 = vld [vmem:[%s1857_s1 + $0x1cc] ss:$16 sps:$4 sm:$0xff]  }
  0x29   :  { %894 = vmatprep.subr.bf16.mxu1 %v1265_v41  ;;  %v1364_v41 = vld [vmem:[%s1857_s1 + $0x3cc] ss:$16 sps:$4 sm:$0xff]  }
  0x2b   :  { %852 = vmatpush2.bf16.msra.mxu0 %v1267_v42  ;;  %v1359_v42 = vld [vmem:[%s1857_s1 + $0x1c8] ss:$16 sps:$4 sm:$0xff]  }
  0x2c   :  { %895 = vmatpush2.bf16.msra.mxu1 %v1268_v43  ;;  %853 = vmatprep.subr.bf16.mxu0 %v1269_v44  ;;  %v1362_v43 = vld [vmem:[%s1857_s1 + $0x3c8] ss:$16 sps:$4 sm:$0xff]   ;;  %v1367_v44 = vld [vmem:[%s1857_s1 + $0x1ac] ss:$16 sps:$4 sm:$0xff]  }
  0x2d   :  { %896 = vmatprep.subr.bf16.mxu1 %v1271_v45  ;;  %v1370_v45 = vld [vmem:[%s1857_s1 + $0x3ac] ss:$16 sps:$4 sm:$0xff]  }
  0x2f   :  { %854 = vmatpush2.bf16.msra.mxu0 %v1273_v46  ;;  %v1365_v46 = vld [vmem:[%s1857_s1 + $0x1a8] ss:$16 sps:$4 sm:$0xff]  }
  0x30   :  { %897 = vmatpush2.bf16.msra.mxu1 %v1274_v47  ;;  %855 = vmatprep.subr.bf16.mxu0 %v1275_v48  ;;  %v1368_v47 = vld [vmem:[%s1857_s1 + $0x3a8] ss:$16 sps:$4 sm:$0xff]   ;;  %v1373_v48 = vld [vmem:[%s1857_s1 + $0x18c] ss:$16 sps:$4 sm:$0xff]  }
  0x31   :  { %898 = vmatprep.subr.bf16.mxu1 %v1277_v50  ;;  %v1371_v50 = vld [vmem:[%s1857_s1 + $0x188] ss:$16 sps:$4 sm:$0xff]  }
  0x33   :  { %856 = vmatpush2.bf16.msra.mxu0 %v1279_v52  ;;  %v1379_v52 = vld [vmem:[%s1857_s1 + $0x16c] ss:$16 sps:$4 sm:$0xff]  }
  0x34   :  { %899 = vmatpush2.bf16.msra.mxu1 %v1280_v53  ;;  %857 = vmatprep.subr.bf16.mxu0 %v1281_v54  ;;  %v1382_v53 = vld [vmem:[%s1857_s1 + $0x36c] ss:$16 sps:$4 sm:$0xff]   ;;  %v1377_v54 = vld [vmem:[%s1857_s1 + $0x168] ss:$16 sps:$4 sm:$0xff]  }
  0x35   :  { %900 = vmatprep.subr.bf16.mxu1 %v1283_v55  ;;  %v1380_v55 = vld [vmem:[%s1857_s1 + $0x368] ss:$16 sps:$4 sm:$0xff]  }
  0x37   :  { %858 = vmatpush2.bf16.msra.mxu0 %v1285_v56  ;;  %v1385_v56 = vld [vmem:[%s1857_s1 + $0x14c] ss:$16 sps:$4 sm:$0xff]  }
  0x38   :  { %901 = vmatpush2.bf16.msra.mxu1 %v1286_v57  ;;  %859 = vmatprep.subr.bf16.mxu0 %v1287_v58  ;;  %v1388_v57 = vld [vmem:[%s1857_s1 + $0x34c] ss:$16 sps:$4 sm:$0xff]   ;;  %v1383_v58 = vld [vmem:[%s1857_s1 + $0x148] ss:$16 sps:$4 sm:$0xff]  }
  0x39   :  { %902 = vmatprep.subr.bf16.mxu1 %v1289_v59  ;;  %v1386_v59 = vld [vmem:[%s1857_s1 + $0x348] ss:$16 sps:$4 sm:$0xff]  }
  0x3b   :  { %860 = vmatpush2.bf16.msra.mxu0 %v1291_v60  ;;  %v1391_v60 = vld [vmem:[%s1857_s1 + $0x12c] ss:$16 sps:$4 sm:$0xff]  }
  0x3c   :  { %903 = vmatpush2.bf16.msra.mxu1 %v1292_v61  ;;  %861 = vmatprep.subr.bf16.mxu0 %v1293_v62  ;;  %v1394_v61 = vld [vmem:[%s1857_s1 + $0x32c] ss:$16 sps:$4 sm:$0xff]   ;;  %v1389_v62 = vld [vmem:[%s1857_s1 + $0x128] ss:$16 sps:$4 sm:$0xff]  }
  0x3d   :  { %904 = vmatprep.subr.bf16.mxu1 %v1295_v63  ;;  %v1392_v63 = vld [vmem:[%s1857_s1 + $0x328] ss:$16 sps:$4 sm:$0xff]  }
  0x3f   :  { %862 = vmatpush2.bf16.msra.mxu0 %v1297_v0  ;;  %v1397_v0 = vld [vmem:[%s1857_s1 + $0x10c] ss:$16 sps:$4 sm:$0xff]  }
  0x40   :  { %905 = vmatpush2.bf16.msra.mxu1 %v1298_v1  ;;  %917 = vmatprep.subr.bf16.mxu0 %v1307_v2  ;;  %v1400_v1 = vld [vmem:[%s1857_s1 + $0x30c] ss:$16 sps:$4 sm:$0xff]   ;;  %v1395_v2 = vld [vmem:[%s1857_s1 + $0x108] ss:$16 sps:$4 sm:$0xff]  }
  0x41   :  { %960 = vmatprep.subr.bf16.mxu1 %v1310_v3  ;;  %v1398_v3 = vld [vmem:[%s1857_s1 + $0x308] ss:$16 sps:$4 sm:$0xff]  }
  0x42   :  { %864 = vmatmul.mubr.bf16.vlgmr.msra.gmra.mxu0 %v1633_v4 }
  0x43   :  { %907 = vmatmul.mubr.bf16.vlgmr.msra.gmra.mxu1 %v1638_v5  ;;  %918 = vmatpush1.bf16.msra.mxu0 %v1305_v6  ;;  %v151_v6 = vlaneseq }
  0x44   :  { %961 = vmatpush1.bf16.msra.mxu1 %v1308_v7  ;;  %919 = vmatprep.subr.bf16.mxu0 %v1313_v8 }
  0x45   :  { %962 = vmatprep.subr.bf16.mxu1 %v1316_v9  ;;  %949 = vmatprep.mubr.bf16.mxu0 %v1301_v49  ;;  %v1376_v49 = vld [vmem:[%s1857_s1 + $0x38c] ss:$16 sps:$4 sm:$0xff]   ;;  %v152_v7 = vshrl.u32 %v151_v6, 7  ;;  %v149_v9 = vld [vmem:[%s1859_s2] sm:$0xf] }
  0x46   :  { %992 = vmatprep.mubr.bf16.mxu1 %v1304_v51  ;;  %v1374_v51 = vld [vmem:[%s1857_s1 + $0x388] ss:$16 sps:$4 sm:$0xff]  }
  0x47   :  { %920 = vmatpush1.bf16.msra.mxu0 %v1311_v10  ;;  %v161_v8 = vsub.s32 2, %v152_v7 }
  0x48   :  { %963 = vmatpush1.bf16.msra.mxu1 %v1314_v11  ;;  %921 = vmatprep.subr.bf16.mxu0 %v1319_v12  ;;  %v165_v11 = vsub.s32 3, %v152_v7 }
  0x49   :  { %964 = vmatprep.subr.bf16.mxu1 %v1322_v13  ;;  %v162_v10 = vrot.slane %v149_v9, %v161_v8  ;;  %v153_v13 = vsub.s32 0, %v152_v7 }
  0x4a   :  { %v166_v12 = vrot.slane %v149_v9, %v165_v11 }
  0x4b   :  { %922 = vmatpush1.bf16.msra.mxu0 %v1317_v14  ;;  %v157_v14 = vsub.s32 1, %v152_v7 }
  0x4c   :  { %965 = vmatpush1.bf16.msra.mxu1 %v1320_v15  ;;  %923 = vmatprep.subr.bf16.mxu0 %v1325_v16  ;;  %v154_v15 = vrot.slane %v149_v9, %v153_v13  ;;  %v1003_v16 = vld [vmem:[%s1860_s3] sm:$0xff] }
  0x4d   :  { %966 = vmatprep.subr.bf16.mxu1 %v1328_v17 }
  0x4f   :  { %924 = vmatpush1.bf16.msra.mxu0 %v1323_v18 }
  0x50   :  { %967 = vmatpush1.bf16.msra.mxu1 %v1326_v19  ;;  %925 = vmatprep.subr.bf16.mxu0 %v1331_v20  ;;  %v1007_v19 = vunpack.c.l.bf16 %v1003_v16 }
  0x51   :  { %968 = vmatprep.subr.bf16.mxu1 %v1334_v21 }
  0x53   :  { %926 = vmatpush1.bf16.msra.mxu0 %v1329_v22  ;;  %v1005_v22 = vld [vmem:[%s1860_s3 + $0x10] sm:$0xff] }
  0x54   :  { %969 = vmatpush1.bf16.msra.mxu1 %v1332_v23  ;;  %927 = vmatprep.subr.bf16.mxu0 %v1337_v24 }
  0x55   :  { %970 = vmatprep.subr.bf16.mxu1 %v1340_v25  ;;  %v1008_v25 = vunpack.c.h.bf16 %v1003_v16 }
  0x57   :  { %928 = vmatpush1.bf16.msra.mxu0 %v1335_v26 }
  0x58   :  { %971 = vmatpush1.bf16.msra.mxu1 %v1338_v27  ;;  %929 = vmatprep.subr.bf16.mxu0 %v1343_v28 }
  0x59   :  { %972 = vmatprep.subr.bf16.mxu1 %v1346_v29 }
  0x5b   :  { %930 = vmatpush1.bf16.msra.mxu0 %v1341_v30 }
  0x5c   :  { %973 = vmatpush1.bf16.msra.mxu1 %v1344_v31  ;;  %931 = vmatprep.subr.bf16.mxu0 %v1349_v32  ;;  %v1011_v31 = vunpack.c.l.bf16 %v1005_v22 }
  0x5d   :  { %974 = vmatprep.subr.bf16.mxu1 %v1352_v33  ;;  %v1012_v33 = vunpack.c.h.bf16 %v1005_v22 }
  0x5f   :  { %932 = vmatpush1.bf16.msra.mxu0 %v1347_v34 }
  0x60   :  { %975 = vmatpush1.bf16.msra.mxu1 %v1350_v35  ;;  %933 = vmatprep.subr.bf16.mxu0 %v1355_v36 }
  0x61   :  { %976 = vmatprep.subr.bf16.mxu1 %v1358_v37 }
  0x63   :  { %934 = vmatpush2.bf16.msra.mxu0 %v1353_v38 }
  0x64   :  { %977 = vmatpush2.bf16.msra.mxu1 %v1356_v39  ;;  %935 = vmatprep.subr.bf16.mxu0 %v1361_v40 }
  0x65   :  { %978 = vmatprep.subr.bf16.mxu1 %v1364_v41 }
  0x67   :  { %936 = vmatpush2.bf16.msra.mxu0 %v1359_v42 }
  0x68   :  { %979 = vmatpush2.bf16.msra.mxu1 %v1362_v43  ;;  %937 = vmatprep.subr.bf16.mxu0 %v1367_v44 }
  0x69   :  { %980 = vmatprep.subr.bf16.mxu1 %v1370_v45 }
  0x6b   :  { %938 = vmatpush2.bf16.msra.mxu0 %v1365_v46 }
  0x6c   :  { %981 = vmatpush2.bf16.msra.mxu1 %v1368_v47  ;;  %939 = vmatprep.subr.bf16.mxu0 %v1373_v48  ;;  %v1004_v47 = vld [vmem:[%s1860_s3 + $0x8] sm:$0xff] }
  0x6d   :  { %982 = vmatprep.subr.bf16.mxu1 %v1376_v49 }
  0x6f   :  { %940 = vmatpush2.bf16.msra.mxu0 %v1371_v50 }
  0x70   :  { %983 = vmatpush2.bf16.msra.mxu1 %v1374_v51  ;;  %941 = vmatprep.subr.bf16.mxu0 %v1379_v52  ;;  %v1009_v51 = vunpack.c.l.bf16 %v1004_v47 }
  0x71   :  { %984 = vmatprep.subr.bf16.mxu1 %v1382_v53 }
  0x73   :  { %942 = vmatpush2.bf16.msra.mxu0 %v1377_v54  ;;  %v1006_v54 = vld [vmem:[%s1860_s3 + $0x18] sm:$0xff] }
  0x74   :  { %985 = vmatpush2.bf16.msra.mxu1 %v1380_v55  ;;  %943 = vmatprep.subr.bf16.mxu0 %v1385_v56  ;;  %v1014_v6 = vunpack.c.h.bf16 %v1006_v54 }
  0x75   :  { %986 = vmatprep.subr.bf16.mxu1 %v1388_v57  ;;  %v1010_v57 = vunpack.c.h.bf16 %v1004_v47 }
  0x77   :  { %944 = vmatpush2.bf16.msra.mxu0 %v1383_v58 }
  0x78   :  { %987 = vmatpush2.bf16.msra.mxu1 %v1386_v59  ;;  %945 = vmatprep.subr.bf16.mxu0 %v1391_v60 }
  0x79   :  { %988 = vmatprep.subr.bf16.mxu1 %v1394_v61 }
  0x7b   :  { %946 = vmatpush2.bf16.msra.mxu0 %v1389_v62 }
  0x7c   :  { %989 = vmatpush2.bf16.msra.mxu1 %v1392_v63  ;;  %947 = vmatprep.subr.bf16.mxu0 %v1397_v0  ;;  %v1013_v63 = vunpack.c.l.bf16 %v1006_v54 }
  0x7d   :  { %990 = vmatprep.subr.bf16.mxu1 %v1400_v1 }
  0x7f   :  { %948 = vmatpush2.bf16.msra.mxu0 %v1395_v2 }
  0x80   :  { %991 = vmatpush2.bf16.msra.mxu1 %v1398_v3 }
  0x82   :  { %950 = vmatmul.mubr.bf16.vlgmr.msra.gmra.mxu0 %v1633_v4  ;;  %v158_v4 = vrot.slane %v149_v9, %v157_v14 }
  0x83   :  { %993 = vmatmul.mubr.bf16.vlgmr.msra.gmra.mxu1 %v1638_v5 }
 0x102   :  { %v865_v17 = vpop.f32.mrf.mxu0 }
 0x103   :  { %v908_v5 = vpop.f32.mrf.mxu1  ;;  %v866_v18 = vadd.f32 %v865_v17, %v154_v15 }
 0x104   :  { %v867_v20 = vpop.f32.mrf.mxu0 }
 0x105   :  { %v910_v21 = vpop.f32.mrf.mxu1  ;;  %v909_v23 = vadd.f32 %v908_v5, %v866_v18  ;;  %v868_v24 = vadd.f32 %v867_v20, %v158_v4 }
 0x106   :  { %v869_v26 = vpop.f32.mrf.mxu0 }
 0x107   :  { %v912_v27 = vpop.f32.mrf.mxu1  ;;  %v1015_v28 = vadd.f32 %v1007_v19, %v909_v23  ;;  %v911_v29 = vadd.f32 %v910_v21, %v868_v24  ;;  %v870_v30 = vadd.f32 %v869_v26, %v154_v15 }
 0x108   :  { %v871_v32 = vpop.f32.mrf.mxu0 }
 0x109   :  { %v1023_v34 = vmax.f32 %v1015_v28, 0.0  ;;  %v1016_v35 = vadd.f32 %v1008_v25, %v911_v29  ;;  %v913_v36 = vadd.f32 %v912_v27, %v870_v30  ;;  %v872_v37 = vadd.f32 %v871_v32, %v158_v4  ;;  %v914_v38 = vpop.f32.mrf.mxu1 }
 0x10b   :  { %v1024_v39 = vmax.f32 %v1016_v35, 0.0  ;;  %v1019_v40 = vadd.f32 %v1011_v31, %v913_v36  ;;  %v915_v41 = vadd.f32 %v914_v38, %v872_v37 }
 0x10d   :  { %v1199_v42 = vpack.c.bf16 %v1024_v39, %v1023_v34  ;;  %v1020_v43 = vadd.f32 %v1012_v33, %v915_v41  ;;  %v1027_v44 = vmax.f32 %v1019_v40, 0.0 }
 0x10f   :  { %1055 = vst [vmem:[%s1861_s4] sm:$0xff] %v1199_v42  ;;  %v1028_v45 = vmax.f32 %v1020_v43, 0.0 }
 0x111   :  { %v1201_v46 = vpack.c.bf16 %v1028_v45, %v1027_v44 }
 0x113   :  { %1057 = vst [vmem:[%s1861_s4 + $0x10] sm:$0xff] %v1201_v46 }
 0x142   :  { %v951_v48 = vpop.f32.mrf.mxu0 }
 0x143   :  { %v994_v49 = vpop.f32.mrf.mxu1  ;;  %v952_v50 = vadd.f32 %v951_v48, %v162_v10 }
 0x144   :  { %v953_v52 = vpop.f32.mrf.mxu0 }
 0x145   :  { %v996_v53 = vpop.f32.mrf.mxu1  ;;  %v995_v55 = vadd.f32 %v994_v49, %v952_v50  ;;  %v954_v56 = vadd.f32 %v953_v52, %v166_v12 }
 0x146   :  { %v955_v58 = vpop.f32.mrf.mxu0 }
 0x147   :  { %v998_v59 = vpop.f32.mrf.mxu1  ;;  %v1017_v60 = vadd.f32 %v1009_v51, %v995_v55  ;;  %v997_v61 = vadd.f32 %v996_v53, %v954_v56  ;;  %v956_v62 = vadd.f32 %v955_v58, %v162_v10 }
 0x148   :  { %v957_v0 = vpop.f32.mrf.mxu0 }
 0x149   :  { %v1018_v1 = vadd.f32 %v1010_v57, %v997_v61  ;;  %v999_v2 = vadd.f32 %v998_v59, %v956_v62  ;;  %v958_v3 = vadd.f32 %v957_v0, %v166_v12  ;;  %v1000_v7 = vpop.f32.mrf.mxu1  ;;  %v1025_v8 = vmax.f32 %v1017_v60, 0.0 }
 0x14b   :  { %v1026_v9 = vmax.f32 %v1018_v1, 0.0  ;;  %v1021_v11 = vadd.f32 %v1013_v63, %v999_v2  ;;  %v1001_v13 = vadd.f32 %v1000_v7, %v958_v3 }
 0x14d   :  { %v1200_v14 = vpack.c.bf16 %v1026_v9, %v1025_v8  ;;  %v1022_v15 = vadd.f32 %v1014_v6, %v1001_v13  ;;  %v1029_v16 = vmax.f32 %v1021_v11, 0.0 }
 0x14f   :  { %1056 = vst [vmem:[%s1861_s4 + $0x8] sm:$0xff] %v1200_v14  ;;  %v1030_v4 = vmax.f32 %v1022_v15, 0.0 }
 0x151   :  { %v1202_v10 = vpack.c.bf16 %v1030_v4, %v1029_v16 }
 0x153   :  { %1058 = vst [vmem:[%s1861_s4 + $0x18] sm:$0xff] %v1202_v10 }

// kernel: resnet_arcface_forward.39
= control target key start
LH: loop header
LB: loop body
LE: loop exit
PB: predicated region body
PF: predicated region fallthrough
CT: control target
= control target key end

     0   :  { %s1817_s1 = inlined_call_operand.vmem [shape: bf16[512,512], index: 1, kind: input, shape index: {}]   ;;  %s1818_s0 = inlined_call_operand.vmem [shape: bf16[16,512], index: 0, kind: input, shape index: {}]   ;;  %s1819_s2 = inlined_call_operand.vmem [shape: f32[1,512], index: 2, kind: input, shape index: {}]   ;;  %s1820_s3 = inlined_call_operand.vmem [shape: bf16[16,512], index: 3, kind: output, shape index: {}]  }
   0x1   :  { %v1180_v0 = vld [vmem:[%s1817_s1 + $0xe4] ss:$16 sps:$4 sm:$0xff]   ;;  %v1184_v2 = vld [vmem:[%s1817_s1 + $0xe0] ss:$16 sps:$4 sm:$0xff]   ;;  %v1281_v51 = vld [vmem:[%s1818_s0 + $0xc] ss:$16 sps:$4 sm:$0xff]  }
   0x2   :  { %v1182_v1 = vld [vmem:[%s1817_s1 + $0x2e4] ss:$16 sps:$4 sm:$0xff]   ;;  %828 = vmatprep.subr.bf16.mxu0 %v1180_v0  ;;  %v1185_v3 = vld [vmem:[%s1817_s1 + $0x2e0] ss:$16 sps:$4 sm:$0xff]   ;;  %903 = vmatprep.mubr.bf16.mxu1 %v1281_v51 }
   0x3   :  { %871 = vmatprep.subr.bf16.mxu1 %v1182_v1  ;;  %v1186_v4 = vld [vmem:[%s1817_s1 + $0xc4] ss:$16 sps:$4 sm:$0xff]   ;;  %829 = vmatpush1.bf16.msra.mxu0 %v1184_v2  ;;  %v1190_v6 = vld [vmem:[%s1817_s1 + $0xc0] ss:$16 sps:$4 sm:$0xff]   ;;  %v1284_v2 = vld [vmem:[%s1817_s1 + $0xec] ss:$16 sps:$4 sm:$0xff]  }
   0x4   :  { %872 = vmatpush1.bf16.msra.mxu1 %v1185_v3  ;;  %v1188_v5 = vld [vmem:[%s1817_s1 + $0x2c4] ss:$16 sps:$4 sm:$0xff]   ;;  %830 = vmatprep.subr.bf16.mxu0 %v1186_v4  ;;  %v1191_v7 = vld [vmem:[%s1817_s1 + $0x2c0] ss:$16 sps:$4 sm:$0xff]   ;;  %v1287_v3 = vld [vmem:[%s1817_s1 + $0x2ec] ss:$16 sps:$4 sm:$0xff]  }
   0x5   :  { %873 = vmatprep.subr.bf16.mxu1 %v1188_v5  ;;  %v1192_v8 = vld [vmem:[%s1817_s1 + $0xa4] ss:$16 sps:$4 sm:$0xff]   ;;  %v1196_v10 = vld [vmem:[%s1817_s1 + $0xa0] ss:$16 sps:$4 sm:$0xff]   ;;  %v1610_v5 = vld [vmem:[%s1818_s0 + $0x8] ss:$16 sps:$4 sm:$0xff]  }
   0x6   :  { %v1194_v9 = vld [vmem:[%s1817_s1 + $0x2a4] ss:$16 sps:$4 sm:$0xff]   ;;  %v1197_v11 = vld [vmem:[%s1817_s1 + $0x2a0] ss:$16 sps:$4 sm:$0xff]  }
   0x7   :  { %831 = vmatpush1.bf16.msra.mxu0 %v1190_v6  ;;  %v1198_v12 = vld [vmem:[%s1817_s1 + $0x84] ss:$16 sps:$4 sm:$0xff]   ;;  %v1202_v14 = vld [vmem:[%s1817_s1 + $0x80] ss:$16 sps:$4 sm:$0xff]   ;;  %v1282_v6 = vld [vmem:[%s1817_s1 + $0xe8] ss:$16 sps:$4 sm:$0xff]  }
   0x8   :  { %874 = vmatpush1.bf16.msra.mxu1 %v1191_v7  ;;  %832 = vmatprep.subr.bf16.mxu0 %v1192_v8  ;;  %v1200_v13 = vld [vmem:[%s1817_s1 + $0x284] ss:$16 sps:$4 sm:$0xff]   ;;  %v1203_v15 = vld [vmem:[%s1817_s1 + $0x280] ss:$16 sps:$4 sm:$0xff]   ;;  %v1285_v7 = vld [vmem:[%s1817_s1 + $0x2e8] ss:$16 sps:$4 sm:$0xff]  }
   0x9   :  { %875 = vmatprep.subr.bf16.mxu1 %v1194_v9  ;;  %v1204_v16 = vld [vmem:[%s1817_s1 + $0x64] ss:$16 sps:$4 sm:$0xff]   ;;  %v1208_v18 = vld [vmem:[%s1817_s1 + $0x60] ss:$16 sps:$4 sm:$0xff]   ;;  %v1290_v8 = vld [vmem:[%s1817_s1 + $0xcc] ss:$16 sps:$4 sm:$0xff]  }
   0xa   :  { %v1206_v17 = vld [vmem:[%s1817_s1 + $0x264] ss:$16 sps:$4 sm:$0xff]   ;;  %v1209_v19 = vld [vmem:[%s1817_s1 + $0x260] ss:$16 sps:$4 sm:$0xff]   ;;  %v1293_v9 = vld [vmem:[%s1817_s1 + $0x2cc] ss:$16 sps:$4 sm:$0xff]  }
   0xb   :  { %833 = vmatpush1.bf16.msra.mxu0 %v1196_v10  ;;  %v1210_v20 = vld [vmem:[%s1817_s1 + $0x44] ss:$16 sps:$4 sm:$0xff]   ;;  %v1214_v22 = vld [vmem:[%s1817_s1 + $0x40] ss:$16 sps:$4 sm:$0xff]   ;;  %v1288_v10 = vld [vmem:[%s1817_s1 + $0xc8] ss:$16 sps:$4 sm:$0xff]  }
   0xc   :  { %876 = vmatpush1.bf16.msra.mxu1 %v1197_v11  ;;  %834 = vmatprep.subr.bf16.mxu0 %v1198_v12  ;;  %v1212_v21 = vld [vmem:[%s1817_s1 + $0x244] ss:$16 sps:$4 sm:$0xff]   ;;  %v1215_v23 = vld [vmem:[%s1817_s1 + $0x240] ss:$16 sps:$4 sm:$0xff]   ;;  %v1291_v11 = vld [vmem:[%s1817_s1 + $0x2c8] ss:$16 sps:$4 sm:$0xff]  }
   0xd   :  { %877 = vmatprep.subr.bf16.mxu1 %v1200_v13  ;;  %v1216_v24 = vld [vmem:[%s1817_s1 + $0x24] ss:$16 sps:$4 sm:$0xff]   ;;  %v1220_v26 = vld [vmem:[%s1817_s1 + $0x20] ss:$16 sps:$4 sm:$0xff]   ;;  %v1296_v12 = vld [vmem:[%s1817_s1 + $0xac] ss:$16 sps:$4 sm:$0xff]  }
   0xe   :  { %v1218_v25 = vld [vmem:[%s1817_s1 + $0x224] ss:$16 sps:$4 sm:$0xff]   ;;  %v1221_v27 = vld [vmem:[%s1817_s1 + $0x220] ss:$16 sps:$4 sm:$0xff]   ;;  %v1299_v13 = vld [vmem:[%s1817_s1 + $0x2ac] ss:$16 sps:$4 sm:$0xff]  }
   0xf   :  { %835 = vmatpush1.bf16.msra.mxu0 %v1202_v14  ;;  %v1222_v28 = vld [vmem:[%s1817_s1 + $0x4] ss:$16 sps:$4 sm:$0xff]   ;;  %v1226_v30 = vld [vmem:[%s1817_s1] ss:$16 sps:$4 sm:$0xff]   ;;  %v1294_v14 = vld [vmem:[%s1817_s1 + $0xa8] ss:$16 sps:$4 sm:$0xff]  }
  0x10   :  { %878 = vmatpush1.bf16.msra.mxu1 %v1203_v15  ;;  %836 = vmatprep.subr.bf16.mxu0 %v1204_v16  ;;  %v1224_v29 = vld [vmem:[%s1817_s1 + $0x204] ss:$16 sps:$4 sm:$0xff]   ;;  %v1227_v31 = vld [vmem:[%s1817_s1 + $0x200] ss:$16 sps:$4 sm:$0xff]   ;;  %v1297_v15 = vld [vmem:[%s1817_s1 + $0x2a8] ss:$16 sps:$4 sm:$0xff]  }
  0x11   :  { %879 = vmatprep.subr.bf16.mxu1 %v1206_v17  ;;  %v1228_v32 = vld [vmem:[%s1817_s1 + $0x1e4] ss:$16 sps:$4 sm:$0xff]   ;;  %v1232_v34 = vld [vmem:[%s1817_s1 + $0x1e0] ss:$16 sps:$4 sm:$0xff]   ;;  %v1302_v16 = vld [vmem:[%s1817_s1 + $0x8c] ss:$16 sps:$4 sm:$0xff]  }
  0x12   :  { %v1230_v33 = vld [vmem:[%s1817_s1 + $0x3e4] ss:$16 sps:$4 sm:$0xff]   ;;  %v1233_v35 = vld [vmem:[%s1817_s1 + $0x3e0] ss:$16 sps:$4 sm:$0xff]   ;;  %v1305_v17 = vld [vmem:[%s1817_s1 + $0x28c] ss:$16 sps:$4 sm:$0xff]  }
  0x13   :  { %837 = vmatpush1.bf16.msra.mxu0 %v1208_v18  ;;  %v1234_v36 = vld [vmem:[%s1817_s1 + $0x1c4] ss:$16 sps:$4 sm:$0xff]   ;;  %v1238_v38 = vld [vmem:[%s1817_s1 + $0x1c0] ss:$16 sps:$4 sm:$0xff]   ;;  %v1300_v18 = vld [vmem:[%s1817_s1 + $0x88] ss:$16 sps:$4 sm:$0xff]  }
  0x14   :  { %880 = vmatpush1.bf16.msra.mxu1 %v1209_v19  ;;  %838 = vmatprep.subr.bf16.mxu0 %v1210_v20  ;;  %v1236_v37 = vld [vmem:[%s1817_s1 + $0x3c4] ss:$16 sps:$4 sm:$0xff]   ;;  %v1239_v39 = vld [vmem:[%s1817_s1 + $0x3c0] ss:$16 sps:$4 sm:$0xff]   ;;  %v1303_v19 = vld [vmem:[%s1817_s1 + $0x288] ss:$16 sps:$4 sm:$0xff]  }
  0x15   :  { %881 = vmatprep.subr.bf16.mxu1 %v1212_v21  ;;  %v1240_v40 = vld [vmem:[%s1817_s1 + $0x1a4] ss:$16 sps:$4 sm:$0xff]   ;;  %v1244_v42 = vld [vmem:[%s1817_s1 + $0x1a0] ss:$16 sps:$4 sm:$0xff]   ;;  %v1308_v20 = vld [vmem:[%s1817_s1 + $0x6c] ss:$16 sps:$4 sm:$0xff]  }
  0x16   :  { %v1242_v41 = vld [vmem:[%s1817_s1 + $0x3a4] ss:$16 sps:$4 sm:$0xff]   ;;  %v1245_v43 = vld [vmem:[%s1817_s1 + $0x3a0] ss:$16 sps:$4 sm:$0xff]   ;;  %v1311_v21 = vld [vmem:[%s1817_s1 + $0x26c] ss:$16 sps:$4 sm:$0xff]  }
  0x17   :  { %839 = vmatpush1.bf16.msra.mxu0 %v1214_v22  ;;  %v1246_v44 = vld [vmem:[%s1817_s1 + $0x184] ss:$16 sps:$4 sm:$0xff]   ;;  %v1250_v46 = vld [vmem:[%s1817_s1 + $0x180] ss:$16 sps:$4 sm:$0xff]   ;;  %v1306_v22 = vld [vmem:[%s1817_s1 + $0x68] ss:$16 sps:$4 sm:$0xff]  }
  0x18   :  { %882 = vmatpush1.bf16.msra.mxu1 %v1215_v23  ;;  %840 = vmatprep.subr.bf16.mxu0 %v1216_v24  ;;  %v1248_v45 = vld [vmem:[%s1817_s1 + $0x384] ss:$16 sps:$4 sm:$0xff]   ;;  %v1251_v47 = vld [vmem:[%s1817_s1 + $0x380] ss:$16 sps:$4 sm:$0xff]   ;;  %v1309_v23 = vld [vmem:[%s1817_s1 + $0x268] ss:$16 sps:$4 sm:$0xff]  }
  0x19   :  { %883 = vmatprep.subr.bf16.mxu1 %v1218_v25  ;;  %v1252_v48 = vld [vmem:[%s1817_s1 + $0x164] ss:$16 sps:$4 sm:$0xff]   ;;  %v1256_v52 = vld [vmem:[%s1817_s1 + $0x160] ss:$16 sps:$4 sm:$0xff]   ;;  %v1314_v24 = vld [vmem:[%s1817_s1 + $0x4c] ss:$16 sps:$4 sm:$0xff]  }
  0x1a   :  { %v1278_v49 = vld [vmem:[%s1818_s0 + $0x4] ss:$16 sps:$4 sm:$0xff]   ;;  %v1257_v53 = vld [vmem:[%s1817_s1 + $0x360] ss:$16 sps:$4 sm:$0xff]   ;;  %v1317_v25 = vld [vmem:[%s1817_s1 + $0x24c] ss:$16 sps:$4 sm:$0xff]  }
  0x1b   :  { %841 = vmatpush1.bf16.msra.mxu0 %v1220_v26  ;;  %v1254_v50 = vld [vmem:[%s1817_s1 + $0x364] ss:$16 sps:$4 sm:$0xff]   ;;  %860 = vmatprep.mubr.bf16.mxu0 %v1278_v49  ;;  %v1262_v56 = vld [vmem:[%s1817_s1 + $0x140] ss:$16 sps:$4 sm:$0xff]   ;;  %v1312_v26 = vld [vmem:[%s1817_s1 + $0x48] ss:$16 sps:$4 sm:$0xff]  }
  0x1c   :  { %884 = vmatpush1.bf16.msra.mxu1 %v1221_v27  ;;  %842 = vmatprep.subr.bf16.mxu0 %v1222_v28  ;;  %v1258_v54 = vld [vmem:[%s1817_s1 + $0x144] ss:$16 sps:$4 sm:$0xff]   ;;  %v1263_v57 = vld [vmem:[%s1817_s1 + $0x340] ss:$16 sps:$4 sm:$0xff]   ;;  %v1315_v27 = vld [vmem:[%s1817_s1 + $0x248] ss:$16 sps:$4 sm:$0xff]  }
  0x1d   :  { %885 = vmatprep.subr.bf16.mxu1 %v1224_v29  ;;  %v1260_v55 = vld [vmem:[%s1817_s1 + $0x344] ss:$16 sps:$4 sm:$0xff]   ;;  %v1268_v60 = vld [vmem:[%s1817_s1 + $0x120] ss:$16 sps:$4 sm:$0xff]   ;;  %v1320_v28 = vld [vmem:[%s1817_s1 + $0x2c] ss:$16 sps:$4 sm:$0xff]  }
  0x1e   :  { %v1264_v58 = vld [vmem:[%s1817_s1 + $0x124] ss:$16 sps:$4 sm:$0xff]   ;;  %v1269_v61 = vld [vmem:[%s1817_s1 + $0x320] ss:$16 sps:$4 sm:$0xff]   ;;  %v1323_v29 = vld [vmem:[%s1817_s1 + $0x22c] ss:$16 sps:$4 sm:$0xff]  }
  0x1f   :  { %843 = vmatpush1.bf16.msra.mxu0 %v1226_v30  ;;  %v1266_v59 = vld [vmem:[%s1817_s1 + $0x324] ss:$16 sps:$4 sm:$0xff]   ;;  %v1274_v0 = vld [vmem:[%s1817_s1 + $0x100] ss:$16 sps:$4 sm:$0xff]   ;;  %v1318_v30 = vld [vmem:[%s1817_s1 + $0x28] ss:$16 sps:$4 sm:$0xff]  }
  0x20   :  { %886 = vmatpush1.bf16.msra.mxu1 %v1227_v31  ;;  %844 = vmatprep.subr.bf16.mxu0 %v1228_v32  ;;  %v1270_v62 = vld [vmem:[%s1817_s1 + $0x104] ss:$16 sps:$4 sm:$0xff]   ;;  %v1275_v1 = vld [vmem:[%s1817_s1 + $0x300] ss:$16 sps:$4 sm:$0xff]   ;;  %v1321_v31 = vld [vmem:[%s1817_s1 + $0x228] ss:$16 sps:$4 sm:$0xff]  }
  0x21   :  { %887 = vmatprep.subr.bf16.mxu1 %v1230_v33  ;;  %v1272_v63 = vld [vmem:[%s1817_s1 + $0x304] ss:$16 sps:$4 sm:$0xff]   ;;  %v1605_v4 = vld [vmem:[%s1818_s0] ss:$16 sps:$4 sm:$0xff]   ;;  %v1326_v32 = vld [vmem:[%s1817_s1 + $0xc] ss:$16 sps:$4 sm:$0xff]  }
  0x22   :  { %v1329_v33 = vld [vmem:[%s1817_s1 + $0x20c] ss:$16 sps:$4 sm:$0xff]  }
  0x23   :  { %845 = vmatpush2.bf16.msra.mxu0 %v1232_v34  ;;  %v1324_v34 = vld [vmem:[%s1817_s1 + $0x8] ss:$16 sps:$4 sm:$0xff]  }
  0x24   :  { %888 = vmatpush2.bf16.msra.mxu1 %v1233_v35  ;;  %846 = vmatprep.subr.bf16.mxu0 %v1234_v36  ;;  %v1327_v35 = vld [vmem:[%s1817_s1 + $0x208] ss:$16 sps:$4 sm:$0xff]   ;;  %v1332_v36 = vld [vmem:[%s1817_s1 + $0x1ec] ss:$16 sps:$4 sm:$0xff]  }
  0x25   :  { %889 = vmatprep.subr.bf16.mxu1 %v1236_v37  ;;  %v1335_v37 = vld [vmem:[%s1817_s1 + $0x3ec] ss:$16 sps:$4 sm:$0xff]  }
  0x27   :  { %847 = vmatpush2.bf16.msra.mxu0 %v1238_v38  ;;  %v1330_v38 = vld [vmem:[%s1817_s1 + $0x1e8] ss:$16 sps:$4 sm:$0xff]  }
  0x28   :  { %890 = vmatpush2.bf16.msra.mxu1 %v1239_v39  ;;  %848 = vmatprep.subr.bf16.mxu0 %v1240_v40  ;;  %v1333_v39 = vld [vmem:[%s1817_s1 + $0x3e8] ss:$16 sps:$4 sm:$0xff]   ;;  %v1338_v40 = vld [vmem:[%s1817_s1 + $0x1cc] ss:$16 sps:$4 sm:$0xff]  }
  0x29   :  { %891 = vmatprep.subr.bf16.mxu1 %v1242_v41  ;;  %v1341_v41 = vld [vmem:[%s1817_s1 + $0x3cc] ss:$16 sps:$4 sm:$0xff]  }
  0x2b   :  { %849 = vmatpush2.bf16.msra.mxu0 %v1244_v42  ;;  %v1336_v42 = vld [vmem:[%s1817_s1 + $0x1c8] ss:$16 sps:$4 sm:$0xff]  }
  0x2c   :  { %892 = vmatpush2.bf16.msra.mxu1 %v1245_v43  ;;  %850 = vmatprep.subr.bf16.mxu0 %v1246_v44  ;;  %v1339_v43 = vld [vmem:[%s1817_s1 + $0x3c8] ss:$16 sps:$4 sm:$0xff]   ;;  %v1344_v44 = vld [vmem:[%s1817_s1 + $0x1ac] ss:$16 sps:$4 sm:$0xff]  }
  0x2d   :  { %893 = vmatprep.subr.bf16.mxu1 %v1248_v45  ;;  %v1347_v45 = vld [vmem:[%s1817_s1 + $0x3ac] ss:$16 sps:$4 sm:$0xff]  }
  0x2f   :  { %851 = vmatpush2.bf16.msra.mxu0 %v1250_v46  ;;  %v1342_v46 = vld [vmem:[%s1817_s1 + $0x1a8] ss:$16 sps:$4 sm:$0xff]  }
  0x30   :  { %894 = vmatpush2.bf16.msra.mxu1 %v1251_v47  ;;  %852 = vmatprep.subr.bf16.mxu0 %v1252_v48  ;;  %v1345_v47 = vld [vmem:[%s1817_s1 + $0x3a8] ss:$16 sps:$4 sm:$0xff]   ;;  %v1350_v48 = vld [vmem:[%s1817_s1 + $0x18c] ss:$16 sps:$4 sm:$0xff]  }
  0x31   :  { %895 = vmatprep.subr.bf16.mxu1 %v1254_v50  ;;  %v1348_v50 = vld [vmem:[%s1817_s1 + $0x188] ss:$16 sps:$4 sm:$0xff]  }
  0x33   :  { %853 = vmatpush2.bf16.msra.mxu0 %v1256_v52  ;;  %v1356_v52 = vld [vmem:[%s1817_s1 + $0x16c] ss:$16 sps:$4 sm:$0xff]  }
  0x34   :  { %896 = vmatpush2.bf16.msra.mxu1 %v1257_v53  ;;  %854 = vmatprep.subr.bf16.mxu0 %v1258_v54  ;;  %v1359_v53 = vld [vmem:[%s1817_s1 + $0x36c] ss:$16 sps:$4 sm:$0xff]   ;;  %v1354_v54 = vld [vmem:[%s1817_s1 + $0x168] ss:$16 sps:$4 sm:$0xff]  }
  0x35   :  { %897 = vmatprep.subr.bf16.mxu1 %v1260_v55  ;;  %v1357_v55 = vld [vmem:[%s1817_s1 + $0x368] ss:$16 sps:$4 sm:$0xff]  }
  0x37   :  { %855 = vmatpush2.bf16.msra.mxu0 %v1262_v56  ;;  %v1362_v56 = vld [vmem:[%s1817_s1 + $0x14c] ss:$16 sps:$4 sm:$0xff]  }
  0x38   :  { %898 = vmatpush2.bf16.msra.mxu1 %v1263_v57  ;;  %856 = vmatprep.subr.bf16.mxu0 %v1264_v58  ;;  %v1365_v57 = vld [vmem:[%s1817_s1 + $0x34c] ss:$16 sps:$4 sm:$0xff]   ;;  %v1360_v58 = vld [vmem:[%s1817_s1 + $0x148] ss:$16 sps:$4 sm:$0xff]  }
  0x39   :  { %899 = vmatprep.subr.bf16.mxu1 %v1266_v59  ;;  %v1363_v59 = vld [vmem:[%s1817_s1 + $0x348] ss:$16 sps:$4 sm:$0xff]  }
  0x3b   :  { %857 = vmatpush2.bf16.msra.mxu0 %v1268_v60  ;;  %v1368_v60 = vld [vmem:[%s1817_s1 + $0x12c] ss:$16 sps:$4 sm:$0xff]  }
  0x3c   :  { %900 = vmatpush2.bf16.msra.mxu1 %v1269_v61  ;;  %858 = vmatprep.subr.bf16.mxu0 %v1270_v62  ;;  %v1371_v61 = vld [vmem:[%s1817_s1 + $0x32c] ss:$16 sps:$4 sm:$0xff]   ;;  %v1366_v62 = vld [vmem:[%s1817_s1 + $0x128] ss:$16 sps:$4 sm:$0xff]  }
  0x3d   :  { %901 = vmatprep.subr.bf16.mxu1 %v1272_v63  ;;  %v1369_v63 = vld [vmem:[%s1817_s1 + $0x328] ss:$16 sps:$4 sm:$0xff]  }
  0x3f   :  { %859 = vmatpush2.bf16.msra.mxu0 %v1274_v0  ;;  %v1374_v0 = vld [vmem:[%s1817_s1 + $0x10c] ss:$16 sps:$4 sm:$0xff]  }
  0x40   :  { %902 = vmatpush2.bf16.msra.mxu1 %v1275_v1  ;;  %914 = vmatprep.subr.bf16.mxu0 %v1284_v2  ;;  %v1377_v1 = vld [vmem:[%s1817_s1 + $0x30c] ss:$16 sps:$4 sm:$0xff]   ;;  %v1372_v2 = vld [vmem:[%s1817_s1 + $0x108] ss:$16 sps:$4 sm:$0xff]  }
  0x41   :  { %957 = vmatprep.subr.bf16.mxu1 %v1287_v3  ;;  %v1375_v3 = vld [vmem:[%s1817_s1 + $0x308] ss:$16 sps:$4 sm:$0xff]  }
  0x42   :  { %861 = vmatmul.mubr.bf16.vlgmr.msra.gmra.mxu0 %v1605_v4 }
  0x43   :  { %904 = vmatmul.mubr.bf16.vlgmr.msra.gmra.mxu1 %v1610_v5  ;;  %915 = vmatpush1.bf16.msra.mxu0 %v1282_v6  ;;  %v148_v6 = vlaneseq }
  0x44   :  { %958 = vmatpush1.bf16.msra.mxu1 %v1285_v7  ;;  %916 = vmatprep.subr.bf16.mxu0 %v1290_v8 }
  0x45   :  { %959 = vmatprep.subr.bf16.mxu1 %v1293_v9  ;;  %946 = vmatprep.mubr.bf16.mxu0 %v1278_v49  ;;  %v1353_v49 = vld [vmem:[%s1817_s1 + $0x38c] ss:$16 sps:$4 sm:$0xff]   ;;  %v149_v7 = vshrl.u32 %v148_v6, 7  ;;  %v146_v9 = vld [vmem:[%s1819_s2] sm:$0xf] }
  0x46   :  { %989 = vmatprep.mubr.bf16.mxu1 %v1281_v51  ;;  %v1351_v51 = vld [vmem:[%s1817_s1 + $0x388] ss:$16 sps:$4 sm:$0xff]  }
  0x47   :  { %917 = vmatpush1.bf16.msra.mxu0 %v1288_v10  ;;  %v158_v8 = vsub.s32 2, %v149_v7 }
  0x48   :  { %960 = vmatpush1.bf16.msra.mxu1 %v1291_v11  ;;  %918 = vmatprep.subr.bf16.mxu0 %v1296_v12  ;;  %v162_v11 = vsub.s32 3, %v149_v7 }
  0x49   :  { %961 = vmatprep.subr.bf16.mxu1 %v1299_v13  ;;  %v159_v10 = vrot.slane %v146_v9, %v158_v8  ;;  %v150_v13 = vsub.s32 0, %v149_v7 }
  0x4a   :  { %v163_v12 = vrot.slane %v146_v9, %v162_v11 }
  0x4b   :  { %919 = vmatpush1.bf16.msra.mxu0 %v1294_v14  ;;  %v154_v14 = vsub.s32 1, %v149_v7 }
  0x4c   :  { %962 = vmatpush1.bf16.msra.mxu1 %v1297_v15  ;;  %920 = vmatprep.subr.bf16.mxu0 %v1302_v16  ;;  %v151_v15 = vrot.slane %v146_v9, %v150_v13 }
  0x4d   :  { %963 = vmatprep.subr.bf16.mxu1 %v1305_v17  ;;  %v155_v16 = vrot.slane %v146_v9, %v154_v14 }
  0x4f   :  { %921 = vmatpush1.bf16.msra.mxu0 %v1300_v18 }
  0x50   :  { %964 = vmatpush1.bf16.msra.mxu1 %v1303_v19  ;;  %922 = vmatprep.subr.bf16.mxu0 %v1308_v20 }
  0x51   :  { %965 = vmatprep.subr.bf16.mxu1 %v1311_v21 }
  0x53   :  { %923 = vmatpush1.bf16.msra.mxu0 %v1306_v22 }
  0x54   :  { %966 = vmatpush1.bf16.msra.mxu1 %v1309_v23  ;;  %924 = vmatprep.subr.bf16.mxu0 %v1314_v24 }
  0x55   :  { %967 = vmatprep.subr.bf16.mxu1 %v1317_v25 }
  0x57   :  { %925 = vmatpush1.bf16.msra.mxu0 %v1312_v26 }
  0x58   :  { %968 = vmatpush1.bf16.msra.mxu1 %v1315_v27  ;;  %926 = vmatprep.subr.bf16.mxu0 %v1320_v28 }
  0x59   :  { %969 = vmatprep.subr.bf16.mxu1 %v1323_v29 }
  0x5b   :  { %927 = vmatpush1.bf16.msra.mxu0 %v1318_v30 }
  0x5c   :  { %970 = vmatpush1.bf16.msra.mxu1 %v1321_v31  ;;  %928 = vmatprep.subr.bf16.mxu0 %v1326_v32 }
  0x5d   :  { %971 = vmatprep.subr.bf16.mxu1 %v1329_v33 }
  0x5f   :  { %929 = vmatpush1.bf16.msra.mxu0 %v1324_v34 }
  0x60   :  { %972 = vmatpush1.bf16.msra.mxu1 %v1327_v35  ;;  %930 = vmatprep.subr.bf16.mxu0 %v1332_v36 }
  0x61   :  { %973 = vmatprep.subr.bf16.mxu1 %v1335_v37 }
  0x63   :  { %931 = vmatpush2.bf16.msra.mxu0 %v1330_v38 }
  0x64   :  { %974 = vmatpush2.bf16.msra.mxu1 %v1333_v39  ;;  %932 = vmatprep.subr.bf16.mxu0 %v1338_v40 }
  0x65   :  { %975 = vmatprep.subr.bf16.mxu1 %v1341_v41 }
  0x67   :  { %933 = vmatpush2.bf16.msra.mxu0 %v1336_v42 }
  0x68   :  { %976 = vmatpush2.bf16.msra.mxu1 %v1339_v43  ;;  %934 = vmatprep.subr.bf16.mxu0 %v1344_v44 }
  0x69   :  { %977 = vmatprep.subr.bf16.mxu1 %v1347_v45 }
  0x6b   :  { %935 = vmatpush2.bf16.msra.mxu0 %v1342_v46 }
  0x6c   :  { %978 = vmatpush2.bf16.msra.mxu1 %v1345_v47  ;;  %936 = vmatprep.subr.bf16.mxu0 %v1350_v48 }
  0x6d   :  { %979 = vmatprep.subr.bf16.mxu1 %v1353_v49 }
  0x6f   :  { %937 = vmatpush2.bf16.msra.mxu0 %v1348_v50 }
  0x70   :  { %980 = vmatpush2.bf16.msra.mxu1 %v1351_v51  ;;  %938 = vmatprep.subr.bf16.mxu0 %v1356_v52 }
  0x71   :  { %981 = vmatprep.subr.bf16.mxu1 %v1359_v53 }
  0x73   :  { %939 = vmatpush2.bf16.msra.mxu0 %v1354_v54 }
  0x74   :  { %982 = vmatpush2.bf16.msra.mxu1 %v1357_v55  ;;  %940 = vmatprep.subr.bf16.mxu0 %v1362_v56 }
  0x75   :  { %983 = vmatprep.subr.bf16.mxu1 %v1365_v57 }
  0x77   :  { %941 = vmatpush2.bf16.msra.mxu0 %v1360_v58 }
  0x78   :  { %984 = vmatpush2.bf16.msra.mxu1 %v1363_v59  ;;  %942 = vmatprep.subr.bf16.mxu0 %v1368_v60 }
  0x79   :  { %985 = vmatprep.subr.bf16.mxu1 %v1371_v61 }
  0x7b   :  { %943 = vmatpush2.bf16.msra.mxu0 %v1366_v62 }
  0x7c   :  { %986 = vmatpush2.bf16.msra.mxu1 %v1369_v63  ;;  %944 = vmatprep.subr.bf16.mxu0 %v1374_v0 }
  0x7d   :  { %987 = vmatprep.subr.bf16.mxu1 %v1377_v1 }
  0x7f   :  { %945 = vmatpush2.bf16.msra.mxu0 %v1372_v2 }
  0x80   :  { %988 = vmatpush2.bf16.msra.mxu1 %v1375_v3 }
  0x82   :  { %947 = vmatmul.mubr.bf16.vlgmr.msra.gmra.mxu0 %v1605_v4 }
  0x83   :  { %990 = vmatmul.mubr.bf16.vlgmr.msra.gmra.mxu1 %v1610_v5 }
 0x102   :  { %v862_v17 = vpop.f32.mrf.mxu0 }
 0x103   :  { %v905_v18 = vpop.f32.mrf.mxu1  ;;  %v863_v19 = vadd.f32 %v862_v17, %v151_v15 }
 0x104   :  { %v864_v4 = vpop.f32.mrf.mxu0 }
 0x105   :  { %v907_v20 = vpop.f32.mrf.mxu1  ;;  %v906_v5 = vadd.f32 %v905_v18, %v863_v19  ;;  %v865_v21 = vadd.f32 %v864_v4, %v155_v16 }
 0x106   :  { %v866_v22 = vpop.f32.mrf.mxu0 }
 0x107   :  { %v909_v23 = vpop.f32.mrf.mxu1  ;;  %v1000_v24 = vmax.f32 %v906_v5, 0.0  ;;  %v908_v25 = vadd.f32 %v907_v20, %v865_v21  ;;  %v867_v26 = vadd.f32 %v866_v22, %v151_v15 }
 0x108   :  { %v868_v27 = vpop.f32.mrf.mxu0 }
 0x109   :  { %v1001_v28 = vmax.f32 %v908_v25, 0.0  ;;  %v910_v29 = vadd.f32 %v909_v23, %v867_v26  ;;  %v869_v30 = vadd.f32 %v868_v27, %v155_v16  ;;  %v911_v31 = vpop.f32.mrf.mxu1 }
 0x10b   :  { %v1176_v32 = vpack.c.bf16 %v1001_v28, %v1000_v24  ;;  %v912_v33 = vadd.f32 %v911_v31, %v869_v30  ;;  %v1004_v34 = vmax.f32 %v910_v29, 0.0 }
 0x10d   :  { %1032 = vst [vmem:[%s1820_s3] sm:$0xff] %v1176_v32  ;;  %v1005_v35 = vmax.f32 %v912_v33, 0.0 }
 0x10f   :  { %v1178_v36 = vpack.c.bf16 %v1005_v35, %v1004_v34 }
 0x111   :  { %1034 = vst [vmem:[%s1820_s3 + $0x10] sm:$0xff] %v1178_v36 }
 0x142   :  { %v948_v37 = vpop.f32.mrf.mxu0 }
 0x143   :  { %v991_v38 = vpop.f32.mrf.mxu1  ;;  %v949_v39 = vadd.f32 %v948_v37, %v159_v10 }
 0x144   :  { %v950_v40 = vpop.f32.mrf.mxu0 }
 0x145   :  { %v993_v41 = vpop.f32.mrf.mxu1  ;;  %v992_v42 = vadd.f32 %v991_v38, %v949_v39  ;;  %v951_v43 = vadd.f32 %v950_v40, %v163_v12 }
 0x146   :  { %v952_v44 = vpop.f32.mrf.mxu0 }
 0x147   :  { %v995_v45 = vpop.f32.mrf.mxu1  ;;  %v994_v46 = vadd.f32 %v993_v41, %v951_v43  ;;  %v953_v47 = vadd.f32 %v952_v44, %v159_v10  ;;  %v1002_v49 = vmax.f32 %v992_v42, 0.0 }
 0x148   :  { %v954_v48 = vpop.f32.mrf.mxu0 }
 0x149   :  { %v1003_v50 = vmax.f32 %v994_v46, 0.0  ;;  %v996_v51 = vadd.f32 %v995_v45, %v953_v47  ;;  %v955_v52 = vadd.f32 %v954_v48, %v163_v12  ;;  %v997_v53 = vpop.f32.mrf.mxu1 }
 0x14b   :  { %v1177_v54 = vpack.c.bf16 %v1003_v50, %v1002_v49  ;;  %v998_v55 = vadd.f32 %v997_v53, %v955_v52  ;;  %v1006_v56 = vmax.f32 %v996_v51, 0.0 }
 0x14d   :  { %1033 = vst [vmem:[%s1820_s3 + $0x8] sm:$0xff] %v1177_v54  ;;  %v1007_v57 = vmax.f32 %v998_v55, 0.0 }
 0x14f   :  { %v1179_v58 = vpack.c.bf16 %v1007_v57, %v1006_v56 }
 0x151   :  { %1035 = vst [vmem:[%s1820_s3 + $0x18] sm:$0xff] %v1179_v58 }

// kernel: resnet_arcface_forward.41
= control target key start
LH: loop header
LB: loop body
LE: loop exit
PB: predicated region body
PF: predicated region fallthrough
CT: control target
= control target key end

     0   :  { %s646_s1 = inlined_call_operand.vmem [shape: bf16[512,128], index: 1, kind: input, shape index: {}]   ;;  %s647_s0 = inlined_call_operand.vmem [shape: bf16[16,512], index: 0, kind: input, shape index: {}]   ;;  %s648_s2 = inlined_call_operand.vmem [shape: f32[1,128], index: 2, kind: input, shape index: {}]   ;;  %s649_s3 = inlined_call_operand.vmem [shape: f32[16,128], index: 3, kind: output, shape index: {}]  }
   0x1   :  { %v471_v0 = vld [vmem:[%s646_s1 + $0x78] sm:$0xff]   ;;  %v475_v4 = vld [vmem:[%s646_s1 + $0x70] sm:$0xff]   ;;  %v479_v8 = vld [vmem:[%s646_s1 + $0x68] sm:$0xff]  }
   0x2   :  { %v472_v1 = vld [vmem:[%s646_s1 + $0xf8] sm:$0xff]   ;;  %427 = vmatprep.subr.bf16.mxu0 %v471_v0  ;;  %v476_v5 = vld [vmem:[%s646_s1 + $0xf0] sm:$0xff]   ;;  %v480_v9 = vld [vmem:[%s646_s1 + $0xe8] sm:$0xff]  }
   0x3   :  { %v473_v2 = vld [vmem:[%s646_s1 + $0x38] sm:$0xff]   ;;  %449 = vmatprep.subr.bf16.mxu1 %v472_v1  ;;  %v477_v6 = vld [vmem:[%s646_s1 + $0x30] sm:$0xff]   ;;  %v481_v10 = vld [vmem:[%s646_s1 + $0x28] sm:$0xff]  }
   0x4   :  { %v474_v3 = vld [vmem:[%s646_s1 + $0xb8] sm:$0xff]   ;;  %428 = vmatpush3.bf16.msra.mxu0 %v473_v2  ;;  %v478_v7 = vld [vmem:[%s646_s1 + $0xb0] sm:$0xff]   ;;  %v482_v11 = vld [vmem:[%s646_s1 + $0xa8] sm:$0xff]  }
   0x5   :  { %450 = vmatpush3.bf16.msra.mxu1 %v474_v3  ;;  %429 = vmatprep.subr.bf16.mxu0 %v475_v4  ;;  %v483_v12 = vld [vmem:[%s646_s1 + $0x60] sm:$0xff]   ;;  %v487_v16 = vld [vmem:[%s646_s1 + $0x58] sm:$0xff]   ;;  %v491_v20 = vld [vmem:[%s646_s1 + $0x50] sm:$0xff]  }
   0x6   :  { %451 = vmatprep.subr.bf16.mxu1 %v476_v5  ;;  %v484_v13 = vld [vmem:[%s646_s1 + $0xe0] sm:$0xff]   ;;  %v488_v17 = vld [vmem:[%s646_s1 + $0xd8] sm:$0xff]   ;;  %v492_v21 = vld [vmem:[%s646_s1 + $0xd0] sm:$0xff]  }
   0x7   :  { %v485_v14 = vld [vmem:[%s646_s1 + $0x20] sm:$0xff]   ;;  %v489_v18 = vld [vmem:[%s646_s1 + $0x18] sm:$0xff]   ;;  %v493_v22 = vld [vmem:[%s646_s1 + $0x10] sm:$0xff]  }
   0x8   :  { %430 = vmatpush3.bf16.msra.mxu0 %v477_v6  ;;  %v486_v15 = vld [vmem:[%s646_s1 + $0xa0] sm:$0xff]   ;;  %v490_v19 = vld [vmem:[%s646_s1 + $0x98] sm:$0xff]   ;;  %v494_v23 = vld [vmem:[%s646_s1 + $0x90] sm:$0xff]  }
   0x9   :  { %452 = vmatpush3.bf16.msra.mxu1 %v478_v7  ;;  %431 = vmatprep.subr.bf16.mxu0 %v479_v8  ;;  %v495_v24 = vld [vmem:[%s646_s1 + $0x48] sm:$0xff]   ;;  %v499_v28 = vld [vmem:[%s646_s1 + $0x40] sm:$0xff]  }
   0xa   :  { %453 = vmatprep.subr.bf16.mxu1 %v480_v9  ;;  %v496_v25 = vld [vmem:[%s646_s1 + $0xc8] sm:$0xff]   ;;  %v500_v29 = vld [vmem:[%s646_s1 + $0xc0] sm:$0xff]  }
   0xb   :  { %v497_v26 = vld [vmem:[%s646_s1 + $0x8] sm:$0xff]   ;;  %v501_v30 = vld [vmem:[%s646_s1] sm:$0xff]  }
   0xc   :  { %432 = vmatpush3.bf16.msra.mxu0 %v481_v10  ;;  %v498_v27 = vld [vmem:[%s646_s1 + $0x88] sm:$0xff]   ;;  %v502_v31 = vld [vmem:[%s646_s1 + $0x80] sm:$0xff]  }
   0xd   :  { %454 = vmatpush3.bf16.msra.mxu1 %v482_v11  ;;  %433 = vmatprep.subr.bf16.mxu0 %v483_v12  ;;  %v503_v32 = vld [vmem:[%s647_s0] ss:$16 sps:$4 sm:$0xff]   ;;  %v505_v33 = vld [vmem:[%s647_s0 + $0x4] ss:$16 sps:$4 sm:$0xff]   ;;  %v506_v34 = vld [vmem:[%s647_s0 + $0x8] ss:$16 sps:$4 sm:$0xff]  }
   0xe   :  { %455 = vmatprep.subr.bf16.mxu1 %v484_v13  ;;  %v508_v35 = vld [vmem:[%s647_s0 + $0xc] ss:$16 sps:$4 sm:$0xff]   ;;  %334 = vmatprep.mubr.bf16.mxu0 %v505_v33  ;;  %v390_v38 = vld [vmem:[%s648_s2] ss:$0 sm:$0xff] }
   0xf   :  { %375 = vmatprep.mubr.bf16.mxu1 %v508_v35 }
  0x10   :  { %434 = vmatpush3.bf16.msra.mxu0 %v485_v14 }
  0x11   :  { %456 = vmatpush3.bf16.msra.mxu1 %v486_v15  ;;  %435 = vmatprep.subr.bf16.mxu0 %v487_v16 }
  0x12   :  { %457 = vmatprep.subr.bf16.mxu1 %v488_v17 }
  0x14   :  { %436 = vmatpush3.bf16.msra.mxu0 %v489_v18 }
  0x15   :  { %458 = vmatpush3.bf16.msra.mxu1 %v490_v19  ;;  %437 = vmatprep.subr.bf16.mxu0 %v491_v20 }
  0x16   :  { %459 = vmatprep.subr.bf16.mxu1 %v492_v21 }
  0x18   :  { %438 = vmatpush3.bf16.msra.mxu0 %v493_v22 }
  0x19   :  { %460 = vmatpush3.bf16.msra.mxu1 %v494_v23  ;;  %439 = vmatprep.subr.bf16.mxu0 %v495_v24 }
  0x1a   :  { %461 = vmatprep.subr.bf16.mxu1 %v496_v25 }
  0x1c   :  { %440 = vmatpush3.bf16.msra.mxu0 %v497_v26 }
  0x1d   :  { %462 = vmatpush3.bf16.msra.mxu1 %v498_v27  ;;  %441 = vmatprep.subr.bf16.mxu0 %v499_v28 }
  0x1e   :  { %463 = vmatprep.subr.bf16.mxu1 %v500_v29 }
  0x20   :  { %442 = vmatpush3.bf16.msra.mxu0 %v501_v30 }
  0x21   :  { %464 = vmatpush3.bf16.msra.mxu1 %v502_v31 }
  0x23   :  { %335 = vmatmul.mubr.bf16.vlgmr.msra.gmra.mxu0 %v503_v32 }
  0x24   :  { %376 = vmatmul.mubr.bf16.vlgmr.msra.gmra.mxu1 %v506_v34 }
  0xe3   :  { %v443_v36 = vpop.f32.mrf.mxu0 }
  0xe4   :  { %v465_v37 = vpop.f32.mrf.mxu1 }
  0xe5   :  { %v444_v39 = vpop.f32.mrf.mxu0 }
  0xe6   :  { %v445_v40 = vadd.f32 %v444_v39, %v443_v36  ;;  %v466_v41 = vpop.f32.mrf.mxu1 }
  0xe7   :  { %v446_v42 = vpop.f32.mrf.mxu0  ;;  %v467_v44 = vadd.f32 %v466_v41, %v465_v37 }
  0xe8   :  { %v337_v43 = vadd.f32 %v445_v40, %v390_v38  ;;  %v468_v45 = vpop.f32.mrf.mxu1 }
  0xe9   :  { %v447_v46 = vpop.f32.mrf.mxu0 }
  0xea   :  { %v378_v47 = vadd.f32 %v467_v44, %v337_v43  ;;  %v448_v48 = vadd.f32 %v447_v46, %v446_v42  ;;  %v469_v49 = vpop.f32.mrf.mxu1 }
  0xeb   :  { %v470_v51 = vadd.f32 %v469_v49, %v468_v45 }
  0xec   :  { %384 = vst [vmem:[%s649_s3] sm:$0xff] %v378_v47  ;;  %v340_v50 = vadd.f32 %v448_v48, %v390_v38 }
  0xee   :  { %v381_v52 = vadd.f32 %v470_v51, %v340_v50 }
  0xf0   :  { %385 = vst [vmem:[%s649_s3 + $0x8] sm:$0xff] %v381_v52 }

// kernel: resnet_arcface_forward.36
= control target key start
LH: loop header
LB: loop body
LE: loop exit
PB: predicated region body
PF: predicated region fallthrough
CT: control target
= control target key end

     0   :  { %s7853_s1 = inlined_call_operand.vmem [shape: bf16[2304,512], index: 1, kind: input, shape index: {}]   ;;  %s7854_s0 = inlined_call_operand.vmem [shape: bf16[16,2304], index: 0, kind: input, shape index: {}]   ;;  %s7855_s2 = inlined_call_operand.vmem [shape: f32[1,512], index: 2, kind: input, shape index: {}]   ;;  %s7856_s3 = inlined_call_operand.vmem [shape: bf16[16,512], index: 3, kind: output, shape index: {}]  }
   0x1   :  { %v5016_v0 = vld [vmem:[%s7853_s1 + $0xe4] ss:$16 sps:$4 sm:$0xff]   ;;  %v5020_v2 = vld [vmem:[%s7853_s1 + $0xe0] ss:$16 sps:$4 sm:$0xff]  }
   0x2   :  { %v5018_v1 = vld [vmem:[%s7853_s1 + $0x2e4] ss:$16 sps:$4 sm:$0xff]   ;;  %3600 = vmatprep.subr.bf16.mxu0 %v5016_v0  ;;  %v5021_v3 = vld [vmem:[%s7853_s1 + $0x2e0] ss:$16 sps:$4 sm:$0xff]  }
   0x3   :  { %3643 = vmatprep.subr.bf16.mxu1 %v5018_v1  ;;  %v5022_v4 = vld [vmem:[%s7853_s1 + $0xc4] ss:$16 sps:$4 sm:$0xff]   ;;  %3601 = vmatpush1.bf16.msra.mxu0 %v5020_v2  ;;  %v5026_v6 = vld [vmem:[%s7853_s1 + $0xc0] ss:$16 sps:$4 sm:$0xff]  }
   0x4   :  { %3644 = vmatpush1.bf16.msra.mxu1 %v5021_v3  ;;  %v5024_v5 = vld [vmem:[%s7853_s1 + $0x2c4] ss:$16 sps:$4 sm:$0xff]   ;;  %3602 = vmatprep.subr.bf16.mxu0 %v5022_v4  ;;  %v5027_v7 = vld [vmem:[%s7853_s1 + $0x2c0] ss:$16 sps:$4 sm:$0xff]  }
   0x5   :  { %3645 = vmatprep.subr.bf16.mxu1 %v5024_v5  ;;  %v5028_v8 = vld [vmem:[%s7853_s1 + $0xa4] ss:$16 sps:$4 sm:$0xff]   ;;  %v5032_v10 = vld [vmem:[%s7853_s1 + $0xa0] ss:$16 sps:$4 sm:$0xff]  }
   0x6   :  { %v5030_v9 = vld [vmem:[%s7853_s1 + $0x2a4] ss:$16 sps:$4 sm:$0xff]   ;;  %v5033_v11 = vld [vmem:[%s7853_s1 + $0x2a0] ss:$16 sps:$4 sm:$0xff]  }
   0x7   :  { %3603 = vmatpush1.bf16.msra.mxu0 %v5026_v6  ;;  %v5034_v12 = vld [vmem:[%s7853_s1 + $0x84] ss:$16 sps:$4 sm:$0xff]   ;;  %v5038_v14 = vld [vmem:[%s7853_s1 + $0x80] ss:$16 sps:$4 sm:$0xff]  }
   0x8   :  { %3646 = vmatpush1.bf16.msra.mxu1 %v5027_v7  ;;  %3604 = vmatprep.subr.bf16.mxu0 %v5028_v8  ;;  %v5036_v13 = vld [vmem:[%s7853_s1 + $0x284] ss:$16 sps:$4 sm:$0xff]   ;;  %v5039_v15 = vld [vmem:[%s7853_s1 + $0x280] ss:$16 sps:$4 sm:$0xff]  }
   0x9   :  { %3647 = vmatprep.subr.bf16.mxu1 %v5030_v9  ;;  %v5040_v16 = vld [vmem:[%s7853_s1 + $0x64] ss:$16 sps:$4 sm:$0xff]   ;;  %v5044_v18 = vld [vmem:[%s7853_s1 + $0x60] ss:$16 sps:$4 sm:$0xff]  }
   0xa   :  { %v5042_v17 = vld [vmem:[%s7853_s1 + $0x264] ss:$16 sps:$4 sm:$0xff]   ;;  %v5045_v19 = vld [vmem:[%s7853_s1 + $0x260] ss:$16 sps:$4 sm:$0xff]  }
   0xb   :  { %3605 = vmatpush1.bf16.msra.mxu0 %v5032_v10  ;;  %v5046_v20 = vld [vmem:[%s7853_s1 + $0x44] ss:$16 sps:$4 sm:$0xff]   ;;  %v5050_v22 = vld [vmem:[%s7853_s1 + $0x40] ss:$16 sps:$4 sm:$0xff]  }
   0xc   :  { %3648 = vmatpush1.bf16.msra.mxu1 %v5033_v11  ;;  %3606 = vmatprep.subr.bf16.mxu0 %v5034_v12  ;;  %v5048_v21 = vld [vmem:[%s7853_s1 + $0x244] ss:$16 sps:$4 sm:$0xff]   ;;  %v5051_v23 = vld [vmem:[%s7853_s1 + $0x240] ss:$16 sps:$4 sm:$0xff]  }
   0xd   :  { %3649 = vmatprep.subr.bf16.mxu1 %v5036_v13  ;;  %v5052_v24 = vld [vmem:[%s7853_s1 + $0x24] ss:$16 sps:$4 sm:$0xff]   ;;  %v5056_v26 = vld [vmem:[%s7853_s1 + $0x20] ss:$16 sps:$4 sm:$0xff]  }
   0xe   :  { %v5054_v25 = vld [vmem:[%s7853_s1 + $0x224] ss:$16 sps:$4 sm:$0xff]   ;;  %v5057_v27 = vld [vmem:[%s7853_s1 + $0x220] ss:$16 sps:$4 sm:$0xff]  }
   0xf   :  { %3607 = vmatpush1.bf16.msra.mxu0 %v5038_v14  ;;  %v5058_v28 = vld [vmem:[%s7853_s1 + $0x4] ss:$16 sps:$4 sm:$0xff]   ;;  %v5062_v30 = vld [vmem:[%s7853_s1] ss:$16 sps:$4 sm:$0xff]  }
  0x10   :  { %3650 = vmatpush1.bf16.msra.mxu1 %v5039_v15  ;;  %3608 = vmatprep.subr.bf16.mxu0 %v5040_v16  ;;  %v5060_v29 = vld [vmem:[%s7853_s1 + $0x204] ss:$16 sps:$4 sm:$0xff]   ;;  %v5063_v31 = vld [vmem:[%s7853_s1 + $0x200] ss:$16 sps:$4 sm:$0xff]  }
  0x11   :  { %3651 = vmatprep.subr.bf16.mxu1 %v5042_v17  ;;  %v5064_v32 = vld [vmem:[%s7853_s1 + $0x1e4] ss:$16 sps:$4 sm:$0xff]   ;;  %v5068_v34 = vld [vmem:[%s7853_s1 + $0x1e0] ss:$16 sps:$4 sm:$0xff]  }
  0x12   :  { %v5066_v33 = vld [vmem:[%s7853_s1 + $0x3e4] ss:$16 sps:$4 sm:$0xff]   ;;  %v5069_v35 = vld [vmem:[%s7853_s1 + $0x3e0] ss:$16 sps:$4 sm:$0xff]  }
  0x13   :  { %3609 = vmatpush1.bf16.msra.mxu0 %v5044_v18  ;;  %v5070_v36 = vld [vmem:[%s7853_s1 + $0x1c4] ss:$16 sps:$4 sm:$0xff]   ;;  %v5074_v38 = vld [vmem:[%s7853_s1 + $0x1c0] ss:$16 sps:$4 sm:$0xff]  }
  0x14   :  { %3652 = vmatpush1.bf16.msra.mxu1 %v5045_v19  ;;  %3610 = vmatprep.subr.bf16.mxu0 %v5046_v20  ;;  %v5072_v37 = vld [vmem:[%s7853_s1 + $0x3c4] ss:$16 sps:$4 sm:$0xff]   ;;  %v5075_v39 = vld [vmem:[%s7853_s1 + $0x3c0] ss:$16 sps:$4 sm:$0xff]  }
  0x15   :  { %3653 = vmatprep.subr.bf16.mxu1 %v5048_v21  ;;  %v5076_v40 = vld [vmem:[%s7853_s1 + $0x1a4] ss:$16 sps:$4 sm:$0xff]   ;;  %v5080_v42 = vld [vmem:[%s7853_s1 + $0x1a0] ss:$16 sps:$4 sm:$0xff]  }
  0x16   :  { %v5078_v41 = vld [vmem:[%s7853_s1 + $0x3a4] ss:$16 sps:$4 sm:$0xff]   ;;  %v5081_v43 = vld [vmem:[%s7853_s1 + $0x3a0] ss:$16 sps:$4 sm:$0xff]  }
  0x17   :  { %3611 = vmatpush1.bf16.msra.mxu0 %v5050_v22  ;;  %v5082_v44 = vld [vmem:[%s7853_s1 + $0x184] ss:$16 sps:$4 sm:$0xff]   ;;  %v5086_v46 = vld [vmem:[%s7853_s1 + $0x180] ss:$16 sps:$4 sm:$0xff]  }
  0x18   :  { %3654 = vmatpush1.bf16.msra.mxu1 %v5051_v23  ;;  %3612 = vmatprep.subr.bf16.mxu0 %v5052_v24  ;;  %v5084_v45 = vld [vmem:[%s7853_s1 + $0x384] ss:$16 sps:$4 sm:$0xff]   ;;  %v5087_v47 = vld [vmem:[%s7853_s1 + $0x380] ss:$16 sps:$4 sm:$0xff]  }
  0x19   :  { %3655 = vmatprep.subr.bf16.mxu1 %v5054_v25  ;;  %v5088_v48 = vld [vmem:[%s7853_s1 + $0x164] ss:$16 sps:$4 sm:$0xff]   ;;  %v5092_v52 = vld [vmem:[%s7853_s1 + $0x160] ss:$16 sps:$4 sm:$0xff]  }
  0x1a   :  { %v5114_v49 = vld [vmem:[%s7854_s0 + $0x4] ss:$72 sps:$4 sm:$0xff]   ;;  %v5093_v53 = vld [vmem:[%s7853_s1 + $0x360] ss:$16 sps:$4 sm:$0xff]  }
  0x1b   :  { %3613 = vmatpush1.bf16.msra.mxu0 %v5056_v26  ;;  %v5090_v50 = vld [vmem:[%s7853_s1 + $0x364] ss:$16 sps:$4 sm:$0xff]   ;;  %3632 = vmatprep.mubr.bf16.mxu0 %v5114_v49  ;;  %v5098_v56 = vld [vmem:[%s7853_s1 + $0x140] ss:$16 sps:$4 sm:$0xff]  }
  0x1c   :  { %3656 = vmatpush1.bf16.msra.mxu1 %v5057_v27  ;;  %3614 = vmatprep.subr.bf16.mxu0 %v5058_v28  ;;  %v5117_v51 = vld [vmem:[%s7854_s0 + $0xc] ss:$72 sps:$4 sm:$0xff]   ;;  %v5099_v57 = vld [vmem:[%s7853_s1 + $0x340] ss:$16 sps:$4 sm:$0xff]  }
  0x1d   :  { %3657 = vmatprep.subr.bf16.mxu1 %v5060_v29  ;;  %3675 = vmatprep.mubr.bf16.mxu1 %v5117_v51  ;;  %v5094_v54 = vld [vmem:[%s7853_s1 + $0x144] ss:$16 sps:$4 sm:$0xff]   ;;  %v5104_v60 = vld [vmem:[%s7853_s1 + $0x120] ss:$16 sps:$4 sm:$0xff]  }
  0x1e   :  { %v5096_v55 = vld [vmem:[%s7853_s1 + $0x344] ss:$16 sps:$4 sm:$0xff]   ;;  %v5105_v61 = vld [vmem:[%s7853_s1 + $0x320] ss:$16 sps:$4 sm:$0xff]  }
  0x1f   :  { %3615 = vmatpush1.bf16.msra.mxu0 %v5062_v30  ;;  %v5100_v58 = vld [vmem:[%s7853_s1 + $0x124] ss:$16 sps:$4 sm:$0xff]   ;;  %v5110_v0 = vld [vmem:[%s7853_s1 + $0x100] ss:$16 sps:$4 sm:$0xff]  }
  0x20   :  { %3658 = vmatpush1.bf16.msra.mxu1 %v5063_v31  ;;  %3616 = vmatprep.subr.bf16.mxu0 %v5064_v32  ;;  %v5102_v59 = vld [vmem:[%s7853_s1 + $0x324] ss:$16 sps:$4 sm:$0xff]   ;;  %v5111_v1 = vld [vmem:[%s7853_s1 + $0x300] ss:$16 sps:$4 sm:$0xff]  }
  0x21   :  { %3659 = vmatprep.subr.bf16.mxu1 %v5066_v33  ;;  %v5106_v62 = vld [vmem:[%s7853_s1 + $0x104] ss:$16 sps:$4 sm:$0xff]   ;;  %v5112_v4 = vld [vmem:[%s7854_s0] ss:$72 sps:$4 sm:$0xff]  }
  0x22   :  { %v5108_v63 = vld [vmem:[%s7853_s1 + $0x304] ss:$16 sps:$4 sm:$0xff]   ;;  %v5115_v5 = vld [vmem:[%s7854_s0 + $0x8] ss:$72 sps:$4 sm:$0xff]  }
  0x23   :  { %3617 = vmatpush2.bf16.msra.mxu0 %v5068_v34  ;;  %v5120_v2 = vld [vmem:[%s7853_s1 + $0x4e4] ss:$16 sps:$4 sm:$0xff]   ;;  %v5118_v6 = vld [vmem:[%s7853_s1 + $0x4e0] ss:$16 sps:$4 sm:$0xff]  }
  0x24   :  { %3660 = vmatpush2.bf16.msra.mxu1 %v5069_v35  ;;  %3618 = vmatprep.subr.bf16.mxu0 %v5070_v36  ;;  %v5123_v3 = vld [vmem:[%s7853_s1 + $0x6e4] ss:$16 sps:$4 sm:$0xff]   ;;  %v5121_v7 = vld [vmem:[%s7853_s1 + $0x6e0] ss:$16 sps:$4 sm:$0xff]  }
  0x25   :  { %3661 = vmatprep.subr.bf16.mxu1 %v5072_v37  ;;  %v5126_v8 = vld [vmem:[%s7853_s1 + $0x4c4] ss:$16 sps:$4 sm:$0xff]   ;;  %v5124_v10 = vld [vmem:[%s7853_s1 + $0x4c0] ss:$16 sps:$4 sm:$0xff]  }
  0x26   :  { %v5129_v9 = vld [vmem:[%s7853_s1 + $0x6c4] ss:$16 sps:$4 sm:$0xff]   ;;  %v5127_v11 = vld [vmem:[%s7853_s1 + $0x6c0] ss:$16 sps:$4 sm:$0xff]  }
  0x27   :  { %3619 = vmatpush2.bf16.msra.mxu0 %v5074_v38  ;;  %v5132_v12 = vld [vmem:[%s7853_s1 + $0x4a4] ss:$16 sps:$4 sm:$0xff]   ;;  %v5130_v14 = vld [vmem:[%s7853_s1 + $0x4a0] ss:$16 sps:$4 sm:$0xff]  }
  0x28   :  { %3662 = vmatpush2.bf16.msra.mxu1 %v5075_v39  ;;  %3620 = vmatprep.subr.bf16.mxu0 %v5076_v40  ;;  %v5135_v13 = vld [vmem:[%s7853_s1 + $0x6a4] ss:$16 sps:$4 sm:$0xff]   ;;  %v5133_v15 = vld [vmem:[%s7853_s1 + $0x6a0] ss:$16 sps:$4 sm:$0xff]  }
  0x29   :  { %3663 = vmatprep.subr.bf16.mxu1 %v5078_v41  ;;  %v5138_v16 = vld [vmem:[%s7853_s1 + $0x484] ss:$16 sps:$4 sm:$0xff]   ;;  %v5136_v18 = vld [vmem:[%s7853_s1 + $0x480] ss:$16 sps:$4 sm:$0xff]  }
  0x2a   :  { %v5141_v17 = vld [vmem:[%s7853_s1 + $0x684] ss:$16 sps:$4 sm:$0xff]   ;;  %v5139_v19 = vld [vmem:[%s7853_s1 + $0x680] ss:$16 sps:$4 sm:$0xff]  }
  0x2b   :  { %3621 = vmatpush2.bf16.msra.mxu0 %v5080_v42  ;;  %v5144_v20 = vld [vmem:[%s7853_s1 + $0x464] ss:$16 sps:$4 sm:$0xff]   ;;  %v5142_v22 = vld [vmem:[%s7853_s1 + $0x460] ss:$16 sps:$4 sm:$0xff]  }
  0x2c   :  { %3664 = vmatpush2.bf16.msra.mxu1 %v5081_v43  ;;  %3622 = vmatprep.subr.bf16.mxu0 %v5082_v44  ;;  %v5147_v21 = vld [vmem:[%s7853_s1 + $0x664] ss:$16 sps:$4 sm:$0xff]   ;;  %v5145_v23 = vld [vmem:[%s7853_s1 + $0x660] ss:$16 sps:$4 sm:$0xff]  }
  0x2d   :  { %3665 = vmatprep.subr.bf16.mxu1 %v5084_v45  ;;  %v5150_v24 = vld [vmem:[%s7853_s1 + $0x444] ss:$16 sps:$4 sm:$0xff]   ;;  %v5148_v26 = vld [vmem:[%s7853_s1 + $0x440] ss:$16 sps:$4 sm:$0xff]  }
  0x2e   :  { %v5153_v25 = vld [vmem:[%s7853_s1 + $0x644] ss:$16 sps:$4 sm:$0xff]   ;;  %v5151_v27 = vld [vmem:[%s7853_s1 + $0x640] ss:$16 sps:$4 sm:$0xff]  }
  0x2f   :  { %3623 = vmatpush2.bf16.msra.mxu0 %v5086_v46  ;;  %v5156_v28 = vld [vmem:[%s7853_s1 + $0x424] ss:$16 sps:$4 sm:$0xff]   ;;  %v5154_v30 = vld [vmem:[%s7853_s1 + $0x420] ss:$16 sps:$4 sm:$0xff]  }
  0x30   :  { %3666 = vmatpush2.bf16.msra.mxu1 %v5087_v47  ;;  %3624 = vmatprep.subr.bf16.mxu0 %v5088_v48  ;;  %v5159_v29 = vld [vmem:[%s7853_s1 + $0x624] ss:$16 sps:$4 sm:$0xff]   ;;  %v5157_v31 = vld [vmem:[%s7853_s1 + $0x620] ss:$16 sps:$4 sm:$0xff]  }
  0x31   :  { %3667 = vmatprep.subr.bf16.mxu1 %v5090_v50  ;;  %v5162_v32 = vld [vmem:[%s7853_s1 + $0x404] ss:$16 sps:$4 sm:$0xff]   ;;  %v5160_v36 = vld [vmem:[%s7853_s1 + $0x400] ss:$16 sps:$4 sm:$0xff]  }
  0x32   :  { %v5165_v33 = vld [vmem:[%s7853_s1 + $0x604] ss:$16 sps:$4 sm:$0xff]   ;;  %v5163_v37 = vld [vmem:[%s7853_s1 + $0x600] ss:$16 sps:$4 sm:$0xff]  }
  0x33   :  { %3625 = vmatpush2.bf16.msra.mxu0 %v5092_v52  ;;  %v5216_v34 = vld [vmem:[%s7854_s0 + $0x14] ss:$72 sps:$4 sm:$0xff]   ;;  %v5166_v40 = vld [vmem:[%s7853_s1 + $0x5e0] ss:$16 sps:$4 sm:$0xff]  }
  0x34   :  { %3668 = vmatpush2.bf16.msra.mxu1 %v5093_v53  ;;  %3626 = vmatprep.subr.bf16.mxu0 %v5094_v54  ;;  %v5219_v35 = vld [vmem:[%s7854_s0 + $0x1c] ss:$72 sps:$4 sm:$0xff]   ;;  %v5169_v41 = vld [vmem:[%s7853_s1 + $0x7e0] ss:$16 sps:$4 sm:$0xff]  }
  0x35   :  { %3669 = vmatprep.subr.bf16.mxu1 %v5096_v55  ;;  %v5168_v38 = vld [vmem:[%s7853_s1 + $0x5e4] ss:$16 sps:$4 sm:$0xff]   ;;  %v5172_v44 = vld [vmem:[%s7853_s1 + $0x5c0] ss:$16 sps:$4 sm:$0xff]  }
  0x36   :  { %v5171_v39 = vld [vmem:[%s7853_s1 + $0x7e4] ss:$16 sps:$4 sm:$0xff]   ;;  %v5175_v45 = vld [vmem:[%s7853_s1 + $0x7c0] ss:$16 sps:$4 sm:$0xff]  }
  0x37   :  { %3627 = vmatpush2.bf16.msra.mxu0 %v5098_v56  ;;  %v5174_v42 = vld [vmem:[%s7853_s1 + $0x5c4] ss:$16 sps:$4 sm:$0xff]   ;;  %v5178_v48 = vld [vmem:[%s7853_s1 + $0x5a0] ss:$16 sps:$4 sm:$0xff]  }
  0x38   :  { %3670 = vmatpush2.bf16.msra.mxu1 %v5099_v57  ;;  %3628 = vmatprep.subr.bf16.mxu0 %v5100_v58  ;;  %v5177_v43 = vld [vmem:[%s7853_s1 + $0x7c4] ss:$16 sps:$4 sm:$0xff]   ;;  %v5181_v49 = vld [vmem:[%s7853_s1 + $0x7a0] ss:$16 sps:$4 sm:$0xff]  }
  0x39   :  { %3671 = vmatprep.subr.bf16.mxu1 %v5102_v59  ;;  %v5180_v46 = vld [vmem:[%s7853_s1 + $0x5a4] ss:$16 sps:$4 sm:$0xff]   ;;  %v5184_v52 = vld [vmem:[%s7853_s1 + $0x580] ss:$16 sps:$4 sm:$0xff]  }
  0x3a   :  { %v5183_v47 = vld [vmem:[%s7853_s1 + $0x7a4] ss:$16 sps:$4 sm:$0xff]   ;;  %v5187_v53 = vld [vmem:[%s7853_s1 + $0x780] ss:$16 sps:$4 sm:$0xff]  }
  0x3b   :  { %3629 = vmatpush2.bf16.msra.mxu0 %v5104_v60  ;;  %v5186_v50 = vld [vmem:[%s7853_s1 + $0x584] ss:$16 sps:$4 sm:$0xff]   ;;  %v5190_v56 = vld [vmem:[%s7853_s1 + $0x560] ss:$16 sps:$4 sm:$0xff]  }
  0x3c   :  { %3672 = vmatpush2.bf16.msra.mxu1 %v5105_v61  ;;  %3630 = vmatprep.subr.bf16.mxu0 %v5106_v62  ;;  %v5189_v51 = vld [vmem:[%s7853_s1 + $0x784] ss:$16 sps:$4 sm:$0xff]   ;;  %v5193_v57 = vld [vmem:[%s7853_s1 + $0x760] ss:$16 sps:$4 sm:$0xff]  }
  0x3d   :  { %3673 = vmatprep.subr.bf16.mxu1 %v5108_v63  ;;  %v5192_v54 = vld [vmem:[%s7853_s1 + $0x564] ss:$16 sps:$4 sm:$0xff]   ;;  %v5196_v60 = vld [vmem:[%s7853_s1 + $0x540] ss:$16 sps:$4 sm:$0xff]  }
  0x3e   :  { %v5195_v55 = vld [vmem:[%s7853_s1 + $0x764] ss:$16 sps:$4 sm:$0xff]   ;;  %v5199_v61 = vld [vmem:[%s7853_s1 + $0x740] ss:$16 sps:$4 sm:$0xff]  }
  0x3f   :  { %3631 = vmatpush2.bf16.msra.mxu0 %v5110_v0  ;;  %v5198_v58 = vld [vmem:[%s7853_s1 + $0x544] ss:$16 sps:$4 sm:$0xff]   ;;  %v5202_v0 = vld [vmem:[%s7853_s1 + $0x520] ss:$16 sps:$4 sm:$0xff]  }
  0x40   :  { %3674 = vmatpush2.bf16.msra.mxu1 %v5111_v1  ;;  %3686 = vmatprep.subr.bf16.mxu0 %v5120_v2  ;;  %v5201_v59 = vld [vmem:[%s7853_s1 + $0x744] ss:$16 sps:$4 sm:$0xff]   ;;  %v5205_v1 = vld [vmem:[%s7853_s1 + $0x720] ss:$16 sps:$4 sm:$0xff]  }
  0x41   :  { %3729 = vmatprep.subr.bf16.mxu1 %v5123_v3  ;;  %v5204_v62 = vld [vmem:[%s7853_s1 + $0x524] ss:$16 sps:$4 sm:$0xff]  }
  0x42   :  { %3633 = vmatmul.mubr.bf16.vlgmr.msra.gmra.mxu0 %v5112_v4  ;;  %v5207_v63 = vld [vmem:[%s7853_s1 + $0x724] ss:$16 sps:$4 sm:$0xff]   ;;  %v5208_v4 = vld [vmem:[%s7853_s1 + $0x500] ss:$16 sps:$4 sm:$0xff]  }
  0x43   :  { %3676 = vmatmul.mubr.bf16.vlgmr.msra.gmra.mxu1 %v5115_v5  ;;  %3687 = vmatpush1.bf16.msra.mxu0 %v5118_v6  ;;  %v5210_v2 = vld [vmem:[%s7853_s1 + $0x504] ss:$16 sps:$4 sm:$0xff]   ;;  %v5211_v5 = vld [vmem:[%s7853_s1 + $0x700] ss:$16 sps:$4 sm:$0xff]  }
  0x44   :  { %3730 = vmatpush1.bf16.msra.mxu1 %v5121_v7  ;;  %3688 = vmatprep.subr.bf16.mxu0 %v5126_v8  ;;  %v5213_v3 = vld [vmem:[%s7853_s1 + $0x704] ss:$16 sps:$4 sm:$0xff]   ;;  %v5214_v8 = vld [vmem:[%s7854_s0 + $0x10] ss:$72 sps:$4 sm:$0xff]  }
  0x45   :  { %3731 = vmatprep.subr.bf16.mxu1 %v5129_v9  ;;  %3718 = vmatprep.mubr.bf16.mxu0 %v5216_v34  ;;  %v5222_v6 = vld [vmem:[%s7853_s1 + $0x8e4] ss:$16 sps:$4 sm:$0xff]   ;;  %v5217_v9 = vld [vmem:[%s7854_s0 + $0x18] ss:$72 sps:$4 sm:$0xff]  }
  0x46   :  { %3761 = vmatprep.mubr.bf16.mxu1 %v5219_v35  ;;  %v5225_v7 = vld [vmem:[%s7853_s1 + $0xae4] ss:$16 sps:$4 sm:$0xff]  }
  0x47   :  { %3689 = vmatpush1.bf16.msra.mxu0 %v5124_v10  ;;  %v5220_v10 = vld [vmem:[%s7853_s1 + $0x8e0] ss:$16 sps:$4 sm:$0xff]   ;;  %v5258_v34 = vld [vmem:[%s7853_s1 + $0x824] ss:$16 sps:$4 sm:$0xff]  }
  0x48   :  { %3732 = vmatpush1.bf16.msra.mxu1 %v5127_v11  ;;  %3690 = vmatprep.subr.bf16.mxu0 %v5132_v12  ;;  %v5223_v11 = vld [vmem:[%s7853_s1 + $0xae0] ss:$16 sps:$4 sm:$0xff]   ;;  %v5228_v12 = vld [vmem:[%s7853_s1 + $0x8c4] ss:$16 sps:$4 sm:$0xff]  }
  0x49   :  { %3733 = vmatprep.subr.bf16.mxu1 %v5135_v13  ;;  %v5231_v13 = vld [vmem:[%s7853_s1 + $0xac4] ss:$16 sps:$4 sm:$0xff]  }
  0x4a   :  { %v5261_v35 = vld [vmem:[%s7853_s1 + $0xa24] ss:$16 sps:$4 sm:$0xff]  }
  0x4b   :  { %3691 = vmatpush1.bf16.msra.mxu0 %v5130_v14  ;;  %v5226_v14 = vld [vmem:[%s7853_s1 + $0x8c0] ss:$16 sps:$4 sm:$0xff]  }
  0x4c   :  { %3734 = vmatpush1.bf16.msra.mxu1 %v5133_v15  ;;  %3692 = vmatprep.subr.bf16.mxu0 %v5138_v16  ;;  %v5229_v15 = vld [vmem:[%s7853_s1 + $0xac0] ss:$16 sps:$4 sm:$0xff]   ;;  %v5234_v16 = vld [vmem:[%s7853_s1 + $0x8a4] ss:$16 sps:$4 sm:$0xff]  }
  0x4d   :  { %3735 = vmatprep.subr.bf16.mxu1 %v5141_v17  ;;  %v5237_v17 = vld [vmem:[%s7853_s1 + $0xaa4] ss:$16 sps:$4 sm:$0xff]  }
  0x4f   :  { %3693 = vmatpush1.bf16.msra.mxu0 %v5136_v18  ;;  %v5232_v18 = vld [vmem:[%s7853_s1 + $0x8a0] ss:$16 sps:$4 sm:$0xff]  }
  0x50   :  { %3736 = vmatpush1.bf16.msra.mxu1 %v5139_v19  ;;  %3694 = vmatprep.subr.bf16.mxu0 %v5144_v20  ;;  %v5318_v19 = vld [vmem:[%s7854_s0 + $0x24] ss:$72 sps:$4 sm:$0xff]   ;;  %v5235_v20 = vld [vmem:[%s7853_s1 + $0xaa0] ss:$16 sps:$4 sm:$0xff]  }
  0x51   :  { %3737 = vmatprep.subr.bf16.mxu1 %v5147_v21  ;;  %v5321_v21 = vld [vmem:[%s7854_s0 + $0x2c] ss:$72 sps:$4 sm:$0xff]  }
  0x53   :  { %3695 = vmatpush1.bf16.msra.mxu0 %v5142_v22  ;;  %v5240_v22 = vld [vmem:[%s7853_s1 + $0x884] ss:$16 sps:$4 sm:$0xff]  }
  0x54   :  { %3738 = vmatpush1.bf16.msra.mxu1 %v5145_v23  ;;  %3696 = vmatprep.subr.bf16.mxu0 %v5150_v24  ;;  %v5243_v23 = vld [vmem:[%s7853_s1 + $0xa84] ss:$16 sps:$4 sm:$0xff]   ;;  %v5238_v24 = vld [vmem:[%s7853_s1 + $0x880] ss:$16 sps:$4 sm:$0xff]  }
  0x55   :  { %3739 = vmatprep.subr.bf16.mxu1 %v5153_v25  ;;  %v5241_v25 = vld [vmem:[%s7853_s1 + $0xa80] ss:$16 sps:$4 sm:$0xff]  }
  0x57   :  { %3697 = vmatpush1.bf16.msra.mxu0 %v5148_v26  ;;  %v5246_v26 = vld [vmem:[%s7853_s1 + $0x864] ss:$16 sps:$4 sm:$0xff]  }
  0x58   :  { %3740 = vmatpush1.bf16.msra.mxu1 %v5151_v27  ;;  %3698 = vmatprep.subr.bf16.mxu0 %v5156_v28  ;;  %v5249_v27 = vld [vmem:[%s7853_s1 + $0xa64] ss:$16 sps:$4 sm:$0xff]   ;;  %v5244_v28 = vld [vmem:[%s7853_s1 + $0x860] ss:$16 sps:$4 sm:$0xff]  }
  0x59   :  { %3741 = vmatprep.subr.bf16.mxu1 %v5159_v29  ;;  %v5247_v29 = vld [vmem:[%s7853_s1 + $0xa60] ss:$16 sps:$4 sm:$0xff]  }
  0x5b   :  { %3699 = vmatpush1.bf16.msra.mxu0 %v5154_v30  ;;  %v5252_v30 = vld [vmem:[%s7853_s1 + $0x844] ss:$16 sps:$4 sm:$0xff]  }
  0x5c   :  { %3742 = vmatpush1.bf16.msra.mxu1 %v5157_v31  ;;  %3700 = vmatprep.subr.bf16.mxu0 %v5162_v32  ;;  %v5255_v31 = vld [vmem:[%s7853_s1 + $0xa44] ss:$16 sps:$4 sm:$0xff]   ;;  %v5250_v32 = vld [vmem:[%s7853_s1 + $0x840] ss:$16 sps:$4 sm:$0xff]  }
  0x5d   :  { %3743 = vmatprep.subr.bf16.mxu1 %v5165_v33  ;;  %v5253_v33 = vld [vmem:[%s7853_s1 + $0xa40] ss:$16 sps:$4 sm:$0xff]  }
  0x5f   :  { %3701 = vmatpush1.bf16.msra.mxu0 %v5160_v36  ;;  %v5256_v36 = vld [vmem:[%s7853_s1 + $0x820] ss:$16 sps:$4 sm:$0xff]  }
  0x60   :  { %3744 = vmatpush1.bf16.msra.mxu1 %v5163_v37  ;;  %3702 = vmatprep.subr.bf16.mxu0 %v5168_v38  ;;  %v5259_v37 = vld [vmem:[%s7853_s1 + $0xa20] ss:$16 sps:$4 sm:$0xff]   ;;  %v5264_v38 = vld [vmem:[%s7853_s1 + $0x804] ss:$16 sps:$4 sm:$0xff]  }
  0x61   :  { %3745 = vmatprep.subr.bf16.mxu1 %v5171_v39  ;;  %v5267_v39 = vld [vmem:[%s7853_s1 + $0xa04] ss:$16 sps:$4 sm:$0xff]  }
  0x63   :  { %3703 = vmatpush2.bf16.msra.mxu0 %v5166_v40  ;;  %v5262_v40 = vld [vmem:[%s7853_s1 + $0x800] ss:$16 sps:$4 sm:$0xff]  }
  0x64   :  { %3746 = vmatpush2.bf16.msra.mxu1 %v5169_v41  ;;  %3704 = vmatprep.subr.bf16.mxu0 %v5174_v42  ;;  %v5265_v41 = vld [vmem:[%s7853_s1 + $0xa00] ss:$16 sps:$4 sm:$0xff]   ;;  %v5270_v42 = vld [vmem:[%s7853_s1 + $0x9e4] ss:$16 sps:$4 sm:$0xff]  }
  0x65   :  { %3747 = vmatprep.subr.bf16.mxu1 %v5177_v43  ;;  %v5273_v43 = vld [vmem:[%s7853_s1 + $0xbe4] ss:$16 sps:$4 sm:$0xff]  }
  0x67   :  { %3705 = vmatpush2.bf16.msra.mxu0 %v5172_v44  ;;  %v5268_v44 = vld [vmem:[%s7853_s1 + $0x9e0] ss:$16 sps:$4 sm:$0xff]  }
  0x68   :  { %3748 = vmatpush2.bf16.msra.mxu1 %v5175_v45  ;;  %3706 = vmatprep.subr.bf16.mxu0 %v5180_v46  ;;  %v5271_v45 = vld [vmem:[%s7853_s1 + $0xbe0] ss:$16 sps:$4 sm:$0xff]   ;;  %v5276_v46 = vld [vmem:[%s7853_s1 + $0x9c4] ss:$16 sps:$4 sm:$0xff]  }
  0x69   :  { %3749 = vmatprep.subr.bf16.mxu1 %v5183_v47  ;;  %v5279_v47 = vld [vmem:[%s7853_s1 + $0xbc4] ss:$16 sps:$4 sm:$0xff]  }
  0x6b   :  { %3707 = vmatpush2.bf16.msra.mxu0 %v5178_v48  ;;  %v5274_v48 = vld [vmem:[%s7853_s1 + $0x9c0] ss:$16 sps:$4 sm:$0xff]  }
  0x6c   :  { %3750 = vmatpush2.bf16.msra.mxu1 %v5181_v49  ;;  %3708 = vmatprep.subr.bf16.mxu0 %v5186_v50  ;;  %v5277_v49 = vld [vmem:[%s7853_s1 + $0xbc0] ss:$16 sps:$4 sm:$0xff]   ;;  %v5282_v50 = vld [vmem:[%s7853_s1 + $0x9a4] ss:$16 sps:$4 sm:$0xff]  }
  0x6d   :  { %3751 = vmatprep.subr.bf16.mxu1 %v5189_v51  ;;  %v5285_v51 = vld [vmem:[%s7853_s1 + $0xba4] ss:$16 sps:$4 sm:$0xff]  }
  0x6f   :  { %3709 = vmatpush2.bf16.msra.mxu0 %v5184_v52  ;;  %v5280_v52 = vld [vmem:[%s7853_s1 + $0x9a0] ss:$16 sps:$4 sm:$0xff]  }
  0x70   :  { %3752 = vmatpush2.bf16.msra.mxu1 %v5187_v53  ;;  %3710 = vmatprep.subr.bf16.mxu0 %v5192_v54  ;;  %v5283_v53 = vld [vmem:[%s7853_s1 + $0xba0] ss:$16 sps:$4 sm:$0xff]   ;;  %v5288_v54 = vld [vmem:[%s7853_s1 + $0x984] ss:$16 sps:$4 sm:$0xff]  }
  0x71   :  { %3753 = vmatprep.subr.bf16.mxu1 %v5195_v55  ;;  %v5291_v55 = vld [vmem:[%s7853_s1 + $0xb84] ss:$16 sps:$4 sm:$0xff]  }
  0x73   :  { %3711 = vmatpush2.bf16.msra.mxu0 %v5190_v56  ;;  %v5286_v56 = vld [vmem:[%s7853_s1 + $0x980] ss:$16 sps:$4 sm:$0xff]  }
  0x74   :  { %3754 = vmatpush2.bf16.msra.mxu1 %v5193_v57  ;;  %3712 = vmatprep.subr.bf16.mxu0 %v5198_v58  ;;  %v5289_v57 = vld [vmem:[%s7853_s1 + $0xb80] ss:$16 sps:$4 sm:$0xff]   ;;  %v5294_v58 = vld [vmem:[%s7853_s1 + $0x964] ss:$16 sps:$4 sm:$0xff]  }
  0x75   :  { %3755 = vmatprep.subr.bf16.mxu1 %v5201_v59  ;;  %v5297_v59 = vld [vmem:[%s7853_s1 + $0xb64] ss:$16 sps:$4 sm:$0xff]  }
  0x77   :  { %3713 = vmatpush2.bf16.msra.mxu0 %v5196_v60  ;;  %v5292_v60 = vld [vmem:[%s7853_s1 + $0x960] ss:$16 sps:$4 sm:$0xff]  }
  0x78   :  { %3756 = vmatpush2.bf16.msra.mxu1 %v5199_v61  ;;  %3714 = vmatprep.subr.bf16.mxu0 %v5204_v62  ;;  %v5295_v61 = vld [vmem:[%s7853_s1 + $0xb60] ss:$16 sps:$4 sm:$0xff]   ;;  %v5300_v62 = vld [vmem:[%s7853_s1 + $0x944] ss:$16 sps:$4 sm:$0xff]  }
  0x79   :  { %3757 = vmatprep.subr.bf16.mxu1 %v5207_v63  ;;  %v5303_v63 = vld [vmem:[%s7853_s1 + $0xb44] ss:$16 sps:$4 sm:$0xff]  }
  0x7b   :  { %3715 = vmatpush2.bf16.msra.mxu0 %v5202_v0  ;;  %v5298_v0 = vld [vmem:[%s7853_s1 + $0x940] ss:$16 sps:$4 sm:$0xff]  }
  0x7c   :  { %3758 = vmatpush2.bf16.msra.mxu1 %v5205_v1  ;;  %3716 = vmatprep.subr.bf16.mxu0 %v5210_v2  ;;  %v5301_v1 = vld [vmem:[%s7853_s1 + $0xb40] ss:$16 sps:$4 sm:$0xff]   ;;  %v5306_v2 = vld [vmem:[%s7853_s1 + $0x924] ss:$16 sps:$4 sm:$0xff]  }
  0x7d   :  { %3759 = vmatprep.subr.bf16.mxu1 %v5213_v3  ;;  %v5309_v3 = vld [vmem:[%s7853_s1 + $0xb24] ss:$16 sps:$4 sm:$0xff]  }
  0x7f   :  { %3717 = vmatpush2.bf16.msra.mxu0 %v5208_v4  ;;  %v5304_v4 = vld [vmem:[%s7853_s1 + $0x920] ss:$16 sps:$4 sm:$0xff]  }
  0x80   :  { %3760 = vmatpush2.bf16.msra.mxu1 %v5211_v5  ;;  %3772 = vmatprep.subr.bf16.mxu0 %v5222_v6  ;;  %v5307_v5 = vld [vmem:[%s7853_s1 + $0xb20] ss:$16 sps:$4 sm:$0xff]   ;;  %v5312_v6 = vld [vmem:[%s7853_s1 + $0x904] ss:$16 sps:$4 sm:$0xff]  }
  0x81   :  { %3815 = vmatprep.subr.bf16.mxu1 %v5225_v7  ;;  %v5315_v7 = vld [vmem:[%s7853_s1 + $0xb04] ss:$16 sps:$4 sm:$0xff]  }
  0x82   :  { %3719 = vmatmul.mubr.bf16.vlgmr.msra.gmra.mxu0 %v5214_v8  ;;  %v5310_v8 = vld [vmem:[%s7853_s1 + $0x900] ss:$16 sps:$4 sm:$0xff]  }
  0x83   :  { %3762 = vmatmul.mubr.bf16.vlgmr.msra.gmra.mxu1 %v5217_v9  ;;  %3773 = vmatpush1.bf16.msra.mxu0 %v5220_v10  ;;  %v5313_v9 = vld [vmem:[%s7853_s1 + $0xb00] ss:$16 sps:$4 sm:$0xff]   ;;  %v5324_v10 = vld [vmem:[%s7853_s1 + $0xce4] ss:$16 sps:$4 sm:$0xff]  }
  0x84   :  { %3816 = vmatpush1.bf16.msra.mxu1 %v5223_v11  ;;  %3774 = vmatprep.subr.bf16.mxu0 %v5228_v12  ;;  %v5327_v11 = vld [vmem:[%s7853_s1 + $0xee4] ss:$16 sps:$4 sm:$0xff]   ;;  %v5316_v12 = vld [vmem:[%s7854_s0 + $0x20] ss:$72 sps:$4 sm:$0xff]  }
  0x85   :  { %3817 = vmatprep.subr.bf16.mxu1 %v5231_v13  ;;  %3804 = vmatprep.mubr.bf16.mxu0 %v5318_v19  ;;  %v5319_v13 = vld [vmem:[%s7854_s0 + $0x28] ss:$72 sps:$4 sm:$0xff]   ;;  %v5423_v19 = vld [vmem:[%s7854_s0 + $0x3c] ss:$72 sps:$4 sm:$0xff]  }
  0x86   :  { %3847 = vmatprep.mubr.bf16.mxu1 %v5321_v21  ;;  %v5331_v21 = vld [vmem:[%s7853_s1 + $0xec0] ss:$16 sps:$4 sm:$0xff]  }
  0x87   :  { %3775 = vmatpush1.bf16.msra.mxu0 %v5226_v14  ;;  %v5322_v14 = vld [vmem:[%s7853_s1 + $0xce0] ss:$16 sps:$4 sm:$0xff]  }
  0x88   :  { %3818 = vmatpush1.bf16.msra.mxu1 %v5229_v15  ;;  %3776 = vmatprep.subr.bf16.mxu0 %v5234_v16  ;;  %v5325_v15 = vld [vmem:[%s7853_s1 + $0xee0] ss:$16 sps:$4 sm:$0xff]   ;;  %v5330_v16 = vld [vmem:[%s7853_s1 + $0xcc4] ss:$16 sps:$4 sm:$0xff]  }
  0x89   :  { %3819 = vmatprep.subr.bf16.mxu1 %v5237_v17  ;;  %v5333_v17 = vld [vmem:[%s7853_s1 + $0xec4] ss:$16 sps:$4 sm:$0xff]  }
  0x8b   :  { %3777 = vmatpush1.bf16.msra.mxu0 %v5232_v18  ;;  %v5420_v18 = vld [vmem:[%s7854_s0 + $0x34] ss:$72 sps:$4 sm:$0xff]  }
  0x8c   :  { %3820 = vmatpush1.bf16.msra.mxu1 %v5235_v20  ;;  %3778 = vmatprep.subr.bf16.mxu0 %v5240_v22  ;;  %v5328_v20 = vld [vmem:[%s7853_s1 + $0xcc0] ss:$16 sps:$4 sm:$0xff]   ;;  %v5336_v22 = vld [vmem:[%s7853_s1 + $0xca4] ss:$16 sps:$4 sm:$0xff]  }
  0x8d   :  { %3821 = vmatprep.subr.bf16.mxu1 %v5243_v23  ;;  %v5339_v23 = vld [vmem:[%s7853_s1 + $0xea4] ss:$16 sps:$4 sm:$0xff]  }
  0x8f   :  { %3779 = vmatpush1.bf16.msra.mxu0 %v5238_v24  ;;  %v5334_v24 = vld [vmem:[%s7853_s1 + $0xca0] ss:$16 sps:$4 sm:$0xff]  }
  0x90   :  { %3822 = vmatpush1.bf16.msra.mxu1 %v5241_v25  ;;  %3780 = vmatprep.subr.bf16.mxu0 %v5246_v26  ;;  %v5337_v25 = vld [vmem:[%s7853_s1 + $0xea0] ss:$16 sps:$4 sm:$0xff]   ;;  %v5342_v26 = vld [vmem:[%s7853_s1 + $0xc84] ss:$16 sps:$4 sm:$0xff]  }
  0x91   :  { %3823 = vmatprep.subr.bf16.mxu1 %v5249_v27  ;;  %v5345_v27 = vld [vmem:[%s7853_s1 + $0xe84] ss:$16 sps:$4 sm:$0xff]  }
  0x93   :  { %3781 = vmatpush1.bf16.msra.mxu0 %v5244_v28  ;;  %v5340_v28 = vld [vmem:[%s7853_s1 + $0xc80] ss:$16 sps:$4 sm:$0xff]  }
  0x94   :  { %3824 = vmatpush1.bf16.msra.mxu1 %v5247_v29  ;;  %3782 = vmatprep.subr.bf16.mxu0 %v5252_v30  ;;  %v5343_v29 = vld [vmem:[%s7853_s1 + $0xe80] ss:$16 sps:$4 sm:$0xff]   ;;  %v5348_v30 = vld [vmem:[%s7853_s1 + $0xc64] ss:$16 sps:$4 sm:$0xff]  }
  0x95   :  { %3825 = vmatprep.subr.bf16.mxu1 %v5255_v31  ;;  %v5351_v31 = vld [vmem:[%s7853_s1 + $0xe64] ss:$16 sps:$4 sm:$0xff]  }
  0x97   :  { %3783 = vmatpush1.bf16.msra.mxu0 %v5250_v32  ;;  %v5346_v32 = vld [vmem:[%s7853_s1 + $0xc60] ss:$16 sps:$4 sm:$0xff]  }
  0x98   :  { %3826 = vmatpush1.bf16.msra.mxu1 %v5253_v33  ;;  %3784 = vmatprep.subr.bf16.mxu0 %v5258_v34  ;;  %v5349_v33 = vld [vmem:[%s7853_s1 + $0xe60] ss:$16 sps:$4 sm:$0xff]   ;;  %v5354_v34 = vld [vmem:[%s7853_s1 + $0xc44] ss:$16 sps:$4 sm:$0xff]  }
  0x99   :  { %3827 = vmatprep.subr.bf16.mxu1 %v5261_v35  ;;  %v5357_v35 = vld [vmem:[%s7853_s1 + $0xe44] ss:$16 sps:$4 sm:$0xff]  }
  0x9b   :  { %3785 = vmatpush1.bf16.msra.mxu0 %v5256_v36  ;;  %v5352_v36 = vld [vmem:[%s7853_s1 + $0xc40] ss:$16 sps:$4 sm:$0xff]  }
  0x9c   :  { %3828 = vmatpush1.bf16.msra.mxu1 %v5259_v37  ;;  %3786 = vmatprep.subr.bf16.mxu0 %v5264_v38  ;;  %v5355_v37 = vld [vmem:[%s7853_s1 + $0xe40] ss:$16 sps:$4 sm:$0xff]   ;;  %v5360_v38 = vld [vmem:[%s7853_s1 + $0xc24] ss:$16 sps:$4 sm:$0xff]  }
  0x9d   :  { %3829 = vmatprep.subr.bf16.mxu1 %v5267_v39  ;;  %v5363_v39 = vld [vmem:[%s7853_s1 + $0xe24] ss:$16 sps:$4 sm:$0xff]  }
  0x9f   :  { %3787 = vmatpush1.bf16.msra.mxu0 %v5262_v40  ;;  %v5358_v40 = vld [vmem:[%s7853_s1 + $0xc20] ss:$16 sps:$4 sm:$0xff]  }
  0xa0   :  { %3830 = vmatpush1.bf16.msra.mxu1 %v5265_v41  ;;  %3788 = vmatprep.subr.bf16.mxu0 %v5270_v42  ;;  %v5361_v41 = vld [vmem:[%s7853_s1 + $0xe20] ss:$16 sps:$4 sm:$0xff]   ;;  %v5366_v42 = vld [vmem:[%s7853_s1 + $0xc04] ss:$16 sps:$4 sm:$0xff]  }
  0xa1   :  { %3831 = vmatprep.subr.bf16.mxu1 %v5273_v43  ;;  %v5369_v43 = vld [vmem:[%s7853_s1 + $0xe04] ss:$16 sps:$4 sm:$0xff]  }
  0xa3   :  { %3789 = vmatpush2.bf16.msra.mxu0 %v5268_v44  ;;  %v5364_v44 = vld [vmem:[%s7853_s1 + $0xc00] ss:$16 sps:$4 sm:$0xff]  }
  0xa4   :  { %3832 = vmatpush2.bf16.msra.mxu1 %v5271_v45  ;;  %3790 = vmatprep.subr.bf16.mxu0 %v5276_v46  ;;  %v5367_v45 = vld [vmem:[%s7853_s1 + $0xe00] ss:$16 sps:$4 sm:$0xff]   ;;  %v5372_v46 = vld [vmem:[%s7853_s1 + $0xde4] ss:$16 sps:$4 sm:$0xff]  }
  0xa5   :  { %3833 = vmatprep.subr.bf16.mxu1 %v5279_v47  ;;  %v5375_v47 = vld [vmem:[%s7853_s1 + $0xfe4] ss:$16 sps:$4 sm:$0xff]  }
  0xa7   :  { %3791 = vmatpush2.bf16.msra.mxu0 %v5274_v48  ;;  %v5370_v48 = vld [vmem:[%s7853_s1 + $0xde0] ss:$16 sps:$4 sm:$0xff]  }
  0xa8   :  { %3834 = vmatpush2.bf16.msra.mxu1 %v5277_v49  ;;  %3792 = vmatprep.subr.bf16.mxu0 %v5282_v50  ;;  %v5373_v49 = vld [vmem:[%s7853_s1 + $0xfe0] ss:$16 sps:$4 sm:$0xff]   ;;  %v5378_v50 = vld [vmem:[%s7853_s1 + $0xdc4] ss:$16 sps:$4 sm:$0xff]  }
  0xa9   :  { %3835 = vmatprep.subr.bf16.mxu1 %v5285_v51  ;;  %v5381_v51 = vld [vmem:[%s7853_s1 + $0xfc4] ss:$16 sps:$4 sm:$0xff]  }
  0xab   :  { %3793 = vmatpush2.bf16.msra.mxu0 %v5280_v52  ;;  %v5376_v52 = vld [vmem:[%s7853_s1 + $0xdc0] ss:$16 sps:$4 sm:$0xff]  }
  0xac   :  { %3836 = vmatpush2.bf16.msra.mxu1 %v5283_v53  ;;  %3794 = vmatprep.subr.bf16.mxu0 %v5288_v54  ;;  %v5379_v53 = vld [vmem:[%s7853_s1 + $0xfc0] ss:$16 sps:$4 sm:$0xff]   ;;  %v5384_v54 = vld [vmem:[%s7853_s1 + $0xda4] ss:$16 sps:$4 sm:$0xff]  }
  0xad   :  { %3837 = vmatprep.subr.bf16.mxu1 %v5291_v55  ;;  %v5387_v55 = vld [vmem:[%s7853_s1 + $0xfa4] ss:$16 sps:$4 sm:$0xff]  }
  0xaf   :  { %3795 = vmatpush2.bf16.msra.mxu0 %v5286_v56  ;;  %v5382_v56 = vld [vmem:[%s7853_s1 + $0xda0] ss:$16 sps:$4 sm:$0xff]  }
  0xb0   :  { %3838 = vmatpush2.bf16.msra.mxu1 %v5289_v57  ;;  %3796 = vmatprep.subr.bf16.mxu0 %v5294_v58  ;;  %v5385_v57 = vld [vmem:[%s7853_s1 + $0xfa0] ss:$16 sps:$4 sm:$0xff]   ;;  %v5390_v58 = vld [vmem:[%s7853_s1 + $0xd84] ss:$16 sps:$4 sm:$0xff]  }
  0xb1   :  { %3839 = vmatprep.subr.bf16.mxu1 %v5297_v59  ;;  %v5393_v59 = vld [vmem:[%s7853_s1 + $0xf84] ss:$16 sps:$4 sm:$0xff]  }
  0xb3   :  { %3797 = vmatpush2.bf16.msra.mxu0 %v5292_v60  ;;  %v5388_v60 = vld [vmem:[%s7853_s1 + $0xd80] ss:$16 sps:$4 sm:$0xff]  }
  0xb4   :  { %3840 = vmatpush2.bf16.msra.mxu1 %v5295_v61  ;;  %3798 = vmatprep.subr.bf16.mxu0 %v5300_v62  ;;  %v5391_v61 = vld [vmem:[%s7853_s1 + $0xf80] ss:$16 sps:$4 sm:$0xff]   ;;  %v5396_v62 = vld [vmem:[%s7853_s1 + $0xd64] ss:$16 sps:$4 sm:$0xff]  }
  0xb5   :  { %3841 = vmatprep.subr.bf16.mxu1 %v5303_v63  ;;  %v5399_v63 = vld [vmem:[%s7853_s1 + $0xf64] ss:$16 sps:$4 sm:$0xff]  }
  0xb7   :  { %3799 = vmatpush2.bf16.msra.mxu0 %v5298_v0  ;;  %v5394_v0 = vld [vmem:[%s7853_s1 + $0xd60] ss:$16 sps:$4 sm:$0xff]  }
  0xb8   :  { %3842 = vmatpush2.bf16.msra.mxu1 %v5301_v1  ;;  %3800 = vmatprep.subr.bf16.mxu0 %v5306_v2  ;;  %v5397_v1 = vld [vmem:[%s7853_s1 + $0xf60] ss:$16 sps:$4 sm:$0xff]   ;;  %v5402_v2 = vld [vmem:[%s7853_s1 + $0xd44] ss:$16 sps:$4 sm:$0xff]  }
  0xb9   :  { %3843 = vmatprep.subr.bf16.mxu1 %v5309_v3  ;;  %v5405_v3 = vld [vmem:[%s7853_s1 + $0xf44] ss:$16 sps:$4 sm:$0xff]  }
  0xbb   :  { %3801 = vmatpush2.bf16.msra.mxu0 %v5304_v4  ;;  %v5400_v4 = vld [vmem:[%s7853_s1 + $0xd40] ss:$16 sps:$4 sm:$0xff]  }
  0xbc   :  { %3844 = vmatpush2.bf16.msra.mxu1 %v5307_v5  ;;  %3802 = vmatprep.subr.bf16.mxu0 %v5312_v6  ;;  %v5403_v5 = vld [vmem:[%s7853_s1 + $0xf40] ss:$16 sps:$4 sm:$0xff]   ;;  %v5408_v6 = vld [vmem:[%s7853_s1 + $0xd24] ss:$16 sps:$4 sm:$0xff]  }
  0xbd   :  { %3845 = vmatprep.subr.bf16.mxu1 %v5315_v7  ;;  %v5411_v7 = vld [vmem:[%s7853_s1 + $0xf24] ss:$16 sps:$4 sm:$0xff]  }
  0xbf   :  { %3803 = vmatpush2.bf16.msra.mxu0 %v5310_v8  ;;  %v5406_v8 = vld [vmem:[%s7853_s1 + $0xd20] ss:$16 sps:$4 sm:$0xff]  }
  0xc0   :  { %3846 = vmatpush2.bf16.msra.mxu1 %v5313_v9  ;;  %3858 = vmatprep.subr.bf16.mxu0 %v5324_v10  ;;  %v5409_v9 = vld [vmem:[%s7853_s1 + $0xf20] ss:$16 sps:$4 sm:$0xff]   ;;  %v5414_v10 = vld [vmem:[%s7853_s1 + $0xd04] ss:$16 sps:$4 sm:$0xff]  }
  0xc1   :  { %3901 = vmatprep.subr.bf16.mxu1 %v5327_v11  ;;  %v5417_v11 = vld [vmem:[%s7853_s1 + $0xf04] ss:$16 sps:$4 sm:$0xff]  }
  0xc2   :  { %3805 = vmatmul.mubr.bf16.vlgmr.msra.gmra.mxu0 %v5316_v12  ;;  %v5412_v12 = vld [vmem:[%s7853_s1 + $0xd00] ss:$16 sps:$4 sm:$0xff]  }
  0xc3   :  { %3848 = vmatmul.mubr.bf16.vlgmr.msra.gmra.mxu1 %v5319_v13  ;;  %3859 = vmatpush1.bf16.msra.mxu0 %v5322_v14  ;;  %v5415_v13 = vld [vmem:[%s7853_s1 + $0xf00] ss:$16 sps:$4 sm:$0xff]   ;;  %v5426_v14 = vld [vmem:[%s7853_s1 + $0x10e4] ss:$16 sps:$4 sm:$0xff]  }
  0xc4   :  { %3902 = vmatpush1.bf16.msra.mxu1 %v5325_v15  ;;  %3860 = vmatprep.subr.bf16.mxu0 %v5330_v16  ;;  %v5429_v15 = vld [vmem:[%s7853_s1 + $0xec] ss:$16 sps:$4 sm:$0xff]   ;;  %v5418_v16 = vld [vmem:[%s7854_s0 + $0x30] ss:$72 sps:$4 sm:$0xff]  }
  0xc5   :  { %3903 = vmatprep.subr.bf16.mxu1 %v5333_v17  ;;  %3890 = vmatprep.mubr.bf16.mxu0 %v5420_v18  ;;  %v5421_v17 = vld [vmem:[%s7854_s0 + $0x38] ss:$72 sps:$4 sm:$0xff]  }
  0xc6   :  { %3933 = vmatprep.mubr.bf16.mxu1 %v5423_v19  ;;  %v5424_v18 = vld [vmem:[%s7853_s1 + $0x10e0] ss:$16 sps:$4 sm:$0xff]   ;;  %v5427_v19 = vld [vmem:[%s7853_s1 + $0xe8] ss:$16 sps:$4 sm:$0xff]  }
  0xc7   :  { %3861 = vmatpush1.bf16.msra.mxu0 %v5328_v20  ;;  %v5432_v20 = vld [vmem:[%s7853_s1 + $0x10c4] ss:$16 sps:$4 sm:$0xff]  }
  0xc8   :  { %3904 = vmatpush1.bf16.msra.mxu1 %v5331_v21  ;;  %3862 = vmatprep.subr.bf16.mxu0 %v5336_v22  ;;  %v5435_v21 = vld [vmem:[%s7853_s1 + $0xcc] ss:$16 sps:$4 sm:$0xff]  }
  0xc9   :  { %3905 = vmatprep.subr.bf16.mxu1 %v5339_v23  ;;  %v5522_v22 = vld [vmem:[%s7854_s0 + $0x44] ss:$72 sps:$4 sm:$0xff]   ;;  %v5430_v23 = vld [vmem:[%s7853_s1 + $0x10c0] ss:$16 sps:$4 sm:$0xff]  }
  0xcb   :  { %3863 = vmatpush1.bf16.msra.mxu0 %v5334_v24  ;;  %v5433_v24 = vld [vmem:[%s7853_s1 + $0xc8] ss:$16 sps:$4 sm:$0xff]  }
  0xcc   :  { %3906 = vmatpush1.bf16.msra.mxu1 %v5337_v25  ;;  %3864 = vmatprep.subr.bf16.mxu0 %v5342_v26  ;;  %v5438_v25 = vld [vmem:[%s7853_s1 + $0x10a4] ss:$16 sps:$4 sm:$0xff]   ;;  %v5441_v26 = vld [vmem:[%s7853_s1 + $0xac] ss:$16 sps:$4 sm:$0xff]  }
  0xcd   :  { %3907 = vmatprep.subr.bf16.mxu1 %v5345_v27  ;;  %v5907_v27 = vld [vmem:[%s7854_s0 + $0x4] ss:$72 sps:$4 sm:$0xff]  }
  0xcf   :  { %3865 = vmatpush1.bf16.msra.mxu0 %v5340_v28  ;;  %v5436_v28 = vld [vmem:[%s7853_s1 + $0x10a0] ss:$16 sps:$4 sm:$0xff]  }
  0xd0   :  { %3908 = vmatpush1.bf16.msra.mxu1 %v5343_v29  ;;  %3866 = vmatprep.subr.bf16.mxu0 %v5348_v30  ;;  %v5439_v29 = vld [vmem:[%s7853_s1 + $0xa8] ss:$16 sps:$4 sm:$0xff]   ;;  %v5444_v30 = vld [vmem:[%s7853_s1 + $0x1084] ss:$16 sps:$4 sm:$0xff]  }
  0xd1   :  { %3909 = vmatprep.subr.bf16.mxu1 %v5351_v31  ;;  %v5447_v31 = vld [vmem:[%s7853_s1 + $0x8c] ss:$16 sps:$4 sm:$0xff]  }
  0xd3   :  { %3867 = vmatpush1.bf16.msra.mxu0 %v5346_v32  ;;  %v5442_v32 = vld [vmem:[%s7853_s1 + $0x1080] ss:$16 sps:$4 sm:$0xff]  }
  0xd4   :  { %3910 = vmatpush1.bf16.msra.mxu1 %v5349_v33  ;;  %3868 = vmatprep.subr.bf16.mxu0 %v5354_v34  ;;  %v5445_v33 = vld [vmem:[%s7853_s1 + $0x88] ss:$16 sps:$4 sm:$0xff]   ;;  %v5450_v34 = vld [vmem:[%s7853_s1 + $0x1064] ss:$16 sps:$4 sm:$0xff]  }
  0xd5   :  { %3911 = vmatprep.subr.bf16.mxu1 %v5357_v35  ;;  %v5453_v35 = vld [vmem:[%s7853_s1 + $0x6c] ss:$16 sps:$4 sm:$0xff]  }
  0xd7   :  { %3869 = vmatpush1.bf16.msra.mxu0 %v5352_v36  ;;  %v5448_v36 = vld [vmem:[%s7853_s1 + $0x1060] ss:$16 sps:$4 sm:$0xff]  }
  0xd8   :  { %3912 = vmatpush1.bf16.msra.mxu1 %v5355_v37  ;;  %3870 = vmatprep.subr.bf16.mxu0 %v5360_v38  ;;  %v5451_v37 = vld [vmem:[%s7853_s1 + $0x68] ss:$16 sps:$4 sm:$0xff]   ;;  %v5456_v38 = vld [vmem:[%s7853_s1 + $0x1044] ss:$16 sps:$4 sm:$0xff]  }
  0xd9   :  { %3913 = vmatprep.subr.bf16.mxu1 %v5363_v39  ;;  %v5459_v39 = vld [vmem:[%s7853_s1 + $0x4c] ss:$16 sps:$4 sm:$0xff]  }
  0xdb   :  { %3871 = vmatpush1.bf16.msra.mxu0 %v5358_v40  ;;  %v5454_v40 = vld [vmem:[%s7853_s1 + $0x1040] ss:$16 sps:$4 sm:$0xff]  }
  0xdc   :  { %3914 = vmatpush1.bf16.msra.mxu1 %v5361_v41  ;;  %3872 = vmatprep.subr.bf16.mxu0 %v5366_v42  ;;  %v5457_v41 = vld [vmem:[%s7853_s1 + $0x48] ss:$16 sps:$4 sm:$0xff]   ;;  %v5462_v42 = vld [vmem:[%s7853_s1 + $0x1024] ss:$16 sps:$4 sm:$0xff]  }
  0xdd   :  { %3915 = vmatprep.subr.bf16.mxu1 %v5369_v43  ;;  %v5465_v43 = vld [vmem:[%s7853_s1 + $0x2c] ss:$16 sps:$4 sm:$0xff]  }
  0xdf   :  { %3873 = vmatpush1.bf16.msra.mxu0 %v5364_v44  ;;  %v5460_v44 = vld [vmem:[%s7853_s1 + $0x1020] ss:$16 sps:$4 sm:$0xff]  }
  0xe0   :  { %3916 = vmatpush1.bf16.msra.mxu1 %v5367_v45  ;;  %3874 = vmatprep.subr.bf16.mxu0 %v5372_v46  ;;  %v5463_v45 = vld [vmem:[%s7853_s1 + $0x28] ss:$16 sps:$4 sm:$0xff]   ;;  %v5468_v46 = vld [vmem:[%s7853_s1 + $0x1004] ss:$16 sps:$4 sm:$0xff]  }
  0xe1   :  { %3917 = vmatprep.subr.bf16.mxu1 %v5375_v47  ;;  %v5471_v47 = vld [vmem:[%s7853_s1 + $0xc] ss:$16 sps:$4 sm:$0xff]  }
  0xe3   :  { %3875 = vmatpush2.bf16.msra.mxu0 %v5370_v48  ;;  %v5466_v48 = vld [vmem:[%s7853_s1 + $0x1000] ss:$16 sps:$4 sm:$0xff]  }
  0xe4   :  { %3918 = vmatpush2.bf16.msra.mxu1 %v5373_v49  ;;  %3876 = vmatprep.subr.bf16.mxu0 %v5378_v50  ;;  %v5469_v49 = vld [vmem:[%s7853_s1 + $0x8] ss:$16 sps:$4 sm:$0xff]   ;;  %v5474_v50 = vld [vmem:[%s7853_s1 + $0x11e4] ss:$16 sps:$4 sm:$0xff]  }
  0xe5   :  { %3919 = vmatprep.subr.bf16.mxu1 %v5381_v51  ;;  %v5477_v51 = vld [vmem:[%s7853_s1 + $0x1ec] ss:$16 sps:$4 sm:$0xff]  }
  0xe7   :  { %3877 = vmatpush2.bf16.msra.mxu0 %v5376_v52  ;;  %v5472_v52 = vld [vmem:[%s7853_s1 + $0x11e0] ss:$16 sps:$4 sm:$0xff]  }
  0xe8   :  { %3920 = vmatpush2.bf16.msra.mxu1 %v5379_v53  ;;  %3878 = vmatprep.subr.bf16.mxu0 %v5384_v54  ;;  %v5475_v53 = vld [vmem:[%s7853_s1 + $0x1e8] ss:$16 sps:$4 sm:$0xff]   ;;  %v5480_v54 = vld [vmem:[%s7853_s1 + $0x11c4] ss:$16 sps:$4 sm:$0xff]  }
  0xe9   :  { %3921 = vmatprep.subr.bf16.mxu1 %v5387_v55  ;;  %v5483_v55 = vld [vmem:[%s7853_s1 + $0x1cc] ss:$16 sps:$4 sm:$0xff]  }
  0xeb   :  { %3879 = vmatpush2.bf16.msra.mxu0 %v5382_v56  ;;  %v5478_v56 = vld [vmem:[%s7853_s1 + $0x11c0] ss:$16 sps:$4 sm:$0xff]  }
  0xec   :  { %3922 = vmatpush2.bf16.msra.mxu1 %v5385_v57  ;;  %3880 = vmatprep.subr.bf16.mxu0 %v5390_v58  ;;  %v5481_v57 = vld [vmem:[%s7853_s1 + $0x1c8] ss:$16 sps:$4 sm:$0xff]   ;;  %v5486_v58 = vld [vmem:[%s7853_s1 + $0x11a4] ss:$16 sps:$4 sm:$0xff]  }
  0xed   :  { %3923 = vmatprep.subr.bf16.mxu1 %v5393_v59  ;;  %v5489_v59 = vld [vmem:[%s7853_s1 + $0x1ac] ss:$16 sps:$4 sm:$0xff]  }
  0xef   :  { %3881 = vmatpush2.bf16.msra.mxu0 %v5388_v60  ;;  %v5484_v60 = vld [vmem:[%s7853_s1 + $0x11a0] ss:$16 sps:$4 sm:$0xff]  }
  0xf0   :  { %3924 = vmatpush2.bf16.msra.mxu1 %v5391_v61  ;;  %3882 = vmatprep.subr.bf16.mxu0 %v5396_v62  ;;  %v5487_v61 = vld [vmem:[%s7853_s1 + $0x1a8] ss:$16 sps:$4 sm:$0xff]   ;;  %v5492_v62 = vld [vmem:[%s7853_s1 + $0x1184] ss:$16 sps:$4 sm:$0xff]  }
  0xf1   :  { %3925 = vmatprep.subr.bf16.mxu1 %v5399_v63  ;;  %v5495_v63 = vld [vmem:[%s7853_s1 + $0x18c] ss:$16 sps:$4 sm:$0xff]  }
  0xf3   :  { %3883 = vmatpush2.bf16.msra.mxu0 %v5394_v0  ;;  %v5490_v0 = vld [vmem:[%s7853_s1 + $0x1180] ss:$16 sps:$4 sm:$0xff]  }
  0xf4   :  { %3926 = vmatpush2.bf16.msra.mxu1 %v5397_v1  ;;  %3884 = vmatprep.subr.bf16.mxu0 %v5402_v2  ;;  %v5493_v1 = vld [vmem:[%s7853_s1 + $0x188] ss:$16 sps:$4 sm:$0xff]   ;;  %v5498_v2 = vld [vmem:[%s7853_s1 + $0x1164] ss:$16 sps:$4 sm:$0xff]  }
  0xf5   :  { %3927 = vmatprep.subr.bf16.mxu1 %v5405_v3  ;;  %v5501_v3 = vld [vmem:[%s7853_s1 + $0x16c] ss:$16 sps:$4 sm:$0xff]  }
  0xf7   :  { %3885 = vmatpush2.bf16.msra.mxu0 %v5400_v4  ;;  %v5496_v4 = vld [vmem:[%s7853_s1 + $0x1160] ss:$16 sps:$4 sm:$0xff]  }
  0xf8   :  { %3928 = vmatpush2.bf16.msra.mxu1 %v5403_v5  ;;  %3886 = vmatprep.subr.bf16.mxu0 %v5408_v6  ;;  %v5499_v5 = vld [vmem:[%s7853_s1 + $0x168] ss:$16 sps:$4 sm:$0xff]   ;;  %v5504_v6 = vld [vmem:[%s7853_s1 + $0x1144] ss:$16 sps:$4 sm:$0xff]  }
  0xf9   :  { %3929 = vmatprep.subr.bf16.mxu1 %v5411_v7  ;;  %v5507_v7 = vld [vmem:[%s7853_s1 + $0x14c] ss:$16 sps:$4 sm:$0xff]  }
  0xfb   :  { %3887 = vmatpush2.bf16.msra.mxu0 %v5406_v8  ;;  %v5502_v8 = vld [vmem:[%s7853_s1 + $0x1140] ss:$16 sps:$4 sm:$0xff]  }
  0xfc   :  { %3930 = vmatpush2.bf16.msra.mxu1 %v5409_v9  ;;  %3888 = vmatprep.subr.bf16.mxu0 %v5414_v10  ;;  %v5505_v9 = vld [vmem:[%s7853_s1 + $0x148] ss:$16 sps:$4 sm:$0xff]   ;;  %v5510_v10 = vld [vmem:[%s7853_s1 + $0x1124] ss:$16 sps:$4 sm:$0xff]  }
  0xfd   :  { %3931 = vmatprep.subr.bf16.mxu1 %v5417_v11  ;;  %v5513_v11 = vld [vmem:[%s7853_s1 + $0x12c] ss:$16 sps:$4 sm:$0xff]  }
  0xff   :  { %3889 = vmatpush2.bf16.msra.mxu0 %v5412_v12  ;;  %v5508_v12 = vld [vmem:[%s7853_s1 + $0x1120] ss:$16 sps:$4 sm:$0xff]  }
 0x100   :  { %3932 = vmatpush2.bf16.msra.mxu1 %v5415_v13  ;;  %3944 = vmatprep.subr.bf16.mxu0 %v5426_v14  ;;  %v5511_v13 = vld [vmem:[%s7853_s1 + $0x128] ss:$16 sps:$4 sm:$0xff]   ;;  %v5516_v14 = vld [vmem:[%s7853_s1 + $0x1104] ss:$16 sps:$4 sm:$0xff]  }
 0x101   :  { %3987 = vmatprep.subr.bf16.mxu1 %v5429_v15  ;;  %v5519_v15 = vld [vmem:[%s7853_s1 + $0x10c] ss:$16 sps:$4 sm:$0xff]  }
 0x102   :  { %3891 = vmatmul.mubr.bf16.vlgmr.msra.gmra.mxu0 %v5418_v16  ;;  %v5514_v16 = vld [vmem:[%s7853_s1 + $0x1100] ss:$16 sps:$4 sm:$0xff]  }
 0x103   :  { %3934 = vmatmul.mubr.bf16.vlgmr.msra.gmra.mxu1 %v5421_v17  ;;  %3945 = vmatpush1.bf16.msra.mxu0 %v5424_v18  ;;  %v5517_v17 = vld [vmem:[%s7853_s1 + $0x108] ss:$16 sps:$4 sm:$0xff]  }
 0x104   :  { %3988 = vmatpush1.bf16.msra.mxu1 %v5427_v19  ;;  %3946 = vmatprep.subr.bf16.mxu0 %v5432_v20  ;;  %v5520_v18 = vld [vmem:[%s7854_s0 + $0x40] ss:$72 sps:$4 sm:$0xff]   ;;  %v5525_v19 = vld [vmem:[%s7853_s1 + $0x2ec] ss:$16 sps:$4 sm:$0xff]  }
 0x105   :  { %3989 = vmatprep.subr.bf16.mxu1 %v5435_v21  ;;  %3976 = vmatprep.mubr.bf16.mxu0 %v5522_v22  ;;  %v5528_v20 = vld [vmem:[%s7853_s1 + $0x4ec] ss:$16 sps:$4 sm:$0xff]   ;;  %v5523_v21 = vld [vmem:[%s7853_s1 + $0x2e8] ss:$16 sps:$4 sm:$0xff]  }
 0x106   :  { %4019 = vmatprep.mubr.bf16.mxu1 %v5907_v27  ;;  %v5526_v22 = vld [vmem:[%s7853_s1 + $0x4e8] ss:$16 sps:$4 sm:$0xff]  }
 0x107   :  { %3947 = vmatpush1.bf16.msra.mxu0 %v5430_v23  ;;  %v5531_v23 = vld [vmem:[%s7853_s1 + $0x2cc] ss:$16 sps:$4 sm:$0xff]   ;;  %v5908_v27 = vld [vmem:[%s7854_s0] ss:$72 sps:$4 sm:$0xff]  }
 0x108   :  { %3990 = vmatpush1.bf16.msra.mxu1 %v5433_v24  ;;  %3948 = vmatprep.subr.bf16.mxu0 %v5438_v25  ;;  %v5534_v24 = vld [vmem:[%s7853_s1 + $0x4cc] ss:$16 sps:$4 sm:$0xff]   ;;  %v5529_v25 = vld [vmem:[%s7853_s1 + $0x2c8] ss:$16 sps:$4 sm:$0xff]  }
 0x109   :  { %3991 = vmatprep.subr.bf16.mxu1 %v5441_v26  ;;  %v5532_v26 = vld [vmem:[%s7853_s1 + $0x4c8] ss:$16 sps:$4 sm:$0xff]  }
 0x10b   :  { %3949 = vmatpush1.bf16.msra.mxu0 %v5436_v28  ;;  %v5537_v28 = vld [vmem:[%s7853_s1 + $0x2ac] ss:$16 sps:$4 sm:$0xff]  }
 0x10c   :  { %3992 = vmatpush1.bf16.msra.mxu1 %v5439_v29  ;;  %3950 = vmatprep.subr.bf16.mxu0 %v5444_v30  ;;  %v5540_v29 = vld [vmem:[%s7853_s1 + $0x4ac] ss:$16 sps:$4 sm:$0xff]   ;;  %v5535_v30 = vld [vmem:[%s7853_s1 + $0x2a8] ss:$16 sps:$4 sm:$0xff]  }
 0x10d   :  { %3993 = vmatprep.subr.bf16.mxu1 %v5447_v31  ;;  %v5538_v31 = vld [vmem:[%s7853_s1 + $0x4a8] ss:$16 sps:$4 sm:$0xff]  }
 0x10f   :  { %3951 = vmatpush1.bf16.msra.mxu0 %v5442_v32  ;;  %v5909_v32 = vld [vmem:[%s7854_s0 + $0xc] ss:$72 sps:$4 sm:$0xff]  }
 0x110   :  { %3994 = vmatpush1.bf16.msra.mxu1 %v5445_v33  ;;  %3952 = vmatprep.subr.bf16.mxu0 %v5450_v34  ;;  %v5910_v33 = vld [vmem:[%s7854_s0 + $0x14] ss:$72 sps:$4 sm:$0xff]  }
 0x111   :  { %3995 = vmatprep.subr.bf16.mxu1 %v5453_v35  ;;  %v5543_v34 = vld [vmem:[%s7853_s1 + $0x28c] ss:$16 sps:$4 sm:$0xff]  }
 0x112   :  { %v5546_v35 = vld [vmem:[%s7853_s1 + $0x48c] ss:$16 sps:$4 sm:$0xff]  }
 0x113   :  { %3953 = vmatpush1.bf16.msra.mxu0 %v5448_v36  ;;  %v5541_v36 = vld [vmem:[%s7853_s1 + $0x288] ss:$16 sps:$4 sm:$0xff]  }
 0x114   :  { %3996 = vmatpush1.bf16.msra.mxu1 %v5451_v37  ;;  %3954 = vmatprep.subr.bf16.mxu0 %v5456_v38  ;;  %v5544_v37 = vld [vmem:[%s7853_s1 + $0x488] ss:$16 sps:$4 sm:$0xff]   ;;  %v5549_v38 = vld [vmem:[%s7853_s1 + $0x26c] ss:$16 sps:$4 sm:$0xff]  }
 0x115   :  { %3997 = vmatprep.subr.bf16.mxu1 %v5459_v39  ;;  %v5552_v39 = vld [vmem:[%s7853_s1 + $0x46c] ss:$16 sps:$4 sm:$0xff]  }
 0x117   :  { %3955 = vmatpush1.bf16.msra.mxu0 %v5454_v40  ;;  %v5547_v40 = vld [vmem:[%s7853_s1 + $0x268] ss:$16 sps:$4 sm:$0xff]  }
 0x118   :  { %3998 = vmatpush1.bf16.msra.mxu1 %v5457_v41  ;;  %3956 = vmatprep.subr.bf16.mxu0 %v5462_v42  ;;  %v5550_v41 = vld [vmem:[%s7853_s1 + $0x468] ss:$16 sps:$4 sm:$0xff]   ;;  %v5555_v42 = vld [vmem:[%s7853_s1 + $0x24c] ss:$16 sps:$4 sm:$0xff]  }
 0x119   :  { %3999 = vmatprep.subr.bf16.mxu1 %v5465_v43  ;;  %v5558_v43 = vld [vmem:[%s7853_s1 + $0x44c] ss:$16 sps:$4 sm:$0xff]  }
 0x11b   :  { %3957 = vmatpush1.bf16.msra.mxu0 %v5460_v44  ;;  %v5553_v44 = vld [vmem:[%s7853_s1 + $0x248] ss:$16 sps:$4 sm:$0xff]  }
 0x11c   :  { %4000 = vmatpush1.bf16.msra.mxu1 %v5463_v45  ;;  %3958 = vmatprep.subr.bf16.mxu0 %v5468_v46  ;;  %v5556_v45 = vld [vmem:[%s7853_s1 + $0x448] ss:$16 sps:$4 sm:$0xff]   ;;  %v5561_v46 = vld [vmem:[%s7853_s1 + $0x22c] ss:$16 sps:$4 sm:$0xff]  }
 0x11d   :  { %4001 = vmatprep.subr.bf16.mxu1 %v5471_v47  ;;  %v5564_v47 = vld [vmem:[%s7853_s1 + $0x42c] ss:$16 sps:$4 sm:$0xff]  }
 0x11f   :  { %3959 = vmatpush1.bf16.msra.mxu0 %v5466_v48  ;;  %v5559_v48 = vld [vmem:[%s7853_s1 + $0x228] ss:$16 sps:$4 sm:$0xff]  }
 0x120   :  { %4002 = vmatpush1.bf16.msra.mxu1 %v5469_v49  ;;  %3960 = vmatprep.subr.bf16.mxu0 %v5474_v50  ;;  %v5562_v49 = vld [vmem:[%s7853_s1 + $0x428] ss:$16 sps:$4 sm:$0xff]   ;;  %v5567_v50 = vld [vmem:[%s7853_s1 + $0x20c] ss:$16 sps:$4 sm:$0xff]  }
 0x121   :  { %4003 = vmatprep.subr.bf16.mxu1 %v5477_v51  ;;  %v5570_v51 = vld [vmem:[%s7853_s1 + $0x40c] ss:$16 sps:$4 sm:$0xff]  }
 0x123   :  { %3961 = vmatpush2.bf16.msra.mxu0 %v5472_v52  ;;  %v5565_v52 = vld [vmem:[%s7853_s1 + $0x208] ss:$16 sps:$4 sm:$0xff]  }
 0x124   :  { %4004 = vmatpush2.bf16.msra.mxu1 %v5475_v53  ;;  %3962 = vmatprep.subr.bf16.mxu0 %v5480_v54  ;;  %v5568_v53 = vld [vmem:[%s7853_s1 + $0x408] ss:$16 sps:$4 sm:$0xff]   ;;  %v5573_v54 = vld [vmem:[%s7853_s1 + $0x3ec] ss:$16 sps:$4 sm:$0xff]  }
 0x125   :  { %4005 = vmatprep.subr.bf16.mxu1 %v5483_v55  ;;  %v5576_v55 = vld [vmem:[%s7853_s1 + $0x5ec] ss:$16 sps:$4 sm:$0xff]  }
 0x127   :  { %3963 = vmatpush2.bf16.msra.mxu0 %v5478_v56  ;;  %v5571_v56 = vld [vmem:[%s7853_s1 + $0x3e8] ss:$16 sps:$4 sm:$0xff]  }
 0x128   :  { %4006 = vmatpush2.bf16.msra.mxu1 %v5481_v57  ;;  %3964 = vmatprep.subr.bf16.mxu0 %v5486_v58  ;;  %v5574_v57 = vld [vmem:[%s7853_s1 + $0x5e8] ss:$16 sps:$4 sm:$0xff]   ;;  %v5579_v58 = vld [vmem:[%s7853_s1 + $0x3cc] ss:$16 sps:$4 sm:$0xff]  }
 0x129   :  { %4007 = vmatprep.subr.bf16.mxu1 %v5489_v59  ;;  %v5582_v59 = vld [vmem:[%s7853_s1 + $0x5cc] ss:$16 sps:$4 sm:$0xff]  }
 0x12b   :  { %3965 = vmatpush2.bf16.msra.mxu0 %v5484_v60  ;;  %v5577_v60 = vld [vmem:[%s7853_s1 + $0x3c8] ss:$16 sps:$4 sm:$0xff]  }
 0x12c   :  { %4008 = vmatpush2.bf16.msra.mxu1 %v5487_v61  ;;  %3966 = vmatprep.subr.bf16.mxu0 %v5492_v62  ;;  %v5580_v61 = vld [vmem:[%s7853_s1 + $0x5c8] ss:$16 sps:$4 sm:$0xff]   ;;  %v5585_v62 = vld [vmem:[%s7853_s1 + $0x3ac] ss:$16 sps:$4 sm:$0xff]  }
 0x12d   :  { %4009 = vmatprep.subr.bf16.mxu1 %v5495_v63  ;;  %v5588_v63 = vld [vmem:[%s7853_s1 + $0x5ac] ss:$16 sps:$4 sm:$0xff]  }
 0x12f   :  { %3967 = vmatpush2.bf16.msra.mxu0 %v5490_v0  ;;  %v5583_v0 = vld [vmem:[%s7853_s1 + $0x3a8] ss:$16 sps:$4 sm:$0xff]  }
 0x130   :  { %4010 = vmatpush2.bf16.msra.mxu1 %v5493_v1  ;;  %3968 = vmatprep.subr.bf16.mxu0 %v5498_v2  ;;  %v5586_v1 = vld [vmem:[%s7853_s1 + $0x5a8] ss:$16 sps:$4 sm:$0xff]   ;;  %v5591_v2 = vld [vmem:[%s7853_s1 + $0x38c] ss:$16 sps:$4 sm:$0xff]  }
 0x131   :  { %4011 = vmatprep.subr.bf16.mxu1 %v5501_v3  ;;  %v5594_v3 = vld [vmem:[%s7853_s1 + $0x58c] ss:$16 sps:$4 sm:$0xff]  }
 0x133   :  { %3969 = vmatpush2.bf16.msra.mxu0 %v5496_v4  ;;  %v5589_v4 = vld [vmem:[%s7853_s1 + $0x388] ss:$16 sps:$4 sm:$0xff]  }
 0x134   :  { %4012 = vmatpush2.bf16.msra.mxu1 %v5499_v5  ;;  %3970 = vmatprep.subr.bf16.mxu0 %v5504_v6  ;;  %v5592_v5 = vld [vmem:[%s7853_s1 + $0x588] ss:$16 sps:$4 sm:$0xff]   ;;  %v5597_v6 = vld [vmem:[%s7853_s1 + $0x36c] ss:$16 sps:$4 sm:$0xff]  }
 0x135   :  { %4013 = vmatprep.subr.bf16.mxu1 %v5507_v7  ;;  %v5600_v7 = vld [vmem:[%s7853_s1 + $0x56c] ss:$16 sps:$4 sm:$0xff]  }
 0x137   :  { %3971 = vmatpush2.bf16.msra.mxu0 %v5502_v8  ;;  %v5595_v8 = vld [vmem:[%s7853_s1 + $0x368] ss:$16 sps:$4 sm:$0xff]  }
 0x138   :  { %4014 = vmatpush2.bf16.msra.mxu1 %v5505_v9  ;;  %3972 = vmatprep.subr.bf16.mxu0 %v5510_v10  ;;  %v5598_v9 = vld [vmem:[%s7853_s1 + $0x568] ss:$16 sps:$4 sm:$0xff]   ;;  %v5603_v10 = vld [vmem:[%s7853_s1 + $0x34c] ss:$16 sps:$4 sm:$0xff]  }
 0x139   :  { %4015 = vmatprep.subr.bf16.mxu1 %v5513_v11  ;;  %v5606_v11 = vld [vmem:[%s7853_s1 + $0x54c] ss:$16 sps:$4 sm:$0xff]  }
 0x13b   :  { %3973 = vmatpush2.bf16.msra.mxu0 %v5508_v12  ;;  %v5601_v12 = vld [vmem:[%s7853_s1 + $0x348] ss:$16 sps:$4 sm:$0xff]  }
 0x13c   :  { %4016 = vmatpush2.bf16.msra.mxu1 %v5511_v13  ;;  %3974 = vmatprep.subr.bf16.mxu0 %v5516_v14  ;;  %v5604_v13 = vld [vmem:[%s7853_s1 + $0x548] ss:$16 sps:$4 sm:$0xff]   ;;  %v5609_v14 = vld [vmem:[%s7853_s1 + $0x32c] ss:$16 sps:$4 sm:$0xff]  }
 0x13d   :  { %4017 = vmatprep.subr.bf16.mxu1 %v5519_v15  ;;  %v5612_v15 = vld [vmem:[%s7853_s1 + $0x52c] ss:$16 sps:$4 sm:$0xff]  }
 0x13f   :  { %3975 = vmatpush2.bf16.msra.mxu0 %v5514_v16  ;;  %v5607_v16 = vld [vmem:[%s7853_s1 + $0x328] ss:$16 sps:$4 sm:$0xff]  }
 0x140   :  { %4018 = vmatpush2.bf16.msra.mxu1 %v5517_v17  ;;  %4030 = vmatprep.subr.bf16.mxu0 %v5525_v19  ;;  %v5610_v17 = vld [vmem:[%s7853_s1 + $0x528] ss:$16 sps:$4 sm:$0xff]   ;;  %v5618_v19 = vld [vmem:[%s7853_s1 + $0x50c] ss:$16 sps:$4 sm:$0xff]  }
 0x141   :  { %4073 = vmatprep.subr.bf16.mxu1 %v5528_v20  ;;  %v5613_v20 = vld [vmem:[%s7853_s1 + $0x308] ss:$16 sps:$4 sm:$0xff]  }
 0x142   :  { %3977 = vmatmul.mubr.bf16.vlgmr.msra.gmra.mxu0 %v5520_v18  ;;  %v5615_v18 = vld [vmem:[%s7853_s1 + $0x30c] ss:$16 sps:$4 sm:$0xff]  }
 0x143   :  { %4020 = vmatmul.mubr.bf16.vlgmr.msra.gmra.mxu1 %v5908_v27  ;;  %4031 = vmatpush1.bf16.msra.mxu0 %v5523_v21  ;;  %v5616_v21 = vld [vmem:[%s7853_s1 + $0x508] ss:$16 sps:$4 sm:$0xff]   ;;  %v5630_v27 = vld [vmem:[%s7853_s1 + $0x8cc] ss:$16 sps:$4 sm:$0xff]  }
 0x144   :  { %4074 = vmatpush1.bf16.msra.mxu1 %v5526_v22  ;;  %4032 = vmatprep.subr.bf16.mxu0 %v5531_v23  ;;  %v5621_v22 = vld [vmem:[%s7853_s1 + $0x6ec] ss:$16 sps:$4 sm:$0xff]  }
 0x145   :  { %4075 = vmatprep.subr.bf16.mxu1 %v5534_v24  ;;  %4062 = vmatprep.mubr.bf16.mxu0 %v5909_v32  ;;  %v5624_v23 = vld [vmem:[%s7853_s1 + $0x8ec] ss:$16 sps:$4 sm:$0xff]   ;;  %v5619_v24 = vld [vmem:[%s7853_s1 + $0x6e8] ss:$16 sps:$4 sm:$0xff]  }
 0x146   :  { %4105 = vmatprep.mubr.bf16.mxu1 %v5910_v33  ;;  %v5633_v32 = vld [vmem:[%s7853_s1 + $0x6ac] ss:$16 sps:$4 sm:$0xff]  }
 0x147   :  { %4033 = vmatpush1.bf16.msra.mxu0 %v5529_v25  ;;  %v5622_v25 = vld [vmem:[%s7853_s1 + $0x8e8] ss:$16 sps:$4 sm:$0xff]   ;;  %v5636_v33 = vld [vmem:[%s7853_s1 + $0x8ac] ss:$16 sps:$4 sm:$0xff]  }
 0x148   :  { %4076 = vmatpush1.bf16.msra.mxu1 %v5532_v26  ;;  %4034 = vmatprep.subr.bf16.mxu0 %v5537_v28  ;;  %v5627_v26 = vld [vmem:[%s7853_s1 + $0x6cc] ss:$16 sps:$4 sm:$0xff]   ;;  %v5911_v28 = vld [vmem:[%s7854_s0 + $0x8] ss:$72 sps:$4 sm:$0xff]  }
 0x149   :  { %4077 = vmatprep.subr.bf16.mxu1 %v5540_v29  ;;  %v5912_v29 = vld [vmem:[%s7854_s0 + $0x10] ss:$72 sps:$4 sm:$0xff]  }
 0x14b   :  { %4035 = vmatpush1.bf16.msra.mxu0 %v5535_v30  ;;  %v5625_v30 = vld [vmem:[%s7853_s1 + $0x6c8] ss:$16 sps:$4 sm:$0xff]  }
 0x14c   :  { %4078 = vmatpush1.bf16.msra.mxu1 %v5538_v31  ;;  %4036 = vmatprep.subr.bf16.mxu0 %v5543_v34  ;;  %v5628_v31 = vld [vmem:[%s7853_s1 + $0x8c8] ss:$16 sps:$4 sm:$0xff]   ;;  %v5913_v34 = vld [vmem:[%s7854_s0 + $0x1c] ss:$72 sps:$4 sm:$0xff]  }
 0x14d   :  { %4079 = vmatprep.subr.bf16.mxu1 %v5546_v35  ;;  %v5914_v35 = vld [vmem:[%s7854_s0 + $0x24] ss:$72 sps:$4 sm:$0xff]  }
 0x14f   :  { %4037 = vmatpush1.bf16.msra.mxu0 %v5541_v36  ;;  %v5631_v36 = vld [vmem:[%s7853_s1 + $0x6a8] ss:$16 sps:$4 sm:$0xff]  }
 0x150   :  { %4080 = vmatpush1.bf16.msra.mxu1 %v5544_v37  ;;  %4038 = vmatprep.subr.bf16.mxu0 %v5549_v38  ;;  %v5634_v37 = vld [vmem:[%s7853_s1 + $0x8a8] ss:$16 sps:$4 sm:$0xff]   ;;  %v5639_v38 = vld [vmem:[%s7853_s1 + $0x68c] ss:$16 sps:$4 sm:$0xff]  }
 0x151   :  { %4081 = vmatprep.subr.bf16.mxu1 %v5552_v39  ;;  %v5642_v39 = vld [vmem:[%s7853_s1 + $0x88c] ss:$16 sps:$4 sm:$0xff]  }
 0x153   :  { %4039 = vmatpush1.bf16.msra.mxu0 %v5547_v40  ;;  %v5637_v40 = vld [vmem:[%s7853_s1 + $0x688] ss:$16 sps:$4 sm:$0xff]  }
 0x154   :  { %4082 = vmatpush1.bf16.msra.mxu1 %v5550_v41  ;;  %4040 = vmatprep.subr.bf16.mxu0 %v5555_v42  ;;  %v5640_v41 = vld [vmem:[%s7853_s1 + $0x888] ss:$16 sps:$4 sm:$0xff]   ;;  %v5645_v42 = vld [vmem:[%s7853_s1 + $0x66c] ss:$16 sps:$4 sm:$0xff]  }
 0x155   :  { %4083 = vmatprep.subr.bf16.mxu1 %v5558_v43  ;;  %v5648_v43 = vld [vmem:[%s7853_s1 + $0x86c] ss:$16 sps:$4 sm:$0xff]  }
 0x157   :  { %4041 = vmatpush1.bf16.msra.mxu0 %v5553_v44  ;;  %v5643_v44 = vld [vmem:[%s7853_s1 + $0x668] ss:$16 sps:$4 sm:$0xff]  }
 0x158   :  { %4084 = vmatpush1.bf16.msra.mxu1 %v5556_v45  ;;  %4042 = vmatprep.subr.bf16.mxu0 %v5561_v46  ;;  %v5646_v45 = vld [vmem:[%s7853_s1 + $0x868] ss:$16 sps:$4 sm:$0xff]   ;;  %v5651_v46 = vld [vmem:[%s7853_s1 + $0x64c] ss:$16 sps:$4 sm:$0xff]  }
 0x159   :  { %4085 = vmatprep.subr.bf16.mxu1 %v5564_v47  ;;  %v5654_v47 = vld [vmem:[%s7853_s1 + $0x84c] ss:$16 sps:$4 sm:$0xff]  }
 0x15b   :  { %4043 = vmatpush1.bf16.msra.mxu0 %v5559_v48  ;;  %v5649_v48 = vld [vmem:[%s7853_s1 + $0x648] ss:$16 sps:$4 sm:$0xff]  }
 0x15c   :  { %4086 = vmatpush1.bf16.msra.mxu1 %v5562_v49  ;;  %4044 = vmatprep.subr.bf16.mxu0 %v5567_v50  ;;  %v5652_v49 = vld [vmem:[%s7853_s1 + $0x848] ss:$16 sps:$4 sm:$0xff]   ;;  %v5657_v50 = vld [vmem:[%s7853_s1 + $0x62c] ss:$16 sps:$4 sm:$0xff]  }
 0x15d   :  { %4087 = vmatprep.subr.bf16.mxu1 %v5570_v51  ;;  %v5660_v51 = vld [vmem:[%s7853_s1 + $0x82c] ss:$16 sps:$4 sm:$0xff]  }
 0x15f   :  { %4045 = vmatpush1.bf16.msra.mxu0 %v5565_v52  ;;  %v5655_v52 = vld [vmem:[%s7853_s1 + $0x628] ss:$16 sps:$4 sm:$0xff]  }
 0x160   :  { %4088 = vmatpush1.bf16.msra.mxu1 %v5568_v53  ;;  %4046 = vmatprep.subr.bf16.mxu0 %v5573_v54  ;;  %v5658_v53 = vld [vmem:[%s7853_s1 + $0x828] ss:$16 sps:$4 sm:$0xff]   ;;  %v5663_v54 = vld [vmem:[%s7853_s1 + $0x60c] ss:$16 sps:$4 sm:$0xff]  }
 0x161   :  { %4089 = vmatprep.subr.bf16.mxu1 %v5576_v55  ;;  %v5666_v55 = vld [vmem:[%s7853_s1 + $0x80c] ss:$16 sps:$4 sm:$0xff]  }
 0x163   :  { %4047 = vmatpush2.bf16.msra.mxu0 %v5571_v56  ;;  %v5661_v56 = vld [vmem:[%s7853_s1 + $0x608] ss:$16 sps:$4 sm:$0xff]  }
 0x164   :  { %4090 = vmatpush2.bf16.msra.mxu1 %v5574_v57  ;;  %4048 = vmatprep.subr.bf16.mxu0 %v5579_v58  ;;  %v5664_v57 = vld [vmem:[%s7853_s1 + $0x808] ss:$16 sps:$4 sm:$0xff]   ;;  %v5669_v58 = vld [vmem:[%s7853_s1 + $0x7ec] ss:$16 sps:$4 sm:$0xff]  }
 0x165   :  { %4091 = vmatprep.subr.bf16.mxu1 %v5582_v59  ;;  %v5672_v59 = vld [vmem:[%s7853_s1 + $0x9ec] ss:$16 sps:$4 sm:$0xff]  }
 0x167   :  { %4049 = vmatpush2.bf16.msra.mxu0 %v5577_v60  ;;  %v5667_v60 = vld [vmem:[%s7853_s1 + $0x7e8] ss:$16 sps:$4 sm:$0xff]  }
 0x168   :  { %4092 = vmatpush2.bf16.msra.mxu1 %v5580_v61  ;;  %4050 = vmatprep.subr.bf16.mxu0 %v5585_v62  ;;  %v5670_v61 = vld [vmem:[%s7853_s1 + $0x9e8] ss:$16 sps:$4 sm:$0xff]   ;;  %v5675_v62 = vld [vmem:[%s7853_s1 + $0x7cc] ss:$16 sps:$4 sm:$0xff]  }
 0x169   :  { %4093 = vmatprep.subr.bf16.mxu1 %v5588_v63  ;;  %v5678_v63 = vld [vmem:[%s7853_s1 + $0x9cc] ss:$16 sps:$4 sm:$0xff]  }
 0x16b   :  { %4051 = vmatpush2.bf16.msra.mxu0 %v5583_v0  ;;  %v5673_v0 = vld [vmem:[%s7853_s1 + $0x7c8] ss:$16 sps:$4 sm:$0xff]  }
 0x16c   :  { %4094 = vmatpush2.bf16.msra.mxu1 %v5586_v1  ;;  %4052 = vmatprep.subr.bf16.mxu0 %v5591_v2  ;;  %v5676_v1 = vld [vmem:[%s7853_s1 + $0x9c8] ss:$16 sps:$4 sm:$0xff]   ;;  %v5681_v2 = vld [vmem:[%s7853_s1 + $0x7ac] ss:$16 sps:$4 sm:$0xff]  }
 0x16d   :  { %4095 = vmatprep.subr.bf16.mxu1 %v5594_v3  ;;  %v5684_v3 = vld [vmem:[%s7853_s1 + $0x9ac] ss:$16 sps:$4 sm:$0xff]  }
 0x16f   :  { %4053 = vmatpush2.bf16.msra.mxu0 %v5589_v4  ;;  %v5679_v4 = vld [vmem:[%s7853_s1 + $0x7a8] ss:$16 sps:$4 sm:$0xff]  }
 0x170   :  { %4096 = vmatpush2.bf16.msra.mxu1 %v5592_v5  ;;  %4054 = vmatprep.subr.bf16.mxu0 %v5597_v6  ;;  %v5682_v5 = vld [vmem:[%s7853_s1 + $0x9a8] ss:$16 sps:$4 sm:$0xff]   ;;  %v5687_v6 = vld [vmem:[%s7853_s1 + $0x78c] ss:$16 sps:$4 sm:$0xff]  }
 0x171   :  { %4097 = vmatprep.subr.bf16.mxu1 %v5600_v7  ;;  %v5690_v7 = vld [vmem:[%s7853_s1 + $0x98c] ss:$16 sps:$4 sm:$0xff]  }
 0x173   :  { %4055 = vmatpush2.bf16.msra.mxu0 %v5595_v8  ;;  %v5685_v8 = vld [vmem:[%s7853_s1 + $0x788] ss:$16 sps:$4 sm:$0xff]  }
 0x174   :  { %4098 = vmatpush2.bf16.msra.mxu1 %v5598_v9  ;;  %4056 = vmatprep.subr.bf16.mxu0 %v5603_v10  ;;  %v5688_v9 = vld [vmem:[%s7853_s1 + $0x988] ss:$16 sps:$4 sm:$0xff]   ;;  %v5693_v10 = vld [vmem:[%s7853_s1 + $0x76c] ss:$16 sps:$4 sm:$0xff]  }
 0x175   :  { %4099 = vmatprep.subr.bf16.mxu1 %v5606_v11  ;;  %v5696_v11 = vld [vmem:[%s7853_s1 + $0x96c] ss:$16 sps:$4 sm:$0xff]  }
 0x177   :  { %4057 = vmatpush2.bf16.msra.mxu0 %v5601_v12  ;;  %v5691_v12 = vld [vmem:[%s7853_s1 + $0x768] ss:$16 sps:$4 sm:$0xff]  }
 0x178   :  { %4100 = vmatpush2.bf16.msra.mxu1 %v5604_v13  ;;  %4058 = vmatprep.subr.bf16.mxu0 %v5609_v14  ;;  %v5694_v13 = vld [vmem:[%s7853_s1 + $0x968] ss:$16 sps:$4 sm:$0xff]   ;;  %v5699_v14 = vld [vmem:[%s7853_s1 + $0x74c] ss:$16 sps:$4 sm:$0xff]  }
 0x179   :  { %4101 = vmatprep.subr.bf16.mxu1 %v5612_v15  ;;  %v5702_v15 = vld [vmem:[%s7853_s1 + $0x94c] ss:$16 sps:$4 sm:$0xff]  }
 0x17b   :  { %4059 = vmatpush2.bf16.msra.mxu0 %v5607_v16  ;;  %v5697_v16 = vld [vmem:[%s7853_s1 + $0x748] ss:$16 sps:$4 sm:$0xff]  }
 0x17c   :  { %4102 = vmatpush2.bf16.msra.mxu1 %v5610_v17  ;;  %4060 = vmatprep.subr.bf16.mxu0 %v5615_v18  ;;  %v5700_v17 = vld [vmem:[%s7853_s1 + $0x948] ss:$16 sps:$4 sm:$0xff]   ;;  %v5705_v18 = vld [vmem:[%s7853_s1 + $0x72c] ss:$16 sps:$4 sm:$0xff]  }
 0x17d   :  { %4103 = vmatprep.subr.bf16.mxu1 %v5618_v19  ;;  %v5708_v19 = vld [vmem:[%s7853_s1 + $0x92c] ss:$16 sps:$4 sm:$0xff]  }
 0x17f   :  { %4061 = vmatpush2.bf16.msra.mxu0 %v5613_v20  ;;  %v5703_v20 = vld [vmem:[%s7853_s1 + $0x728] ss:$16 sps:$4 sm:$0xff]  }
 0x180   :  { %4104 = vmatpush2.bf16.msra.mxu1 %v5616_v21  ;;  %4116 = vmatprep.subr.bf16.mxu0 %v5621_v22  ;;  %v5706_v21 = vld [vmem:[%s7853_s1 + $0x928] ss:$16 sps:$4 sm:$0xff]   ;;  %v5711_v22 = vld [vmem:[%s7853_s1 + $0x70c] ss:$16 sps:$4 sm:$0xff]  }
 0x181   :  { %4159 = vmatprep.subr.bf16.mxu1 %v5624_v23  ;;  %v5714_v23 = vld [vmem:[%s7853_s1 + $0x90c] ss:$16 sps:$4 sm:$0xff]  }
 0x182   :  { %4063 = vmatmul.mubr.bf16.vlgmr.msra.gmra.mxu0 %v5911_v28  ;;  %v5715_v28 = vld [vmem:[%s7853_s1 + $0xae8] ss:$16 sps:$4 sm:$0xff]  }
 0x183   :  { %4106 = vmatmul.mubr.bf16.vlgmr.msra.gmra.mxu1 %v5912_v29  ;;  %4117 = vmatpush1.bf16.msra.mxu0 %v5619_v24  ;;  %v5709_v24 = vld [vmem:[%s7853_s1 + $0x708] ss:$16 sps:$4 sm:$0xff]  }
 0x184   :  { %4160 = vmatpush1.bf16.msra.mxu1 %v5622_v25  ;;  %4118 = vmatprep.subr.bf16.mxu0 %v5627_v26  ;;  %v5712_v25 = vld [vmem:[%s7853_s1 + $0x908] ss:$16 sps:$4 sm:$0xff]   ;;  %v5717_v26 = vld [vmem:[%s7853_s1 + $0xaec] ss:$16 sps:$4 sm:$0xff]  }
 0x185   :  { %4161 = vmatprep.subr.bf16.mxu1 %v5630_v27  ;;  %4148 = vmatprep.mubr.bf16.mxu0 %v5913_v34  ;;  %v5720_v27 = vld [vmem:[%s7853_s1 + $0xcec] ss:$16 sps:$4 sm:$0xff]   ;;  %v5718_v29 = vld [vmem:[%s7853_s1 + $0xce8] ss:$16 sps:$4 sm:$0xff]  }
 0x186   :  { %4191 = vmatprep.mubr.bf16.mxu1 %v5914_v35  ;;  %v5721_v34 = vld [vmem:[%s7853_s1 + $0xac8] ss:$16 sps:$4 sm:$0xff]  }
 0x187   :  { %4119 = vmatpush1.bf16.msra.mxu0 %v5625_v30  ;;  %v5723_v30 = vld [vmem:[%s7853_s1 + $0xacc] ss:$16 sps:$4 sm:$0xff]   ;;  %v5724_v35 = vld [vmem:[%s7853_s1 + $0xcc8] ss:$16 sps:$4 sm:$0xff]  }
 0x188   :  { %4162 = vmatpush1.bf16.msra.mxu1 %v5628_v31  ;;  %4120 = vmatprep.subr.bf16.mxu0 %v5633_v32  ;;  %v5726_v31 = vld [vmem:[%s7853_s1 + $0xccc] ss:$16 sps:$4 sm:$0xff]   ;;  %v5915_v32 = vld [vmem:[%s7854_s0 + $0x18] ss:$72 sps:$4 sm:$0xff]  }
 0x189   :  { %4163 = vmatprep.subr.bf16.mxu1 %v5636_v33  ;;  %v5916_v33 = vld [vmem:[%s7854_s0 + $0x20] ss:$72 sps:$4 sm:$0xff]  }
 0x18b   :  { %4121 = vmatpush1.bf16.msra.mxu0 %v5631_v36  ;;  %v5729_v36 = vld [vmem:[%s7853_s1 + $0xaac] ss:$16 sps:$4 sm:$0xff]  }
 0x18c   :  { %4164 = vmatpush1.bf16.msra.mxu1 %v5634_v37  ;;  %4122 = vmatprep.subr.bf16.mxu0 %v5639_v38  ;;  %v5732_v37 = vld [vmem:[%s7853_s1 + $0xcac] ss:$16 sps:$4 sm:$0xff]  }
 0x18d   :  { %4165 = vmatprep.subr.bf16.mxu1 %v5642_v39  ;;  %v5917_v38 = vld [vmem:[%s7854_s0 + $0x2c] ss:$72 sps:$4 sm:$0xff]  }
 0x18e   :  { %v5918_v39 = vld [vmem:[%s7854_s0 + $0x34] ss:$72 sps:$4 sm:$0xff]  }
 0x18f   :  { %4123 = vmatpush1.bf16.msra.mxu0 %v5637_v40  ;;  %v5727_v40 = vld [vmem:[%s7853_s1 + $0xaa8] ss:$16 sps:$4 sm:$0xff]  }
 0x190   :  { %4166 = vmatpush1.bf16.msra.mxu1 %v5640_v41  ;;  %4124 = vmatprep.subr.bf16.mxu0 %v5645_v42  ;;  %v5730_v41 = vld [vmem:[%s7853_s1 + $0xca8] ss:$16 sps:$4 sm:$0xff]   ;;  %v5735_v42 = vld [vmem:[%s7853_s1 + $0xa8c] ss:$16 sps:$4 sm:$0xff]  }
 0x191   :  { %4167 = vmatprep.subr.bf16.mxu1 %v5648_v43  ;;  %v5738_v43 = vld [vmem:[%s7853_s1 + $0xc8c] ss:$16 sps:$4 sm:$0xff]  }
 0x193   :  { %4125 = vmatpush1.bf16.msra.mxu0 %v5643_v44  ;;  %v7421_v44 = vpop.f32.mrf.mxu0 }
 0x194   :  { %4168 = vmatpush1.bf16.msra.mxu1 %v5646_v45  ;;  %4126 = vmatprep.subr.bf16.mxu0 %v5651_v46  ;;  %v5733_v45 = vld [vmem:[%s7853_s1 + $0xa88] ss:$16 sps:$4 sm:$0xff]  }
 0x195   :  { %4169 = vmatprep.subr.bf16.mxu1 %v5654_v47  ;;  %v5736_v46 = vld [vmem:[%s7853_s1 + $0xc88] ss:$16 sps:$4 sm:$0xff]   ;;  %v5741_v47 = vld [vmem:[%s7853_s1 + $0xa6c] ss:$16 sps:$4 sm:$0xff]  }
 0x197   :  { %4127 = vmatpush1.bf16.msra.mxu0 %v5649_v48  ;;  %v5744_v48 = vld [vmem:[%s7853_s1 + $0xc6c] ss:$16 sps:$4 sm:$0xff]  }
 0x198   :  { %4170 = vmatpush1.bf16.msra.mxu1 %v5652_v49  ;;  %4128 = vmatprep.subr.bf16.mxu0 %v5657_v50  ;;  %v7435_v49 = vpop.f32.mrf.mxu0  ;;  %v5739_v50 = vld [vmem:[%s7853_s1 + $0xa68] ss:$16 sps:$4 sm:$0xff]  }
 0x199   :  { %4171 = vmatprep.subr.bf16.mxu1 %v5660_v51  ;;  %v5742_v51 = vld [vmem:[%s7853_s1 + $0xc68] ss:$16 sps:$4 sm:$0xff]  }
 0x19b   :  { %4129 = vmatpush1.bf16.msra.mxu0 %v5655_v52  ;;  %v7443_v52 = vpop.f32.mrf.mxu1 }
 0x19c   :  { %4172 = vmatpush1.bf16.msra.mxu1 %v5658_v53  ;;  %4130 = vmatprep.subr.bf16.mxu0 %v5663_v54  ;;  %v5747_v53 = vld [vmem:[%s7853_s1 + $0xa4c] ss:$16 sps:$4 sm:$0xff]  }
 0x19d   :  { %4173 = vmatprep.subr.bf16.mxu1 %v5666_v55  ;;  %v5750_v54 = vld [vmem:[%s7853_s1 + $0xc4c] ss:$16 sps:$4 sm:$0xff]   ;;  %v7451_v55 = vpop.f32.mrf.mxu0 }
 0x19f   :  { %4131 = vmatpush1.bf16.msra.mxu0 %v5661_v56  ;;  %v5745_v56 = vld [vmem:[%s7853_s1 + $0xa48] ss:$16 sps:$4 sm:$0xff]  }
 0x1a0   :  { %4174 = vmatpush1.bf16.msra.mxu1 %v5664_v57  ;;  %4132 = vmatprep.subr.bf16.mxu0 %v5669_v58  ;;  %v5748_v57 = vld [vmem:[%s7853_s1 + $0xc48] ss:$16 sps:$4 sm:$0xff]   ;;  %v7459_v58 = vpop.f32.mrf.mxu1 }
 0x1a1   :  { %4175 = vmatprep.subr.bf16.mxu1 %v5672_v59  ;;  %v5753_v59 = vld [vmem:[%s7853_s1 + $0xa2c] ss:$16 sps:$4 sm:$0xff]  }
 0x1a3   :  { %4133 = vmatpush2.bf16.msra.mxu0 %v5667_v60  ;;  %v5756_v60 = vld [vmem:[%s7853_s1 + $0xc2c] ss:$16 sps:$4 sm:$0xff]  }
 0x1a4   :  { %4176 = vmatpush2.bf16.msra.mxu1 %v5670_v61  ;;  %4134 = vmatprep.subr.bf16.mxu0 %v5675_v62  ;;  %v7467_v61 = vpop.f32.mrf.mxu0  ;;  %v5751_v62 = vld [vmem:[%s7853_s1 + $0xa28] ss:$16 sps:$4 sm:$0xff]  }
 0x1a5   :  { %4177 = vmatprep.subr.bf16.mxu1 %v5678_v63  ;;  %v5754_v63 = vld [vmem:[%s7853_s1 + $0xc28] ss:$16 sps:$4 sm:$0xff]  }
 0x1a7   :  { %4135 = vmatpush2.bf16.msra.mxu0 %v5673_v0  ;;  %v7475_v0 = vpop.f32.mrf.mxu1 }
 0x1a8   :  { %4178 = vmatpush2.bf16.msra.mxu1 %v5676_v1  ;;  %4136 = vmatprep.subr.bf16.mxu0 %v5681_v2  ;;  %v7477_v1 = vpop.f32.mrf.mxu0  ;;  %v5759_v2 = vld [vmem:[%s7853_s1 + $0xa0c] ss:$16 sps:$4 sm:$0xff]  }
 0x1a9   :  { %4179 = vmatprep.subr.bf16.mxu1 %v5684_v3  ;;  %v5762_v3 = vld [vmem:[%s7853_s1 + $0xc0c] ss:$16 sps:$4 sm:$0xff]  }
 0x1ab   :  { %4137 = vmatpush2.bf16.msra.mxu0 %v5679_v4  ;;  %v610_v4 = vlaneseq }
 0x1ac   :  { %4180 = vmatpush2.bf16.msra.mxu1 %v5682_v5  ;;  %4138 = vmatprep.subr.bf16.mxu0 %v5687_v6  ;;  %v5757_v5 = vld [vmem:[%s7853_s1 + $0xa08] ss:$16 sps:$4 sm:$0xff]  }
 0x1ad   :  { %4181 = vmatprep.subr.bf16.mxu1 %v5690_v7  ;;  %v5760_v6 = vld [vmem:[%s7853_s1 + $0xc08] ss:$16 sps:$4 sm:$0xff]   ;;  %v7491_v7 = vpop.f32.mrf.mxu1 }
 0x1af   :  { %4139 = vmatpush2.bf16.msra.mxu0 %v5685_v8  ;;  %v7493_v8 = vpop.f32.mrf.mxu0 }
 0x1b0   :  { %4182 = vmatpush2.bf16.msra.mxu1 %v5688_v9  ;;  %4140 = vmatprep.subr.bf16.mxu0 %v5693_v10  ;;  %v5765_v9 = vld [vmem:[%s7853_s1 + $0xbec] ss:$16 sps:$4 sm:$0xff]  }
 0x1b1   :  { %4183 = vmatprep.subr.bf16.mxu1 %v5696_v11  ;;  %v5768_v10 = vld [vmem:[%s7853_s1 + $0xdec] ss:$16 sps:$4 sm:$0xff]   ;;  %v7501_v11 = vpop.f32.mrf.mxu1 }
 0x1b3   :  { %4141 = vmatpush2.bf16.msra.mxu0 %v5691_v12  ;;  %v7503_v12 = vshrl.u32 %v610_v4, 7 }
 0x1b4   :  { %4184 = vmatpush2.bf16.msra.mxu1 %v5694_v13  ;;  %4142 = vmatprep.subr.bf16.mxu0 %v5699_v14  ;;  %v5763_v13 = vld [vmem:[%s7853_s1 + $0xbe8] ss:$16 sps:$4 sm:$0xff]  }
 0x1b5   :  { %4185 = vmatprep.subr.bf16.mxu1 %v5702_v15  ;;  %v5766_v14 = vld [vmem:[%s7853_s1 + $0xde8] ss:$16 sps:$4 sm:$0xff]   ;;  %v7511_v15 = vpop.f32.mrf.mxu0 }
 0x1b7   :  { %4143 = vmatpush2.bf16.msra.mxu0 %v5697_v16  ;;  %v5771_v16 = vld [vmem:[%s7853_s1 + $0xbcc] ss:$16 sps:$4 sm:$0xff]  }
 0x1b8   :  { %4186 = vmatpush2.bf16.msra.mxu1 %v5700_v17  ;;  %4144 = vmatprep.subr.bf16.mxu0 %v5705_v18  ;;  %v5774_v17 = vld [vmem:[%s7853_s1 + $0xdcc] ss:$16 sps:$4 sm:$0xff]   ;;  %v7519_v18 = vpop.f32.mrf.mxu1 }
 0x1b9   :  { %4187 = vmatprep.subr.bf16.mxu1 %v5708_v19  ;;  %v612_v19 = vsub.s32 0, %v7503_v12 }
 0x1bb   :  { %4145 = vmatpush2.bf16.msra.mxu0 %v5703_v20  ;;  %v5769_v20 = vld [vmem:[%s7853_s1 + $0xbc8] ss:$16 sps:$4 sm:$0xff]  }
 0x1bc   :  { %4188 = vmatpush2.bf16.msra.mxu1 %v5706_v21  ;;  %4146 = vmatprep.subr.bf16.mxu0 %v5711_v22  ;;  %v5772_v21 = vld [vmem:[%s7853_s1 + $0xdc8] ss:$16 sps:$4 sm:$0xff]   ;;  %v7531_v22 = vld [vmem:[%s7855_s2] sm:$0xf] }
 0x1bd   :  { %4189 = vmatprep.subr.bf16.mxu1 %v5714_v23  ;;  %v7533_v23 = vpop.f32.mrf.mxu0 }
 0x1bf   :  { %4147 = vmatpush2.bf16.msra.mxu0 %v5709_v24  ;;  %v5777_v24 = vld [vmem:[%s7853_s1 + $0xbac] ss:$16 sps:$4 sm:$0xff]  }
 0x1c0   :  { %4190 = vmatpush2.bf16.msra.mxu1 %v5712_v25  ;;  %4202 = vmatprep.subr.bf16.mxu0 %v5717_v26  ;;  %v5780_v25 = vld [vmem:[%s7853_s1 + $0xdac] ss:$16 sps:$4 sm:$0xff]   ;;  %v616_v26 = vsub.s32 1, %v7503_v12 }
 0x1c1   :  { %4245 = vmatprep.subr.bf16.mxu1 %v5720_v27  ;;  %v7542_v27 = vpop.f32.mrf.mxu1 }
 0x1c2   :  { %4149 = vmatmul.mubr.bf16.vlgmr.msra.gmra.mxu0 %v5915_v32  ;;  %v5783_v32 = vld [vmem:[%s7853_s1 + $0xb8c] ss:$16 sps:$4 sm:$0xff]  }
 0x1c3   :  { %4192 = vmatmul.mubr.bf16.vlgmr.msra.gmra.mxu1 %v5916_v33  ;;  %4203 = vmatpush1.bf16.msra.mxu0 %v5715_v28  ;;  %v3806_v28 = vpop.f32.mrf.mxu0  ;;  %v5786_v33 = vld [vmem:[%s7853_s1 + $0xd8c] ss:$16 sps:$4 sm:$0xff]  }
 0x1c4   :  { %4246 = vmatpush1.bf16.msra.mxu1 %v5718_v29  ;;  %4204 = vmatprep.subr.bf16.mxu0 %v5723_v30  ;;  %v613_v29 = vrot.slane %v7531_v22, %v612_v19  ;;  %v5775_v30 = vld [vmem:[%s7853_s1 + $0xba8] ss:$16 sps:$4 sm:$0xff]  }
 0x1c5   :  { %4247 = vmatprep.subr.bf16.mxu1 %v5726_v31  ;;  %4234 = vmatprep.mubr.bf16.mxu0 %v5917_v38  ;;  %v5778_v31 = vld [vmem:[%s7853_s1 + $0xda8] ss:$16 sps:$4 sm:$0xff]  }
 0x1c6   :  { %4277 = vmatprep.mubr.bf16.mxu1 %v5918_v39  ;;  %v5781_v38 = vld [vmem:[%s7853_s1 + $0xb88] ss:$16 sps:$4 sm:$0xff]  }
 0x1c7   :  { %4205 = vmatpush1.bf16.msra.mxu0 %v5721_v34  ;;  %v617_v34 = vrot.slane %v7531_v22, %v616_v26  ;;  %v5784_v39 = vld [vmem:[%s7853_s1 + $0xd88] ss:$16 sps:$4 sm:$0xff]  }
 0x1c8   :  { %4248 = vmatpush1.bf16.msra.mxu1 %v5724_v35  ;;  %4206 = vmatprep.subr.bf16.mxu0 %v5729_v36  ;;  %v3769_v35 = vpop.f32.mrf.mxu1  ;;  %v3808_v36 = vpop.f32.mrf.mxu0  ;;  %v5805_v19 = vld [vmem:[%s7853_s1 + $0xb08] ss:$16 sps:$4 sm:$0xff]  }
 0x1c9   :  { %4249 = vmatprep.subr.bf16.mxu1 %v5732_v37  ;;  %v3635_v37 = vadd.f32 %v7421_v44, %v613_v29 }
 0x1ca   :  { %v3810_v44 = vpop.f32.mrf.mxu0 }
 0x1cb   :  { %4207 = vmatpush1.bf16.msra.mxu0 %v5727_v40  ;;  %v3849_v40 = vpop.f32.mrf.mxu1 }
 0x1cc   :  { %4250 = vmatpush1.bf16.msra.mxu1 %v5730_v41  ;;  %4208 = vmatprep.subr.bf16.mxu0 %v5735_v42  ;;  %v5789_v41 = vld [vmem:[%s7853_s1 + $0xb6c] ss:$16 sps:$4 sm:$0xff]  }
 0x1cd   :  { %4251 = vmatprep.subr.bf16.mxu1 %v5738_v43  ;;  %v5792_v42 = vld [vmem:[%s7853_s1 + $0xd6c] ss:$16 sps:$4 sm:$0xff]   ;;  %v3637_v43 = vadd.f32 %v7435_v49, %v617_v34 }
 0x1ce   :  { %v5795_v49 = vld [vmem:[%s7853_s1 + $0xb4c] ss:$16 sps:$4 sm:$0xff]  }
 0x1cf   :  { %4209 = vmatpush1.bf16.msra.mxu0 %v5733_v45  ;;  %v3678_v45 = vadd.f32 %v7443_v52, %v3635_v37  ;;  %v3680_v52 = vadd.f32 %v7459_v58, %v3637_v43 }
 0x1d0   :  { %4252 = vmatpush1.bf16.msra.mxu1 %v5736_v46  ;;  %4210 = vmatprep.subr.bf16.mxu0 %v5741_v47  ;;  %v3639_v46 = vadd.f32 %v7451_v55, %v613_v29  ;;  %v5787_v47 = vld [vmem:[%s7853_s1 + $0xb68] ss:$16 sps:$4 sm:$0xff]   ;;  %v3812_v55 = vpop.f32.mrf.mxu0 }
 0x1d1   :  { %4253 = vmatprep.subr.bf16.mxu1 %v5744_v48  ;;  %v5790_v48 = vld [vmem:[%s7853_s1 + $0xd68] ss:$16 sps:$4 sm:$0xff]  }
 0x1d3   :  { %4211 = vmatpush1.bf16.msra.mxu0 %v5739_v50  ;;  %v3851_v50 = vpop.f32.mrf.mxu1 }
 0x1d4   :  { %4254 = vmatpush1.bf16.msra.mxu1 %v5742_v51  ;;  %4212 = vmatprep.subr.bf16.mxu0 %v5747_v53  ;;  %v5798_v51 = vld [vmem:[%s7853_s1 + $0xd4c] ss:$16 sps:$4 sm:$0xff]   ;;  %v3641_v53 = vadd.f32 %v7467_v61, %v617_v34 }
 0x1d5   :  { %4255 = vmatprep.subr.bf16.mxu1 %v5750_v54  ;;  %v3721_v54 = vadd.f32 %v7477_v1, %v3678_v45  ;;  %v3853_v58 = vpop.f32.mrf.mxu1  ;;  %v5801_v61 = vld [vmem:[%s7853_s1 + $0xb2c] ss:$16 sps:$4 sm:$0xff]  }
 0x1d6   :  { %v5819_v34 = vld [vmem:[%s7853_s1 + $0xecc] ss:$16 sps:$4 sm:$0xff]  }
 0x1d7   :  { %4213 = vmatpush1.bf16.msra.mxu0 %v5745_v56  ;;  %v3682_v56 = vadd.f32 %v7475_v0, %v3639_v46  ;;  %v3684_v0 = vadd.f32 %v7491_v7, %v3641_v53  ;;  %v3764_v1 = vadd.f32 %v7501_v11, %v3721_v54  ;;  %v3855_v7 = vpop.f32.mrf.mxu1  ;;  %v5810_v11 = vld [vmem:[%s7853_s1 + $0xd0c] ss:$16 sps:$4 sm:$0xff]   ;;  %v5817_v46 = vld [vmem:[%s7853_s1 + $0xec8] ss:$16 sps:$4 sm:$0xff]  }
 0x1d8   :  { %4256 = vmatpush1.bf16.msra.mxu1 %v5748_v57  ;;  %4214 = vmatprep.subr.bf16.mxu0 %v5753_v59  ;;  %v3723_v57 = vadd.f32 %v7493_v8, %v3680_v52  ;;  %v5793_v59 = vld [vmem:[%s7853_s1 + $0xb48] ss:$16 sps:$4 sm:$0xff]   ;;  %v5921_v53 = vld [vmem:[%s7854_s0 + $0x3c] ss:$72 sps:$4 sm:$0xff]  }
 0x1d9   :  { %4257 = vmatprep.subr.bf16.mxu1 %v5756_v60  ;;  %v5796_v60 = vld [vmem:[%s7853_s1 + $0xd48] ss:$16 sps:$4 sm:$0xff]   ;;  %v3727_v4 = vadd.f32 %v7533_v23, %v3684_v0  ;;  %v5813_v23 = vld [vmem:[%s7853_s1 + $0xeec] ss:$16 sps:$4 sm:$0xff]  }
 0x1da   :  { %v5802_v8 = vld [vmem:[%s7853_s1 + $0xd28] ss:$16 sps:$4 sm:$0xff]   ;;  %v5922_v54 = vld [vmem:[%s7854_s0 + $0x44] ss:$72 sps:$4 sm:$0xff]  }
 0x1db   :  { %4215 = vmatpush1.bf16.msra.mxu0 %v5751_v62  ;;  %v3892_v62 = vpop.f32.mrf.mxu0  ;;  %v5831_v0 = vld [vmem:[%s7853_s1 + $0xe8c] ss:$16 sps:$4 sm:$0xff]  }
 0x1dc   :  { %4258 = vmatpush1.bf16.msra.mxu1 %v5754_v63  ;;  %4216 = vmatprep.subr.bf16.mxu0 %v5759_v2  ;;  %v5804_v63 = vld [vmem:[%s7853_s1 + $0xd2c] ss:$16 sps:$4 sm:$0xff]   ;;  %v3725_v2 = vadd.f32 %v7511_v15, %v3682_v56  ;;  %v3935_v15 = vpop.f32.mrf.mxu1 }
 0x1dd   :  { %4259 = vmatprep.subr.bf16.mxu1 %v5762_v3  ;;  %v3766_v3 = vadd.f32 %v7519_v18, %v3723_v57 }
 0x1df   :  { %4217 = vmatpush1.bf16.msra.mxu0 %v5757_v5  ;;  %v3807_v5 = vadd.f32 %v3806_v28, %v3764_v1  ;;  %v3937_v28 = vpop.f32.mrf.mxu1  ;;  %v5834_v1 = vld [vmem:[%s7853_s1 + $0x108c] ss:$16 sps:$4 sm:$0xff]  }
 0x1e0   :  { %4260 = vmatpush1.bf16.msra.mxu1 %v5760_v6  ;;  %4218 = vmatprep.subr.bf16.mxu0 %v5765_v9  ;;  %v5799_v6 = vld [vmem:[%s7853_s1 + $0xb28] ss:$16 sps:$4 sm:$0xff]   ;;  %v3894_v9 = vpop.f32.mrf.mxu0 }
 0x1e1   :  { %4261 = vmatprep.subr.bf16.mxu1 %v5768_v10  ;;  %v5807_v10 = vld [vmem:[%s7853_s1 + $0xb0c] ss:$16 sps:$4 sm:$0xff]  }
 0x1e3   :  { %4219 = vmatpush2.bf16.msra.mxu0 %v5763_v13  ;;  %v3768_v13 = vadd.f32 %v7542_v27, %v3725_v2 }
 0x1e4   :  { %4262 = vmatpush2.bf16.msra.mxu1 %v5766_v14  ;;  %4220 = vmatprep.subr.bf16.mxu0 %v5771_v16  ;;  %v3809_v14 = vadd.f32 %v3808_v36, %v3766_v3  ;;  %v3770_v16 = vadd.f32 %v3769_v35, %v3727_v4  ;;  %v5822_v35 = vld [vmem:[%s7853_s1 + $0x10cc] ss:$16 sps:$4 sm:$0xff]  }
 0x1e5   :  { %4263 = vmatprep.subr.bf16.mxu1 %v5774_v17  ;;  %v3850_v17 = vadd.f32 %v3849_v40, %v3807_v5  ;;  %v3811_v18 = vadd.f32 %v3810_v44, %v3768_v13  ;;  %v5838_v13 = vld [vmem:[%s7853_s1 + $0x1068] ss:$16 sps:$4 sm:$0xff]  }
 0x1e6   :  { %v3813_v26 = vadd.f32 %v3812_v55, %v3770_v16  ;;  %v5841_v16 = vld [vmem:[%s7853_s1 + $0xe48] ss:$16 sps:$4 sm:$0xff]  }
 0x1e7   :  { %4221 = vmatpush2.bf16.msra.mxu0 %v5769_v20  ;;  %v5808_v20 = vld [vmem:[%s7853_s1 + $0xd08] ss:$16 sps:$4 sm:$0xff]   ;;  %v3893_v27 = vadd.f32 %v3892_v62, %v3850_v17  ;;  %v3854_v29 = vadd.f32 %v3853_v58, %v3811_v18  ;;  %v5849_v18 = vld [vmem:[%s7853_s1 + $0xe2c] ss:$16 sps:$4 sm:$0xff]  }
 0x1e8   :  { %4264 = vmatpush2.bf16.msra.mxu1 %v5772_v21  ;;  %4222 = vmatprep.subr.bf16.mxu0 %v5777_v24  ;;  %v3896_v21 = vpop.f32.mrf.mxu0  ;;  %v5816_v24 = vld [vmem:[%s7853_s1 + $0x10ec] ss:$16 sps:$4 sm:$0xff]   ;;  %v3856_v36 = vadd.f32 %v3855_v7, %v3813_v26  ;;  %v5823_v62 = vld [vmem:[%s7853_s1 + $0xea8] ss:$16 sps:$4 sm:$0xff]  }
 0x1e9   :  { %4265 = vmatprep.subr.bf16.mxu1 %v5780_v25  ;;  %v3852_v25 = vadd.f32 %v3851_v50, %v3809_v14  ;;  %v3936_v37 = vadd.f32 %v3935_v15, %v3893_v27  ;;  %v5825_v50 = vld [vmem:[%s7853_s1 + $0xeac] ss:$16 sps:$4 sm:$0xff]   ;;  %v5844_v17 = vld [vmem:[%s7853_s1 + $0x1048] ss:$16 sps:$4 sm:$0xff]  }
 0x1ea   :  { %v5837_v7 = vld [vmem:[%s7853_s1 + $0xe6c] ss:$16 sps:$4 sm:$0xff]   ;;  %v5856_v26 = vld [vmem:[%s7853_s1 + $0x1008] ss:$16 sps:$4 sm:$0xff]  }
 0x1eb   :  { %4223 = vmatpush2.bf16.msra.mxu0 %v5775_v30  ;;  %v3895_v30 = vadd.f32 %v3894_v9, %v3852_v25  ;;  %v5840_v9 = vld [vmem:[%s7853_s1 + $0x106c] ss:$16 sps:$4 sm:$0xff]   ;;  %v5853_v25 = vld [vmem:[%s7853_s1 + $0xe08] ss:$16 sps:$4 sm:$0xff]  }
 0x1ec   :  { %4266 = vmatpush2.bf16.msra.mxu1 %v5778_v31  ;;  %4224 = vmatprep.subr.bf16.mxu0 %v5783_v32  ;;  %v5811_v31 = vld [vmem:[%s7853_s1 + $0xee8] ss:$16 sps:$4 sm:$0xff]   ;;  %v5843_v14 = vld [vmem:[%s7853_s1 + $0xe4c] ss:$16 sps:$4 sm:$0xff]  }
 0x1ed   :  { %4267 = vmatprep.subr.bf16.mxu1 %v5786_v33  ;;  %v5814_v32 = vld [vmem:[%s7853_s1 + $0x10e8] ss:$16 sps:$4 sm:$0xff]   ;;  %v3898_v33 = vpop.f32.mrf.mxu0  ;;  %v3938_v43 = vadd.f32 %v3937_v28, %v3895_v30  ;;  %v5846_v15 = vld [vmem:[%s7853_s1 + $0x104c] ss:$16 sps:$4 sm:$0xff]  }
 0x1ee   :  { %v3899_v44 = vadd.f32 %v3898_v33, %v3856_v36  ;;  %v5861_v27 = vld [vmem:[%s7853_s1 + $0xfec] ss:$16 sps:$4 sm:$0xff]   ;;  %v5862_v30 = vld [vmem:[%s7853_s1 + $0x11e8] ss:$16 sps:$4 sm:$0xff]  }
 0x1ef   :  { %4225 = vmatpush2.bf16.msra.mxu0 %v5781_v38  ;;  %v3897_v38 = vadd.f32 %v3896_v21, %v3854_v29  ;;  %v5850_v21 = vld [vmem:[%s7853_s1 + $0x1028] ss:$16 sps:$4 sm:$0xff]   ;;  %v5864_v28 = vld [vmem:[%s7853_s1 + $0x11ec] ss:$16 sps:$4 sm:$0xff]  }
 0x1f0   :  { %4268 = vmatpush2.bf16.msra.mxu1 %v5784_v39  ;;  %4226 = vmatprep.subr.bf16.mxu0 %v5789_v41  ;;  %v3939_v39 = vpop.f32.mrf.mxu1  ;;  %v5919_v41 = vld [vmem:[%s7854_s0 + $0x28] ss:$72 sps:$4 sm:$0xff]   ;;  %v5876_v36 = vld [vmem:[%s7853_s1 + $0x11ac] ss:$16 sps:$4 sm:$0xff]  }
 0x1f1   :  { %4269 = vmatprep.subr.bf16.mxu1 %v5792_v42  ;;  %v5920_v42 = vld [vmem:[%s7854_s0 + $0x30] ss:$72 sps:$4 sm:$0xff]  }
 0x1f2   :  { %v3941_v55 = vpop.f32.mrf.mxu1  ;;  %v5859_v29 = vld [vmem:[%s7853_s1 + $0xfe8] ss:$16 sps:$4 sm:$0xff]  }
 0x1f3   :  { %4227 = vmatpush2.bf16.msra.mxu0 %v5787_v47  ;;  %v5820_v47 = vld [vmem:[%s7853_s1 + $0x10c8] ss:$16 sps:$4 sm:$0xff]   ;;  %v3942_v57 = vadd.f32 %v3941_v55, %v3899_v44  ;;  %v5888_v44 = vld [vmem:[%s7853_s1 + $0x116c] ss:$16 sps:$4 sm:$0xff]  }
 0x1f4   :  { %4270 = vmatpush2.bf16.msra.mxu1 %v5790_v48  ;;  %4228 = vmatprep.subr.bf16.mxu0 %v5795_v49  ;;  %v5828_v49 = vld [vmem:[%s7853_s1 + $0x10ac] ss:$16 sps:$4 sm:$0xff]   ;;  %v5865_v33 = vld [vmem:[%s7853_s1 + $0xfc8] ss:$16 sps:$4 sm:$0xff]  }
 0x1f5   :  { %4271 = vmatprep.subr.bf16.mxu1 %v5798_v51  ;;  %v3940_v51 = vadd.f32 %v3939_v39, %v3897_v38  ;;  %v5874_v38 = vld [vmem:[%s7853_s1 + $0x11a8] ss:$16 sps:$4 sm:$0xff]   ;;  %v5879_v39 = vld [vmem:[%s7853_s1 + $0xf8c] ss:$16 sps:$4 sm:$0xff]  }
 0x1f6   :  { %v5903_v55 = vld [vmem:[%s7853_s1 + $0xf0c] ss:$16 sps:$4 sm:$0xff]  }
 0x1f7   :  { %4229 = vmatpush2.bf16.msra.mxu0 %v5793_v59 }
 0x1f8   :  { %4272 = vmatpush2.bf16.msra.mxu1 %v5796_v60  ;;  %4230 = vmatprep.subr.bf16.mxu0 %v5801_v61  ;;  %v5826_v61 = vld [vmem:[%s7853_s1 + $0x10a8] ss:$16 sps:$4 sm:$0xff]  }
 0x1f9   :  { %4273 = vmatprep.subr.bf16.mxu1 %v5804_v63 }
 0x1fb   :  { %4231 = vmatpush2.bf16.msra.mxu0 %v5799_v6  ;;  %v5829_v6 = vld [vmem:[%s7853_s1 + $0xe88] ss:$16 sps:$4 sm:$0xff]  }
 0x1fc   :  { %4274 = vmatpush2.bf16.msra.mxu1 %v5802_v8  ;;  %4232 = vmatprep.subr.bf16.mxu0 %v5807_v10  ;;  %v5832_v8 = vld [vmem:[%s7853_s1 + $0x1088] ss:$16 sps:$4 sm:$0xff]  }
 0x1fd   :  { %4275 = vmatprep.subr.bf16.mxu1 %v5810_v11  ;;  %v5835_v11 = vld [vmem:[%s7853_s1 + $0xe68] ss:$16 sps:$4 sm:$0xff]  }
 0x1ff   :  { %4233 = vmatpush2.bf16.msra.mxu0 %v5805_v19  ;;  %v5852_v19 = vld [vmem:[%s7853_s1 + $0x102c] ss:$16 sps:$4 sm:$0xff]  }
 0x200   :  { %4276 = vmatpush2.bf16.msra.mxu1 %v5808_v20  ;;  %4288 = vmatprep.subr.bf16.mxu0 %v5813_v23  ;;  %v5847_v20 = vld [vmem:[%s7853_s1 + $0xe28] ss:$16 sps:$4 sm:$0xff]   ;;  %v5855_v23 = vld [vmem:[%s7853_s1 + $0xe0c] ss:$16 sps:$4 sm:$0xff]  }
 0x201   :  { %4331 = vmatprep.subr.bf16.mxu1 %v5816_v24  ;;  %v5858_v24 = vld [vmem:[%s7853_s1 + $0x100c] ss:$16 sps:$4 sm:$0xff]  }
 0x202   :  { %v3978_v40 = vpop.f32.mrf.mxu0  ;;  %4235 = vmatmul.mubr.bf16.vlgmr.msra.gmra.mxu0 %v5919_v41  ;;  %v5877_v41 = vld [vmem:[%s7853_s1 + $0xf88] ss:$16 sps:$4 sm:$0xff]  }
 0x203   :  { %4278 = vmatmul.mubr.bf16.vlgmr.msra.gmra.mxu1 %v5920_v42  ;;  %v3979_v45 = vadd.f32 %v3978_v40, %v3936_v37  ;;  %4289 = vmatpush1.bf16.msra.mxu0 %v5811_v31  ;;  %v5867_v31 = vld [vmem:[%s7853_s1 + $0xfcc] ss:$16 sps:$4 sm:$0xff]   ;;  %v5871_v37 = vld [vmem:[%s7853_s1 + $0xfa8] ss:$16 sps:$4 sm:$0xff]  }
 0x204   :  { %4332 = vmatpush1.bf16.msra.mxu1 %v5814_v32  ;;  %v3980_v48 = vpop.f32.mrf.mxu0  ;;  %4290 = vmatprep.subr.bf16.mxu0 %v5819_v34  ;;  %v5870_v32 = vld [vmem:[%s7853_s1 + $0x11cc] ss:$16 sps:$4 sm:$0xff]   ;;  %v5868_v34 = vld [vmem:[%s7853_s1 + $0x11c8] ss:$16 sps:$4 sm:$0xff]  }
 0x205   :  { %4333 = vmatprep.subr.bf16.mxu1 %v5822_v35  ;;  %v3981_v52 = vadd.f32 %v3980_v48, %v3938_v43  ;;  %4320 = vmatprep.mubr.bf16.mxu0 %v5921_v53  ;;  %v4374_v59 = vmax.f32 %v3979_v45, 0.0  ;;  %v5873_v35 = vld [vmem:[%s7853_s1 + $0xfac] ss:$16 sps:$4 sm:$0xff]   ;;  %v5880_v42 = vld [vmem:[%s7853_s1 + $0x1188] ss:$16 sps:$4 sm:$0xff]  }
 0x206   :  { %4363 = vmatprep.mubr.bf16.mxu1 %v5922_v54  ;;  %v3982_v56 = vpop.f32.mrf.mxu0  ;;  %v5882_v40 = vld [vmem:[%s7853_s1 + $0x118c] ss:$16 sps:$4 sm:$0xff]   ;;  %v5883_v45 = vld [vmem:[%s7853_s1 + $0xf68] ss:$16 sps:$4 sm:$0xff]  }
 0x207   :  { %v4375_v60 = vmax.f32 %v3981_v52, 0.0  ;;  %v3983_v58 = vadd.f32 %v3982_v56, %v3940_v51  ;;  %4291 = vmatpush1.bf16.msra.mxu0 %v5817_v46  ;;  %v5885_v43 = vld [vmem:[%s7853_s1 + $0xf6c] ss:$16 sps:$4 sm:$0xff]   ;;  %v5886_v46 = vld [vmem:[%s7853_s1 + $0x1168] ss:$16 sps:$4 sm:$0xff]  }
 0x208   :  { %4334 = vmatpush1.bf16.msra.mxu1 %v5820_v47  ;;  %v3984_v63 = vpop.f32.mrf.mxu0  ;;  %4292 = vmatprep.subr.bf16.mxu0 %v5825_v50  ;;  %v5891_v47 = vld [vmem:[%s7853_s1 + $0xf4c] ss:$16 sps:$4 sm:$0xff]   ;;  %v5889_v50 = vld [vmem:[%s7853_s1 + $0xf48] ss:$16 sps:$4 sm:$0xff]  }
 0x209   :  { %4335 = vmatprep.subr.bf16.mxu1 %v5828_v49  ;;  %v5012_v2 = vpack.c.bf16 %v4375_v60, %v4374_v59  ;;  %v3985_v3 = vadd.f32 %v3984_v63, %v3942_v57  ;;  %v4378_v4 = vmax.f32 %v3983_v58, 0.0  ;;  %v5894_v48 = vld [vmem:[%s7853_s1 + $0x114c] ss:$16 sps:$4 sm:$0xff]   ;;  %v5892_v49 = vld [vmem:[%s7853_s1 + $0x1148] ss:$16 sps:$4 sm:$0xff]  }
 0x20a   :  { %v5897_v51 = vld [vmem:[%s7853_s1 + $0xf2c] ss:$16 sps:$4 sm:$0xff]   ;;  %v5895_v53 = vld [vmem:[%s7853_s1 + $0xf28] ss:$16 sps:$4 sm:$0xff]  }
 0x20b   :  { %4406 = vst [vmem:[%s7856_s3] sm:$0xff] %v5012_v2  ;;  %v4379_v5 = vmax.f32 %v3985_v3, 0.0  ;;  %4293 = vmatpush1.bf16.msra.mxu0 %v5823_v62  ;;  %v5900_v52 = vld [vmem:[%s7853_s1 + $0x112c] ss:$16 sps:$4 sm:$0xff]   ;;  %v5898_v54 = vld [vmem:[%s7853_s1 + $0x1128] ss:$16 sps:$4 sm:$0xff]   ;;  %v4021_v62 = vpop.f32.mrf.mxu1 }
 0x20c   :  { %4336 = vmatpush1.bf16.msra.mxu1 %v5826_v61  ;;  %4294 = vmatprep.subr.bf16.mxu0 %v5831_v0  ;;  %v5906_v56 = vld [vmem:[%s7853_s1 + $0x110c] ss:$16 sps:$4 sm:$0xff]   ;;  %v5901_v57 = vld [vmem:[%s7853_s1 + $0xf08] ss:$16 sps:$4 sm:$0xff]  }
 0x20d   :  { %4337 = vmatprep.subr.bf16.mxu1 %v5834_v1  ;;  %v5014_v10 = vpack.c.bf16 %v4379_v5, %v4378_v4  ;;  %v5904_v59 = vld [vmem:[%s7853_s1 + $0x1108] ss:$16 sps:$4 sm:$0xff]   ;;  %v4023_v61 = vpop.f32.mrf.mxu1 }
 0x20e   :  { %v5923_v60 = vld [vmem:[%s7854_s0 + $0x38] ss:$72 sps:$4 sm:$0xff]  }
 0x20f   :  { %4408 = vst [vmem:[%s7856_s3 + $0x10] sm:$0xff] %v5014_v10  ;;  %4295 = vmatpush1.bf16.msra.mxu0 %v5829_v6  ;;  %v5924_v58 = vld [vmem:[%s7854_s0 + $0x40] ss:$72 sps:$4 sm:$0xff]   ;;  %v4025_v63 = vpop.f32.mrf.mxu1 }
 0x210   :  { %4338 = vmatpush1.bf16.msra.mxu1 %v5832_v8  ;;  %4296 = vmatprep.subr.bf16.mxu0 %v5837_v7 }
 0x211   :  { %4339 = vmatprep.subr.bf16.mxu1 %v5840_v9  ;;  %v4027_v0 = vpop.f32.mrf.mxu1 }
 0x213   :  { %4297 = vmatpush1.bf16.msra.mxu0 %v5835_v11  ;;  %v620_v11 = vsub.s32 2, %v7503_v12 }
 0x214   :  { %4340 = vmatpush1.bf16.msra.mxu1 %v5838_v13  ;;  %4298 = vmatprep.subr.bf16.mxu0 %v5843_v14  ;;  %v624_v13 = vsub.s32 3, %v7503_v12 }
 0x215   :  { %4341 = vmatprep.subr.bf16.mxu1 %v5846_v15 }
 0x217   :  { %4299 = vmatpush1.bf16.msra.mxu0 %v5841_v16  ;;  %v621_v16 = vrot.slane %v7531_v22, %v620_v11 }
 0x218   :  { %4342 = vmatpush1.bf16.msra.mxu1 %v5844_v17  ;;  %4300 = vmatprep.subr.bf16.mxu0 %v5849_v18  ;;  %v625_v17 = vrot.slane %v7531_v22, %v624_v13 }
 0x219   :  { %4343 = vmatprep.subr.bf16.mxu1 %v5852_v19 }
 0x21b   :  { %4301 = vmatpush1.bf16.msra.mxu0 %v5847_v20  ;;  %v4022_v20 = vadd.f32 %v4021_v62, %v621_v16 }
 0x21c   :  { %4344 = vmatpush1.bf16.msra.mxu1 %v5850_v21  ;;  %4302 = vmatprep.subr.bf16.mxu0 %v5855_v23  ;;  %v4024_v21 = vadd.f32 %v4023_v61, %v625_v17 }
 0x21d   :  { %4345 = vmatprep.subr.bf16.mxu1 %v5858_v24 }
 0x21f   :  { %4303 = vmatpush1.bf16.msra.mxu0 %v5853_v25 }
 0x220   :  { %4346 = vmatpush1.bf16.msra.mxu1 %v5856_v26  ;;  %4304 = vmatprep.subr.bf16.mxu0 %v5861_v27  ;;  %v4026_v26 = vadd.f32 %v4025_v63, %v621_v16 }
 0x221   :  { %4347 = vmatprep.subr.bf16.mxu1 %v5864_v28 }
 0x223   :  { %4305 = vmatpush2.bf16.msra.mxu0 %v5859_v29 }
 0x224   :  { %4348 = vmatpush2.bf16.msra.mxu1 %v5862_v30  ;;  %4306 = vmatprep.subr.bf16.mxu0 %v5867_v31  ;;  %v4028_v30 = vadd.f32 %v4027_v0, %v625_v17 }
 0x225   :  { %4349 = vmatprep.subr.bf16.mxu1 %v5870_v32 }
 0x227   :  { %4307 = vmatpush2.bf16.msra.mxu0 %v5865_v33 }
 0x228   :  { %4350 = vmatpush2.bf16.msra.mxu1 %v5868_v34  ;;  %4308 = vmatprep.subr.bf16.mxu0 %v5873_v35 }
 0x229   :  { %4351 = vmatprep.subr.bf16.mxu1 %v5876_v36 }
 0x22b   :  { %4309 = vmatpush2.bf16.msra.mxu0 %v5871_v37 }
 0x22c   :  { %4352 = vmatpush2.bf16.msra.mxu1 %v5874_v38  ;;  %4310 = vmatprep.subr.bf16.mxu0 %v5879_v39 }
 0x22d   :  { %4353 = vmatprep.subr.bf16.mxu1 %v5882_v40 }
 0x22f   :  { %4311 = vmatpush2.bf16.msra.mxu0 %v5877_v41 }
 0x230   :  { %4354 = vmatpush2.bf16.msra.mxu1 %v5880_v42  ;;  %4312 = vmatprep.subr.bf16.mxu0 %v5885_v43 }
 0x231   :  { %4355 = vmatprep.subr.bf16.mxu1 %v5888_v44 }
 0x233   :  { %4313 = vmatpush2.bf16.msra.mxu0 %v5883_v45 }
 0x234   :  { %4356 = vmatpush2.bf16.msra.mxu1 %v5886_v46  ;;  %4314 = vmatprep.subr.bf16.mxu0 %v5891_v47 }
 0x235   :  { %4357 = vmatprep.subr.bf16.mxu1 %v5894_v48 }
 0x237   :  { %4315 = vmatpush2.bf16.msra.mxu0 %v5889_v50 }
 0x238   :  { %4358 = vmatpush2.bf16.msra.mxu1 %v5892_v49  ;;  %4316 = vmatprep.subr.bf16.mxu0 %v5897_v51 }
 0x239   :  { %4359 = vmatprep.subr.bf16.mxu1 %v5900_v52 }
 0x23b   :  { %4317 = vmatpush2.bf16.msra.mxu0 %v5895_v53 }
 0x23c   :  { %4360 = vmatpush2.bf16.msra.mxu1 %v5898_v54  ;;  %4318 = vmatprep.subr.bf16.mxu0 %v5903_v55 }
 0x23d   :  { %4361 = vmatprep.subr.bf16.mxu1 %v5906_v56 }
 0x23f   :  { %4319 = vmatpush2.bf16.msra.mxu0 %v5901_v57 }
 0x240   :  { %4362 = vmatpush2.bf16.msra.mxu1 %v5904_v59 }
 0x242   :  { %4321 = vmatmul.mubr.bf16.vlgmr.msra.gmra.mxu0 %v5923_v60  ;;  %v4064_v1 = vpop.f32.mrf.mxu0 }
 0x243   :  { %4364 = vmatmul.mubr.bf16.vlgmr.msra.gmra.mxu1 %v5924_v58  ;;  %v4107_v2 = vpop.f32.mrf.mxu1  ;;  %v4065_v23 = vadd.f32 %v4064_v1, %v4022_v20 }
 0x244   :  { %v4066_v3 = vpop.f32.mrf.mxu0 }
 0x245   :  { %v4109_v4 = vpop.f32.mrf.mxu1  ;;  %v4067_v27 = vadd.f32 %v4066_v3, %v4024_v21  ;;  %v4108_v31 = vadd.f32 %v4107_v2, %v4065_v23 }
 0x246   :  { %v4068_v5 = vpop.f32.mrf.mxu0 }
 0x247   :  { %v4111_v6 = vpop.f32.mrf.mxu1  ;;  %v4069_v12 = vadd.f32 %v4068_v5, %v4026_v26  ;;  %v4110_v32 = vadd.f32 %v4109_v4, %v4067_v27 }
 0x248   :  { %v4070_v8 = vpop.f32.mrf.mxu0 }
 0x249   :  { %v4113_v7 = vpop.f32.mrf.mxu1  ;;  %v4071_v33 = vadd.f32 %v4070_v8, %v4028_v30  ;;  %v4112_v22 = vadd.f32 %v4111_v6, %v4069_v12 }
 0x24b   :  { %v4114_v38 = vadd.f32 %v4113_v7, %v4071_v33 }
 0x282   :  { %v4150_v9 = vpop.f32.mrf.mxu0 }
 0x283   :  { %v4193_v10 = vpop.f32.mrf.mxu1  ;;  %v4151_v34 = vadd.f32 %v4150_v9, %v4108_v31 }
 0x284   :  { %v4152_v14 = vpop.f32.mrf.mxu0 }
 0x285   :  { %v4195_v15 = vpop.f32.mrf.mxu1  ;;  %v4153_v37 = vadd.f32 %v4152_v14, %v4110_v32  ;;  %v4194_v39 = vadd.f32 %v4193_v10, %v4151_v34 }
 0x286   :  { %v4154_v18 = vpop.f32.mrf.mxu0 }
 0x287   :  { %v4197_v19 = vpop.f32.mrf.mxu1  ;;  %v4155_v40 = vadd.f32 %v4154_v18, %v4112_v22  ;;  %v4196_v43 = vadd.f32 %v4195_v15, %v4153_v37 }
 0x288   :  { %v4156_v24 = vpop.f32.mrf.mxu0 }
 0x289   :  { %v4199_v25 = vpop.f32.mrf.mxu1  ;;  %v4157_v44 = vadd.f32 %v4156_v24, %v4114_v38  ;;  %v4198_v46 = vadd.f32 %v4197_v19, %v4155_v40 }
 0x28b   :  { %v4200_v49 = vadd.f32 %v4199_v25, %v4157_v44 }
 0x2c2   :  { %v4236_v28 = vpop.f32.mrf.mxu0 }
 0x2c3   :  { %v4279_v29 = vpop.f32.mrf.mxu1  ;;  %v4237_v45 = vadd.f32 %v4236_v28, %v4194_v39 }
 0x2c4   :  { %v4238_v35 = vpop.f32.mrf.mxu0 }
 0x2c5   :  { %v4281_v36 = vpop.f32.mrf.mxu1  ;;  %v4239_v47 = vadd.f32 %v4238_v35, %v4196_v43  ;;  %v4280_v51 = vadd.f32 %v4279_v29, %v4237_v45 }
 0x2c6   :  { %v4240_v41 = vpop.f32.mrf.mxu0 }
 0x2c7   :  { %v4283_v42 = vpop.f32.mrf.mxu1  ;;  %v4241_v52 = vadd.f32 %v4240_v41, %v4198_v46  ;;  %v4282_v55 = vadd.f32 %v4281_v36, %v4239_v47 }
 0x2c8   :  { %v4242_v48 = vpop.f32.mrf.mxu0 }
 0x2c9   :  { %v4285_v50 = vpop.f32.mrf.mxu1  ;;  %v4243_v56 = vadd.f32 %v4242_v48, %v4200_v49  ;;  %v4284_v58 = vadd.f32 %v4283_v42, %v4241_v52 }
 0x2cb   :  { %v4286_v1 = vadd.f32 %v4285_v50, %v4243_v56 }
 0x302   :  { %v4322_v53 = vpop.f32.mrf.mxu0 }
 0x303   :  { %v4365_v54 = vpop.f32.mrf.mxu1  ;;  %v4323_v57 = vadd.f32 %v4322_v53, %v4280_v51 }
 0x304   :  { %v4324_v59 = vpop.f32.mrf.mxu0 }
 0x305   :  { %v4367_v60 = vpop.f32.mrf.mxu1  ;;  %v4366_v62 = vadd.f32 %v4365_v54, %v4323_v57  ;;  %v4325_v61 = vadd.f32 %v4324_v59, %v4282_v55 }
 0x306   :  { %v4326_v63 = vpop.f32.mrf.mxu0 }
 0x307   :  { %v4369_v0 = vpop.f32.mrf.mxu1  ;;  %v4368_v2 = vadd.f32 %v4367_v60, %v4325_v61  ;;  %v4327_v3 = vadd.f32 %v4326_v63, %v4284_v58  ;;  %v4376_v5 = vmax.f32 %v4366_v62, 0.0 }
 0x308   :  { %v4328_v4 = vpop.f32.mrf.mxu0 }
 0x309   :  { %v4377_v6 = vmax.f32 %v4368_v2, 0.0  ;;  %v4370_v8 = vadd.f32 %v4369_v0, %v4327_v3  ;;  %v4329_v7 = vadd.f32 %v4328_v4, %v4286_v1  ;;  %v4371_v9 = vpop.f32.mrf.mxu1 }
 0x30b   :  { %v5013_v10 = vpack.c.bf16 %v4377_v6, %v4376_v5  ;;  %v4372_v11 = vadd.f32 %v4371_v9, %v4329_v7  ;;  %v4380_v13 = vmax.f32 %v4370_v8, 0.0 }
 0x30d   :  { %4407 = vst [vmem:[%s7856_s3 + $0x8] sm:$0xff] %v5013_v10  ;;  %v4381_v14 = vmax.f32 %v4372_v11, 0.0 }
 0x30f   :  { %v5015_v15 = vpack.c.bf16 %v4381_v14, %v4380_v13 }
 0x311   :  { %4409 = vst [vmem:[%s7856_s3 + $0x18] sm:$0xff] %v5015_v15 }

</bundles_post_ra>
